<compile_context>
chip_gen: v6e
topology: v6e:2x2x1
jax: 0.10.0
libtpu: 0.0.40
codegen_flags: <defaults>
</compile_context>

<pallas_src>
import functools

import jax
import jax.numpy as jnp
from jax.experimental import pallas as pl
from jax.experimental.pallas import tpu as pltpu

BN_EPS = 1e-5
LEAKY_SLOPE = 0.2        # matches nn.LeakyReLU(0.2) in the original module
LANE = 128
SUBLANE = 8
MAX_ROW_TILE = 128       # rows of the batch processed per grid step


def _round_up(x, m):
    return ((x + m - 1) // m) * m


# ---------------------------------------------------------------------------
# Fused 4-layer MLP kernel: one grid step = one row tile through all layers.
# Weights/shifts are grid-constant blocks (resident in VMEM for the whole call).
# ---------------------------------------------------------------------------
def _fused_mlp_kernel(x_ref, w1_ref, s1_ref, w2_ref, s2_ref, w3_ref, s3_ref,
                      w4_ref, s4_ref, o_ref, *, negative_slope):
    """o = L4(leaky(L3(leaky(L2(leaky(L1(x)))))))  with Li(h) = h @ Wi + si."""

    def layer(h_bf16, w_ref, s_ref, leaky):
        y = jnp.dot(h_bf16, w_ref[...], preferred_element_type=jnp.float32)
        y = y + s_ref[...]
        if leaky:
            y = jnp.where(y > 0, y, negative_slope * y)
        return y

    h = x_ref[...].astype(jnp.bfloat16)
    h = layer(h, w1_ref, s1_ref, True).astype(jnp.bfloat16)
    h = layer(h, w2_ref, s2_ref, True).astype(jnp.bfloat16)
    h = layer(h, w3_ref, s3_ref, True).astype(jnp.bfloat16)
    o_ref[...] = layer(h, w4_ref, s4_ref, False).astype(o_ref.dtype)


def fused_mlp(x, folded, *, row_tile=None):
    """x: (rows, in_features) f32.  folded = (w1,s1,...,w4,s4); wi are bf16
    (in, out) with BN scale folded in, si are f32 (1, out).
    Returns (rows_padded, padded_out) f32."""
    rows, k_in = x.shape
    n_pad = folded[-2].shape[1]

    if row_tile is None:
        row_tile = min(MAX_ROW_TILE, _round_up(rows, SUBLANE))
    row_tile = _round_up(row_tile, SUBLANE)
    rows_pad = _round_up(rows, row_tile)
    if rows_pad != rows:
        x = jnp.pad(x, ((0, rows_pad - rows), (0, 0)))
    grid_t = rows_pad // row_tile

    flops = 2 * rows_pad * sum(w.shape[0] * w.shape[1] for w in folded[0::2])
    bytes_accessed = (x.size * x.dtype.itemsize
                      + sum(a.size * a.dtype.itemsize for a in folded)
                      + rows_pad * n_pad * 4)

    x_spec = pl.BlockSpec((row_tile, k_in), lambda t: (t, 0))
    o_spec = pl.BlockSpec((row_tile, n_pad), lambda t: (t, 0))
    # Constant block index across the grid -> each weight/shift is DMA'd once
    # per pallas_call (per core) and stays resident in VMEM for all row tiles.
    w_specs = [pl.BlockSpec(a.shape, lambda t: (0, 0)) for a in folded]

    kernel = functools.partial(_fused_mlp_kernel, negative_slope=LEAKY_SLOPE)

    return pl.pallas_call(
        kernel,
        out_shape=jax.ShapeDtypeStruct((rows_pad, n_pad), jnp.float32),
        grid=(grid_t,),
        in_specs=[x_spec] + w_specs,
        out_specs=o_spec,
        compiler_params=pltpu.CompilerParams(
            dimension_semantics=("parallel",),      # v7x: 2 TCs split the batch
            vmem_limit_bytes=40 * 1024 * 1024),
        cost_estimate=pl.CostEstimate(flops=flops, transcendentals=0,
                                      bytes_accessed=bytes_accessed),
    )(x, *folded)


def face_classifier_forward(x, folded, num_classes, row_tile=None):
    rows = x.shape[0]
    out_padded = fused_mlp(x, folded, row_tile=row_tile)
    return out_padded[:rows, :num_classes]


# ---------------------------------------------------------------------------
# Parameter construction (deterministic, PyTorch-like shapes) + one-time fold.
# ---------------------------------------------------------------------------
def init_linear(key, fan_in, fan_out):
    kw, kb = jax.random.split(key)
    bound = 1.0 / jnp.sqrt(jnp.float32(fan_in))
    w = jax.random.uniform(kw, (fan_out, fan_in), jnp.float32, -bound, bound)
    b = jax.random.uniform(kb, (fan_out,), jnp.float32, -bound, bound)
    return w, b


def init_bn(key, num_features):
    k1, k2, k3, k4 = jax.random.split(key, 4)
    gamma = 1.0 + 0.05 * jax.random.normal(k1, (num_features,), jnp.float32)
    beta = 0.05 * jax.random.normal(k2, (num_features,), jnp.float32)
    running_mean = 0.05 * jax.random.normal(k3, (num_features,), jnp.float32)
    running_var = 1.0 + 0.05 * jax.random.uniform(k4, (num_features,), jnp.float32)
    return gamma, beta, running_mean, running_var


def make_params(key, input_size, num_classes):
    dims = [input_size, 2048, 1024, 512, num_classes]
    params = []
    for i in range(4):
        key, k_lin, k_bn = jax.random.split(key, 3)
        w, b = init_linear(k_lin, dims[i], dims[i + 1])
        bn = init_bn(k_bn, dims[i + 1]) if i < 3 else None
        params.append((w, b, bn))
    return params


def fold_params(params, *, lane_pad=LANE):
    """One-time fold: transpose weights, fold eval-mode BN scale into columns,
    fold bias+BN into a shift, cast weights to bf16, lane-pad the last layer."""
    folded = []
    for i, (w, b, bn) in enumerate(params):
        w_t = jnp.asarray(w, jnp.float32).T          # (in, out)
        if bn is None:
            w_fold = w_t
            shift = b.astype(jnp.float32)
        else:
            gamma, beta, mean, var = bn
            bn_scale = gamma / jnp.sqrt(var + BN_EPS)
            w_fold = w_t * bn_scale[None, :]
            shift = bn_scale * b + beta - mean * bn_scale
        if i == len(params) - 1:
            n = w_fold.shape[1]
            n_padded = _round_up(n, lane_pad)
            w_fold = jnp.pad(w_fold, ((0, 0), (0, n_padded - n)))
            shift = jnp.pad(shift, (0, n_padded - n))
        folded.append(w_fold.astype(jnp.bfloat16))
        folded.append(shift.reshape(1, -1).astype(jnp.float32))
    return tuple(folded)


# ---------------------------------------------------------------------------
# References.
# ---------------------------------------------------------------------------
def face_classifier_reference(x, params):
    """Plain-JAX f32 reference with the original module's eval-mode semantics."""
    h = x
    for w, b, bn in params:
        y = h @ w.T + b
        if bn is not None:
            gamma, beta, mean, var = bn
            y = (y - mean) / jnp.sqrt(var + BN_EPS) * gamma + beta
            y = jnp.where(y > 0, y, LEAKY_SLOPE * y)
        h = y
    return h


def quantized_reference(x, folded, num_classes):
    """Plain-JAX mirror of the kernel math (bf16 weights/activations, f32 acc)."""
    h = x.astype(jnp.bfloat16)
    n_layers = len(folded) // 2
    for i in range(n_layers):
        w, s = folded[2 * i], folded[2 * i + 1]
        y = jnp.dot(h, w, preferred_element_type=jnp.float32) + s
        if i < n_layers - 1:
            y = jnp.where(y > 0, y, LEAKY_SLOPE * y)
            h = y.astype(jnp.bfloat16)
        else:
            h = y
    return h[:, :num_classes]


if __name__ == "__main__":
    key = jax.random.PRNGKey(0)
    k_params, k_x, k_x2 = jax.random.split(key, 3)

    batch, input_size, num_classes = 8, 256, 10
    params = make_params(k_params, input_size, num_classes)
    folded = fold_params(params)                 # folded ONCE, reused every forward
    x = jax.random.normal(k_x, (batch, input_size), jnp.float32)

    forward = jax.jit(face_classifier_forward, static_argnums=(2, 3))

    # Single-tile call (batch=8 -> grid=(1,)).
    out = jax.block_until_ready(forward(x, folded, num_classes))
    assert out.shape == (batch, num_classes)

    # Tight check: kernel vs plain-JAX mirror of the same bf16-folded math.
    ref_q = quantized_reference(x, folded, num_classes)
    assert jnp.allclose(out, ref_q, atol=2e-3, rtol=2e-3), "mismatch vs quantized ref"

    # Loose check: kernel vs full-f32 eval-mode semantics (bf16 weight error).
    ref = face_classifier_reference(x, params)
    assert jnp.allclose(out, ref, atol=1e-1, rtol=1e-1), "mismatch vs f32 reference"

    # Multi-tile grid path: 24 rows with an 8-row tile -> grid=(3,).  Weights
    # are DMA'd once per call and reused across all three batch tiles.
    x_big = jax.random.normal(k_x2, (24, input_size), jnp.float32)
    out_big = jax.block_until_ready(forward(x_big, folded, num_classes, 8))
    assert out_big.shape == (24, num_classes)
    ref_q_big = quantized_reference(x_big, folded, num_classes)
    assert jnp.allclose(out_big, ref_q_big, atol=2e-3, rtol=2e-3), "grid mismatch"

    print("KERNEL_OK")
</pallas_src>

<mosaic_0001>
module attributes {stable_mosaic.version = 11 : i64} {
  func.func @_fused_mlp_kernel(%arg0: i32, %arg1: memref<8x256xf32, #tpu.memory_space<vmem>>, %arg2: memref<256x2048xbf16, #tpu.memory_space<vmem>>, %arg3: memref<1x2048xf32, #tpu.memory_space<vmem>>, %arg4: memref<2048x1024xbf16, #tpu.memory_space<vmem>>, %arg5: memref<1x1024xf32, #tpu.memory_space<vmem>>, %arg6: memref<1024x512xbf16, #tpu.memory_space<vmem>>, %arg7: memref<1x512xf32, #tpu.memory_space<vmem>>, %arg8: memref<512x128xbf16, #tpu.memory_space<vmem>>, %arg9: memref<1x128xf32, #tpu.memory_space<vmem>>, %arg10: memref<8x128xf32, #tpu.memory_space<vmem>>) attributes {dimension_semantics = [#tpu.dimension_semantics<parallel>], iteration_bounds = array<i64: 1>, scalar_prefetch = 0 : i64, scratch_operands = 0 : i64, tpu.core_type = #tpu.core_type<tc>, window_params = [{transform_indices = @transform_0, window_bounds = array<i64: 8, 256>}, {pipeline_mode = #tpu.pipeline_mode<synchronous>, transform_indices = @transform_1, window_bounds = array<i64: 256, 2048>}, {pipeline_mode = #tpu.pipeline_mode<synchronous>, transform_indices = @transform_2, window_bounds = array<i64: 1, 2048>}, {pipeline_mode = #tpu.pipeline_mode<synchronous>, transform_indices = @transform_3, window_bounds = array<i64: 2048, 1024>}, {pipeline_mode = #tpu.pipeline_mode<synchronous>, transform_indices = @transform_4, window_bounds = array<i64: 1, 1024>}, {pipeline_mode = #tpu.pipeline_mode<synchronous>, transform_indices = @transform_5, window_bounds = array<i64: 1024, 512>}, {pipeline_mode = #tpu.pipeline_mode<synchronous>, transform_indices = @transform_6, window_bounds = array<i64: 1, 512>}, {pipeline_mode = #tpu.pipeline_mode<synchronous>, transform_indices = @transform_7, window_bounds = array<i64: 512, 128>}, {pipeline_mode = #tpu.pipeline_mode<synchronous>, transform_indices = @transform_8, window_bounds = array<i64: 1, 128>}, {transform_indices = @transform_9, window_bounds = array<i64: 8, 128>}]} {
    %c0 = arith.constant 0 : index
    %c0_0 = arith.constant 0 : index
    %0 = vector.load %arg1[%c0, %c0_0] : memref<8x256xf32, #tpu.memory_space<vmem>>, vector<8x256xf32>
    %1 = arith.truncf %0 : vector<8x256xf32> to vector<8x256xbf16>
    %c0_1 = arith.constant 0 : index
    %c0_2 = arith.constant 0 : index
    %2 = vector.load %arg2[%c0_1, %c0_2] : memref<256x2048xbf16, #tpu.memory_space<vmem>>, vector<256x2048xbf16>
    %cst = arith.constant dense<0.000000e+00> : vector<8x2048xf32>
    %3 = tpu.matmul %1, %2, %cst {dimension_numbers = #tpu.dot_dimension_numbers<[1], [0], [0], [1], [0, 0, 1, 1], [], []>} : vector<8x256xbf16>, vector<256x2048xbf16>, vector<8x2048xf32> -> vector<8x2048xf32>
    %c0_3 = arith.constant 0 : index
    %c0_4 = arith.constant 0 : index
    %4 = vector.load %arg3[%c0_3, %c0_4] : memref<1x2048xf32, #tpu.memory_space<vmem>>, vector<1x2048xf32>
    %5 = vector.broadcast %4 : vector<1x2048xf32> to vector<8x2048xf32>
    %6 = arith.addf %3, %5 : vector<8x2048xf32>
    %cst_5 = arith.constant 0.000000e+00 : f32
    %7 = vector.broadcast %cst_5 : f32 to vector<8x2048xf32>
    %8 = arith.cmpf ogt, %6, %7 : vector<8x2048xf32>
    %cst_6 = arith.constant 2.000000e-01 : f32
    %9 = vector.broadcast %cst_6 : f32 to vector<8x2048xf32>
    %10 = arith.mulf %9, %6 : vector<8x2048xf32>
    %11 = arith.select %8, %6, %10 : vector<8x2048xi1>, vector<8x2048xf32>
    %12 = arith.truncf %11 : vector<8x2048xf32> to vector<8x2048xbf16>
    %c0_7 = arith.constant 0 : index
    %c0_8 = arith.constant 0 : index
    %13 = vector.load %arg4[%c0_7, %c0_8] : memref<2048x1024xbf16, #tpu.memory_space<vmem>>, vector<2048x1024xbf16>
    %cst_9 = arith.constant dense<0.000000e+00> : vector<8x1024xf32>
    %14 = tpu.matmul %12, %13, %cst_9 {dimension_numbers = #tpu.dot_dimension_numbers<[1], [0], [0], [1], [0, 0, 1, 1], [], []>} : vector<8x2048xbf16>, vector<2048x1024xbf16>, vector<8x1024xf32> -> vector<8x1024xf32>
    %c0_10 = arith.constant 0 : index
    %c0_11 = arith.constant 0 : index
    %15 = vector.load %arg5[%c0_10, %c0_11] : memref<1x1024xf32, #tpu.memory_space<vmem>>, vector<1x1024xf32>
    %16 = vector.broadcast %15 : vector<1x1024xf32> to vector<8x1024xf32>
    %17 = arith.addf %14, %16 : vector<8x1024xf32>
    %cst_12 = arith.constant 0.000000e+00 : f32
    %18 = vector.broadcast %cst_12 : f32 to vector<8x1024xf32>
    %19 = arith.cmpf ogt, %17, %18 : vector<8x1024xf32>
    %cst_13 = arith.constant 2.000000e-01 : f32
    %20 = vector.broadcast %cst_13 : f32 to vector<8x1024xf32>
    %21 = arith.mulf %20, %17 : vector<8x1024xf32>
    %22 = arith.select %19, %17, %21 : vector<8x1024xi1>, vector<8x1024xf32>
    %23 = arith.truncf %22 : vector<8x1024xf32> to vector<8x1024xbf16>
    %c0_14 = arith.constant 0 : index
    %c0_15 = arith.constant 0 : index
    %24 = vector.load %arg6[%c0_14, %c0_15] : memref<1024x512xbf16, #tpu.memory_space<vmem>>, vector<1024x512xbf16>
    %cst_16 = arith.constant dense<0.000000e+00> : vector<8x512xf32>
    %25 = tpu.matmul %23, %24, %cst_16 {dimension_numbers = #tpu.dot_dimension_numbers<[1], [0], [0], [1], [0, 0, 1, 1], [], []>} : vector<8x1024xbf16>, vector<1024x512xbf16>, vector<8x512xf32> -> vector<8x512xf32>
    %c0_17 = arith.constant 0 : index
    %c0_18 = arith.constant 0 : index
    %26 = vector.load %arg7[%c0_17, %c0_18] : memref<1x512xf32, #tpu.memory_space<vmem>>, vector<1x512xf32>
    %27 = vector.broadcast %26 : vector<1x512xf32> to vector<8x512xf32>
    %28 = arith.addf %25, %27 : vector<8x512xf32>
    %cst_19 = arith.constant 0.000000e+00 : f32
    %29 = vector.broadcast %cst_19 : f32 to vector<8x512xf32>
    %30 = arith.cmpf ogt, %28, %29 : vector<8x512xf32>
    %cst_20 = arith.constant 2.000000e-01 : f32
    %31 = vector.broadcast %cst_20 : f32 to vector<8x512xf32>
    %32 = arith.mulf %31, %28 : vector<8x512xf32>
    %33 = arith.select %30, %28, %32 : vector<8x512xi1>, vector<8x512xf32>
    %34 = arith.truncf %33 : vector<8x512xf32> to vector<8x512xbf16>
    %c0_21 = arith.constant 0 : index
    %c0_22 = arith.constant 0 : index
    %35 = vector.load %arg8[%c0_21, %c0_22] : memref<512x128xbf16, #tpu.memory_space<vmem>>, vector<512x128xbf16>
    %cst_23 = arith.constant dense<0.000000e+00> : vector<8x128xf32>
    %36 = tpu.matmul %34, %35, %cst_23 {dimension_numbers = #tpu.dot_dimension_numbers<[1], [0], [0], [1], [0, 0, 1, 1], [], []>} : vector<8x512xbf16>, vector<512x128xbf16>, vector<8x128xf32> -> vector<8x128xf32>
    %c0_24 = arith.constant 0 : index
    %c0_25 = arith.constant 0 : index
    %37 = vector.load %arg9[%c0_24, %c0_25] : memref<1x128xf32, #tpu.memory_space<vmem>>, vector<1x128xf32>
    %38 = vector.broadcast %37 : vector<1x128xf32> to vector<8x128xf32>
    %39 = arith.addf %36, %38 : vector<8x128xf32>
    %c0_26 = arith.constant 0 : index
    %c0_27 = arith.constant 0 : index
    %40 = vector.load %arg10[%c0_26, %c0_27] : memref<8x128xf32, #tpu.memory_space<vmem>>, vector<8x128xf32>
    tpu.vector_store %arg10[%c0_26, %c0_27], %39 {strides = array<i32>} : memref<8x128xf32, #tpu.memory_space<vmem>>, vector<8x128xf32>,
    return
  }
  func.func @transform_0(%arg0: i32) -> (i32, i32) {
    %c0_i32 = arith.constant 0 : i32
    %c0_i32_0 = arith.constant 0 : i32
    return %arg0, %c0_i32 : i32, i32
  }
  func.func @transform_1(%arg0: i32) -> (i32, i32) {
    %c0_i32 = arith.constant 0 : i32
    %c0_i32_0 = arith.constant 0 : i32
    %c0_i32_1 = arith.constant 0 : i32
    return %c0_i32, %c0_i32_0 : i32, i32
  }
  func.func @transform_2(%arg0: i32) -> (i32, i32) {
    %c0_i32 = arith.constant 0 : i32
    %c0_i32_0 = arith.constant 0 : i32
    %c0_i32_1 = arith.constant 0 : i32
    return %c0_i32, %c0_i32_0 : i32, i32
  }
  func.func @transform_3(%arg0: i32) -> (i32, i32) {
    %c0_i32 = arith.constant 0 : i32
    %c0_i32_0 = arith.constant 0 : i32
    %c0_i32_1 = arith.constant 0 : i32
    return %c0_i32, %c0_i32_0 : i32, i32
  }
  func.func @transform_4(%arg0: i32) -> (i32, i32) {
    %c0_i32 = arith.constant 0 : i32
    %c0_i32_0 = arith.constant 0 : i32
    %c0_i32_1 = arith.constant 0 : i32
    return %c0_i32, %c0_i32_0 : i32, i32
  }
  func.func @transform_5(%arg0: i32) -> (i32, i32) {
    %c0_i32 = arith.constant 0 : i32
    %c0_i32_0 = arith.constant 0 : i32
    %c0_i32_1 = arith.constant 0 : i32
    return %c0_i32, %c0_i32_0 : i32, i32
  }
  func.func @transform_6(%arg0: i32) -> (i32, i32) {
    %c0_i32 = arith.constant 0 : i32
    %c0_i32_0 = arith.constant 0 : i32
    %c0_i32_1 = arith.constant 0 : i32
    return %c0_i32, %c0_i32_0 : i32, i32
  }
  func.func @transform_7(%arg0: i32) -> (i32, i32) {
    %c0_i32 = arith.constant 0 : i32
    %c0_i32_0 = arith.constant 0 : i32
    %c0_i32_1 = arith.constant 0 : i32
    return %c0_i32, %c0_i32_0 : i32, i32
  }
  func.func @transform_8(%arg0: i32) -> (i32, i32) {
    %c0_i32 = arith.constant 0 : i32
    %c0_i32_0 = arith.constant 0 : i32
    %c0_i32_1 = arith.constant 0 : i32
    return %c0_i32, %c0_i32_0 : i32, i32
  }
  func.func @transform_9(%arg0: i32) -> (i32, i32) {
    %c0_i32 = arith.constant 0 : i32
    %c0_i32_0 = arith.constant 0 : i32
    return %arg0, %c0_i32 : i32, i32
  }
}

</mosaic_0001>

<bundles_post_ra>
// kernel: face_classifier_forward.1
= control target key start
LH: loop header
LB: loop body
LE: loop exit
PB: predicated region body
PF: predicated region fallthrough
CT: control target
= control target key end

     0   :  { %14 = vsyncpa [#allocation3], 0  ;;  %s14681_s0 = inlined_call_operand.hbm [shape: f32[8,256], index: 0, kind: input, shape index: {}]   ;;  %s14682_s1 = inlined_call_operand.hbm [shape: bf16[256,2048], index: 1, kind: input, shape index: {}]   ;;  %s14683_s2 = inlined_call_operand.hbm [shape: f32[1,2048], index: 2, kind: input, shape index: {}]   ;;  %s14684_s3 = inlined_call_operand.hbm [shape: bf16[2048,1024], index: 3, kind: input, shape index: {}]   ;;  %s14685_s4 = inlined_call_operand.hbm [shape: f32[1,1024], index: 4, kind: input, shape index: {}]   ;;  %s14686_s5 = inlined_call_operand.hbm [shape: bf16[1024,512], index: 5, kind: input, shape index: {}]   ;;  %s14687_s6 = inlined_call_operand.hbm [shape: f32[1,512], index: 6, kind: input, shape index: {}]   ;;  %s14688_s7 = inlined_call_operand.hbm [shape: bf16[512,128], index: 7, kind: input, shape index: {}]   ;;  %s14689_s8 = inlined_call_operand.hbm [shape: f32[1,128], index: 8, kind: input, shape index: {}]   ;;  %s14690_s9 = inlined_call_operand.hbm [shape: f32[8,128], index: 9, kind: output, shape index: {}]  }
   0x1   :  { %15 = vsyncpa [#allocation6], 0 }
   0x2   :  { %16 = vsyncpa [#allocation9], 0 }
   0x3   :  { %17 = vsyncpa [#allocation12], 0 }
   0x4   :  { %18 = vsyncpa [#allocation15], 0 }
   0x5   :  { %19 = vsyncpa [#allocation4], 0  ;;  %s14218_s30 = smov [#allocation5]  }
   0x6   :  { %s35_s10 = sshll.u32 %s14218_s30, 4  ;;  %s36_s10 = int_to_ptr.vmem [resolvable:$true] %s35_s10 }
   0x7   :  { %s14014_s11 = scalar_lea.vmem %s36_s10, 32768  ;;  %p14019_p1 = scmp.lt.s32.totalorder %s36_s10, %s36_s10 }
   0x8   :  { %p14015_p0 = scmp.ne.s32.totalorder %s36_s10, %s14014_s11  ;;  %p14020_p2 = scmp.lt.s32.totalorder %s14014_s11, %s14014_s11 }
   0xa   :  { %p14021_p3 = por %p14020_p2, %p14019_p1 }
   0xc   :  { %p14022_p4 = pnand %p14021_p3, %p14015_p0 }
   0xe   :  { %14025 = shalt.err (!%p14022_p4)
}
   0xf   :  { %s14219_s12 = smov 1024   ;;  %s14220_s13 = smov 64  }
  0x10   :  { %41 = dma.hbm_to_vmem [thread:$0]  %s14682_s1, 32768, %s36_s10, [#allocation6], %s14219_s12, %s14219_s12, %s14220_s13  }
  0x11   :  { %s14221_s16 = smov [#allocation8]  }
  0x12   :  { %s57_s17 = sshll.u32 %s14221_s16, 4  ;;  %s58_s17 = int_to_ptr.vmem [resolvable:$true] %s57_s17 }
  0x13   :  { %s14034_s18 = scalar_lea.vmem %s58_s17, 131072  ;;  %p14039_p6 = scmp.lt.s32.totalorder %s58_s17, %s58_s17 }
  0x14   :  { %p14035_p5 = scmp.ne.s32.totalorder %s58_s17, %s14034_s18  ;;  %p14040_p7 = scmp.lt.s32.totalorder %s14034_s18, %s14034_s18 }
  0x16   :  { %p14041_p8 = por %p14040_p7, %p14039_p6 }
  0x18   :  { %p14042_p9 = pnand %p14041_p8, %p14035_p5 }
  0x1a   :  { %14045 = shalt.err (!%p14042_p9)
}
  0x1b   :  { %s14222_s19 = smov 512   ;;  %s14223_s20 = smov 32  }
  0x1c   :  { %63 = dma.hbm_to_vmem [thread:$0]  %s14684_s3, 131072, %s58_s17, [#allocation9], %s14222_s19, %s14222_s19, %s14223_s20  }
  0x1d   :  { %s14224_s23 = smov [#allocation11]  }
  0x1e   :  { %s79_s24 = sshll.u32 %s14224_s23, 4  ;;  %s80_s24 = int_to_ptr.vmem [resolvable:$true] %s79_s24 }
  0x1f   :  { %s14054_s1 = scalar_lea.vmem %s80_s24, 32768  ;;  %p14059_p11 = scmp.lt.s32.totalorder %s80_s24, %s80_s24 }
  0x20   :  { %p14055_p10 = scmp.ne.s32.totalorder %s80_s24, %s14054_s1  ;;  %p14060_p12 = scmp.lt.s32.totalorder %s14054_s1, %s14054_s1 }
  0x22   :  { %p14061_p13 = por %p14060_p12, %p14059_p11 }
  0x24   :  { %p14062_p0 = pnand %p14061_p13, %p14055_p10 }
  0x26   :  { %14065 = shalt.err (!%p14062_p0)
}
  0x27   :  { %s14225_s25 = smov 256   ;;  %s14226_s26 = smov 16  }
  0x28   :  { %85 = dma.hbm_to_vmem [thread:$0]  %s14686_s5, 32768, %s80_s24, [#allocation12], %s14225_s25, %s14225_s25, %s14226_s26  }
  0x29   :  { %s14227_s29 = smov [#allocation14]  }
  0x2a   :  { %s101_s30 = sshll.u32 %s14227_s29, 4  ;;  %s102_s30 = int_to_ptr.vmem [resolvable:$true] %s101_s30 }
  0x2b   :  { %s14074_s3 = scalar_lea.vmem %s102_s30, 4096  ;;  %p14079_p2 = scmp.lt.s32.totalorder %s102_s30, %s102_s30 }
  0x2c   :  { %p14075_p1 = scmp.ne.s32.totalorder %s102_s30, %s14074_s3  ;;  %p14080_p3 = scmp.lt.s32.totalorder %s14074_s3, %s14074_s3 }
  0x2e   :  { %p14081_p4 = por %p14080_p3, %p14079_p2 }
  0x30   :  { %p14082_p5 = pnand %p14081_p4, %p14075_p1 }
  0x32   :  { %14085 = shalt.err (!%p14082_p5)
}
  0x33   :  { %s14228_s10 = smov 4   ;;  %s14229_s14 = smov [#allocation2]  }
  0x34   :  { %107 = dma.hbm_to_vmem [thread:$0]  %s14688_s7, 4096, %s102_s30, [#allocation15], %s14220_s13, %s14220_s13, %s14228_s10  }
  0x35   :  { %s26_s15 = sshll.u32 %s14229_s14, 4  ;;  %s14230_s5 = smov [#allocation7]   ;;  %s27_s15 = int_to_ptr.vmem [resolvable:$true] %s26_s15 }
  0x36   :  { %s48_s16 = sshll.u32 %s14230_s5, 4  ;;  %s14094_s17 = scalar_lea.vmem %s27_s15, 256  ;;  %s49_s16 = int_to_ptr.vmem [resolvable:$true] %s48_s16 }
  0x37   :  { %p14095_p6 = scmp.ne.s32.totalorder %s27_s15, %s14094_s17  ;;  %p14099_p7 = scmp.lt.s32.totalorder %s27_s15, %s27_s15 }
  0x38   :  { %p14100_p8 = scmp.lt.s32.totalorder %s14094_s17, %s14094_s17 }
  0x3a   :  { %p14101_p9 = por %p14100_p8, %p14099_p7 }
  0x3c   :  { %p14102_p10 = pnand %p14101_p9, %p14095_p6 }
  0x3e   :  { %14105 = shalt.err (!%p14102_p10)
}
  0x3f   :  { %29 = dma.hbm_to_vmem [thread:$0]  %s14681_s0, 256, %s27_s15, [#allocation3]  }
  0x40   :  { %s14114_s20 = scalar_lea.vmem %s49_s16, 256  ;;  %p14119_p12 = scmp.lt.s32.totalorder %s49_s16, %s49_s16 }
  0x41   :  { %p14115_p11 = scmp.ne.s32.totalorder %s49_s16, %s14114_s20  ;;  %p14120_p13 = scmp.lt.s32.totalorder %s14114_s20, %s14114_s20 }
  0x43   :  { %p14121_p0 = por %p14120_p13, %p14119_p12 }
  0x45   :  { %p14122_p1 = pnand %p14121_p0, %p14115_p11 }
  0x47   :  { %14125 = shalt.err (!%p14122_p1)
}
  0x48   :  { %51 = dma.hbm_to_vmem [thread:$0]  %s14683_s2, 256, %s49_s16, [#allocation6]  }
  0x49   :  { %s14231_s21 = smov [#allocation10]   ;;  %s14232_s23 = smov [#allocation13]  }
  0x4a   :  { %s70_s22 = sshll.u32 %s14231_s21, 4  ;;  %s92_s24 = sshll.u32 %s14232_s23, 4  ;;  %s71_s22 = int_to_ptr.vmem [resolvable:$true] %s70_s22  ;;  %s93_s24 = int_to_ptr.vmem [resolvable:$true] %s92_s24 }
  0x4b   :  { %s14134_s1 = scalar_lea.vmem %s71_s22, 128  ;;  %p14139_p3 = scmp.lt.s32.totalorder %s71_s22, %s71_s22 }
  0x4c   :  { %p14135_p2 = scmp.ne.s32.totalorder %s71_s22, %s14134_s1  ;;  %p14140_p4 = scmp.lt.s32.totalorder %s14134_s1, %s14134_s1 }
  0x4e   :  { %p14141_p5 = por %p14140_p4, %p14139_p3 }
  0x50   :  { %p14142_p6 = pnand %p14141_p5, %p14135_p2 }
  0x52   :  { %14145 = shalt.err (!%p14142_p6)
}
  0x53   :  { %73 = dma.hbm_to_vmem [thread:$0]  %s14685_s4, 128, %s71_s22, [#allocation9]  }
  0x54   :  { %s14154_s26 = scalar_lea.vmem %s93_s24, 64  ;;  %p14159_p8 = scmp.lt.s32.totalorder %s93_s24, %s93_s24 }
  0x55   :  { %p14155_p7 = scmp.ne.s32.totalorder %s93_s24, %s14154_s26  ;;  %p14160_p9 = scmp.lt.s32.totalorder %s14154_s26, %s14154_s26 }
  0x57   :  { %p14161_p10 = por %p14160_p9, %p14159_p8 }
  0x59   :  { %p14162_p11 = pnand %p14161_p10, %p14155_p7 }
  0x5b   :  { %14165 = shalt.err (!%p14162_p11)
}
  0x5c   :  { %95 = dma.hbm_to_vmem [thread:$0]  %s14687_s6, 64, %s93_s24, [#allocation12]  }
  0x5d   :  { %s14233_s28 = smov [#allocation16]  }
  0x5e   :  { %s114_s29 = sshll.u32 %s14233_s28, 4  ;;  %s115_s29 = int_to_ptr.vmem [resolvable:$true] %s114_s29 }
  0x5f   :  { %s14174_s30 = scalar_lea.vmem %s115_s29, 16  ;;  %s14178_s3 = scalar_lea.vmem %s115_s29, 32 }
  0x60   :  { %p14175_p12 = scmp.ne.s32.totalorder %s115_s29, %s14174_s30  ;;  %p14179_p13 = scmp.lt.s32.totalorder %s115_s29, %s115_s29 }
  0x61   :  { %p14180_p0 = scmp.lt.s32.totalorder %s14178_s3, %s14174_s30 }
  0x63   :  { %p14181_p1 = por %p14180_p0, %p14179_p13 }
  0x65   :  { %p14182_p2 = pnand %p14181_p1, %p14175_p12 }
  0x67   :  { %14185 = shalt.err (!%p14182_p2)
}
  0x68   :  { %117 = dma.hbm_to_vmem [thread:$0]  %s14689_s8, 16, %s115_s29, [#allocation15]  }
  0x69   :  { %14206 = dma.done.wait [#allocation3], 256  }
  0x6a   :  { %14207 = vsyncadd [#allocation3], 4294967040 }
  0x6b   :  { %14208 = dma.done.wait [#allocation6], 33024  }
  0x6c   :  { %14209 = vsyncadd [#allocation6], 4294934272 }
  0x6d   :  { %14210 = dma.done.wait [#allocation9], 131200  }
  0x6e   :  { %14211 = vsyncadd [#allocation9], 4294836096 }
  0x6f   :  { %14212 = dma.done.wait [#allocation12], 32832  }
  0x70   :  { %14213 = vsyncadd [#allocation12], 4294934464 }
  0x71   :  { %14214 = dma.done.wait [#allocation15], 4112  }
  0x72   :  { %14215 = vsyncadd [#allocation15], 4294963184  ;;  %v262_v0 = vld [vmem:[#allocation5 + $0x380] sm:$0xff]  ;;  %v263_v2 = vld [vmem:[#allocation5 + $0x388] sm:$0xff]  ;;  %s14234_s6 = smov [#allocation17]  }
  0x73   :  { %v270_v1 = vld [vmem:[#allocation5 + $0x3c0] sm:$0xff]  ;;  %v271_v4 = vld [vmem:[#allocation5 + $0x3c8] sm:$0xff]  ;;  %v147_v53 = vld [vmem:[#allocation2 + $0x8] sm:$0xff]  ;;  %s11944_s8 = sshll.u32 %s14234_s6, 4  ;;  %s11945_s8 = int_to_ptr.vmem [resolvable:$true] %s11944_s8 }
  0x74   :  { %v12070_v3 = vcombine.high %v262_v0, %v270_v1  ;;  %v12069_v5 = vcombine.low %v262_v0, %v270_v1  ;;  %v246_v6 = vld [vmem:[#allocation5 + $0x300] sm:$0xff]  ;;  %v12072_v8 = vcombine.high %v263_v2, %v271_v4  ;;  %v12071_v9 = vcombine.low %v263_v2, %v271_v4  ;;  %v247_v11 = vld [vmem:[#allocation5 + $0x308] sm:$0xff]  ;;  %s14186_s11 = scalar_lea.vmem %s11945_s8, 128  ;;  %p14191_p4 = scmp.lt.s32.totalorder %s11945_s8, %s11945_s8 }
  0x75   :  { %v254_v7 = vld [vmem:[#allocation5 + $0x340] sm:$0xff]  ;;  %v255_v12 = vld [vmem:[#allocation5 + $0x348] sm:$0xff]  ;;  %v14315_v57 = vpack.c.bf16 %v147_v53, %v147_v53  ;;  %p14187_p3 = scmp.ne.s32.totalorder %s11945_s8, %s14186_s11  ;;  %p14192_p5 = scmp.lt.s32.totalorder %s14186_s11, %s14186_s11 }
  0x76   :  { %v12054_v10 = vcombine.high %v246_v6, %v254_v7  ;;  %v230_v13 = vld [vmem:[#allocation5 + $0x280] sm:$0xff]  ;;  %1770 = vmatprep.subr.bf16.mxu0 %v12070_v3  ;;  %v12056_v14 = vcombine.high %v247_v11, %v255_v12  ;;  %v231_v16 = vld [vmem:[#allocation5 + $0x288] sm:$0xff]  ;;  %1811 = vmatprep.subr.bf16.mxu1 %v12072_v8  ;;  %v12053_v18 = vcombine.low %v246_v6, %v254_v7 }
  0x77   :  { %v238_v15 = vld [vmem:[#allocation5 + $0x2c0] sm:$0xff]  ;;  %v239_v17 = vld [vmem:[#allocation5 + $0x2c8] sm:$0xff]  ;;  %1771 = vmatpush1.bf16.msra.mxu0 %v12069_v5  ;;  %1812 = vmatpush1.bf16.msra.mxu1 %v12071_v9  ;;  %v12055_v19 = vcombine.low %v247_v11, %v255_v12  ;;  %p14193_p6 = por %p14192_p5, %p14191_p4 }
  0x78   :  { %1772 = vmatprep.subr.bf16.mxu0 %v12054_v10  ;;  %v12038_v20 = vcombine.high %v230_v13, %v238_v15  ;;  %1813 = vmatprep.subr.bf16.mxu1 %v12056_v14  ;;  %v12040_v21 = vcombine.high %v231_v16, %v239_v17  ;;  %v214_v22 = vld [vmem:[#allocation5 + $0x200] sm:$0xff]  ;;  %v215_v24 = vld [vmem:[#allocation5 + $0x208] sm:$0xff]  ;;  %v12037_v26 = vcombine.low %v230_v13, %v238_v15 }
  0x79   :  { %v222_v23 = vld [vmem:[#allocation5 + $0x240] sm:$0xff]  ;;  %v223_v25 = vld [vmem:[#allocation5 + $0x248] sm:$0xff]  ;;  %v12039_v27 = vcombine.low %v231_v16, %v239_v17  ;;  %1802 = vmatprep.mubr.bf16.mxu0 %v14315_v57  ;;  %1843 = vmatprep.mubr.bf16.mxu1 %v14315_v57  ;;  %p14194_p7 = pnand %p14193_p6, %p14187_p3 }
  0x7a   :  { %v12022_v28 = vcombine.high %v214_v22, %v222_v23  ;;  %v12024_v29 = vcombine.high %v215_v24, %v223_v25  ;;  %v198_v30 = vld [vmem:[#allocation5 + $0x180] sm:$0xff]  ;;  %v199_v32 = vld [vmem:[#allocation5 + $0x188] sm:$0xff]  ;;  %v12021_v34 = vcombine.low %v214_v22, %v222_v23  ;;  %v12023_v35 = vcombine.low %v215_v24, %v223_v25 }
  0x7b   :  { %1773 = vmatpush1.bf16.msra.mxu0 %v12053_v18  ;;  %1814 = vmatpush1.bf16.msra.mxu1 %v12055_v19  ;;  %v206_v31 = vld [vmem:[#allocation5 + $0x1c0] sm:$0xff]  ;;  %v207_v33 = vld [vmem:[#allocation5 + $0x1c8] sm:$0xff] }
  0x7c   :  { %1774 = vmatprep.subr.bf16.mxu0 %v12038_v20  ;;  %1815 = vmatprep.subr.bf16.mxu1 %v12040_v21  ;;  %v12006_v36 = vcombine.high %v198_v30, %v206_v31  ;;  %v12008_v37 = vcombine.high %v199_v32, %v207_v33  ;;  %v182_v38 = vld [vmem:[#allocation5 + $0x100] sm:$0xff]  ;;  %v183_v40 = vld [vmem:[#allocation5 + $0x108] sm:$0xff]  ;;  %v12005_v42 = vcombine.low %v198_v30, %v206_v31 }
  0x7d   :  { %v190_v39 = vld [vmem:[#allocation5 + $0x140] sm:$0xff]  ;;  %v191_v41 = vld [vmem:[#allocation5 + $0x148] sm:$0xff]  ;;  %v12007_v43 = vcombine.low %v199_v32, %v207_v33 }
  0x7e   :  { %v11990_v44 = vcombine.high %v182_v38, %v190_v39  ;;  %v11992_v45 = vcombine.high %v183_v40, %v191_v41  ;;  %v166_v46 = vld [vmem:[#allocation5 + $0x80] sm:$0xff]  ;;  %v167_v48 = vld [vmem:[#allocation5 + $0x88] sm:$0xff]  ;;  %v11989_v50 = vcombine.low %v182_v38, %v190_v39  ;;  %v11991_v51 = vcombine.low %v183_v40, %v191_v41 }
  0x7f   :  { %1775 = vmatpush1.bf16.msra.mxu0 %v12037_v26  ;;  %1816 = vmatpush1.bf16.msra.mxu1 %v12039_v27  ;;  %v174_v47 = vld [vmem:[#allocation5 + $0xc0] sm:$0xff]  ;;  %v175_v49 = vld [vmem:[#allocation5 + $0xc8] sm:$0xff] }
  0x80   :  { %1776 = vmatprep.subr.bf16.mxu0 %v12022_v28  ;;  %1817 = vmatprep.subr.bf16.mxu1 %v12024_v29  ;;  %v11974_v52 = vcombine.high %v166_v46, %v174_v47  ;;  %v11976_v54 = vcombine.high %v167_v48, %v175_v49  ;;  %v150_v55 = vld [vmem:[#allocation5] sm:$0xff]  ;;  %v151_v58 = vld [vmem:[#allocation5 + $0x8] sm:$0xff]  ;;  %v11973_v60 = vcombine.low %v166_v46, %v174_v47 }
  0x81   :  { %v158_v56 = vld [vmem:[#allocation5 + $0x40] sm:$0xff]  ;;  %v159_v59 = vld [vmem:[#allocation5 + $0x48] sm:$0xff]  ;;  %v11975_v61 = vcombine.low %v167_v48, %v175_v49 }
  0x82   :  { %v11958_v62 = vcombine.high %v150_v55, %v158_v56  ;;  %v11960_v63 = vcombine.high %v151_v58, %v159_v59  ;;  %v390_v0 = vld [vmem:[#allocation5 + $0x780] sm:$0xff]  ;;  %v391_v2 = vld [vmem:[#allocation5 + $0x788] sm:$0xff]  ;;  %v11957_v4 = vcombine.low %v150_v55, %v158_v56  ;;  %v11959_v5 = vcombine.low %v151_v58, %v159_v59 }
  0x83   :  { %1777 = vmatpush1.bf16.msra.mxu0 %v12021_v34  ;;  %1818 = vmatpush1.bf16.msra.mxu1 %v12023_v35  ;;  %v398_v1 = vld [vmem:[#allocation5 + $0x7c0] sm:$0xff]  ;;  %v399_v3 = vld [vmem:[#allocation5 + $0x7c8] sm:$0xff] }
  0x84   :  { %1778 = vmatprep.subr.bf16.mxu0 %v12006_v36  ;;  %1819 = vmatprep.subr.bf16.mxu1 %v12008_v37  ;;  %v12198_v6 = vcombine.high %v390_v0, %v398_v1  ;;  %v12200_v7 = vcombine.high %v391_v2, %v399_v3  ;;  %v374_v8 = vld [vmem:[#allocation5 + $0x700] sm:$0xff]  ;;  %v375_v10 = vld [vmem:[#allocation5 + $0x708] sm:$0xff]  ;;  %v12197_v12 = vcombine.low %v390_v0, %v398_v1  ;;  %v264_v1 = vld [vmem:[#allocation5 + $0x390] sm:$0xff] }
  0x85   :  { %v382_v9 = vld [vmem:[#allocation5 + $0x740] sm:$0xff]  ;;  %v383_v11 = vld [vmem:[#allocation5 + $0x748] sm:$0xff]  ;;  %v12199_v13 = vcombine.low %v391_v2, %v399_v3  ;;  %v272_v2 = vld [vmem:[#allocation5 + $0x3d0] sm:$0xff] }
  0x86   :  { %v12182_v14 = vcombine.high %v374_v8, %v382_v9  ;;  %v12184_v15 = vcombine.high %v375_v10, %v383_v11  ;;  %v358_v16 = vld [vmem:[#allocation5 + $0x680] sm:$0xff]  ;;  %v359_v18 = vld [vmem:[#allocation5 + $0x688] sm:$0xff]  ;;  %v12181_v20 = vcombine.low %v374_v8, %v382_v9  ;;  %v12183_v21 = vcombine.low %v375_v10, %v383_v11  ;;  %v265_v3 = vld [vmem:[#allocation5 + $0x398] sm:$0xff] }
  0x87   :  { %1779 = vmatpush1.bf16.msra.mxu0 %v12005_v42  ;;  %1820 = vmatpush1.bf16.msra.mxu1 %v12007_v43  ;;  %v366_v17 = vld [vmem:[#allocation5 + $0x6c0] sm:$0xff]  ;;  %v367_v19 = vld [vmem:[#allocation5 + $0x6c8] sm:$0xff]  ;;  %v12074_v8 = vcombine.high %v264_v1, %v272_v2  ;;  %v248_v10 = vld [vmem:[#allocation5 + $0x310] sm:$0xff] }
  0x88   :  { %1780 = vmatprep.subr.bf16.mxu0 %v11990_v44  ;;  %1821 = vmatprep.subr.bf16.mxu1 %v11992_v45  ;;  %v12166_v22 = vcombine.high %v358_v16, %v366_v17  ;;  %v12168_v23 = vcombine.high %v359_v18, %v367_v19  ;;  %v342_v24 = vld [vmem:[#allocation5 + $0x600] sm:$0xff]  ;;  %v343_v26 = vld [vmem:[#allocation5 + $0x608] sm:$0xff]  ;;  %v12165_v28 = vcombine.low %v358_v16, %v366_v17  ;;  %v256_v11 = vld [vmem:[#allocation5 + $0x350] sm:$0xff] }
  0x89   :  { %v350_v25 = vld [vmem:[#allocation5 + $0x640] sm:$0xff]  ;;  %v351_v27 = vld [vmem:[#allocation5 + $0x648] sm:$0xff]  ;;  %v12167_v29 = vcombine.low %v359_v18, %v367_v19  ;;  %v12058_v17 = vcombine.high %v248_v10, %v256_v11  ;;  %v232_v18 = vld [vmem:[#allocation5 + $0x290] sm:$0xff] }
  0x8a   :  { %v12150_v30 = vcombine.high %v342_v24, %v350_v25  ;;  %v12152_v31 = vcombine.high %v343_v26, %v351_v27  ;;  %v326_v32 = vld [vmem:[#allocation5 + $0x580] sm:$0xff]  ;;  %v327_v34 = vld [vmem:[#allocation5 + $0x588] sm:$0xff]  ;;  %v12149_v36 = vcombine.low %v342_v24, %v350_v25  ;;  %v12151_v37 = vcombine.low %v343_v26, %v351_v27  ;;  %v240_v19 = vld [vmem:[#allocation5 + $0x2d0] sm:$0xff] }
  0x8b   :  { %1781 = vmatpush1.bf16.msra.mxu0 %v11989_v50  ;;  %1822 = vmatpush1.bf16.msra.mxu1 %v11991_v51  ;;  %v334_v33 = vld [vmem:[#allocation5 + $0x5c0] sm:$0xff]  ;;  %v335_v35 = vld [vmem:[#allocation5 + $0x5c8] sm:$0xff]  ;;  %v12042_v25 = vcombine.high %v232_v18, %v240_v19  ;;  %v216_v26 = vld [vmem:[#allocation5 + $0x210] sm:$0xff] }
  0x8c   :  { %1782 = vmatprep.subr.bf16.mxu0 %v11974_v52  ;;  %1823 = vmatprep.subr.bf16.mxu1 %v11976_v54  ;;  %v12134_v38 = vcombine.high %v326_v32, %v334_v33  ;;  %v12136_v39 = vcombine.high %v327_v34, %v335_v35  ;;  %v310_v40 = vld [vmem:[#allocation5 + $0x500] sm:$0xff]  ;;  %v311_v42 = vld [vmem:[#allocation5 + $0x508] sm:$0xff]  ;;  %v12133_v44 = vcombine.low %v326_v32, %v334_v33  ;;  %v224_v27 = vld [vmem:[#allocation5 + $0x250] sm:$0xff] }
  0x8d   :  { %v318_v41 = vld [vmem:[#allocation5 + $0x540] sm:$0xff]  ;;  %v319_v43 = vld [vmem:[#allocation5 + $0x548] sm:$0xff]  ;;  %v12135_v45 = vcombine.low %v327_v34, %v335_v35  ;;  %v12026_v33 = vcombine.high %v216_v26, %v224_v27  ;;  %v200_v34 = vld [vmem:[#allocation5 + $0x190] sm:$0xff] }
  0x8e   :  { %v12118_v46 = vcombine.high %v310_v40, %v318_v41  ;;  %v12120_v47 = vcombine.high %v311_v42, %v319_v43  ;;  %v294_v48 = vld [vmem:[#allocation5 + $0x480] sm:$0xff]  ;;  %v295_v50 = vld [vmem:[#allocation5 + $0x488] sm:$0xff]  ;;  %v12117_v52 = vcombine.low %v310_v40, %v318_v41  ;;  %v12119_v53 = vcombine.low %v311_v42, %v319_v43  ;;  %v208_v35 = vld [vmem:[#allocation5 + $0x1d0] sm:$0xff] }
  0x8f   :  { %1783 = vmatpush1.bf16.msra.mxu0 %v11973_v60  ;;  %1824 = vmatpush1.bf16.msra.mxu1 %v11975_v61  ;;  %v302_v49 = vld [vmem:[#allocation5 + $0x4c0] sm:$0xff]  ;;  %v303_v51 = vld [vmem:[#allocation5 + $0x4c8] sm:$0xff]  ;;  %v12010_v41 = vcombine.high %v200_v34, %v208_v35  ;;  %v184_v42 = vld [vmem:[#allocation5 + $0x110] sm:$0xff] }
  0x90   :  { %1784 = vmatprep.subr.bf16.mxu0 %v11958_v62  ;;  %1825 = vmatprep.subr.bf16.mxu1 %v11960_v63  ;;  %v12102_v54 = vcombine.high %v294_v48, %v302_v49  ;;  %v12104_v55 = vcombine.high %v295_v50, %v303_v51  ;;  %v278_v56 = vld [vmem:[#allocation5 + $0x400] sm:$0xff]  ;;  %v279_v59 = vld [vmem:[#allocation5 + $0x408] sm:$0xff]  ;;  %v12101_v61 = vcombine.low %v294_v48, %v302_v49  ;;  %v192_v43 = vld [vmem:[#allocation5 + $0x150] sm:$0xff] }
  0x91   :  { %v286_v58 = vld [vmem:[#allocation5 + $0x440] sm:$0xff]  ;;  %v287_v60 = vld [vmem:[#allocation5 + $0x448] sm:$0xff]  ;;  %v12103_v62 = vcombine.low %v295_v50, %v303_v51  ;;  %v11994_v49 = vcombine.high %v184_v42, %v192_v43  ;;  %v168_v50 = vld [vmem:[#allocation5 + $0x90] sm:$0xff] }
  0x92   :  { %v12086_v63 = vcombine.high %v278_v56, %v286_v58  ;;  %v12088_v0 = vcombine.high %v279_v59, %v287_v60  ;;  %v176_v51 = vld [vmem:[#allocation5 + $0xd0] sm:$0xff] }
  0x93   :  { %1785 = vmatpush1.bf16.msra.mxu0 %v11957_v4  ;;  %1826 = vmatpush1.bf16.msra.mxu1 %v11959_v5  ;;  %v273_v4 = vld [vmem:[#allocation5 + $0x3d8] sm:$0xff]  ;;  %v12085_v5 = vcombine.low %v278_v56, %v286_v58  ;;  %v11978_v58 = vcombine.high %v168_v50, %v176_v51 }
  0x94   :  { %1786 = vmatprep.subr.bf16.mxu0 %v12198_v6  ;;  %1827 = vmatprep.subr.bf16.mxu1 %v12200_v7  ;;  %v146_v6 = vld [vmem:[#allocation2] sm:$0xff]  ;;  %v12087_v7 = vcombine.low %v279_v59, %v287_v60  ;;  %v12076_v9 = vcombine.high %v265_v3, %v273_v4  ;;  %v12075_v16 = vcombine.low %v265_v3, %v273_v4 }
  0x95   :  { %v152_v59 = vld [vmem:[#allocation5 + $0x10] sm:$0xff] }
  0x96   :  { %v160_v60 = vld [vmem:[#allocation5 + $0x50] sm:$0xff] }
  0x97   :  { %1787 = vmatpush2.bf16.msra.mxu0 %v12197_v12  ;;  %1828 = vmatpush2.bf16.msra.mxu1 %v12199_v13  ;;  %v14319_v12 = vpack.c.bf16 %v146_v6, %v146_v6  ;;  %v249_v13 = vld [vmem:[#allocation5 + $0x318] sm:$0xff]  ;;  %v392_v3 = vld [vmem:[#allocation5 + $0x790] sm:$0xff] }
  0x98   :  { %1788 = vmatprep.subr.bf16.mxu0 %v12182_v14  ;;  %1829 = vmatprep.subr.bf16.mxu1 %v12184_v15  ;;  %v257_v14 = vld [vmem:[#allocation5 + $0x358] sm:$0xff]  ;;  %v12073_v15 = vcombine.low %v264_v1, %v272_v2  ;;  %v11962_v2 = vcombine.high %v152_v59, %v160_v60  ;;  %v400_v4 = vld [vmem:[#allocation5 + $0x7d0] sm:$0xff] }
  0x99   :  { %v12059_v24 = vcombine.low %v249_v13, %v257_v14 }
  0x9b   :  { %1789 = vmatpush2.bf16.msra.mxu0 %v12181_v20  ;;  %1830 = vmatpush2.bf16.msra.mxu1 %v12183_v21  ;;  %v233_v20 = vld [vmem:[#allocation5 + $0x298] sm:$0xff]  ;;  %v12060_v21 = vcombine.high %v249_v13, %v257_v14  ;;  %v384_v13 = vld [vmem:[#allocation5 + $0x750] sm:$0xff] }
  0x9c   :  { %1790 = vmatprep.subr.bf16.mxu0 %v12166_v22  ;;  %1831 = vmatprep.subr.bf16.mxu1 %v12168_v23  ;;  %v241_v22 = vld [vmem:[#allocation5 + $0x2d8] sm:$0xff]  ;;  %v12057_v23 = vcombine.low %v248_v10, %v256_v11  ;;  %v12202_v10 = vcombine.high %v392_v3, %v400_v4  ;;  %v376_v11 = vld [vmem:[#allocation5 + $0x710] sm:$0xff] }
  0x9d   :  { %v12043_v32 = vcombine.low %v233_v20, %v241_v22  ;;  %v377_v14 = vld [vmem:[#allocation5 + $0x718] sm:$0xff] }
  0x9f   :  { %1791 = vmatpush2.bf16.msra.mxu0 %v12165_v28  ;;  %1832 = vmatpush2.bf16.msra.mxu1 %v12167_v29  ;;  %v217_v28 = vld [vmem:[#allocation5 + $0x218] sm:$0xff]  ;;  %v12044_v29 = vcombine.high %v233_v20, %v241_v22  ;;  %v360_v20 = vld [vmem:[#allocation5 + $0x690] sm:$0xff] }
  0xa0   :  { %1792 = vmatprep.subr.bf16.mxu0 %v12150_v30  ;;  %1833 = vmatprep.subr.bf16.mxu1 %v12152_v31  ;;  %v225_v30 = vld [vmem:[#allocation5 + $0x258] sm:$0xff]  ;;  %v12041_v31 = vcombine.low %v232_v18, %v240_v19  ;;  %v12186_v19 = vcombine.high %v376_v11, %v384_v13 }
  0xa1   :  { %v12027_v40 = vcombine.low %v217_v28, %v225_v30  ;;  %v361_v22 = vld [vmem:[#allocation5 + $0x698] sm:$0xff] }
  0xa3   :  { %1793 = vmatpush2.bf16.msra.mxu0 %v12149_v36  ;;  %1834 = vmatpush2.bf16.msra.mxu1 %v12151_v37  ;;  %v201_v36 = vld [vmem:[#allocation5 + $0x198] sm:$0xff]  ;;  %v12028_v37 = vcombine.high %v217_v28, %v225_v30  ;;  %v344_v28 = vld [vmem:[#allocation5 + $0x610] sm:$0xff] }
  0xa4   :  { %1794 = vmatprep.subr.bf16.mxu0 %v12134_v38  ;;  %1835 = vmatprep.subr.bf16.mxu1 %v12136_v39  ;;  %v209_v38 = vld [vmem:[#allocation5 + $0x1d8] sm:$0xff]  ;;  %v12025_v39 = vcombine.low %v216_v26, %v224_v27 }
  0xa5   :  { %v12011_v48 = vcombine.low %v201_v36, %v209_v38  ;;  %v345_v30 = vld [vmem:[#allocation5 + $0x618] sm:$0xff] }
  0xa7   :  { %1795 = vmatpush2.bf16.msra.mxu0 %v12133_v44  ;;  %1836 = vmatpush2.bf16.msra.mxu1 %v12135_v45  ;;  %v185_v44 = vld [vmem:[#allocation5 + $0x118] sm:$0xff]  ;;  %v12012_v45 = vcombine.high %v201_v36, %v209_v38  ;;  %v328_v36 = vld [vmem:[#allocation5 + $0x590] sm:$0xff] }
  0xa8   :  { %1796 = vmatprep.subr.bf16.mxu0 %v12118_v46  ;;  %1837 = vmatprep.subr.bf16.mxu1 %v12120_v47  ;;  %v193_v46 = vld [vmem:[#allocation5 + $0x158] sm:$0xff]  ;;  %v12009_v47 = vcombine.low %v200_v34, %v208_v35 }
  0xa9   :  { %v11995_v56 = vcombine.low %v185_v44, %v193_v46  ;;  %v329_v38 = vld [vmem:[#allocation5 + $0x598] sm:$0xff] }
  0xab   :  { %1797 = vmatpush2.bf16.msra.mxu0 %v12117_v52  ;;  %1838 = vmatpush2.bf16.msra.mxu1 %v12119_v53  ;;  %v169_v52 = vld [vmem:[#allocation5 + $0x98] sm:$0xff]  ;;  %v11996_v53 = vcombine.high %v185_v44, %v193_v46  ;;  %v312_v44 = vld [vmem:[#allocation5 + $0x510] sm:$0xff] }
  0xac   :  { %1798 = vmatprep.subr.bf16.mxu0 %v12102_v54  ;;  %1839 = vmatprep.subr.bf16.mxu1 %v12104_v55  ;;  %v177_v54 = vld [vmem:[#allocation5 + $0xd8] sm:$0xff]  ;;  %v11993_v55 = vcombine.low %v184_v42, %v192_v43 }
  0xad   :  { %v11979_v1 = vcombine.low %v169_v52, %v177_v54  ;;  %v313_v46 = vld [vmem:[#allocation5 + $0x518] sm:$0xff] }
  0xaf   :  { %1799 = vmatpush2.bf16.msra.mxu0 %v12101_v61  ;;  %1840 = vmatpush2.bf16.msra.mxu1 %v12103_v62  ;;  %v153_v61 = vld [vmem:[#allocation5 + $0x18] sm:$0xff]  ;;  %v11980_v62 = vcombine.high %v169_v52, %v177_v54  ;;  %v296_v52 = vld [vmem:[#allocation5 + $0x490] sm:$0xff] }
  0xb0   :  { %1800 = vmatprep.subr.bf16.mxu0 %v12086_v63  ;;  %1841 = vmatprep.subr.bf16.mxu1 %v12088_v0  ;;  %v161_v63 = vld [vmem:[#allocation5 + $0x58] sm:$0xff]  ;;  %v11977_v0 = vcombine.low %v168_v50, %v176_v51 }
  0xb1   :  { %v11964_v6 = vcombine.high %v153_v61, %v161_v63  ;;  %v297_v54 = vld [vmem:[#allocation5 + $0x498] sm:$0xff] }
  0xb3   :  { %1801 = vmatpush2.bf16.msra.mxu0 %v12085_v5  ;;  %1842 = vmatpush2.bf16.msra.mxu1 %v12087_v7  ;;  %v393_v5 = vld [vmem:[#allocation5 + $0x798] sm:$0xff] }
  0xb4   :  { %1852 = vmatprep.subr.bf16.mxu0 %v12074_v8  ;;  %1893 = vmatprep.subr.bf16.mxu1 %v12076_v9  ;;  %v401_v7 = vld [vmem:[#allocation5 + $0x7d8] sm:$0xff]  ;;  %v11961_v8 = vcombine.low %v152_v59, %v160_v60  ;;  %v11963_v9 = vcombine.low %v153_v61, %v161_v63  ;;  %v280_v61 = vld [vmem:[#allocation5 + $0x410] sm:$0xff] }
  0xb5   :  { %v12203_v18 = vcombine.low %v393_v5, %v401_v7  ;;  %v281_v63 = vld [vmem:[#allocation5 + $0x418] sm:$0xff] }
  0xb6   :  { %1803 = vmatmul.mubr.bf16.vlgmr.msra.gmra.mxu0 %v14319_v12  ;;  %1844 = vmatmul.mubr.bf16.vlgmr.msra.gmra.mxu1 %v14319_v12 }
  0xb7   :  { %1853 = vmatpush1.bf16.msra.mxu0 %v12073_v15  ;;  %1894 = vmatpush1.bf16.msra.mxu1 %v12075_v16  ;;  %v12204_v15 = vcombine.high %v393_v5, %v401_v7  ;;  %v385_v16 = vld [vmem:[#allocation5 + $0x758] sm:$0xff]  ;;  %v266_v5 = vld [vmem:[#allocation5 + $0x3a0] sm:$0xff]  ;;  %v267_v7 = vld [vmem:[#allocation5 + $0x3a8] sm:$0xff] }
  0xb8   :  { %1854 = vmatprep.subr.bf16.mxu0 %v12058_v17  ;;  %1895 = vmatprep.subr.bf16.mxu1 %v12060_v21  ;;  %v12201_v17 = vcombine.low %v392_v3, %v400_v4  ;;  %v368_v21 = vld [vmem:[#allocation5 + $0x6d0] sm:$0xff]  ;;  %v12187_v26 = vcombine.low %v377_v14, %v385_v16 }
  0xb9   :  { %1884 = vmatprep.mubr.bf16.mxu0 %v14315_v57  ;;  %1925 = vmatprep.mubr.bf16.mxu1 %v14315_v57  ;;  %v12170_v27 = vcombine.high %v360_v20, %v368_v21 }
  0xbb   :  { %1855 = vmatpush1.bf16.msra.mxu0 %v12057_v23  ;;  %1896 = vmatpush1.bf16.msra.mxu1 %v12059_v24  ;;  %v12188_v23 = vcombine.high %v377_v14, %v385_v16  ;;  %v369_v24 = vld [vmem:[#allocation5 + $0x6d8] sm:$0xff]  ;;  %v250_v14 = vld [vmem:[#allocation5 + $0x320] sm:$0xff]  ;;  %v251_v16 = vld [vmem:[#allocation5 + $0x328] sm:$0xff] }
  0xbc   :  { %1856 = vmatprep.subr.bf16.mxu0 %v12042_v25  ;;  %1897 = vmatprep.subr.bf16.mxu1 %v12044_v29  ;;  %v12185_v25 = vcombine.low %v376_v11, %v384_v13  ;;  %v352_v29 = vld [vmem:[#allocation5 + $0x650] sm:$0xff]  ;;  %v12171_v34 = vcombine.low %v361_v22, %v369_v24 }
  0xbd   :  { %v12154_v35 = vcombine.high %v344_v28, %v352_v29 }
  0xbf   :  { %1857 = vmatpush1.bf16.msra.mxu0 %v12041_v31  ;;  %1898 = vmatpush1.bf16.msra.mxu1 %v12043_v32  ;;  %v12172_v31 = vcombine.high %v361_v22, %v369_v24  ;;  %v353_v32 = vld [vmem:[#allocation5 + $0x658] sm:$0xff]  ;;  %v234_v22 = vld [vmem:[#allocation5 + $0x2a0] sm:$0xff] }
  0xc0   :  { %1858 = vmatprep.subr.bf16.mxu0 %v12026_v33  ;;  %1899 = vmatprep.subr.bf16.mxu1 %v12028_v37  ;;  %v12169_v33 = vcombine.low %v360_v20, %v368_v21  ;;  %v336_v37 = vld [vmem:[#allocation5 + $0x5d0] sm:$0xff]  ;;  %v12155_v42 = vcombine.low %v345_v30, %v353_v32 }
  0xc1   :  { %v12138_v43 = vcombine.high %v328_v36, %v336_v37 }
  0xc3   :  { %1859 = vmatpush1.bf16.msra.mxu0 %v12025_v39  ;;  %1900 = vmatpush1.bf16.msra.mxu1 %v12027_v40  ;;  %v12156_v39 = vcombine.high %v345_v30, %v353_v32  ;;  %v337_v40 = vld [vmem:[#allocation5 + $0x5d8] sm:$0xff]  ;;  %v218_v30 = vld [vmem:[#allocation5 + $0x220] sm:$0xff]  ;;  %v219_v32 = vld [vmem:[#allocation5 + $0x228] sm:$0xff] }
  0xc4   :  { %1860 = vmatprep.subr.bf16.mxu0 %v12010_v41  ;;  %1901 = vmatprep.subr.bf16.mxu1 %v12012_v45  ;;  %v12153_v41 = vcombine.low %v344_v28, %v352_v29  ;;  %v320_v45 = vld [vmem:[#allocation5 + $0x550] sm:$0xff]  ;;  %v12139_v50 = vcombine.low %v329_v38, %v337_v40 }
  0xc5   :  { %v12122_v51 = vcombine.high %v312_v44, %v320_v45 }
  0xc7   :  { %1861 = vmatpush1.bf16.msra.mxu0 %v12009_v47  ;;  %1902 = vmatpush1.bf16.msra.mxu1 %v12011_v48  ;;  %v12140_v47 = vcombine.high %v329_v38, %v337_v40  ;;  %v321_v48 = vld [vmem:[#allocation5 + $0x558] sm:$0xff]  ;;  %v202_v38 = vld [vmem:[#allocation5 + $0x1a0] sm:$0xff]  ;;  %v203_v40 = vld [vmem:[#allocation5 + $0x1a8] sm:$0xff] }
  0xc8   :  { %1862 = vmatprep.subr.bf16.mxu0 %v11994_v49  ;;  %1903 = vmatprep.subr.bf16.mxu1 %v11996_v53  ;;  %v12137_v49 = vcombine.low %v328_v36, %v336_v37  ;;  %v304_v53 = vld [vmem:[#allocation5 + $0x4d0] sm:$0xff]  ;;  %v12123_v59 = vcombine.low %v313_v46, %v321_v48 }
  0xc9   :  { %v12106_v60 = vcombine.high %v296_v52, %v304_v53 }
  0xcb   :  { %1863 = vmatpush1.bf16.msra.mxu0 %v11993_v55  ;;  %1904 = vmatpush1.bf16.msra.mxu1 %v11995_v56  ;;  %v12124_v55 = vcombine.high %v313_v46, %v321_v48  ;;  %v305_v56 = vld [vmem:[#allocation5 + $0x4d8] sm:$0xff]  ;;  %v186_v46 = vld [vmem:[#allocation5 + $0x120] sm:$0xff]  ;;  %v187_v48 = vld [vmem:[#allocation5 + $0x128] sm:$0xff] }
  0xcc   :  { %1864 = vmatprep.subr.bf16.mxu0 %v11978_v58  ;;  %1905 = vmatprep.subr.bf16.mxu1 %v11980_v62  ;;  %v12121_v58 = vcombine.low %v312_v44, %v320_v45  ;;  %v288_v62 = vld [vmem:[#allocation5 + $0x450] sm:$0xff]  ;;  %v12107_v3 = vcombine.low %v297_v54, %v305_v56 }
  0xcd   :  { %v12090_v4 = vcombine.high %v280_v61, %v288_v62 }
  0xcf   :  { %1865 = vmatpush1.bf16.msra.mxu0 %v11977_v0  ;;  %1906 = vmatpush1.bf16.msra.mxu1 %v11979_v1  ;;  %v12108_v0 = vcombine.high %v297_v54, %v305_v56  ;;  %v289_v1 = vld [vmem:[#allocation5 + $0x458] sm:$0xff]  ;;  %v170_v54 = vld [vmem:[#allocation5 + $0xa0] sm:$0xff]  ;;  %v171_v56 = vld [vmem:[#allocation5 + $0xa8] sm:$0xff] }
  0xd0   :  { %1866 = vmatprep.subr.bf16.mxu0 %v11962_v2  ;;  %1907 = vmatprep.subr.bf16.mxu1 %v11964_v6  ;;  %v12105_v2 = vcombine.low %v296_v52, %v304_v53  ;;  %v274_v6 = vld [vmem:[#allocation5 + $0x3e0] sm:$0xff]  ;;  %v12091_v11 = vcombine.low %v281_v63, %v289_v1 }
  0xd1   :  { %v12078_v13 = vcombine.high %v266_v5, %v274_v6 }
  0xd3   :  { %1867 = vmatpush1.bf16.msra.mxu0 %v11961_v8  ;;  %1908 = vmatpush1.bf16.msra.mxu1 %v11963_v9  ;;  %v12092_v8 = vcombine.high %v281_v63, %v289_v1  ;;  %v275_v9 = vld [vmem:[#allocation5 + $0x3e8] sm:$0xff]  ;;  %v154_v63 = vld [vmem:[#allocation5 + $0x20] sm:$0xff] }
  0xd4   :  { %1868 = vmatprep.subr.bf16.mxu0 %v12202_v10  ;;  %1909 = vmatprep.subr.bf16.mxu1 %v12204_v15  ;;  %v12089_v10 = vcombine.low %v280_v61, %v288_v62  ;;  %v258_v15 = vld [vmem:[#allocation5 + $0x360] sm:$0xff]  ;;  %v12079_v20 = vcombine.low %v267_v7, %v275_v9  ;;  %v155_v1 = vld [vmem:[#allocation5 + $0x28] sm:$0xff] }
  0xd5   :  { %v12062_v21 = vcombine.high %v250_v14, %v258_v15 }
  0xd7   :  { %1869 = vmatpush2.bf16.msra.mxu0 %v12201_v17  ;;  %1910 = vmatpush2.bf16.msra.mxu1 %v12203_v18  ;;  %v12080_v17 = vcombine.high %v267_v7, %v275_v9  ;;  %v259_v18 = vld [vmem:[#allocation5 + $0x368] sm:$0xff]  ;;  %v394_v7 = vld [vmem:[#allocation5 + $0x7a0] sm:$0xff] }
  0xd8   :  { %1870 = vmatprep.subr.bf16.mxu0 %v12186_v19  ;;  %1911 = vmatprep.subr.bf16.mxu1 %v12188_v23  ;;  %v12077_v19 = vcombine.low %v266_v5, %v274_v6  ;;  %v242_v23 = vld [vmem:[#allocation5 + $0x2e0] sm:$0xff]  ;;  %v12064_v24 = vcombine.high %v251_v16, %v259_v18  ;;  %v12063_v28 = vcombine.low %v251_v16, %v259_v18  ;;  %v395_v9 = vld [vmem:[#allocation5 + $0x7a8] sm:$0xff] }
  0xd9   :  { %v12046_v29 = vcombine.high %v234_v22, %v242_v23  ;;  %v378_v16 = vld [vmem:[#allocation5 + $0x720] sm:$0xff]  ;;  %v379_v18 = vld [vmem:[#allocation5 + $0x728] sm:$0xff] }
  0xdb   :  { %1871 = vmatpush2.bf16.msra.mxu0 %v12185_v25  ;;  %1912 = vmatpush2.bf16.msra.mxu1 %v12187_v26  ;;  %v235_v25 = vld [vmem:[#allocation5 + $0x2a8] sm:$0xff] }
  0xdc   :  { %1872 = vmatprep.subr.bf16.mxu0 %v12170_v27  ;;  %1913 = vmatprep.subr.bf16.mxu1 %v12172_v31  ;;  %v243_v26 = vld [vmem:[#allocation5 + $0x2e8] sm:$0xff]  ;;  %v12061_v27 = vcombine.low %v250_v14, %v258_v15  ;;  %v226_v31 = vld [vmem:[#allocation5 + $0x260] sm:$0xff] }
  0xdd   :  { %v12047_v36 = vcombine.low %v235_v25, %v243_v26  ;;  %v12030_v37 = vcombine.high %v218_v30, %v226_v31 }
  0xdf   :  { %1873 = vmatpush2.bf16.msra.mxu0 %v12169_v33  ;;  %1914 = vmatpush2.bf16.msra.mxu1 %v12171_v34  ;;  %v12048_v33 = vcombine.high %v235_v25, %v243_v26  ;;  %v227_v34 = vld [vmem:[#allocation5 + $0x268] sm:$0xff]  ;;  %v370_v25 = vld [vmem:[#allocation5 + $0x6e0] sm:$0xff] }
  0xe0   :  { %1874 = vmatprep.subr.bf16.mxu0 %v12154_v35  ;;  %1915 = vmatprep.subr.bf16.mxu1 %v12156_v39  ;;  %v12045_v35 = vcombine.low %v234_v22, %v242_v23  ;;  %v210_v39 = vld [vmem:[#allocation5 + $0x1e0] sm:$0xff]  ;;  %v12031_v44 = vcombine.low %v219_v32, %v227_v34  ;;  %v363_v26 = vld [vmem:[#allocation5 + $0x6a8] sm:$0xff] }
  0xe1   :  { %v12014_v45 = vcombine.high %v202_v38, %v210_v39 }
  0xe3   :  { %1875 = vmatpush2.bf16.msra.mxu0 %v12153_v41  ;;  %1916 = vmatpush2.bf16.msra.mxu1 %v12155_v42  ;;  %v12032_v41 = vcombine.high %v219_v32, %v227_v34  ;;  %v211_v42 = vld [vmem:[#allocation5 + $0x1e8] sm:$0xff]  ;;  %v346_v32 = vld [vmem:[#allocation5 + $0x620] sm:$0xff] }
  0xe4   :  { %1876 = vmatprep.subr.bf16.mxu0 %v12138_v43  ;;  %1917 = vmatprep.subr.bf16.mxu1 %v12140_v47  ;;  %v12029_v43 = vcombine.low %v218_v30, %v226_v31  ;;  %v194_v47 = vld [vmem:[#allocation5 + $0x160] sm:$0xff]  ;;  %v12015_v52 = vcombine.low %v203_v40, %v211_v42  ;;  %v347_v34 = vld [vmem:[#allocation5 + $0x628] sm:$0xff] }
  0xe5   :  { %v11998_v53 = vcombine.high %v186_v46, %v194_v47 }
  0xe7   :  { %1877 = vmatpush2.bf16.msra.mxu0 %v12137_v49  ;;  %1918 = vmatpush2.bf16.msra.mxu1 %v12139_v50  ;;  %v12016_v49 = vcombine.high %v203_v40, %v211_v42  ;;  %v195_v50 = vld [vmem:[#allocation5 + $0x168] sm:$0xff]  ;;  %v330_v40 = vld [vmem:[#allocation5 + $0x5a0] sm:$0xff] }
  0xe8   :  { %1878 = vmatprep.subr.bf16.mxu0 %v12122_v51  ;;  %1919 = vmatprep.subr.bf16.mxu1 %v12124_v55  ;;  %v12013_v51 = vcombine.low %v202_v38, %v210_v39  ;;  %v178_v55 = vld [vmem:[#allocation5 + $0xe0] sm:$0xff]  ;;  %v11999_v61 = vcombine.low %v187_v48, %v195_v50  ;;  %v331_v42 = vld [vmem:[#allocation5 + $0x5a8] sm:$0xff] }
  0xe9   :  { %v11982_v62 = vcombine.high %v170_v54, %v178_v55 }
  0xeb   :  { %1879 = vmatpush2.bf16.msra.mxu0 %v12121_v58  ;;  %1920 = vmatpush2.bf16.msra.mxu1 %v12123_v59  ;;  %v12000_v58 = vcombine.high %v187_v48, %v195_v50  ;;  %v179_v59 = vld [vmem:[#allocation5 + $0xe8] sm:$0xff]  ;;  %v314_v48 = vld [vmem:[#allocation5 + $0x520] sm:$0xff] }
  0xec   :  { %1880 = vmatprep.subr.bf16.mxu0 %v12106_v60  ;;  %1921 = vmatprep.subr.bf16.mxu1 %v12108_v0  ;;  %v11997_v60 = vcombine.low %v186_v46, %v194_v47  ;;  %v162_v0 = vld [vmem:[#allocation5 + $0x60] sm:$0xff]  ;;  %v11983_v5 = vcombine.low %v171_v56, %v179_v59  ;;  %v315_v50 = vld [vmem:[#allocation5 + $0x528] sm:$0xff] }
  0xed   :  { %v11966_v6 = vcombine.high %v154_v63, %v162_v0 }
  0xef   :  { %1881 = vmatpush2.bf16.msra.mxu0 %v12105_v2  ;;  %1922 = vmatpush2.bf16.msra.mxu1 %v12107_v3  ;;  %v11984_v2 = vcombine.high %v171_v56, %v179_v59  ;;  %v163_v3 = vld [vmem:[#allocation5 + $0x68] sm:$0xff]  ;;  %v298_v56 = vld [vmem:[#allocation5 + $0x4a0] sm:$0xff] }
  0xf0   :  { %1882 = vmatprep.subr.bf16.mxu0 %v12090_v4  ;;  %1923 = vmatprep.subr.bf16.mxu1 %v12092_v8  ;;  %v11981_v4 = vcombine.low %v170_v54, %v178_v55  ;;  %v402_v8 = vld [vmem:[#allocation5 + $0x7e0] sm:$0xff]  ;;  %v11967_v14 = vcombine.low %v155_v1, %v163_v3  ;;  %v299_v59 = vld [vmem:[#allocation5 + $0x4a8] sm:$0xff] }
  0xf1   :  { %v12206_v15 = vcombine.high %v394_v7, %v402_v8 }
  0xf3   :  { %1883 = vmatpush2.bf16.msra.mxu0 %v12089_v10  ;;  %1924 = vmatpush2.bf16.msra.mxu1 %v12091_v11  ;;  %v11968_v10 = vcombine.high %v155_v1, %v163_v3  ;;  %v403_v11 = vld [vmem:[#allocation5 + $0x7e8] sm:$0xff]  ;;  %v282_v1 = vld [vmem:[#allocation5 + $0x420] sm:$0xff] }
  0xf4   :  { %1934 = vmatprep.subr.bf16.mxu0 %v12078_v13  ;;  %1975 = vmatprep.subr.bf16.mxu1 %v12080_v17  ;;  %v11965_v13 = vcombine.low %v154_v63, %v162_v0  ;;  %v386_v17 = vld [vmem:[#allocation5 + $0x760] sm:$0xff]  ;;  %v12207_v22 = vcombine.low %v395_v9, %v403_v11  ;;  %v283_v3 = vld [vmem:[#allocation5 + $0x428] sm:$0xff] }
  0xf5   :  { %v12190_v23 = vcombine.high %v378_v16, %v386_v17 }
  0xf6   :  { %1885 = vmatmul.mubr.bf16.vlgmr.msra.gmra.mxu0 %v14319_v12  ;;  %1926 = vmatmul.mubr.bf16.vlgmr.msra.gmra.mxu1 %v14319_v12 }
  0xf7   :  { %1935 = vmatpush1.bf16.msra.mxu0 %v12077_v19  ;;  %1976 = vmatpush1.bf16.msra.mxu1 %v12079_v20  ;;  %v12208_v19 = vcombine.high %v395_v9, %v403_v11  ;;  %v387_v20 = vld [vmem:[#allocation5 + $0x768] sm:$0xff]  ;;  %v268_v9 = vld [vmem:[#allocation5 + $0x3b0] sm:$0xff]  ;;  %v269_v11 = vld [vmem:[#allocation5 + $0x3b8] sm:$0xff] }
  0xf8   :  { %1936 = vmatprep.subr.bf16.mxu0 %v12062_v21  ;;  %1977 = vmatprep.subr.bf16.mxu1 %v12064_v24  ;;  %v12205_v21 = vcombine.low %v394_v7, %v402_v8  ;;  %v362_v24 = vld [vmem:[#allocation5 + $0x6a0] sm:$0xff]  ;;  %v12191_v30 = vcombine.low %v379_v18, %v387_v20 }
  0xf9   :  { %1966 = vmatprep.mubr.bf16.mxu0 %v14315_v57  ;;  %2007 = vmatprep.mubr.bf16.mxu1 %v14315_v57  ;;  %v12174_v31 = vcombine.high %v362_v24, %v370_v25 }
  0xfb   :  { %1937 = vmatpush1.bf16.msra.mxu0 %v12061_v27  ;;  %1978 = vmatpush1.bf16.msra.mxu1 %v12063_v28  ;;  %v12192_v27 = vcombine.high %v379_v18, %v387_v20  ;;  %v371_v28 = vld [vmem:[#allocation5 + $0x6e8] sm:$0xff]  ;;  %v252_v18 = vld [vmem:[#allocation5 + $0x330] sm:$0xff]  ;;  %v253_v20 = vld [vmem:[#allocation5 + $0x338] sm:$0xff] }
  0xfc   :  { %1938 = vmatprep.subr.bf16.mxu0 %v12046_v29  ;;  %1979 = vmatprep.subr.bf16.mxu1 %v12048_v33  ;;  %v12189_v29 = vcombine.low %v378_v16, %v386_v17  ;;  %v354_v33 = vld [vmem:[#allocation5 + $0x660] sm:$0xff]  ;;  %v12175_v38 = vcombine.low %v363_v26, %v371_v28 }
  0xfd   :  { %v12158_v39 = vcombine.high %v346_v32, %v354_v33 }
  0xff   :  { %1939 = vmatpush1.bf16.msra.mxu0 %v12045_v35  ;;  %1980 = vmatpush1.bf16.msra.mxu1 %v12047_v36  ;;  %v12176_v35 = vcombine.high %v363_v26, %v371_v28  ;;  %v355_v36 = vld [vmem:[#allocation5 + $0x668] sm:$0xff]  ;;  %v236_v26 = vld [vmem:[#allocation5 + $0x2b0] sm:$0xff]  ;;  %v237_v28 = vld [vmem:[#allocation5 + $0x2b8] sm:$0xff] }
 0x100   :  { %1940 = vmatprep.subr.bf16.mxu0 %v12030_v37  ;;  %1981 = vmatprep.subr.bf16.mxu1 %v12032_v41  ;;  %v12173_v37 = vcombine.low %v362_v24, %v370_v25  ;;  %v338_v41 = vld [vmem:[#allocation5 + $0x5e0] sm:$0xff]  ;;  %v12159_v46 = vcombine.low %v347_v34, %v355_v36 }
 0x101   :  { %v12142_v47 = vcombine.high %v330_v40, %v338_v41 }
 0x103   :  { %1941 = vmatpush1.bf16.msra.mxu0 %v12029_v43  ;;  %1982 = vmatpush1.bf16.msra.mxu1 %v12031_v44  ;;  %v12160_v43 = vcombine.high %v347_v34, %v355_v36  ;;  %v339_v44 = vld [vmem:[#allocation5 + $0x5e8] sm:$0xff]  ;;  %v220_v34 = vld [vmem:[#allocation5 + $0x230] sm:$0xff]  ;;  %v221_v36 = vld [vmem:[#allocation5 + $0x238] sm:$0xff] }
 0x104   :  { %1942 = vmatprep.subr.bf16.mxu0 %v12014_v45  ;;  %1983 = vmatprep.subr.bf16.mxu1 %v12016_v49  ;;  %v12157_v45 = vcombine.low %v346_v32, %v354_v33  ;;  %v322_v49 = vld [vmem:[#allocation5 + $0x560] sm:$0xff]  ;;  %v12143_v54 = vcombine.low %v331_v42, %v339_v44 }
 0x105   :  { %v12126_v55 = vcombine.high %v314_v48, %v322_v49 }
 0x107   :  { %1943 = vmatpush1.bf16.msra.mxu0 %v12013_v51  ;;  %1984 = vmatpush1.bf16.msra.mxu1 %v12015_v52  ;;  %v12144_v51 = vcombine.high %v331_v42, %v339_v44  ;;  %v323_v52 = vld [vmem:[#allocation5 + $0x568] sm:$0xff]  ;;  %v204_v42 = vld [vmem:[#allocation5 + $0x1b0] sm:$0xff]  ;;  %v205_v44 = vld [vmem:[#allocation5 + $0x1b8] sm:$0xff] }
 0x108   :  { %1944 = vmatprep.subr.bf16.mxu0 %v11998_v53  ;;  %1985 = vmatprep.subr.bf16.mxu1 %v12000_v58  ;;  %v12141_v53 = vcombine.low %v330_v40, %v338_v41  ;;  %v306_v58 = vld [vmem:[#allocation5 + $0x4e0] sm:$0xff]  ;;  %v12127_v63 = vcombine.low %v315_v50, %v323_v52 }
 0x109   :  { %v12110_v0 = vcombine.high %v298_v56, %v306_v58 }
 0x10b   :  { %1945 = vmatpush1.bf16.msra.mxu0 %v11997_v60  ;;  %1986 = vmatpush1.bf16.msra.mxu1 %v11999_v61  ;;  %v12128_v60 = vcombine.high %v315_v50, %v323_v52  ;;  %v307_v61 = vld [vmem:[#allocation5 + $0x4e8] sm:$0xff]  ;;  %v188_v50 = vld [vmem:[#allocation5 + $0x130] sm:$0xff] }
 0x10c   :  { %1946 = vmatprep.subr.bf16.mxu0 %v11982_v62  ;;  %1987 = vmatprep.subr.bf16.mxu1 %v11984_v2  ;;  %v12125_v62 = vcombine.low %v314_v48, %v322_v49  ;;  %v290_v2 = vld [vmem:[#allocation5 + $0x460] sm:$0xff]  ;;  %v12111_v7 = vcombine.low %v299_v59, %v307_v61 }
 0x10d   :  { %v12094_v8 = vcombine.high %v282_v1, %v290_v2 }
 0x10f   :  { %1947 = vmatpush1.bf16.msra.mxu0 %v11981_v4  ;;  %1988 = vmatpush1.bf16.msra.mxu1 %v11983_v5  ;;  %v12112_v4 = vcombine.high %v299_v59, %v307_v61  ;;  %v291_v5 = vld [vmem:[#allocation5 + $0x468] sm:$0xff]  ;;  %v180_v59 = vld [vmem:[#allocation5 + $0xf0] sm:$0xff] }
 0x110   :  { %1948 = vmatprep.subr.bf16.mxu0 %v11966_v6  ;;  %1989 = vmatprep.subr.bf16.mxu1 %v11968_v10  ;;  %v12109_v6 = vcombine.low %v298_v56, %v306_v58  ;;  %v276_v10 = vld [vmem:[#allocation5 + $0x3f0] sm:$0xff]  ;;  %v12095_v16 = vcombine.low %v283_v3, %v291_v5 }
 0x111   :  { %v12082_v17 = vcombine.high %v268_v9, %v276_v10  ;;  %v172_v58 = vld [vmem:[#allocation5 + $0xb0] sm:$0xff] }
 0x113   :  { %1949 = vmatpush1.bf16.msra.mxu0 %v11965_v13  ;;  %1990 = vmatpush1.bf16.msra.mxu1 %v11967_v14  ;;  %v12096_v13 = vcombine.high %v283_v3, %v291_v5  ;;  %v277_v14 = vld [vmem:[#allocation5 + $0x3f8] sm:$0xff]  ;;  %v164_v3 = vld [vmem:[#allocation5 + $0x70] sm:$0xff] }
 0x114   :  { %1950 = vmatprep.subr.bf16.mxu0 %v12206_v15  ;;  %1991 = vmatprep.subr.bf16.mxu1 %v12208_v19  ;;  %v12093_v15 = vcombine.low %v282_v1, %v290_v2  ;;  %v260_v19 = vld [vmem:[#allocation5 + $0x370] sm:$0xff]  ;;  %v12083_v24 = vcombine.low %v269_v11, %v277_v14  ;;  %v11986_v1 = vcombine.high %v172_v58, %v180_v59 }
 0x115   :  { %v12066_v25 = vcombine.high %v252_v18, %v260_v19  ;;  %v156_v2 = vld [vmem:[#allocation5 + $0x30] sm:$0xff] }
 0x117   :  { %1951 = vmatpush2.bf16.msra.mxu0 %v12205_v21  ;;  %1992 = vmatpush2.bf16.msra.mxu1 %v12207_v22  ;;  %v12084_v21 = vcombine.high %v269_v11, %v277_v14  ;;  %v261_v22 = vld [vmem:[#allocation5 + $0x378] sm:$0xff]  ;;  %v404_v11 = vld [vmem:[#allocation5 + $0x7f0] sm:$0xff] }
 0x118   :  { %1952 = vmatprep.subr.bf16.mxu0 %v12190_v23  ;;  %1993 = vmatprep.subr.bf16.mxu1 %v12192_v27  ;;  %v12081_v23 = vcombine.low %v268_v9, %v276_v10  ;;  %v244_v27 = vld [vmem:[#allocation5 + $0x2f0] sm:$0xff]  ;;  %v12067_v32 = vcombine.low %v253_v20, %v261_v22  ;;  %v11970_v9 = vcombine.high %v156_v2, %v164_v3 }
 0x119   :  { %v12050_v33 = vcombine.high %v236_v26, %v244_v27  ;;  %v396_v10 = vld [vmem:[#allocation5 + $0x7b0] sm:$0xff] }
 0x11b   :  { %1953 = vmatpush2.bf16.msra.mxu0 %v12189_v29  ;;  %1994 = vmatpush2.bf16.msra.mxu1 %v12191_v30  ;;  %v12068_v29 = vcombine.high %v253_v20, %v261_v22  ;;  %v245_v30 = vld [vmem:[#allocation5 + $0x2f8] sm:$0xff]  ;;  %v388_v20 = vld [vmem:[#allocation5 + $0x770] sm:$0xff] }
 0x11c   :  { %1954 = vmatprep.subr.bf16.mxu0 %v12174_v31  ;;  %1995 = vmatprep.subr.bf16.mxu1 %v12176_v35  ;;  %v12065_v31 = vcombine.low %v252_v18, %v260_v19  ;;  %v228_v35 = vld [vmem:[#allocation5 + $0x270] sm:$0xff]  ;;  %v12051_v40 = vcombine.low %v237_v28, %v245_v30  ;;  %v12210_v18 = vcombine.high %v396_v10, %v404_v11 }
 0x11d   :  { %v12034_v41 = vcombine.high %v220_v34, %v228_v35  ;;  %v380_v19 = vld [vmem:[#allocation5 + $0x730] sm:$0xff] }
 0x11f   :  { %1955 = vmatpush2.bf16.msra.mxu0 %v12173_v37  ;;  %1996 = vmatpush2.bf16.msra.mxu1 %v12175_v38  ;;  %v12052_v37 = vcombine.high %v237_v28, %v245_v30  ;;  %v229_v38 = vld [vmem:[#allocation5 + $0x278] sm:$0xff]  ;;  %v364_v28 = vld [vmem:[#allocation5 + $0x6b0] sm:$0xff] }
 0x120   :  { %1956 = vmatprep.subr.bf16.mxu0 %v12158_v39  ;;  %1997 = vmatprep.subr.bf16.mxu1 %v12160_v43  ;;  %v12049_v39 = vcombine.low %v236_v26, %v244_v27  ;;  %v212_v43 = vld [vmem:[#allocation5 + $0x1f0] sm:$0xff]  ;;  %v12035_v48 = vcombine.low %v221_v36, %v229_v38  ;;  %v12194_v26 = vcombine.high %v380_v19, %v388_v20  ;;  %v365_v30 = vld [vmem:[#allocation5 + $0x6b8] sm:$0xff] }
 0x121   :  { %v12018_v49 = vcombine.high %v204_v42, %v212_v43 }
 0x123   :  { %1957 = vmatpush2.bf16.msra.mxu0 %v12157_v45  ;;  %1998 = vmatpush2.bf16.msra.mxu1 %v12159_v46  ;;  %v12036_v45 = vcombine.high %v221_v36, %v229_v38  ;;  %v213_v46 = vld [vmem:[#allocation5 + $0x1f8] sm:$0xff]  ;;  %v348_v36 = vld [vmem:[#allocation5 + $0x630] sm:$0xff] }
 0x124   :  { %1958 = vmatprep.subr.bf16.mxu0 %v12142_v47  ;;  %1999 = vmatprep.subr.bf16.mxu1 %v12144_v51  ;;  %v12033_v47 = vcombine.low %v220_v34, %v228_v35  ;;  %v189_v51 = vld [vmem:[#allocation5 + $0x138] sm:$0xff]  ;;  %v12020_v52 = vcombine.high %v205_v44, %v213_v46 }
 0x125   :  { %v349_v38 = vld [vmem:[#allocation5 + $0x638] sm:$0xff] }
 0x127   :  { %1959 = vmatpush2.bf16.msra.mxu0 %v12141_v53  ;;  %2000 = vmatpush2.bf16.msra.mxu1 %v12143_v54  ;;  %v197_v53 = vld [vmem:[#allocation5 + $0x178] sm:$0xff]  ;;  %v12017_v54 = vcombine.low %v204_v42, %v212_v43 }
 0x128   :  { %1960 = vmatprep.subr.bf16.mxu0 %v12126_v55  ;;  %2001 = vmatprep.subr.bf16.mxu1 %v12128_v60  ;;  %v12019_v55 = vcombine.low %v205_v44, %v213_v46  ;;  %v173_v60 = vld [vmem:[#allocation5 + $0xb8] sm:$0xff]  ;;  %v12004_v61 = vcombine.high %v189_v51, %v197_v53  ;;  %v332_v44 = vld [vmem:[#allocation5 + $0x5b0] sm:$0xff] }
 0x129   :  { %v333_v46 = vld [vmem:[#allocation5 + $0x5b8] sm:$0xff] }
 0x12b   :  { %1961 = vmatpush2.bf16.msra.mxu0 %v12125_v62  ;;  %2002 = vmatpush2.bf16.msra.mxu1 %v12127_v63  ;;  %v181_v62 = vld [vmem:[#allocation5 + $0xf8] sm:$0xff] }
 0x12c   :  { %1962 = vmatprep.subr.bf16.mxu0 %v12110_v0  ;;  %2003 = vmatprep.subr.bf16.mxu1 %v12112_v4  ;;  %v12003_v0 = vcombine.low %v189_v51, %v197_v53  ;;  %v157_v4 = vld [vmem:[#allocation5 + $0x38] sm:$0xff]  ;;  %v11988_v5 = vcombine.high %v173_v60, %v181_v62  ;;  %v316_v51 = vld [vmem:[#allocation5 + $0x530] sm:$0xff] }
 0x12d   :  { %v317_v53 = vld [vmem:[#allocation5 + $0x538] sm:$0xff] }
 0x12f   :  { %1963 = vmatpush2.bf16.msra.mxu0 %v12109_v6  ;;  %2004 = vmatpush2.bf16.msra.mxu1 %v12111_v7  ;;  %v165_v6 = vld [vmem:[#allocation5 + $0x78] sm:$0xff]  ;;  %v11985_v7 = vcombine.low %v172_v58, %v180_v59 }
 0x130   :  { %1964 = vmatprep.subr.bf16.mxu0 %v12094_v8  ;;  %2005 = vmatprep.subr.bf16.mxu1 %v12096_v13  ;;  %v11987_v8 = vcombine.low %v173_v60, %v181_v62  ;;  %v397_v13 = vld [vmem:[#allocation5 + $0x7b8] sm:$0xff]  ;;  %v11972_v14 = vcombine.high %v157_v4, %v165_v6  ;;  %v300_v60 = vld [vmem:[#allocation5 + $0x4b0] sm:$0xff] }
 0x131   :  { %v301_v62 = vld [vmem:[#allocation5 + $0x4b8] sm:$0xff] }
 0x133   :  { %1965 = vmatpush2.bf16.msra.mxu0 %v12093_v15  ;;  %2006 = vmatpush2.bf16.msra.mxu1 %v12095_v16  ;;  %v405_v15 = vld [vmem:[#allocation5 + $0x7f8] sm:$0xff]  ;;  %v11969_v16 = vcombine.low %v156_v2, %v164_v3 }
 0x134   :  { %2016 = vmatprep.subr.bf16.mxu0 %v12082_v17  ;;  %2057 = vmatprep.subr.bf16.mxu1 %v12084_v21  ;;  %v11971_v17 = vcombine.low %v157_v4, %v165_v6  ;;  %v381_v21 = vld [vmem:[#allocation5 + $0x738] sm:$0xff]  ;;  %v12212_v22 = vcombine.high %v397_v13, %v405_v15  ;;  %v284_v4 = vld [vmem:[#allocation5 + $0x430] sm:$0xff] }
 0x135   :  { %v285_v6 = vld [vmem:[#allocation5 + $0x438] sm:$0xff] }
 0x136   :  { %1967 = vmatmul.mubr.bf16.vlgmr.msra.gmra.mxu0 %v14319_v12  ;;  %2008 = vmatmul.mubr.bf16.vlgmr.msra.gmra.mxu1 %v14319_v12 }
 0x137   :  { %2017 = vmatpush1.bf16.msra.mxu0 %v12081_v23  ;;  %2058 = vmatpush1.bf16.msra.mxu1 %v12083_v24  ;;  %v389_v23 = vld [vmem:[#allocation5 + $0x778] sm:$0xff]  ;;  %v12209_v24 = vcombine.low %v396_v10, %v404_v11 }
 0x138   :  { %2018 = vmatprep.subr.bf16.mxu0 %v12066_v25  ;;  %2059 = vmatprep.subr.bf16.mxu1 %v12068_v29  ;;  %v12211_v25 = vcombine.low %v397_v13, %v405_v15  ;;  %v12196_v27 = vcombine.high %v381_v21, %v389_v23  ;;  %v372_v29 = vld [vmem:[#allocation5 + $0x6f0] sm:$0xff] }
 0x139   :  { %2048 = vmatprep.mubr.bf16.mxu0 %v14315_v57  ;;  %2089 = vmatprep.mubr.bf16.mxu1 %v14315_v57  ;;  %v196_v57 = vld [vmem:[#allocation5 + $0x170] sm:$0xff]  ;;  %v12178_v34 = vcombine.high %v364_v28, %v372_v29 }
 0x13a   :  { %v12002_v56 = vcombine.high %v188_v50, %v196_v57  ;;  %v12001_v63 = vcombine.low %v188_v50, %v196_v57  ;;  %v2222_v15 = vld [vmem:[#allocation8 + $0x1e0] sm:$0xff] }
 0x13b   :  { %2019 = vmatpush1.bf16.msra.mxu0 %v12065_v31  ;;  %2060 = vmatpush1.bf16.msra.mxu1 %v12067_v32  ;;  %v373_v31 = vld [vmem:[#allocation5 + $0x6f8] sm:$0xff]  ;;  %v12193_v32 = vcombine.low %v380_v19, %v388_v20 }
 0x13c   :  { %2020 = vmatprep.subr.bf16.mxu0 %v12050_v33  ;;  %2061 = vmatprep.subr.bf16.mxu1 %v12052_v37  ;;  %v12195_v33 = vcombine.low %v381_v21, %v389_v23  ;;  %v12180_v35 = vcombine.high %v365_v30, %v373_v31  ;;  %v356_v37 = vld [vmem:[#allocation5 + $0x670] sm:$0xff] }
 0x13d   :  { %v12162_v42 = vcombine.high %v348_v36, %v356_v37 }
 0x13f   :  { %2021 = vmatpush1.bf16.msra.mxu0 %v12049_v39  ;;  %2062 = vmatpush1.bf16.msra.mxu1 %v12051_v40  ;;  %v357_v39 = vld [vmem:[#allocation5 + $0x678] sm:$0xff]  ;;  %v12177_v40 = vcombine.low %v364_v28, %v372_v29  ;;  %v2342_v28 = vld [vmem:[#allocation8 + $0x5a0] sm:$0xff] }
 0x140   :  { %2022 = vmatprep.subr.bf16.mxu0 %v12034_v41  ;;  %2063 = vmatprep.subr.bf16.mxu1 %v12036_v45  ;;  %v12179_v41 = vcombine.low %v365_v30, %v373_v31  ;;  %v12164_v43 = vcombine.high %v349_v38, %v357_v39  ;;  %v340_v45 = vld [vmem:[#allocation5 + $0x5f0] sm:$0xff]  ;;  %v14341_v30 = vld [vmem:[#allocation7] sm:$0xff] }
 0x141   :  { %v12146_v50 = vcombine.high %v332_v44, %v340_v45 }
 0x143   :  { %2023 = vmatpush1.bf16.msra.mxu0 %v12033_v47  ;;  %2064 = vmatpush1.bf16.msra.mxu1 %v12035_v48  ;;  %v341_v47 = vld [vmem:[#allocation5 + $0x5f8] sm:$0xff]  ;;  %v12161_v48 = vcombine.low %v348_v36, %v356_v37  ;;  %v2206_v36 = vld [vmem:[#allocation8 + $0x160] sm:$0xff] }
 0x144   :  { %2024 = vmatprep.subr.bf16.mxu0 %v12018_v49  ;;  %2065 = vmatprep.subr.bf16.mxu1 %v12020_v52  ;;  %v12163_v49 = vcombine.low %v349_v38, %v357_v39  ;;  %v12148_v57 = vcombine.high %v333_v46, %v341_v47  ;;  %v324_v52 = vld [vmem:[#allocation5 + $0x570] sm:$0xff] }
 0x145   :  { %v12130_v58 = vcombine.high %v316_v51, %v324_v52  ;;  %v2330_v39 = vld [vmem:[#allocation8 + $0x540] sm:$0xff] }
 0x147   :  { %2025 = vmatpush1.bf16.msra.mxu0 %v12017_v54  ;;  %2066 = vmatpush1.bf16.msra.mxu1 %v12019_v55  ;;  %v325_v54 = vld [vmem:[#allocation5 + $0x578] sm:$0xff]  ;;  %v12145_v55 = vcombine.low %v332_v44, %v340_v45 }
 0x148   :  { %2026 = vmatprep.subr.bf16.mxu0 %v12002_v56  ;;  %2067 = vmatprep.subr.bf16.mxu1 %v12004_v61  ;;  %v12147_v56 = vcombine.low %v333_v46, %v341_v47  ;;  %v12132_v59 = vcombine.high %v317_v53, %v325_v54  ;;  %v308_v61 = vld [vmem:[#allocation5 + $0x4f0] sm:$0xff] }
 0x149   :  { %v12114_v2 = vcombine.high %v300_v60, %v308_v61 }
 0x14b   :  { %2027 = vmatpush1.bf16.msra.mxu0 %v12001_v63  ;;  %2068 = vmatpush1.bf16.msra.mxu1 %v12003_v0  ;;  %v309_v63 = vld [vmem:[#allocation5 + $0x4f8] sm:$0xff]  ;;  %v12129_v0 = vcombine.low %v316_v51, %v324_v52  ;;  %v2198_v51 = vld [vmem:[#allocation8 + $0x120] sm:$0xff] }
 0x14c   :  { %2028 = vmatprep.subr.bf16.mxu0 %v11986_v1  ;;  %2069 = vmatprep.subr.bf16.mxu1 %v11988_v5  ;;  %v12131_v1 = vcombine.low %v317_v53, %v325_v54  ;;  %v12116_v3 = vcombine.high %v301_v62, %v309_v63  ;;  %v292_v5 = vld [vmem:[#allocation5 + $0x470] sm:$0xff]  ;;  %v12115_v10 = vcombine.low %v301_v62, %v309_v63 }
 0x14d   :  { %v12098_v11 = vcombine.high %v284_v4, %v292_v5  ;;  %v2322_v54 = vld [vmem:[#allocation8 + $0x500] sm:$0xff] }
 0x14e   :  { %v2186_v63 = vld [vmem:[#allocation8 + $0xc0] sm:$0xff] }
 0x14f   :  { %2029 = vmatpush1.bf16.msra.mxu0 %v11985_v7  ;;  %2070 = vmatpush1.bf16.msra.mxu1 %v11987_v8  ;;  %v293_v7 = vld [vmem:[#allocation5 + $0x478] sm:$0xff]  ;;  %v12113_v8 = vcombine.low %v300_v60, %v308_v61 }
 0x150   :  { %2030 = vmatprep.subr.bf16.mxu0 %v11970_v9  ;;  %2071 = vmatprep.subr.bf16.mxu1 %v11972_v14  ;;  %v410_v9 = vlaneseq  ;;  %v12100_v13 = vcombine.high %v285_v6, %v293_v7  ;;  %v2218_v14 = vld [vmem:[#allocation8 + $0x1c0] sm:$0xff]  ;;  %v12099_v20 = vcombine.low %v285_v6, %v293_v7 }
 0x151   :  { %v12270_v21 = vcombine.high %v2218_v14, %v2222_v15  ;;  %v12269_v29 = vcombine.low %v2218_v14, %v2222_v15  ;;  %v2306_v14 = vld [vmem:[#allocation8 + $0x480] sm:$0xff] }
 0x152   :  { %v14333_v19 = vshrl.u32 %v410_v9, 7  ;;  %v2310_v15 = vld [vmem:[#allocation8 + $0x4a0] sm:$0xff] }
 0x153   :  { %2031 = vmatpush1.bf16.msra.mxu0 %v11969_v16  ;;  %2072 = vmatpush1.bf16.msra.mxu1 %v11971_v17  ;;  %v2346_v16 = vld [vmem:[#allocation8 + $0x5c0] sm:$0xff] }
 0x154   :  { %2032 = vmatprep.subr.bf16.mxu0 %v12210_v18  ;;  %2073 = vmatprep.subr.bf16.mxu1 %v12212_v22  ;;  %v2350_v17 = vld [vmem:[#allocation8 + $0x5e0] sm:$0xff]  ;;  %v12097_v18 = vcombine.low %v284_v4, %v292_v5  ;;  %v14336_v23 = vsub.s32 1, %v14333_v19 }
 0x155   :  { %v12398_v22 = vcombine.high %v2346_v16, %v2350_v17  ;;  %v12397_v31 = vcombine.low %v2346_v16, %v2350_v17  ;;  %v2314_v4 = vld [vmem:[#allocation8 + $0x4c0] sm:$0xff] }
 0x156   :  { %v2318_v5 = vld [vmem:[#allocation8 + $0x4e0] sm:$0xff] }
 0x157   :  { %2033 = vmatpush2.bf16.msra.mxu0 %v12209_v24  ;;  %2074 = vmatpush2.bf16.msra.mxu1 %v12211_v25  ;;  %v2210_v24 = vld [vmem:[#allocation8 + $0x180] sm:$0xff]  ;;  %v12365_v17 = vcombine.low %v2314_v4, %v2318_v5 }
 0x158   :  { %2034 = vmatprep.subr.bf16.mxu0 %v12194_v26  ;;  %2075 = vmatprep.subr.bf16.mxu1 %v12196_v27  ;;  %v2214_v25 = vld [vmem:[#allocation8 + $0x1a0] sm:$0xff]  ;;  %v14339_v26 = vsub.s32 3, %v14333_v19 }
 0x159   :  { %v2338_v27 = vld [vmem:[#allocation8 + $0x580] sm:$0xff] }
 0x15a   :  { %v425_v38 = vrot.slane %v14341_v30, %v14339_v26  ;;  %v12389_v44 = vcombine.low %v2338_v27, %v2342_v28 }
 0x15b   :  { %2035 = vmatpush2.bf16.msra.mxu0 %v12193_v32  ;;  %2076 = vmatpush2.bf16.msra.mxu1 %v12195_v33  ;;  %v12262_v32 = vcombine.high %v2210_v24, %v2214_v25  ;;  %v417_v33 = vrot.slane %v14341_v30, %v14336_v23 }
 0x15c   :  { %2036 = vmatprep.subr.bf16.mxu0 %v12178_v34  ;;  %2077 = vmatprep.subr.bf16.mxu1 %v12180_v35  ;;  %v12390_v34 = vcombine.high %v2338_v27, %v2342_v28  ;;  %v2202_v35 = vld [vmem:[#allocation8 + $0x140] sm:$0xff]  ;;  %v12357_v28 = vcombine.low %v2306_v14, %v2310_v15 }
 0x15d   :  { %v12254_v45 = vcombine.high %v2202_v35, %v2206_v36 }
 0x15f   :  { %2037 = vmatpush2.bf16.msra.mxu0 %v12177_v40  ;;  %2078 = vmatpush2.bf16.msra.mxu1 %v12179_v41  ;;  %v2334_v40 = vld [vmem:[#allocation8 + $0x560] sm:$0xff] }
 0x160   :  { %2038 = vmatprep.subr.bf16.mxu0 %v12162_v42  ;;  %2079 = vmatprep.subr.bf16.mxu1 %v12164_v43  ;;  %v12261_v42 = vcombine.low %v2210_v24, %v2214_v25  ;;  %v2298_v24 = vld [vmem:[#allocation8 + $0x440] sm:$0xff] }
 0x161   :  { %v2302_v25 = vld [vmem:[#allocation8 + $0x460] sm:$0xff] }
 0x163   :  { %2039 = vmatpush2.bf16.msra.mxu0 %v12161_v48  ;;  %2080 = vmatpush2.bf16.msra.mxu1 %v12163_v49  ;;  %v12382_v48 = vcombine.high %v2330_v39, %v2334_v40 }
 0x164   :  { %2040 = vmatprep.subr.bf16.mxu0 %v12146_v50  ;;  %2081 = vmatprep.subr.bf16.mxu1 %v12148_v57  ;;  %v2194_v57 = vld [vmem:[#allocation8 + $0x100] sm:$0xff] }
 0x165   :  { %v12246_v62 = vcombine.high %v2194_v57, %v2198_v51  ;;  %v12245_v7 = vcombine.low %v2194_v57, %v2198_v51  ;;  %v2278_v57 = vld [vmem:[#allocation8 + $0x3a0] sm:$0xff] }
 0x166   :  { %v2402_v51 = vld [vmem:[#allocation8 + $0x780] sm:$0xff] }
 0x167   :  { %2041 = vmatpush2.bf16.msra.mxu0 %v12145_v55  ;;  %2082 = vmatpush2.bf16.msra.mxu1 %v12147_v56  ;;  %v2326_v55 = vld [vmem:[#allocation8 + $0x520] sm:$0xff] }
 0x168   :  { %2042 = vmatprep.subr.bf16.mxu0 %v12130_v58  ;;  %2083 = vmatprep.subr.bf16.mxu1 %v12132_v59  ;;  %v12381_v59 = vcombine.low %v2330_v39, %v2334_v40 }
 0x16b   :  { %2043 = vmatpush2.bf16.msra.mxu0 %v12129_v0  ;;  %2084 = vmatpush2.bf16.msra.mxu1 %v12131_v1  ;;  %v2190_v0 = vld [vmem:[#allocation8 + $0xe0] sm:$0xff] }
 0x16c   :  { %2044 = vmatprep.subr.bf16.mxu0 %v12114_v2  ;;  %2085 = vmatprep.subr.bf16.mxu1 %v12116_v3  ;;  %v12374_v3 = vcombine.high %v2322_v54, %v2326_v55  ;;  %v12238_v9 = vcombine.high %v2186_v63, %v2190_v0  ;;  %v12237_v16 = vcombine.low %v2186_v63, %v2190_v0 }
 0x16f   :  { %2045 = vmatpush2.bf16.msra.mxu0 %v12113_v8  ;;  %2086 = vmatpush2.bf16.msra.mxu1 %v12115_v10  ;;  %v12373_v8 = vcombine.low %v2322_v54, %v2326_v55  ;;  %v12366_v10 = vcombine.high %v2314_v4, %v2318_v5  ;;  %v2386_v4 = vld [vmem:[#allocation8 + $0x700] sm:$0xff] }
 0x170   :  { %2046 = vmatprep.subr.bf16.mxu0 %v12098_v11  ;;  %2087 = vmatprep.subr.bf16.mxu1 %v12100_v13  ;;  %v2178_v11 = vld [vmem:[#allocation8 + $0x80] sm:$0xff] }
 0x171   :  { %v2182_v13 = vld [vmem:[#allocation8 + $0xa0] sm:$0xff] }
 0x172   :  { %v12229_v27 = vcombine.low %v2178_v11, %v2182_v13  ;;  %v2390_v5 = vld [vmem:[#allocation8 + $0x720] sm:$0xff] }
 0x173   :  { %2047 = vmatpush2.bf16.msra.mxu0 %v12097_v18  ;;  %2088 = vmatpush2.bf16.msra.mxu1 %v12099_v20  ;;  %v12230_v18 = vcombine.high %v2178_v11, %v2182_v13  ;;  %v12358_v20 = vcombine.high %v2306_v14, %v2310_v15  ;;  %v2250_v11 = vld [vmem:[#allocation8 + $0x2c0] sm:$0xff] }
 0x174   :  { %8348 = vmatprep.subr.bf16.mxu0 %v12270_v21  ;;  %8389 = vmatprep.subr.bf16.mxu1 %v12398_v22  ;;  %v2170_v21 = vld [vmem:[#allocation8 + $0x40] sm:$0xff] }
 0x175   :  { %v2174_v22 = vld [vmem:[#allocation8 + $0x60] sm:$0xff] }
 0x176   :  { %v14345_v37 = vpop.f32.mrf.mxu0  ;;  %2049 = vmatmul.mubr.bf16.vlgmr.msra.gmra.mxu0 %v14319_v12  ;;  %v14350_v41 = vpop.f32.mrf.mxu1  ;;  %2090 = vmatmul.mubr.bf16.vlgmr.msra.gmra.mxu1 %v14319_v12  ;;  %v12253_v12 = vcombine.low %v2202_v35, %v2206_v36  ;;  %v2294_v35 = vld [vmem:[#allocation8 + $0x420] sm:$0xff]  ;;  %v12221_v36 = vcombine.low %v2170_v21, %v2174_v22 }
 0x177   :  { %8349 = vmatpush1.bf16.msra.mxu0 %v12269_v29  ;;  %8390 = vmatpush1.bf16.msra.mxu1 %v12397_v31  ;;  %v12222_v29 = vcombine.high %v2170_v21, %v2174_v22  ;;  %v12350_v31 = vcombine.high %v2298_v24, %v2302_v25  ;;  %v2254_v13 = vld [vmem:[#allocation8 + $0x2e0] sm:$0xff] }
 0x178   :  { %v1806_v43 = vpop.f32.mrf.mxu0  ;;  %8350 = vmatprep.subr.bf16.mxu0 %v12262_v32  ;;  %v1847_v47 = vpop.f32.mrf.mxu1  ;;  %8391 = vmatprep.subr.bf16.mxu1 %v12390_v34  ;;  %v2162_v32 = vld [vmem:[#allocation8] sm:$0xff] }
 0x179   :  { %v1807_v46 = vadd.f32 %v1806_v43, %v417_v33  ;;  %v1848_v49 = vadd.f32 %v1847_v47, %v425_v38  ;;  %v2166_v33 = vld [vmem:[#allocation8 + $0x20] sm:$0xff]  ;;  %v12349_v38 = vcombine.low %v2298_v24, %v2302_v25  ;;  %v14363_v25 = vsub.s32 2, %v14333_v19 }
 0x17a   :  { %v1808_v50 = vpop.f32.mrf.mxu0  ;;  %v1849_v53 = vpop.f32.mrf.mxu1  ;;  %v2290_v34 = vld [vmem:[#allocation8 + $0x400] sm:$0xff]  ;;  %v12214_v39 = vcombine.high %v2162_v32, %v2166_v33 }
 0x17b   :  { %vm2099_vm0 = vcmp.gt.f32.partialorder %v1807_v46, 0.0  ;;  %v2115_v52 = vmul.f32 0.2, %v1807_v46  ;;  %8351 = vmatpush1.bf16.msra.mxu0 %v12261_v42  ;;  %vm2101_vm1 = vcmp.gt.f32.partialorder %v1848_v49, 0.0  ;;  %v2117_v56 = vmul.f32 0.2, %v1848_v49  ;;  %8392 = vmatpush1.bf16.msra.mxu1 %v12389_v44 }
 0x17c   :  { %v1809_v58 = vpop.f32.mrf.mxu0  ;;  %8352 = vmatprep.subr.bf16.mxu0 %v12254_v45  ;;  %v1850_v61 = vpop.f32.mrf.mxu1  ;;  %8393 = vmatprep.subr.bf16.mxu1 %v12382_v48  ;;  %v12342_v40 = vcombine.high %v2290_v34, %v2294_v35  ;;  %v2282_v42 = vld [vmem:[#allocation8 + $0x3c0] sm:$0xff]  ;;  %v12341_v47 = vcombine.low %v2290_v34, %v2294_v35 }
 0x17d   :  { %v2131_v60 = vsel %vm2099_vm0, %v1807_v46, %v2115_v52  ;;  %v2133_v2 = vsel %vm2101_vm1, %v1848_v49, %v2117_v56  ;;  %v2286_v43 = vld [vmem:[#allocation8 + $0x3e0] sm:$0xff]  ;;  %v12213_v46 = vcombine.low %v2162_v32, %v2166_v33 }
 0x17e   :  { %v14353_v1 = vpack.c.bf16 %v2131_v60, %v2131_v60  ;;  %v14355_v6 = vpack.c.bf16 %v2133_v2, %v2133_v2  ;;  %v2410_v44 = vld [vmem:[#allocation8 + $0x7c0] sm:$0xff]  ;;  %v12334_v48 = vcombine.high %v2282_v42, %v2286_v43  ;;  %v12333_v53 = vcombine.low %v2282_v42, %v2286_v43 }
 0x17f   :  { %8353 = vmatpush1.bf16.msra.mxu0 %v12253_v12  ;;  %8394 = vmatpush1.bf16.msra.mxu1 %v12381_v59  ;;  %v2414_v45 = vld [vmem:[#allocation8 + $0x7e0] sm:$0xff] }
 0x180   :  { %8380 = vmatprep.mubr.bf16.mxu0 %v14353_v1  ;;  %8421 = vmatprep.mubr.bf16.mxu1 %v14355_v6  ;;  %v12462_v49 = vcombine.high %v2410_v44, %v2414_v45  ;;  %v2274_v50 = vld [vmem:[#allocation8 + $0x380] sm:$0xff]  ;;  %v12461_v12 = vcombine.low %v2410_v44, %v2414_v45 }
 0x181   :  { %8354 = vmatprep.subr.bf16.mxu0 %v12246_v62  ;;  %8395 = vmatprep.subr.bf16.mxu1 %v12374_v3  ;;  %v2406_v52 = vld [vmem:[#allocation8 + $0x7a0] sm:$0xff]  ;;  %v12326_v54 = vcombine.high %v2274_v50, %v2278_v57  ;;  %v12325_v61 = vcombine.low %v2274_v50, %v2278_v57 }
 0x182   :  { %v12454_v55 = vcombine.high %v2402_v51, %v2406_v52  ;;  %v2266_v56 = vld [vmem:[#allocation8 + $0x340] sm:$0xff]  ;;  %v12453_v62 = vcombine.low %v2402_v51, %v2406_v52 }
 0x183   :  { %8355 = vmatpush1.bf16.msra.mxu0 %v12245_v7  ;;  %8396 = vmatpush1.bf16.msra.mxu1 %v12373_v8  ;;  %v2270_v58 = vld [vmem:[#allocation8 + $0x360] sm:$0xff] }
 0x184   :  { %8356 = vmatprep.subr.bf16.mxu0 %v12238_v9  ;;  %8397 = vmatprep.subr.bf16.mxu1 %v12366_v10  ;;  %v2394_v59 = vld [vmem:[#allocation8 + $0x740] sm:$0xff]  ;;  %v12318_v63 = vcombine.high %v2266_v56, %v2270_v58  ;;  %v12317_v7 = vcombine.low %v2266_v56, %v2270_v58  ;;  %v12438_v10 = vcombine.high %v2386_v4, %v2390_v5 }
 0x185   :  { %v2398_v60 = vld [vmem:[#allocation8 + $0x760] sm:$0xff] }
 0x186   :  { %v12446_v0 = vcombine.high %v2394_v59, %v2398_v60  ;;  %v2258_v2 = vld [vmem:[#allocation8 + $0x300] sm:$0xff]  ;;  %v12445_v8 = vcombine.low %v2394_v59, %v2398_v60 }
 0x187   :  { %8357 = vmatpush1.bf16.msra.mxu0 %v12237_v16  ;;  %8398 = vmatpush1.bf16.msra.mxu1 %v12365_v17  ;;  %v2262_v3 = vld [vmem:[#allocation8 + $0x320] sm:$0xff]  ;;  %v12437_v17 = vcombine.low %v2386_v4, %v2390_v5  ;;  %v14375_v5 = vsub.s32 7, %v14333_v19 }
 0x188   :  { %8358 = vmatprep.subr.bf16.mxu0 %v12230_v18  ;;  %8399 = vmatprep.subr.bf16.mxu1 %v12358_v20  ;;  %v12310_v9 = vcombine.high %v2258_v2, %v2262_v3  ;;  %v2378_v14 = vld [vmem:[#allocation8 + $0x6c0] sm:$0xff]  ;;  %v12309_v16 = vcombine.low %v2258_v2, %v2262_v3  ;;  %v12302_v18 = vcombine.high %v2250_v11, %v2254_v13  ;;  %v14360_v20 = vsub.s32 0, %v14333_v19 }
 0x189   :  { %v2382_v15 = vld [vmem:[#allocation8 + $0x6e0] sm:$0xff] }
 0x18a   :  { %v12430_v21 = vcombine.high %v2378_v14, %v2382_v15  ;;  %v2242_v22 = vld [vmem:[#allocation8 + $0x280] sm:$0xff]  ;;  %v413_v33 = vrot.slane %v14341_v30, %v14360_v20 }
 0x18b   :  { %8359 = vmatpush1.bf16.msra.mxu0 %v12229_v27  ;;  %8400 = vmatpush1.bf16.msra.mxu1 %v12357_v28  ;;  %v2246_v24 = vld [vmem:[#allocation8 + $0x2a0] sm:$0xff] }
 0x18c   :  { %8360 = vmatprep.subr.bf16.mxu0 %v12222_v29  ;;  %8401 = vmatprep.subr.bf16.mxu1 %v12350_v31  ;;  %v2370_v27 = vld [vmem:[#allocation8 + $0x680] sm:$0xff]  ;;  %v12301_v29 = vcombine.low %v2250_v11, %v2254_v13  ;;  %v12429_v31 = vcombine.low %v2378_v14, %v2382_v15  ;;  %v12294_v32 = vcombine.high %v2242_v22, %v2246_v24 }
 0x18d   :  { %v2374_v28 = vld [vmem:[#allocation8 + $0x6a0] sm:$0xff]  ;;  %v12293_v42 = vcombine.low %v2242_v22, %v2246_v24  ;;  %v1805_v45 = vadd.f32 %v14345_v37, %v413_v33  ;;  %v441_v22 = vrot.slane %v14341_v30, %v14375_v5 }
 0x18e   :  { %v12422_v34 = vcombine.high %v2370_v27, %v2374_v28  ;;  %v2234_v35 = vld [vmem:[#allocation8 + $0x240] sm:$0xff]  ;;  %v12421_v43 = vcombine.low %v2370_v27, %v2374_v28 }
 0x18f   :  { %8361 = vmatpush1.bf16.msra.mxu0 %v12221_v36  ;;  %8402 = vmatpush1.bf16.msra.mxu1 %v12349_v38  ;;  %v2238_v36 = vld [vmem:[#allocation8 + $0x260] sm:$0xff]  ;;  %v421_v38 = vrot.slane %v14341_v30, %v14363_v25  ;;  %vm2098_vm2 = vcmp.gt.f32.partialorder %v1805_v45, 0.0 }
 0x190   :  { %8362 = vmatprep.subr.bf16.mxu0 %v12214_v39  ;;  %8403 = vmatprep.subr.bf16.mxu1 %v12342_v40  ;;  %v2362_v39 = vld [vmem:[#allocation8 + $0x640] sm:$0xff]  ;;  %v12286_v44 = vcombine.high %v2234_v35, %v2238_v36  ;;  %v12285_v51 = vcombine.low %v2234_v35, %v2238_v36 }
 0x191   :  { %v2366_v40 = vld [vmem:[#allocation8 + $0x660] sm:$0xff] }
 0x192   :  { %v2354_v50 = vld [vmem:[#allocation8 + $0x600] sm:$0xff]  ;;  %v12413_v52 = vcombine.low %v2362_v39, %v2366_v40 }
 0x193   :  { %8363 = vmatpush1.bf16.msra.mxu0 %v12213_v46  ;;  %8404 = vmatpush1.bf16.msra.mxu1 %v12341_v47  ;;  %v12414_v46 = vcombine.high %v2362_v39, %v2366_v40  ;;  %v2226_v47 = vld [vmem:[#allocation8 + $0x200] sm:$0xff] }
 0x194   :  { %8364 = vmatprep.subr.bf16.mxu0 %v12334_v48  ;;  %8405 = vmatprep.subr.bf16.mxu1 %v12462_v49  ;;  %v2230_v48 = vld [vmem:[#allocation8 + $0x220] sm:$0xff]  ;;  %v1846_v49 = vadd.f32 %v14350_v41, %v421_v38 }
 0x195   :  { %v2358_v57 = vld [vmem:[#allocation8 + $0x620] sm:$0xff]  ;;  %v12277_v41 = vcombine.low %v2226_v47, %v2230_v48 }
 0x196   :  { %v2478_v56 = vld [vmem:[#allocation8 + $0x9e0] sm:$0xff]  ;;  %v2116_v37 = vmul.f32 0.2, %v1846_v49  ;;  %vm2100_vm3 = vcmp.gt.f32.partialorder %v1846_v49, 0.0  ;;  %v12405_v60 = vcombine.low %v2354_v50, %v2358_v57 }
 0x197   :  { %8365 = vmatpush2.bf16.msra.mxu0 %v12333_v53  ;;  %8406 = vmatpush2.bf16.msra.mxu1 %v12461_v12  ;;  %v12278_v53 = vcombine.high %v2226_v47, %v2230_v48  ;;  %v2114_v12 = vmul.f32 0.2, %v1805_v45  ;;  %v2602_v58 = vld [vmem:[#allocation8 + $0xdc0] sm:$0xff] }
 0x198   :  { %8366 = vmatprep.subr.bf16.mxu0 %v12326_v54  ;;  %8407 = vmatprep.subr.bf16.mxu1 %v12454_v55  ;;  %v12406_v54 = vcombine.high %v2354_v50, %v2358_v57  ;;  %v2474_v55 = vld [vmem:[#allocation8 + $0x9c0] sm:$0xff]  ;;  %v2132_v4 = vsel %vm2100_vm3, %v1846_v49, %v2116_v37 }
 0x199   :  { %v2606_v59 = vld [vmem:[#allocation8 + $0xde0] sm:$0xff]  ;;  %v14379_v14 = vpack.c.bf16 %v2132_v4, %v2132_v4 }
 0x19a   :  { %v2466_v2 = vld [vmem:[#allocation8 + $0x980] sm:$0xff]  ;;  %v12653_v11 = vcombine.low %v2602_v58, %v2606_v59 }
 0x19b   :  { %8367 = vmatpush2.bf16.msra.mxu0 %v12325_v61  ;;  %8408 = vmatpush2.bf16.msra.mxu1 %v12453_v62  ;;  %v12526_v61 = vcombine.high %v2474_v55, %v2478_v56  ;;  %v2130_v62 = vsel %vm2098_vm2, %v1805_v45, %v2114_v12  ;;  %v2470_v3 = vld [vmem:[#allocation8 + $0x9a0] sm:$0xff] }
 0x19c   :  { %8368 = vmatprep.subr.bf16.mxu0 %v12318_v63  ;;  %8409 = vmatprep.subr.bf16.mxu1 %v12446_v0  ;;  %v12654_v63 = vcombine.high %v2602_v58, %v2606_v59  ;;  %v14372_v0 = vsub.s32 5, %v14333_v19  ;;  %v12518_v13 = vcombine.high %v2466_v2, %v2470_v3  ;;  %v2586_v24 = vld [vmem:[#allocation8 + $0xd40] sm:$0xff] }
 0x19d   :  { %v2590_v27 = vld [vmem:[#allocation8 + $0xd60] sm:$0xff] }
 0x19e   :  { %v433_v15 = vrot.slane %v14341_v30, %v14372_v0  ;;  %v12638_v36 = vcombine.high %v2586_v24, %v2590_v27  ;;  %v2450_v40 = vld [vmem:[#allocation8 + $0x900] sm:$0xff]  ;;  %v12637_v50 = vcombine.low %v2586_v24, %v2590_v27 }
 0x19f   :  { %8369 = vmatpush2.bf16.msra.mxu0 %v12317_v7  ;;  %8410 = vmatpush2.bf16.msra.mxu1 %v12445_v8  ;;  %v2594_v7 = vld [vmem:[#allocation8 + $0xd80] sm:$0xff] }
 0x1a0   :  { %8370 = vmatprep.subr.bf16.mxu0 %v12310_v9  ;;  %8411 = vmatprep.subr.bf16.mxu1 %v12438_v10  ;;  %v2598_v8 = vld [vmem:[#allocation8 + $0xda0] sm:$0xff]  ;;  %v12525_v9 = vcombine.low %v2474_v55, %v2478_v56  ;;  %v14377_v10 = vpack.c.bf16 %v2130_v62, %v2130_v62 }
 0x1a1   :  { %v2582_v47 = vld [vmem:[#allocation8 + $0xd20] sm:$0xff] }
 0x1a2   :  { %v2446_v12 = vld [vmem:[#allocation8 + $0x8e0] sm:$0xff] }
 0x1a3   :  { %8371 = vmatpush2.bf16.msra.mxu0 %v12309_v16  ;;  %8412 = vmatpush2.bf16.msra.mxu1 %v12437_v17  ;;  %v12646_v16 = vcombine.high %v2594_v7, %v2598_v8  ;;  %v2458_v17 = vld [vmem:[#allocation8 + $0x940] sm:$0xff] }
 0x1a4   :  { %8372 = vmatprep.subr.bf16.mxu0 %v12302_v18  ;;  %8413 = vmatprep.subr.bf16.mxu1 %v12430_v21  ;;  %v2462_v18 = vld [vmem:[#allocation8 + $0x960] sm:$0xff] }
 0x1a5   :  { %v12510_v33 = vcombine.high %v2458_v17, %v2462_v18  ;;  %v12509_v45 = vcombine.low %v2458_v17, %v2462_v18  ;;  %v2570_v37 = vld [vmem:[#allocation8 + $0xcc0] sm:$0xff] }
 0x1a6   :  { %v2574_v58 = vld [vmem:[#allocation8 + $0xce0] sm:$0xff] }
 0x1a7   :  { %8373 = vmatpush2.bf16.msra.mxu0 %v12301_v29  ;;  %8414 = vmatpush2.bf16.msra.mxu1 %v12429_v31  ;;  %v12517_v29 = vcombine.low %v2466_v2, %v2470_v3  ;;  %v12622_v62 = vcombine.high %v2570_v37, %v2574_v58  ;;  %v2438_v2 = vld [vmem:[#allocation8 + $0x8a0] sm:$0xff] }
 0x1a8   :  { %8374 = vmatprep.subr.bf16.mxu0 %v12294_v32  ;;  %8415 = vmatprep.subr.bf16.mxu1 %v12422_v34  ;;  %v12645_v32 = vcombine.low %v2594_v7, %v2598_v8  ;;  %v2562_v3 = vld [vmem:[#allocation8 + $0xc80] sm:$0xff]  ;;  %v12621_v8 = vcombine.low %v2570_v37, %v2574_v58 }
 0x1a9   :  { %v2566_v4 = vld [vmem:[#allocation8 + $0xca0] sm:$0xff] }
 0x1aa   :  { %v2558_v17 = vld [vmem:[#allocation8 + $0xc60] sm:$0xff] }
 0x1ab   :  { %8375 = vmatpush2.bf16.msra.mxu0 %v12293_v42  ;;  %8416 = vmatpush2.bf16.msra.mxu1 %v12421_v43  ;;  %v2454_v42 = vld [vmem:[#allocation8 + $0x920] sm:$0xff] }
 0x1ac   :  { %8376 = vmatprep.subr.bf16.mxu0 %v12286_v44  ;;  %8417 = vmatprep.subr.bf16.mxu1 %v12414_v46  ;;  %v2578_v46 = vld [vmem:[#allocation8 + $0xd00] sm:$0xff] }
 0x1ad   :  { %v12630_v56 = vcombine.high %v2578_v46, %v2582_v47  ;;  %v2650_v37 = vld [vmem:[#allocation8 + $0xf40] sm:$0xff] }
 0x1ae   :  { %v2654_v58 = vld [vmem:[#allocation8 + $0xf60] sm:$0xff] }
 0x1af   :  { %8377 = vmatpush2.bf16.msra.mxu0 %v12285_v51  ;;  %8418 = vmatpush2.bf16.msra.mxu1 %v12413_v52  ;;  %v12502_v52 = vcombine.high %v2450_v40, %v2454_v42 }
 0x1b0   :  { %8378 = vmatprep.subr.bf16.mxu0 %v12278_v53  ;;  %8419 = vmatprep.subr.bf16.mxu1 %v12406_v54  ;;  %v2442_v53 = vld [vmem:[#allocation8 + $0x8c0] sm:$0xff] }
 0x1b1   :  { %v12493_v7 = vcombine.low %v2442_v53, %v2446_v12 }
 0x1b3   :  { %8379 = vmatpush2.bf16.msra.mxu0 %v12277_v41  ;;  %8420 = vmatpush2.bf16.msra.mxu1 %v12405_v60  ;;  %v12501_v41 = vcombine.low %v2450_v40, %v2454_v42  ;;  %v12629_v60 = vcombine.low %v2578_v46, %v2582_v47  ;;  %v2542_v40 = vld [vmem:[#allocation8 + $0xbe0] sm:$0xff] }
 0x1b4   :  { %8430 = vmatprep.subr.bf16.mxu0 %v12526_v61  ;;  %8471 = vmatprep.subr.bf16.mxu1 %v12654_v63  ;;  %v12494_v61 = vcombine.high %v2442_v53, %v2446_v12  ;;  %v2434_v63 = vld [vmem:[#allocation8 + $0x880] sm:$0xff] }
 0x1b5   :  { %v12485_v18 = vcombine.low %v2434_v63, %v2438_v2  ;;  %v2666_v42 = vld [vmem:[#allocation8 + $0xfc0] sm:$0xff] }
 0x1b6   :  { %v14383_v21 = vpop.f32.mrf.mxu0  ;;  %8381 = vmatmul.mubr.bf16.vlgmr.msra.gmra.mxu0 %v14377_v10  ;;  %v14388_v28 = vpop.f32.mrf.mxu1  ;;  %8422 = vmatmul.mubr.bf16.vlgmr.msra.gmra.mxu1 %v14379_v14 }
 0x1b7   :  { %8431 = vmatpush1.bf16.msra.mxu0 %v12525_v9  ;;  %8472 = vmatpush1.bf16.msra.mxu1 %v12653_v11  ;;  %v12486_v9 = vcombine.high %v2434_v63, %v2438_v2  ;;  %v12614_v11 = vcombine.high %v2562_v3, %v2566_v4  ;;  %v2514_v63 = vld [vmem:[#allocation8 + $0xb00] sm:$0xff] }
 0x1b8   :  { %v1888_v31 = vpop.f32.mrf.mxu0  ;;  %8432 = vmatprep.subr.bf16.mxu0 %v12518_v13  ;;  %v1929_v35 = vpop.f32.mrf.mxu1  ;;  %8473 = vmatprep.subr.bf16.mxu1 %v12646_v16  ;;  %v2426_v13 = vld [vmem:[#allocation8 + $0x840] sm:$0xff] }
 0x1b9   :  { %v1889_v34 = vadd.f32 %v1888_v31, %v433_v15  ;;  %v1930_v38 = vadd.f32 %v1929_v35, %v441_v22  ;;  %v2430_v15 = vld [vmem:[#allocation8 + $0x860] sm:$0xff]  ;;  %v12613_v22 = vcombine.low %v2562_v3, %v2566_v4 }
 0x1ba   :  { %v1890_v39 = vpop.f32.mrf.mxu0  ;;  %v1931_v44 = vpop.f32.mrf.mxu1  ;;  %v2554_v16 = vld [vmem:[#allocation8 + $0xc40] sm:$0xff]  ;;  %v12478_v24 = vcombine.high %v2426_v13, %v2430_v15 }
 0x1bb   :  { %vm2103_vm4 = vcmp.gt.f32.partialorder %v1889_v34, 0.0  ;;  %v2119_v43 = vmul.f32 0.2, %v1889_v34  ;;  %8433 = vmatpush1.bf16.msra.mxu0 %v12517_v29  ;;  %vm2105_vm5 = vcmp.gt.f32.partialorder %v1930_v38, 0.0  ;;  %v2121_v48 = vmul.f32 0.2, %v1930_v38  ;;  %8474 = vmatpush1.bf16.msra.mxu1 %v12645_v32 }
 0x1bc   :  { %v1891_v49 = vpop.f32.mrf.mxu0  ;;  %8434 = vmatprep.subr.bf16.mxu0 %v12510_v33  ;;  %v1932_v51 = vpop.f32.mrf.mxu1  ;;  %8475 = vmatprep.subr.bf16.mxu1 %v12638_v36  ;;  %v12606_v27 = vcombine.high %v2554_v16, %v2558_v17  ;;  %v2418_v29 = vld [vmem:[#allocation8 + $0x800] sm:$0xff]  ;;  %v12605_v35 = vcombine.low %v2554_v16, %v2558_v17 }
 0x1bd   :  { %v2135_v57 = vsel %vm2103_vm4, %v1889_v34, %v2119_v43  ;;  %v2137_v55 = vsel %vm2105_vm5, %v1930_v38, %v2121_v48  ;;  %v2422_v31 = vld [vmem:[#allocation8 + $0x820] sm:$0xff]  ;;  %v12477_v34 = vcombine.low %v2426_v13, %v2430_v15 }
 0x1be   :  { %v14391_v54 = vpack.c.bf16 %v2135_v57, %v2135_v57  ;;  %v14393_v59 = vpack.c.bf16 %v2137_v55, %v2137_v55  ;;  %v2546_v32 = vld [vmem:[#allocation8 + $0xc00] sm:$0xff]  ;;  %v12470_v36 = vcombine.high %v2418_v29, %v2422_v31  ;;  %v12469_v44 = vcombine.low %v2418_v29, %v2422_v31 }
 0x1bf   :  { %8435 = vmatpush1.bf16.msra.mxu0 %v12509_v45  ;;  %8476 = vmatpush1.bf16.msra.mxu1 %v12637_v50  ;;  %v2550_v33 = vld [vmem:[#allocation8 + $0xc20] sm:$0xff] }
 0x1c0   :  { %8462 = vmatprep.mubr.bf16.mxu0 %v14391_v54  ;;  %8503 = vmatprep.mubr.bf16.mxu1 %v14393_v59  ;;  %v12598_v38 = vcombine.high %v2546_v32, %v2550_v33  ;;  %v2538_v39 = vld [vmem:[#allocation8 + $0xbc0] sm:$0xff]  ;;  %v12597_v45 = vcombine.low %v2546_v32, %v2550_v33  ;;  %v14401_v33 = vsub.s32 6, %v14333_v19 }
 0x1c1   :  { %8436 = vmatprep.subr.bf16.mxu0 %v12502_v52  ;;  %8477 = vmatprep.subr.bf16.mxu1 %v12630_v56  ;;  %v2670_v43 = vld [vmem:[#allocation8 + $0xfe0] sm:$0xff]  ;;  %v12590_v46 = vcombine.high %v2538_v39, %v2542_v40  ;;  %v12589_v51 = vcombine.low %v2538_v39, %v2542_v40 }
 0x1c2   :  { %v12718_v47 = vcombine.high %v2666_v42, %v2670_v43  ;;  %v2530_v48 = vld [vmem:[#allocation8 + $0xb80] sm:$0xff]  ;;  %v12717_v52 = vcombine.low %v2666_v42, %v2670_v43 }
 0x1c3   :  { %8437 = vmatpush1.bf16.msra.mxu0 %v12501_v41  ;;  %8478 = vmatpush1.bf16.msra.mxu1 %v12629_v60  ;;  %v2534_v49 = vld [vmem:[#allocation8 + $0xba0] sm:$0xff] }
 0x1c4   :  { %8438 = vmatprep.subr.bf16.mxu0 %v12494_v61  ;;  %8479 = vmatprep.subr.bf16.mxu1 %v12622_v62  ;;  %v2658_v50 = vld [vmem:[#allocation8 + $0xf80] sm:$0xff]  ;;  %v12582_v53 = vcombine.high %v2530_v48, %v2534_v49  ;;  %v12581_v41 = vcombine.low %v2530_v48, %v2534_v49  ;;  %v12702_v62 = vcombine.high %v2650_v37, %v2654_v58 }
 0x1c5   :  { %v2662_v57 = vld [vmem:[#allocation8 + $0xfa0] sm:$0xff] }
 0x1c6   :  { %v12710_v12 = vcombine.high %v2658_v50, %v2662_v57  ;;  %v2522_v55 = vld [vmem:[#allocation8 + $0xb40] sm:$0xff]  ;;  %v12709_v60 = vcombine.low %v2658_v50, %v2662_v57 }
 0x1c7   :  { %8439 = vmatpush1.bf16.msra.mxu0 %v12493_v7  ;;  %8480 = vmatpush1.bf16.msra.mxu1 %v12621_v8  ;;  %v2526_v56 = vld [vmem:[#allocation8 + $0xb60] sm:$0xff]  ;;  %v12701_v8 = vcombine.low %v2650_v37, %v2654_v58 }
 0x1c8   :  { %8440 = vmatprep.subr.bf16.mxu0 %v12486_v9  ;;  %8481 = vmatprep.subr.bf16.mxu1 %v12614_v11  ;;  %v12574_v61 = vcombine.high %v2522_v55, %v2526_v56  ;;  %v2518_v2 = vld [vmem:[#allocation8 + $0xb20] sm:$0xff]  ;;  %v12573_v7 = vcombine.low %v2522_v55, %v2526_v56 }
 0x1c9   :  { %v2642_v3 = vld [vmem:[#allocation8 + $0xf00] sm:$0xff]  ;;  %v12566_v9 = vcombine.high %v2514_v63, %v2518_v2 }
 0x1ca   :  { %v2646_v4 = vld [vmem:[#allocation8 + $0xf20] sm:$0xff] }
 0x1cb   :  { %8441 = vmatpush1.bf16.msra.mxu0 %v12485_v18  ;;  %8482 = vmatpush1.bf16.msra.mxu1 %v12613_v22  ;;  %v12694_v11 = vcombine.high %v2642_v3, %v2646_v4  ;;  %v2506_v13 = vld [vmem:[#allocation8 + $0xac0] sm:$0xff]  ;;  %v12565_v18 = vcombine.low %v2514_v63, %v2518_v2  ;;  %v12693_v22 = vcombine.low %v2642_v3, %v2646_v4 }
 0x1cc   :  { %8442 = vmatprep.subr.bf16.mxu0 %v12478_v24  ;;  %8483 = vmatprep.subr.bf16.mxu1 %v12606_v27  ;;  %v2510_v15 = vld [vmem:[#allocation8 + $0xae0] sm:$0xff]  ;;  %v14398_v27 = vsub.s32 4, %v14333_v19 }
 0x1cd   :  { %v2634_v16 = vld [vmem:[#allocation8 + $0xec0] sm:$0xff]  ;;  %v12558_v24 = vcombine.high %v2506_v13, %v2510_v15 }
 0x1ce   :  { %v2638_v17 = vld [vmem:[#allocation8 + $0xee0] sm:$0xff]  ;;  %v429_v40 = vrot.slane %v14341_v30, %v14398_v27 }
 0x1cf   :  { %8443 = vmatpush1.bf16.msra.mxu0 %v12477_v34  ;;  %8484 = vmatpush1.bf16.msra.mxu1 %v12605_v35  ;;  %v12686_v29 = vcombine.high %v2634_v16, %v2638_v17  ;;  %v2498_v31 = vld [vmem:[#allocation8 + $0xa80] sm:$0xff] }
 0x1d0   :  { %8444 = vmatprep.subr.bf16.mxu0 %v12470_v36  ;;  %8485 = vmatprep.subr.bf16.mxu1 %v12598_v38  ;;  %v2502_v32 = vld [vmem:[#allocation8 + $0xaa0] sm:$0xff]  ;;  %v12557_v36 = vcombine.low %v2506_v13, %v2510_v15  ;;  %v12685_v38 = vcombine.low %v2634_v16, %v2638_v17  ;;  %v1887_v50 = vadd.f32 %v14383_v21, %v429_v40 }
 0x1d1   :  { %v2626_v34 = vld [vmem:[#allocation8 + $0xe80] sm:$0xff]  ;;  %v12550_v39 = vcombine.high %v2498_v31, %v2502_v32 }
 0x1d2   :  { %v2630_v35 = vld [vmem:[#allocation8 + $0xea0] sm:$0xff]  ;;  %v2118_v58 = vmul.f32 0.2, %v1887_v50  ;;  %vm2102_vm6 = vcmp.gt.f32.partialorder %v1887_v50, 0.0 }
 0x1d3   :  { %8445 = vmatpush1.bf16.msra.mxu0 %v12469_v44  ;;  %8486 = vmatpush1.bf16.msra.mxu1 %v12597_v45  ;;  %v12678_v42 = vcombine.high %v2626_v34, %v2630_v35  ;;  %v2490_v43 = vld [vmem:[#allocation8 + $0xa40] sm:$0xff]  ;;  %v437_v45 = vrot.slane %v14341_v30, %v14401_v33  ;;  %v12677_v48 = vcombine.low %v2626_v34, %v2630_v35 }
 0x1d4   :  { %8446 = vmatprep.subr.bf16.mxu0 %v12590_v46  ;;  %8487 = vmatprep.subr.bf16.mxu1 %v12718_v47  ;;  %v2494_v44 = vld [vmem:[#allocation8 + $0xa60] sm:$0xff]  ;;  %v12549_v47 = vcombine.low %v2498_v31, %v2502_v32  ;;  %v2134_v4 = vsel %vm2102_vm6, %v1887_v50, %v2118_v58 }
 0x1d5   :  { %v2618_v19 = vld [vmem:[#allocation8 + $0xe40] sm:$0xff]  ;;  %v12542_v49 = vcombine.high %v2490_v43, %v2494_v44  ;;  %v12541_v30 = vcombine.low %v2490_v43, %v2494_v44  ;;  %v14409_v17 = vpack.c.bf16 %v2134_v4, %v2134_v4 }
 0x1d6   :  { %v2622_v46 = vld [vmem:[#allocation8 + $0xe60] sm:$0xff] }
 0x1d7   :  { %8447 = vmatpush2.bf16.msra.mxu0 %v12589_v51  ;;  %8488 = vmatpush2.bf16.msra.mxu1 %v12717_v52  ;;  %v12670_v57 = vcombine.high %v2618_v19, %v2622_v46  ;;  %v2482_v51 = vld [vmem:[#allocation8 + $0xa00] sm:$0xff]  ;;  %v12669_v56 = vcombine.low %v2618_v19, %v2622_v46 }
 0x1d8   :  { %8448 = vmatprep.subr.bf16.mxu0 %v12582_v53  ;;  %8489 = vmatprep.subr.bf16.mxu1 %v12710_v12  ;;  %v2486_v52 = vld [vmem:[#allocation8 + $0xa20] sm:$0xff]  ;;  %v1928_v53 = vadd.f32 %v14388_v28, %v437_v45 }
 0x1d9   :  { %v2610_v12 = vld [vmem:[#allocation8 + $0xe00] sm:$0xff]  ;;  %v12534_v37 = vcombine.high %v2482_v51, %v2486_v52  ;;  %v12533_v28 = vcombine.low %v2482_v51, %v2486_v52 }
 0x1da   :  { %v2614_v55 = vld [vmem:[#allocation8 + $0xe20] sm:$0xff]  ;;  %v2120_v21 = vmul.f32 0.2, %v1928_v53  ;;  %vm2104_vm7 = vcmp.gt.f32.partialorder %v1928_v53, 0.0 }
 0x1db   :  { %8449 = vmatpush2.bf16.msra.mxu0 %v12581_v41  ;;  %8490 = vmatpush2.bf16.msra.mxu1 %v12709_v60  ;;  %v12662_v41 = vcombine.high %v2610_v12, %v2614_v55  ;;  %v2730_v60 = vld [vmem:[#allocation8 + $0x11c0] sm:$0xff]  ;;  %v12661_v2 = vcombine.low %v2610_v12, %v2614_v55 }
 0x1dc   :  { %8450 = vmatprep.subr.bf16.mxu0 %v12574_v61  ;;  %8491 = vmatprep.subr.bf16.mxu1 %v12702_v62  ;;  %v2734_v61 = vld [vmem:[#allocation8 + $0x11e0] sm:$0xff] }
 0x1dd   :  { %v2858_v62 = vld [vmem:[#allocation8 + $0x15c0] sm:$0xff]  ;;  %v12782_v3 = vcombine.high %v2730_v60, %v2734_v61  ;;  %v12781_v16 = vcombine.low %v2730_v60, %v2734_v61 }
 0x1de   :  { %v2862_v63 = vld [vmem:[#allocation8 + $0x15e0] sm:$0xff] }
 0x1df   :  { %8451 = vmatpush2.bf16.msra.mxu0 %v12573_v7  ;;  %8492 = vmatpush2.bf16.msra.mxu1 %v12701_v8  ;;  %v12910_v7 = vcombine.high %v2858_v62, %v2862_v63  ;;  %v2722_v8 = vld [vmem:[#allocation8 + $0x1180] sm:$0xff] }
 0x1e0   :  { %8452 = vmatprep.subr.bf16.mxu0 %v12566_v9  ;;  %8493 = vmatprep.subr.bf16.mxu1 %v12694_v11  ;;  %v2726_v9 = vld [vmem:[#allocation8 + $0x11a0] sm:$0xff]  ;;  %v2136_v11 = vsel %vm2104_vm7, %v1928_v53, %v2120_v21 }
 0x1e1   :  { %v2850_v13 = vld [vmem:[#allocation8 + $0x1580] sm:$0xff]  ;;  %v12773_v43 = vcombine.low %v2722_v8, %v2726_v9 }
 0x1e2   :  { %v2854_v15 = vld [vmem:[#allocation8 + $0x15a0] sm:$0xff] }
 0x1e3   :  { %8453 = vmatpush2.bf16.msra.mxu0 %v12565_v18  ;;  %8494 = vmatpush2.bf16.msra.mxu1 %v12693_v22  ;;  %v14411_v18 = vld [vmem:[#allocation7 + $0x8] sm:$0xff]  ;;  %v12909_v22 = vcombine.low %v2858_v62, %v2862_v63  ;;  %v12902_v32 = vcombine.high %v2850_v13, %v2854_v15  ;;  %v2714_v34 = vld [vmem:[#allocation8 + $0x1140] sm:$0xff]  ;;  %v12901_v45 = vcombine.low %v2850_v13, %v2854_v15 }
 0x1e4   :  { %8454 = vmatprep.subr.bf16.mxu0 %v12558_v24  ;;  %8495 = vmatprep.subr.bf16.mxu1 %v12686_v29  ;;  %v12774_v24 = vcombine.high %v2722_v8, %v2726_v9  ;;  %v14413_v29 = vpack.c.bf16 %v2136_v11, %v2136_v11  ;;  %v449_v31 = vrot.slane %v14411_v18, %v14336_v23  ;;  %v2718_v35 = vld [vmem:[#allocation8 + $0x1160] sm:$0xff] }
 0x1e5   :  { %v2846_v40 = vld [vmem:[#allocation8 + $0x1560] sm:$0xff]  ;;  %v12766_v19 = vcombine.high %v2714_v34, %v2718_v35  ;;  %v12765_v12 = vcombine.low %v2714_v34, %v2718_v35 }
 0x1e6   :  { %v2710_v51 = vld [vmem:[#allocation8 + $0x1120] sm:$0xff] }
 0x1e7   :  { %8455 = vmatpush2.bf16.msra.mxu0 %v12557_v36  ;;  %8496 = vmatpush2.bf16.msra.mxu1 %v12685_v38  ;;  %v457_v38 = vrot.slane %v14411_v18, %v14339_v26  ;;  %v2834_v55 = vld [vmem:[#allocation8 + $0x1500] sm:$0xff] }
 0x1e8   :  { %8456 = vmatprep.subr.bf16.mxu0 %v12550_v39  ;;  %8497 = vmatprep.subr.bf16.mxu1 %v12678_v42  ;;  %v2842_v39 = vld [vmem:[#allocation8 + $0x1540] sm:$0xff] }
 0x1e9   :  { %v12893_v58 = vcombine.low %v2842_v39, %v2846_v40  ;;  %v2698_v21 = vld [vmem:[#allocation8 + $0x10c0] sm:$0xff] }
 0x1ea   :  { %v2702_v62 = vld [vmem:[#allocation8 + $0x10e0] sm:$0xff] }
 0x1eb   :  { %8457 = vmatpush2.bf16.msra.mxu0 %v12549_v47  ;;  %8498 = vmatpush2.bf16.msra.mxu1 %v12677_v48  ;;  %v12894_v48 = vcombine.high %v2842_v39, %v2846_v40  ;;  %v2830_v4 = vld [vmem:[#allocation8 + $0x14e0] sm:$0xff]  ;;  %v12750_v11 = vcombine.high %v2698_v21, %v2702_v62 }
 0x1ec   :  { %8458 = vmatprep.subr.bf16.mxu0 %v12542_v49  ;;  %8499 = vmatprep.subr.bf16.mxu1 %v12670_v57  ;;  %v2706_v57 = vld [vmem:[#allocation8 + $0x1100] sm:$0xff] }
 0x1ed   :  { %v12758_v61 = vcombine.high %v2706_v57, %v2710_v51  ;;  %v12757_v8 = vcombine.low %v2706_v57, %v2710_v51  ;;  %v2690_v15 = vld [vmem:[#allocation8 + $0x1080] sm:$0xff] }
 0x1ee   :  { %v2686_v39 = vld [vmem:[#allocation8 + $0x1060] sm:$0xff] }
 0x1ef   :  { %8459 = vmatpush2.bf16.msra.mxu0 %v12541_v30  ;;  %8500 = vmatpush2.bf16.msra.mxu1 %v12669_v56  ;;  %v2838_v30 = vld [vmem:[#allocation8 + $0x1520] sm:$0xff] }
 0x1f0   :  { %8460 = vmatprep.subr.bf16.mxu0 %v12534_v37  ;;  %8501 = vmatprep.subr.bf16.mxu1 %v12662_v41  ;;  %v12885_v9 = vcombine.low %v2834_v55, %v2838_v30  ;;  %v2810_v40 = vld [vmem:[#allocation8 + $0x1440] sm:$0xff] }
 0x1f3   :  { %8461 = vmatpush2.bf16.msra.mxu0 %v12533_v28  ;;  %8502 = vmatpush2.bf16.msra.mxu1 %v12661_v2  ;;  %v12886_v2 = vcombine.high %v2834_v55, %v2838_v30  ;;  %v2798_v55 = vld [vmem:[#allocation8 + $0x13e0] sm:$0xff] }
 0x1f4   :  { %8512 = vmatprep.subr.bf16.mxu0 %v12782_v3  ;;  %8553 = vmatprep.subr.bf16.mxu1 %v12910_v7  ;;  %v2826_v3 = vld [vmem:[#allocation8 + $0x14c0] sm:$0xff] }
 0x1f5   :  { %v12878_v13 = vcombine.high %v2826_v3, %v2830_v4  ;;  %v2922_v30 = vld [vmem:[#allocation8 + $0x17c0] sm:$0xff] }
 0x1f6   :  { %v14417_v36 = vpop.f32.mrf.mxu0  ;;  %8463 = vmatmul.mubr.bf16.vlgmr.msra.gmra.mxu0 %v14409_v17  ;;  %v14422_v42 = vpop.f32.mrf.mxu1  ;;  %8504 = vmatmul.mubr.bf16.vlgmr.msra.gmra.mxu1 %v14413_v29 }
 0x1f7   :  { %8513 = vmatpush1.bf16.msra.mxu0 %v12781_v16  ;;  %8554 = vmatpush1.bf16.msra.mxu1 %v12909_v22  ;;  %v2694_v16 = vld [vmem:[#allocation8 + $0x10a0] sm:$0xff] }
 0x1f8   :  { %v1970_v44 = vpop.f32.mrf.mxu0  ;;  %8514 = vmatprep.subr.bf16.mxu0 %v12774_v24  ;;  %v2011_v47 = vpop.f32.mrf.mxu1  ;;  %8555 = vmatprep.subr.bf16.mxu1 %v12902_v32  ;;  %v2818_v22 = vld [vmem:[#allocation8 + $0x1480] sm:$0xff]  ;;  %v12877_v32 = vcombine.low %v2826_v3, %v2830_v4  ;;  %v12742_v34 = vcombine.high %v2690_v15, %v2694_v16 }
 0x1f9   :  { %v1971_v46 = vadd.f32 %v1970_v44, %v449_v31  ;;  %v2012_v49 = vadd.f32 %v2011_v47, %v457_v38  ;;  %v2822_v24 = vld [vmem:[#allocation8 + $0x14a0] sm:$0xff]  ;;  %v12749_v31 = vcombine.low %v2698_v21, %v2702_v62  ;;  %v12741_v44 = vcombine.low %v2690_v15, %v2694_v16 }
 0x1fa   :  { %v1972_v50 = vpop.f32.mrf.mxu0  ;;  %v2013_v53 = vpop.f32.mrf.mxu1  ;;  %v12870_v35 = vcombine.high %v2818_v22, %v2822_v24  ;;  %v2682_v38 = vld [vmem:[#allocation8 + $0x1040] sm:$0xff] }
 0x1fb   :  { %vm2107_vm8 = vcmp.gt.f32.partialorder %v1971_v46, 0.0  ;;  %v2123_v52 = vmul.f32 0.2, %v1971_v46  ;;  %8515 = vmatpush1.bf16.msra.mxu0 %v12773_v43  ;;  %vm2109_vm9 = vcmp.gt.f32.partialorder %v2012_v49, 0.0  ;;  %v2125_v56 = vmul.f32 0.2, %v2012_v49  ;;  %8556 = vmatpush1.bf16.msra.mxu1 %v12901_v45 }
 0x1fc   :  { %v1973_v37 = vpop.f32.mrf.mxu0  ;;  %8516 = vmatprep.subr.bf16.mxu0 %v12766_v19  ;;  %v2014_v60 = vpop.f32.mrf.mxu1  ;;  %8557 = vmatprep.subr.bf16.mxu1 %v12894_v48  ;;  %v2814_v43 = vld [vmem:[#allocation8 + $0x1460] sm:$0xff]  ;;  %v12869_v45 = vcombine.low %v2818_v22, %v2822_v24  ;;  %v12734_v19 = vcombine.high %v2682_v38, %v2686_v39  ;;  %v12733_v57 = vcombine.low %v2682_v38, %v2686_v39 }
 0x1fd   :  { %v2139_v41 = vsel %vm2107_vm8, %v1971_v46, %v2123_v52  ;;  %v2141_v28 = vsel %vm2109_vm9, %v2012_v49, %v2125_v56  ;;  %v12862_v46 = vcombine.high %v2810_v40, %v2814_v43  ;;  %v2674_v47 = vld [vmem:[#allocation8 + $0x1000] sm:$0xff]  ;;  %v12861_v51 = vcombine.low %v2810_v40, %v2814_v43 }
 0x1fe   :  { %v14425_v63 = vpack.c.bf16 %v2139_v41, %v2139_v41  ;;  %v14427_v7 = vpack.c.bf16 %v2141_v28, %v2141_v28  ;;  %v2678_v48 = vld [vmem:[#allocation8 + $0x1020] sm:$0xff] }
 0x1ff   :  { %8517 = vmatpush1.bf16.msra.mxu0 %v12765_v12  ;;  %8558 = vmatpush1.bf16.msra.mxu1 %v12893_v58  ;;  %v2802_v49 = vld [vmem:[#allocation8 + $0x1400] sm:$0xff]  ;;  %v12726_v52 = vcombine.high %v2674_v47, %v2678_v48  ;;  %v12725_v37 = vcombine.low %v2674_v47, %v2678_v48 }
 0x200   :  { %8544 = vmatprep.mubr.bf16.mxu0 %v14425_v63  ;;  %8585 = vmatprep.mubr.bf16.mxu1 %v14427_v7  ;;  %v2806_v50 = vld [vmem:[#allocation8 + $0x1420] sm:$0xff] }
 0x201   :  { %8518 = vmatprep.subr.bf16.mxu0 %v12758_v61  ;;  %8559 = vmatprep.subr.bf16.mxu1 %v12886_v2  ;;  %v12854_v53 = vcombine.high %v2802_v49, %v2806_v50  ;;  %v2794_v12 = vld [vmem:[#allocation8 + $0x13c0] sm:$0xff]  ;;  %v12853_v58 = vcombine.low %v2802_v49, %v2806_v50 }
 0x202   :  { %v2926_v56 = vld [vmem:[#allocation8 + $0x17e0] sm:$0xff]  ;;  %v12846_v41 = vcombine.high %v2794_v12, %v2798_v55  ;;  %v12845_v2 = vcombine.low %v2794_v12, %v2798_v55 }
 0x203   :  { %8519 = vmatpush1.bf16.msra.mxu0 %v12757_v8  ;;  %8560 = vmatpush1.bf16.msra.mxu1 %v12885_v9  ;;  %v12974_v60 = vcombine.high %v2922_v30, %v2926_v56  ;;  %v2786_v61 = vld [vmem:[#allocation8 + $0x1380] sm:$0xff]  ;;  %v12973_v3 = vcombine.low %v2922_v30, %v2926_v56 }
 0x204   :  { %8520 = vmatprep.subr.bf16.mxu0 %v12750_v11  ;;  %8561 = vmatprep.subr.bf16.mxu1 %v12878_v13  ;;  %v2790_v21 = vld [vmem:[#allocation8 + $0x13a0] sm:$0xff] }
 0x205   :  { %v2914_v62 = vld [vmem:[#allocation8 + $0x1780] sm:$0xff]  ;;  %v12838_v4 = vcombine.high %v2786_v61, %v2790_v21  ;;  %v12837_v16 = vcombine.low %v2786_v61, %v2790_v21  ;;  %v453_v61 = vrot.slane %v14411_v18, %v14363_v25 }
 0x206   :  { %v2918_v28 = vld [vmem:[#allocation8 + $0x17a0] sm:$0xff] }
 0x207   :  { %8521 = vmatpush1.bf16.msra.mxu0 %v12749_v31  ;;  %8562 = vmatpush1.bf16.msra.mxu1 %v12877_v32  ;;  %v12966_v8 = vcombine.high %v2914_v62, %v2918_v28  ;;  %v2778_v9 = vld [vmem:[#allocation8 + $0x1340] sm:$0xff]  ;;  %v12965_v22 = vcombine.low %v2914_v62, %v2918_v28 }
 0x208   :  { %8522 = vmatprep.subr.bf16.mxu0 %v12742_v34  ;;  %8563 = vmatprep.subr.bf16.mxu1 %v12870_v35  ;;  %v2782_v11 = vld [vmem:[#allocation8 + $0x1360] sm:$0xff] }
 0x209   :  { %v2906_v13 = vld [vmem:[#allocation8 + $0x1740] sm:$0xff]  ;;  %v12830_v24 = vcombine.high %v2778_v9, %v2782_v11  ;;  %v12829_v39 = vcombine.low %v2778_v9, %v2782_v11 }
 0x20a   :  { %v2910_v15 = vld [vmem:[#allocation8 + $0x1760] sm:$0xff] }
 0x20b   :  { %8523 = vmatpush1.bf16.msra.mxu0 %v12741_v44  ;;  %8564 = vmatpush1.bf16.msra.mxu1 %v12869_v45  ;;  %v12958_v31 = vcombine.high %v2906_v13, %v2910_v15  ;;  %v2770_v32 = vld [vmem:[#allocation8 + $0x1300] sm:$0xff]  ;;  %v12957_v40 = vcombine.low %v2906_v13, %v2910_v15  ;;  %v2010_v13 = vadd.f32 %v14422_v42, %v453_v61 }
 0x20c   :  { %8524 = vmatprep.subr.bf16.mxu0 %v12734_v19  ;;  %8565 = vmatprep.subr.bf16.mxu1 %v12862_v46  ;;  %v2774_v34 = vld [vmem:[#allocation8 + $0x1320] sm:$0xff] }
 0x20d   :  { %v2898_v35 = vld [vmem:[#allocation8 + $0x1700] sm:$0xff]  ;;  %v12822_v43 = vcombine.high %v2770_v32, %v2774_v34  ;;  %v12821_v48 = vcombine.low %v2770_v32, %v2774_v34  ;;  %vm2108_vm11 = vcmp.gt.f32.partialorder %v2010_v13, 0.0 }
 0x20e   :  { %v2902_v38 = vld [vmem:[#allocation8 + $0x1720] sm:$0xff] }
 0x20f   :  { %8525 = vmatpush1.bf16.msra.mxu0 %v12733_v57  ;;  %8566 = vmatpush1.bf16.msra.mxu1 %v12861_v51  ;;  %v12950_v44 = vcombine.high %v2898_v35, %v2902_v38  ;;  %v2762_v45 = vld [vmem:[#allocation8 + $0x12c0] sm:$0xff]  ;;  %v12949_v49 = vcombine.low %v2898_v35, %v2902_v38 }
 0x210   :  { %8526 = vmatprep.subr.bf16.mxu0 %v12726_v52  ;;  %8567 = vmatprep.subr.bf16.mxu1 %v12854_v53  ;;  %v2766_v19 = vld [vmem:[#allocation8 + $0x12e0] sm:$0xff] }
 0x211   :  { %v2890_v46 = vld [vmem:[#allocation8 + $0x16c0] sm:$0xff]  ;;  %v12814_v50 = vcombine.high %v2762_v45, %v2766_v19  ;;  %v12813_v55 = vcombine.low %v2762_v45, %v2766_v19 }
 0x212   :  { %v2894_v47 = vld [vmem:[#allocation8 + $0x16e0] sm:$0xff] }
 0x213   :  { %8527 = vmatpush1.bf16.msra.mxu0 %v12725_v37  ;;  %8568 = vmatpush1.bf16.msra.mxu1 %v12853_v58  ;;  %v12942_v57 = vcombine.high %v2890_v46, %v2894_v47  ;;  %v2754_v51 = vld [vmem:[#allocation8 + $0x1280] sm:$0xff]  ;;  %v12941_v30 = vcombine.low %v2890_v46, %v2894_v47  ;;  %v445_v37 = vrot.slane %v14411_v18, %v14360_v20 }
 0x214   :  { %8528 = vmatprep.subr.bf16.mxu0 %v12846_v41  ;;  %8569 = vmatprep.subr.bf16.mxu1 %v12974_v60  ;;  %v2758_v52 = vld [vmem:[#allocation8 + $0x12a0] sm:$0xff] }
 0x215   :  { %v2882_v53 = vld [vmem:[#allocation8 + $0x1680] sm:$0xff]  ;;  %v12806_v56 = vcombine.high %v2754_v51, %v2758_v52  ;;  %v12805_v28 = vcombine.low %v2754_v51, %v2758_v52 }
 0x216   :  { %v2886_v12 = vld [vmem:[#allocation8 + $0x16a0] sm:$0xff] }
 0x217   :  { %8529 = vmatpush2.bf16.msra.mxu0 %v12845_v2  ;;  %8570 = vmatpush2.bf16.msra.mxu1 %v12973_v3  ;;  %v12934_v58 = vcombine.high %v2882_v53, %v2886_v12  ;;  %v2746_v41 = vld [vmem:[#allocation8 + $0x1240] sm:$0xff]  ;;  %v12933_v2 = vcombine.low %v2882_v53, %v2886_v12 }
 0x218   :  { %8530 = vmatprep.subr.bf16.mxu0 %v12838_v4  ;;  %8571 = vmatprep.subr.bf16.mxu1 %v12966_v8  ;;  %v2750_v60 = vld [vmem:[#allocation8 + $0x1260] sm:$0xff]  ;;  %v1969_v4 = vadd.f32 %v14417_v36, %v445_v37  ;;  %v2124_v36 = vmul.f32 0.2, %v2010_v13 }
 0x219   :  { %v2874_v21 = vld [vmem:[#allocation8 + $0x1640] sm:$0xff]  ;;  %v12798_v3 = vcombine.high %v2746_v41, %v2750_v60 }
 0x21a   :  { %v2878_v62 = vld [vmem:[#allocation8 + $0x1660] sm:$0xff]  ;;  %v2122_v32 = vmul.f32 0.2, %v1969_v4  ;;  %vm2106_vm10 = vcmp.gt.f32.partialorder %v1969_v4, 0.0 }
 0x21b   :  { %8531 = vmatpush2.bf16.msra.mxu0 %v12837_v16  ;;  %8572 = vmatpush2.bf16.msra.mxu1 %v12965_v22  ;;  %v12926_v8 = vcombine.high %v2874_v21, %v2878_v62  ;;  %v2738_v9 = vld [vmem:[#allocation8 + $0x1200] sm:$0xff]  ;;  %v12797_v22 = vcombine.low %v2746_v41, %v2750_v60  ;;  %v473_v41 = vrot.slane %v14411_v18, %v14375_v5 }
 0x21c   :  { %8532 = vmatprep.subr.bf16.mxu0 %v12830_v24  ;;  %8573 = vmatprep.subr.bf16.mxu1 %v12958_v31  ;;  %v2742_v11 = vld [vmem:[#allocation8 + $0x1220] sm:$0xff]  ;;  %v12925_v24 = vcombine.low %v2874_v21, %v2878_v62  ;;  %v2138_v45 = vsel %vm2106_vm10, %v1969_v4, %v2122_v32 }
 0x21d   :  { %v2866_v15 = vld [vmem:[#allocation8 + $0x1600] sm:$0xff]  ;;  %v12790_v31 = vcombine.high %v2738_v9, %v2742_v11  ;;  %v12789_v42 = vcombine.low %v2738_v9, %v2742_v11  ;;  %v14437_v51 = vpack.c.bf16 %v2138_v45, %v2138_v45 }
 0x21e   :  { %v2870_v16 = vld [vmem:[#allocation8 + $0x1620] sm:$0xff] }
 0x21f   :  { %8533 = vmatpush2.bf16.msra.mxu0 %v12829_v39  ;;  %8574 = vmatpush2.bf16.msra.mxu1 %v12957_v40  ;;  %v12918_v34 = vcombine.high %v2866_v15, %v2870_v16  ;;  %v2986_v35 = vld [vmem:[#allocation8 + $0x19c0] sm:$0xff] }
 0x220   :  { %8534 = vmatprep.subr.bf16.mxu0 %v12822_v43  ;;  %8575 = vmatprep.subr.bf16.mxu1 %v12950_v44  ;;  %v2990_v38 = vld [vmem:[#allocation8 + $0x19e0] sm:$0xff]  ;;  %v12917_v43 = vcombine.low %v2866_v15, %v2870_v16 }
 0x221   :  { %v3114_v39 = vld [vmem:[#allocation8 + $0x1dc0] sm:$0xff]  ;;  %v13038_v44 = vcombine.high %v2986_v35, %v2990_v38 }
 0x222   :  { %v3118_v40 = vld [vmem:[#allocation8 + $0x1de0] sm:$0xff] }
 0x223   :  { %8535 = vmatpush2.bf16.msra.mxu0 %v12821_v48  ;;  %8576 = vmatpush2.bf16.msra.mxu1 %v12949_v49  ;;  %v13166_v19 = vcombine.high %v3114_v39, %v3118_v40  ;;  %v2978_v46 = vld [vmem:[#allocation8 + $0x1980] sm:$0xff]  ;;  %v2140_v48 = vsel %vm2108_vm11, %v2010_v13, %v2124_v36  ;;  %v13165_v52 = vcombine.low %v3114_v39, %v3118_v40 }
 0x224   :  { %8536 = vmatprep.subr.bf16.mxu0 %v12814_v50  ;;  %8577 = vmatprep.subr.bf16.mxu1 %v12942_v57  ;;  %v2982_v47 = vld [vmem:[#allocation8 + $0x19a0] sm:$0xff]  ;;  %v13037_v57 = vcombine.low %v2986_v35, %v2990_v38  ;;  %v14439_v12 = vpack.c.bf16 %v2140_v48, %v2140_v48 }
 0x225   :  { %v3106_v49 = vld [vmem:[#allocation8 + $0x1d80] sm:$0xff]  ;;  %v13030_v53 = vcombine.high %v2978_v46, %v2982_v47  ;;  %v13029_v62 = vcombine.low %v2978_v46, %v2982_v47 }
 0x226   :  { %v3110_v50 = vld [vmem:[#allocation8 + $0x1da0] sm:$0xff] }
 0x227   :  { %8537 = vmatpush2.bf16.msra.mxu0 %v12813_v55  ;;  %8578 = vmatpush2.bf16.msra.mxu1 %v12941_v30  ;;  %v465_v55 = vrot.slane %v14411_v18, %v14372_v0  ;;  %v13158_v30 = vcombine.high %v3106_v49, %v3110_v50  ;;  %v2974_v37 = vld [vmem:[#allocation8 + $0x1960] sm:$0xff] }
 0x228   :  { %8538 = vmatprep.subr.bf16.mxu0 %v12806_v56  ;;  %8579 = vmatprep.subr.bf16.mxu1 %v12934_v58  ;;  %v2970_v56 = vld [vmem:[#allocation8 + $0x1940] sm:$0xff] }
 0x229   :  { %v3098_v60 = vld [vmem:[#allocation8 + $0x1d40] sm:$0xff] }
 0x22a   :  { %v3102_v61 = vld [vmem:[#allocation8 + $0x1d60] sm:$0xff] }
 0x22b   :  { %8539 = vmatpush2.bf16.msra.mxu0 %v12805_v28  ;;  %8580 = vmatpush2.bf16.msra.mxu1 %v12933_v2  ;;  %v13157_v2 = vcombine.low %v3106_v49, %v3110_v50  ;;  %v13150_v9 = vcombine.high %v3098_v60, %v3102_v61  ;;  %v2962_v15 = vld [vmem:[#allocation8 + $0x1900] sm:$0xff]  ;;  %v13149_v36 = vcombine.low %v3098_v60, %v3102_v61 }
 0x22c   :  { %8540 = vmatprep.subr.bf16.mxu0 %v12798_v3  ;;  %8581 = vmatprep.subr.bf16.mxu1 %v12926_v8  ;;  %v13022_v3 = vcombine.high %v2970_v56, %v2974_v37  ;;  %v2966_v16 = vld [vmem:[#allocation8 + $0x1920] sm:$0xff] }
 0x22d   :  { %v3090_v32 = vld [vmem:[#allocation8 + $0x1d00] sm:$0xff]  ;;  %v13013_v50 = vcombine.low %v2962_v15, %v2966_v16 }
 0x22e   :  { %v3082_v47 = vld [vmem:[#allocation8 + $0x1cc0] sm:$0xff] }
 0x22f   :  { %8541 = vmatpush2.bf16.msra.mxu0 %v12797_v22  ;;  %8582 = vmatpush2.bf16.msra.mxu1 %v12925_v24  ;;  %v3086_v48 = vld [vmem:[#allocation8 + $0x1ce0] sm:$0xff] }
 0x230   :  { %8542 = vmatprep.subr.bf16.mxu0 %v12790_v31  ;;  %8583 = vmatprep.subr.bf16.mxu1 %v12918_v34  ;;  %v13021_v31 = vcombine.low %v2970_v56, %v2974_v37  ;;  %v3094_v34 = vld [vmem:[#allocation8 + $0x1d20] sm:$0xff]  ;;  %v13133_v60 = vcombine.low %v3082_v47, %v3086_v48 }
 0x231   :  { %v13142_v46 = vcombine.high %v3090_v32, %v3094_v34  ;;  %v3074_v56 = vld [vmem:[#allocation8 + $0x1c80] sm:$0xff] }
 0x232   :  { %v3078_v37 = vld [vmem:[#allocation8 + $0x1ca0] sm:$0xff] }
 0x233   :  { %8543 = vmatpush2.bf16.msra.mxu0 %v12789_v42  ;;  %8584 = vmatpush2.bf16.msra.mxu1 %v12917_v43  ;;  %v13014_v42 = vcombine.high %v2962_v15, %v2966_v16  ;;  %v2954_v43 = vld [vmem:[#allocation8 + $0x18c0] sm:$0xff] }
 0x234   :  { %8594 = vmatprep.subr.bf16.mxu0 %v13038_v44  ;;  %8635 = vmatprep.subr.bf16.mxu1 %v13166_v19  ;;  %v2958_v44 = vld [vmem:[#allocation8 + $0x18e0] sm:$0xff] }
 0x235   :  { %v2930_v15 = vld [vmem:[#allocation8 + $0x1800] sm:$0xff] }
 0x236   :  { %v14443_v58 = vpop.f32.mrf.mxu0  ;;  %8545 = vmatmul.mubr.bf16.vlgmr.msra.gmra.mxu0 %v14437_v51  ;;  %v14448_v21 = vpop.f32.mrf.mxu1  ;;  %8586 = vmatmul.mubr.bf16.vlgmr.msra.gmra.mxu1 %v14439_v12  ;;  %v2934_v16 = vld [vmem:[#allocation8 + $0x1820] sm:$0xff] }
 0x237   :  { %8595 = vmatpush1.bf16.msra.mxu0 %v13037_v57  ;;  %8636 = vmatpush1.bf16.msra.mxu1 %v13165_v52  ;;  %v13141_v57 = vcombine.low %v3090_v32, %v3094_v34  ;;  %v13006_v52 = vcombine.high %v2954_v43, %v2958_v44  ;;  %v12982_v34 = vcombine.high %v2930_v15, %v2934_v16 }
 0x238   :  { %v2052_v28 = vpop.f32.mrf.mxu0  ;;  %8596 = vmatprep.subr.bf16.mxu0 %v13030_v53  ;;  %v2093_v8 = vpop.f32.mrf.mxu1  ;;  %8637 = vmatprep.subr.bf16.mxu1 %v13158_v30  ;;  %v13134_v53 = vcombine.high %v3082_v47, %v3086_v48  ;;  %v2950_v30 = vld [vmem:[#allocation8 + $0x18a0] sm:$0xff] }
 0x239   :  { %v2053_v4 = vadd.f32 %v2052_v28, %v465_v55  ;;  %v2094_v11 = vadd.f32 %v2093_v8, %v473_v41  ;;  %v2946_v55 = vld [vmem:[#allocation8 + $0x1880] sm:$0xff]  ;;  %v13005_v41 = vcombine.low %v2954_v43, %v2958_v44 }
 0x23a   :  { %v2054_v13 = vpop.f32.mrf.mxu0  ;;  %v2095_v24 = vpop.f32.mrf.mxu1  ;;  %v12998_v61 = vcombine.high %v2946_v55, %v2950_v30  ;;  %v2938_v28 = vld [vmem:[#allocation8 + $0x1840] sm:$0xff]  ;;  %v12997_v8 = vcombine.low %v2946_v55, %v2950_v30 }
 0x23b   :  { %vm2111_vm12 = vcmp.gt.f32.partialorder %v2053_v4, 0.0  ;;  %v2127_v22 = vmul.f32 0.2, %v2053_v4  ;;  %8597 = vmatpush1.bf16.msra.mxu0 %v13029_v62  ;;  %vm2113_vm13 = vcmp.gt.f32.partialorder %v2094_v11, 0.0  ;;  %v2129_v35 = vmul.f32 0.2, %v2094_v11  ;;  %8638 = vmatpush1.bf16.msra.mxu1 %v13157_v2 }
 0x23c   :  { %v2055_v38 = vpop.f32.mrf.mxu0  ;;  %8598 = vmatprep.subr.bf16.mxu0 %v13022_v3  ;;  %v2096_v40 = vpop.f32.mrf.mxu1  ;;  %8639 = vmatprep.subr.bf16.mxu1 %v13150_v9  ;;  %v13126_v62 = vcombine.high %v3074_v56, %v3078_v37  ;;  %v2942_v2 = vld [vmem:[#allocation8 + $0x1860] sm:$0xff]  ;;  %v13125_v9 = vcombine.low %v3074_v56, %v3078_v37 }
 0x23d   :  { %v2143_v39 = vsel %vm2111_vm12, %v2053_v4, %v2127_v22  ;;  %v2145_v19 = vsel %vm2113_vm13, %v2094_v11, %v2129_v35  ;;  %v3066_v3 = vld [vmem:[#allocation8 + $0x1c40] sm:$0xff]  ;;  %v12990_v11 = vcombine.high %v2938_v28, %v2942_v2 }
 0x23e   :  { %v14451_v45 = vpack.c.bf16 %v2143_v39, %v2143_v39  ;;  %v14453_v49 = vpack.c.bf16 %v2145_v19, %v2145_v19  ;;  %v3070_v4 = vld [vmem:[#allocation8 + $0x1c60] sm:$0xff] }
 0x23f   :  { %8599 = vmatpush1.bf16.msra.mxu0 %v13021_v31  ;;  %8640 = vmatpush1.bf16.msra.mxu1 %v13149_v36  ;;  %v13118_v13 = vcombine.high %v3066_v3, %v3070_v4  ;;  %v3058_v22 = vld [vmem:[#allocation8 + $0x1c00] sm:$0xff]  ;;  %v12989_v31 = vcombine.low %v2938_v28, %v2942_v2  ;;  %v13117_v32 = vcombine.low %v3066_v3, %v3070_v4 }
 0x240   :  { %8626 = vmatprep.mubr.bf16.mxu0 %v14451_v45  ;;  %8667 = vmatprep.mubr.bf16.mxu1 %v14453_v49  ;;  %v3062_v24 = vld [vmem:[#allocation8 + $0x1c20] sm:$0xff] }
 0x241   :  { %8600 = vmatprep.subr.bf16.mxu0 %v13014_v42  ;;  %8641 = vmatprep.subr.bf16.mxu1 %v13142_v46  ;;  %v13110_v35 = vcombine.high %v3058_v22, %v3062_v24  ;;  %v3050_v38 = vld [vmem:[#allocation8 + $0x1bc0] sm:$0xff]  ;;  %v12981_v42 = vcombine.low %v2930_v15, %v2934_v16  ;;  %v13109_v43 = vcombine.low %v3058_v22, %v3062_v24 }
 0x242   :  { %v3054_v36 = vld [vmem:[#allocation8 + $0x1be0] sm:$0xff] }
 0x243   :  { %8601 = vmatpush1.bf16.msra.mxu0 %v13013_v50  ;;  %8642 = vmatpush1.bf16.msra.mxu1 %v13141_v57  ;;  %v3178_v39 = vld [vmem:[#allocation8 + $0x1fc0] sm:$0xff]  ;;  %v13102_v44 = vcombine.high %v3050_v38, %v3054_v36  ;;  %v13101_v57 = vcombine.low %v3050_v38, %v3054_v36 }
 0x244   :  { %8602 = vmatprep.subr.bf16.mxu0 %v13006_v52  ;;  %8643 = vmatprep.subr.bf16.mxu1 %v13134_v53  ;;  %v3182_v40 = vld [vmem:[#allocation8 + $0x1fe0] sm:$0xff] }
 0x245   :  { %v13230_v19 = vcombine.high %v3178_v39, %v3182_v40  ;;  %v3042_v46 = vld [vmem:[#allocation8 + $0x1b80] sm:$0xff]  ;;  %v13229_v52 = vcombine.low %v3178_v39, %v3182_v40 }
 0x246   :  { %v3046_v47 = vld [vmem:[#allocation8 + $0x1ba0] sm:$0xff] }
 0x247   :  { %8603 = vmatpush1.bf16.msra.mxu0 %v13005_v41  ;;  %8644 = vmatpush1.bf16.msra.mxu1 %v13133_v60  ;;  %v3170_v48 = vld [vmem:[#allocation8 + $0x1f80] sm:$0xff]  ;;  %v13094_v53 = vcombine.high %v3042_v46, %v3046_v47  ;;  %v13093_v60 = vcombine.low %v3042_v46, %v3046_v47  ;;  %v461_v46 = vrot.slane %v14411_v18, %v14398_v27 }
 0x248   :  { %8604 = vmatprep.subr.bf16.mxu0 %v12998_v61  ;;  %8645 = vmatprep.subr.bf16.mxu1 %v13126_v62  ;;  %v3174_v50 = vld [vmem:[#allocation8 + $0x1fa0] sm:$0xff] }
 0x249   :  { %v13222_v55 = vcombine.high %v3170_v48, %v3174_v50  ;;  %v3034_v30 = vld [vmem:[#allocation8 + $0x1b40] sm:$0xff]  ;;  %v13221_v61 = vcombine.low %v3170_v48, %v3174_v50 }
 0x24a   :  { %v3038_v56 = vld [vmem:[#allocation8 + $0x1b60] sm:$0xff] }
 0x24b   :  { %8605 = vmatpush1.bf16.msra.mxu0 %v12997_v8  ;;  %8646 = vmatpush1.bf16.msra.mxu1 %v13125_v9  ;;  %v3162_v37 = vld [vmem:[#allocation8 + $0x1f40] sm:$0xff]  ;;  %v13086_v62 = vcombine.high %v3034_v30, %v3038_v56  ;;  %v13085_v9 = vcombine.low %v3034_v30, %v3038_v56 }
 0x24c   :  { %8606 = vmatprep.subr.bf16.mxu0 %v12990_v11  ;;  %8647 = vmatprep.subr.bf16.mxu1 %v13118_v13  ;;  %v3166_v41 = vld [vmem:[#allocation8 + $0x1f60] sm:$0xff] }
 0x24d   :  { %v13214_v28 = vcombine.high %v3162_v37, %v3166_v41  ;;  %v3026_v2 = vld [vmem:[#allocation8 + $0x1b00] sm:$0xff]  ;;  %v13213_v11 = vcombine.low %v3162_v37, %v3166_v41  ;;  %v2051_v37 = vadd.f32 %v14443_v58, %v461_v46 }
 0x24e   :  { %v3030_v3 = vld [vmem:[#allocation8 + $0x1b20] sm:$0xff] }
 0x24f   :  { %8607 = vmatpush1.bf16.msra.mxu0 %v12989_v31  ;;  %8648 = vmatpush1.bf16.msra.mxu1 %v13117_v32  ;;  %v3154_v4 = vld [vmem:[#allocation8 + $0x1f00] sm:$0xff]  ;;  %v13078_v13 = vcombine.high %v3026_v2, %v3030_v3  ;;  %v13077_v32 = vcombine.low %v3026_v2, %v3030_v3  ;;  %vm2110_vm14 = vcmp.gt.f32.partialorder %v2051_v37, 0.0 }
 0x250   :  { %8608 = vmatprep.subr.bf16.mxu0 %v12982_v34  ;;  %8649 = vmatprep.subr.bf16.mxu1 %v13110_v35  ;;  %v3158_v8 = vld [vmem:[#allocation8 + $0x1f20] sm:$0xff] }
 0x251   :  { %v13206_v15 = vcombine.high %v3154_v4, %v3158_v8  ;;  %v3018_v16 = vld [vmem:[#allocation8 + $0x1ac0] sm:$0xff]  ;;  %v13205_v34 = vcombine.low %v3154_v4, %v3158_v8  ;;  %v2126_v8 = vmul.f32 0.2, %v2051_v37 }
 0x252   :  { %v3022_v22 = vld [vmem:[#allocation8 + $0x1ae0] sm:$0xff] }
 0x253   :  { %8609 = vmatpush1.bf16.msra.mxu0 %v12981_v42  ;;  %8650 = vmatpush1.bf16.msra.mxu1 %v13109_v43  ;;  %v3146_v24 = vld [vmem:[#allocation8 + $0x1ec0] sm:$0xff]  ;;  %v13070_v35 = vcombine.high %v3018_v16, %v3022_v22  ;;  %v13069_v43 = vcombine.low %v3018_v16, %v3022_v22  ;;  %v2351_v16 = vld [vmem:[#allocation8 + $0x5e8] sm:$0xff] }
 0x254   :  { %8610 = vmatprep.subr.bf16.mxu0 %v13102_v44  ;;  %8651 = vmatprep.subr.bf16.mxu1 %v13230_v19  ;;  %v3150_v31 = vld [vmem:[#allocation8 + $0x1ee0] sm:$0xff] }
 0x255   :  { %v13198_v38 = vcombine.high %v3146_v24, %v3150_v31  ;;  %v3010_v36 = vld [vmem:[#allocation8 + $0x1a80] sm:$0xff]  ;;  %v13197_v44 = vcombine.low %v3146_v24, %v3150_v31 }
 0x256   :  { %v3014_v39 = vld [vmem:[#allocation8 + $0x1aa0] sm:$0xff] }
 0x257   :  { %8611 = vmatpush2.bf16.msra.mxu0 %v13101_v57  ;;  %8652 = vmatpush2.bf16.msra.mxu1 %v13229_v52  ;;  %v3138_v40 = vld [vmem:[#allocation8 + $0x1e80] sm:$0xff]  ;;  %v13062_v19 = vcombine.high %v3010_v36, %v3014_v39  ;;  %v469_v57 = vrot.slane %v14411_v18, %v14401_v33 }
 0x258   :  { %8612 = vmatprep.subr.bf16.mxu0 %v13094_v53  ;;  %8653 = vmatprep.subr.bf16.mxu1 %v13222_v55  ;;  %v3142_v42 = vld [vmem:[#allocation8 + $0x1ea0] sm:$0xff]  ;;  %v13061_v55 = vcombine.low %v3010_v36, %v3014_v39  ;;  %v2215_v36 = vld [vmem:[#allocation8 + $0x1a8] sm:$0xff] }
 0x259   :  { %v13190_v47 = vcombine.high %v3138_v40, %v3142_v42  ;;  %v3002_v48 = vld [vmem:[#allocation8 + $0x1a40] sm:$0xff]  ;;  %v13189_v30 = vcombine.low %v3138_v40, %v3142_v42  ;;  %v2339_v42 = vld [vmem:[#allocation8 + $0x588] sm:$0xff] }
 0x25a   :  { %v3006_v50 = vld [vmem:[#allocation8 + $0x1a60] sm:$0xff] }
 0x25b   :  { %8613 = vmatpush2.bf16.msra.mxu0 %v13093_v60  ;;  %8654 = vmatpush2.bf16.msra.mxu1 %v13221_v61  ;;  %v3130_v52 = vld [vmem:[#allocation8 + $0x1e40] sm:$0xff]  ;;  %v13054_v56 = vcombine.high %v3002_v48, %v3006_v50  ;;  %v13053_v18 = vcombine.low %v3002_v48, %v3006_v50  ;;  %v2203_v50 = vld [vmem:[#allocation8 + $0x148] sm:$0xff] }
 0x25c   :  { %8614 = vmatprep.subr.bf16.mxu0 %v13086_v62  ;;  %8655 = vmatprep.subr.bf16.mxu1 %v13214_v28  ;;  %v3134_v53 = vld [vmem:[#allocation8 + $0x1e60] sm:$0xff]  ;;  %v2092_v62 = vadd.f32 %v14448_v21, %v469_v57  ;;  %v2207_v57 = vld [vmem:[#allocation8 + $0x168] sm:$0xff] }
 0x25d   :  { %v13182_v41 = vcombine.high %v3130_v52, %v3134_v53  ;;  %v2994_v60 = vld [vmem:[#allocation8 + $0x1a00] sm:$0xff]  ;;  %v13181_v3 = vcombine.low %v3130_v52, %v3134_v53 }
 0x25e   :  { %v2998_v61 = vld [vmem:[#allocation8 + $0x1a20] sm:$0xff]  ;;  %v2128_v58 = vmul.f32 0.2, %v2092_v62  ;;  %vm2112_vm15 = vcmp.gt.f32.partialorder %v2092_v62, 0.0 }
 0x25f   :  { %8615 = vmatpush2.bf16.msra.mxu0 %v13085_v9  ;;  %8656 = vmatpush2.bf16.msra.mxu1 %v13213_v11  ;;  %v3122_v28 = vld [vmem:[#allocation8 + $0x1e00] sm:$0xff]  ;;  %v13046_v4 = vcombine.high %v2994_v60, %v2998_v61  ;;  %v2219_v11 = vld [vmem:[#allocation8 + $0x1c8] sm:$0xff]  ;;  %v13045_v21 = vcombine.low %v2994_v60, %v2998_v61 }
 0x260   :  { %8616 = vmatprep.subr.bf16.mxu0 %v13078_v13  ;;  %8657 = vmatprep.subr.bf16.mxu1 %v13206_v15  ;;  %v3126_v2 = vld [vmem:[#allocation8 + $0x1e20] sm:$0xff]  ;;  %v2223_v13 = vld [vmem:[#allocation8 + $0x1e8] sm:$0xff] }
 0x261   :  { %v13174_v9 = vcombine.high %v3122_v28, %v3126_v2  ;;  %v2347_v15 = vld [vmem:[#allocation8 + $0x5c8] sm:$0xff]  ;;  %v13173_v22 = vcombine.low %v3122_v28, %v3126_v2  ;;  %v3186_v24 = vld [vmem:[#allocation10] sm:$0xff]  ;;  %v12272_v31 = vcombine.high %v2219_v11, %v2223_v13  ;;  %v12271_v40 = vcombine.low %v2219_v11, %v2223_v13 }
 0x262   :  { %v3191_v39 = vrot.slane %v3186_v24, %v14360_v20  ;;  %v2323_v11 = vld [vmem:[#allocation8 + $0x508] sm:$0xff] }
 0x263   :  { %8617 = vmatpush2.bf16.msra.mxu0 %v13077_v32  ;;  %8658 = vmatpush2.bf16.msra.mxu1 %v13205_v34  ;;  %v2142_v32 = vsel %vm2110_vm14, %v2051_v37, %v2126_v8  ;;  %v12400_v34 = vcombine.high %v2347_v15, %v2351_v16  ;;  %v2199_v8 = vld [vmem:[#allocation8 + $0x128] sm:$0xff] }
 0x264   :  { %8618 = vmatprep.subr.bf16.mxu0 %v13070_v35  ;;  %8659 = vmatprep.subr.bf16.mxu1 %v13198_v38  ;;  %v2144_v35 = vsel %vm2112_vm15, %v2092_v62, %v2128_v58  ;;  %v2211_v38 = vld [vmem:[#allocation8 + $0x188] sm:$0xff]  ;;  %v12256_v62 = vcombine.high %v2203_v50, %v2207_v57 }
 0x265   :  { %v14466_v46 = vpack.c.bf16 %v2144_v35, %v2144_v35  ;;  %v12264_v48 = vcombine.high %v2211_v38, %v2215_v36  ;;  %v2327_v13 = vld [vmem:[#allocation8 + $0x528] sm:$0xff] }
 0x266   :  { %v2191_v35 = vld [vmem:[#allocation8 + $0xe8] sm:$0xff] }
 0x267   :  { %8619 = vmatpush2.bf16.msra.mxu0 %v13069_v43  ;;  %8660 = vmatpush2.bf16.msra.mxu1 %v13197_v44  ;;  %v2343_v43 = vld [vmem:[#allocation8 + $0x5a8] sm:$0xff]  ;;  %v14464_v44 = vpack.c.bf16 %v2142_v32, %v2142_v32  ;;  %v12376_v32 = vcombine.high %v2323_v11, %v2327_v13 }
 0x268   :  { %8620 = vmatprep.subr.bf16.mxu0 %v13062_v19  ;;  %8661 = vmatprep.subr.bf16.mxu1 %v13190_v47  ;;  %v12399_v19 = vcombine.low %v2347_v15, %v2351_v16  ;;  %v3195_v47 = vrot.slane %v3186_v24, %v14336_v23  ;;  %v12392_v53 = vcombine.high %v2339_v42, %v2343_v43 }
 0x269   :  { %v12391_v61 = vcombine.low %v2339_v42, %v2343_v43  ;;  %v12255_v16 = vcombine.low %v2203_v50, %v2207_v57  ;;  %v2311_v50 = vld [vmem:[#allocation8 + $0x4a8] sm:$0xff] }
 0x26b   :  { %8621 = vmatpush2.bf16.msra.mxu0 %v13061_v55  ;;  %8662 = vmatpush2.bf16.msra.mxu1 %v13189_v30  ;;  %v2331_v55 = vld [vmem:[#allocation8 + $0x548] sm:$0xff] }
 0x26c   :  { %8622 = vmatprep.subr.bf16.mxu0 %v13054_v56  ;;  %8663 = vmatprep.subr.bf16.mxu1 %v13182_v41  ;;  %v2335_v30 = vld [vmem:[#allocation8 + $0x568] sm:$0xff]  ;;  %v12263_v41 = vcombine.low %v2211_v38, %v2215_v36 }
 0x26d   :  { %v2315_v38 = vld [vmem:[#allocation8 + $0x4c8] sm:$0xff] }
 0x26e   :  { %v2319_v36 = vld [vmem:[#allocation8 + $0x4e8] sm:$0xff] }
 0x26f   :  { %8623 = vmatpush2.bf16.msra.mxu0 %v13053_v18  ;;  %8664 = vmatpush2.bf16.msra.mxu1 %v13181_v3  ;;  %v12384_v3 = vcombine.high %v2331_v55, %v2335_v30  ;;  %v12368_v43 = vcombine.high %v2315_v38, %v2319_v36 }
 0x270   :  { %8624 = vmatprep.subr.bf16.mxu0 %v13046_v4  ;;  %8665 = vmatprep.subr.bf16.mxu1 %v13174_v9  ;;  %v2195_v4 = vld [vmem:[#allocation8 + $0x108] sm:$0xff] }
 0x271   :  { %v12248_v24 = vcombine.high %v2195_v4, %v2199_v8 }
 0x273   :  { %8625 = vmatpush2.bf16.msra.mxu0 %v13045_v21  ;;  %8666 = vmatpush2.bf16.msra.mxu1 %v13173_v22  ;;  %v12383_v22 = vcombine.low %v2331_v55, %v2335_v30  ;;  %v2171_v30 = vld [vmem:[#allocation8 + $0x48] sm:$0xff] }
 0x274   :  { %8676 = vmatprep.subr.bf16.mxu0 %v12272_v31  ;;  %8717 = vmatprep.subr.bf16.mxu1 %v12400_v34  ;;  %v2187_v34 = vld [vmem:[#allocation8 + $0xc8] sm:$0xff] }
 0x275   :  { %v12240_v42 = vcombine.high %v2187_v34, %v2191_v35  ;;  %v12239_v57 = vcombine.low %v2187_v34, %v2191_v35 }
 0x276   :  { %v8382_v52 = vpop.f32.mrf.mxu0  ;;  %8627 = vmatmul.mubr.bf16.vlgmr.msra.gmra.mxu0 %v14464_v44  ;;  %v8423_v37 = vpop.f32.mrf.mxu1  ;;  %8668 = vmatmul.mubr.bf16.vlgmr.msra.gmra.mxu1 %v14466_v46 }
 0x277   :  { %v8383_v56 = vadd.f32 %v8382_v52, %v3191_v39  ;;  %8677 = vmatpush1.bf16.msra.mxu0 %v12271_v40  ;;  %8708 = vmatprep.mubr.bf16.mxu0 %v14353_v1  ;;  %v12247_v39 = vcombine.low %v2195_v4, %v2199_v8  ;;  %v12375_v40 = vcombine.low %v2323_v11, %v2327_v13  ;;  %v2291_v4 = vld [vmem:[#allocation8 + $0x408] sm:$0xff] }
 0x278   :  { %8718 = vmatpush1.bf16.msra.mxu1 %v12399_v19  ;;  %v8384_v60 = vpop.f32.mrf.mxu0  ;;  %8749 = vmatprep.mubr.bf16.mxu1 %v14355_v6  ;;  %v8425_v18 = vpop.f32.mrf.mxu1  ;;  %v2179_v19 = vld [vmem:[#allocation8 + $0x88] sm:$0xff]  ;;  %v12367_v52 = vcombine.low %v2315_v38, %v2319_v36 }
 0x279   :  { %v14472_v28 = vadd.f32 %v8423_v37, %v8383_v56  ;;  %v8385_v2 = vadd.f32 %v8384_v60, %v3195_v47  ;;  %8678 = vmatprep.subr.bf16.mxu0 %v12264_v48  ;;  %8719 = vmatprep.subr.bf16.mxu1 %v12392_v53  ;;  %v2183_v47 = vld [vmem:[#allocation8 + $0xa8] sm:$0xff] }
 0x27a   :  { %v8386_v9 = vpop.f32.mrf.mxu0  ;;  %v8427_v15 = vpop.f32.mrf.mxu1  ;;  %v2307_v48 = vld [vmem:[#allocation8 + $0x488] sm:$0xff]  ;;  %v12232_v53 = vcombine.high %v2179_v19, %v2183_v47  ;;  %v12231_v60 = vcombine.low %v2179_v19, %v2183_v47 }
 0x27b   :  { %v14475_v58 = vadd.f32 %v8425_v18, %v8385_v2  ;;  %8679 = vmatpush1.bf16.msra.mxu0 %v12263_v41  ;;  %v12360_v55 = vcombine.high %v2307_v48, %v2311_v50  ;;  %v2175_v56 = vld [vmem:[#allocation8 + $0x68] sm:$0xff] }
 0x27c   :  { %8720 = vmatpush1.bf16.msra.mxu1 %v12391_v61  ;;  %v8387_v21 = vpop.f32.mrf.mxu0  ;;  %8680 = vmatprep.subr.bf16.mxu0 %v12256_v62  ;;  %v8428_v31 = vpop.f32.mrf.mxu1  ;;  %v2299_v37 = vld [vmem:[#allocation8 + $0x448] sm:$0xff]  ;;  %v12359_v61 = vcombine.low %v2307_v48, %v2311_v50  ;;  %v12224_v62 = vcombine.high %v2171_v30, %v2175_v56  ;;  %v12223_v9 = vcombine.low %v2171_v30, %v2175_v56 }
 0x27d   :  { %8721 = vmatprep.subr.bf16.mxu1 %v12384_v3  ;;  %v2303_v41 = vld [vmem:[#allocation8 + $0x468] sm:$0xff] }
 0x27e   :  { %v12352_v2 = vcombine.high %v2299_v37, %v2303_v41  ;;  %v2163_v18 = vld [vmem:[#allocation8 + $0x8] sm:$0xff]  ;;  %v12351_v11 = vcombine.low %v2299_v37, %v2303_v41 }
 0x27f   :  { %8681 = vmatpush1.bf16.msra.mxu0 %v12255_v16  ;;  %v2167_v3 = vld [vmem:[#allocation8 + $0x28] sm:$0xff] }
 0x280   :  { %8722 = vmatpush1.bf16.msra.mxu1 %v12383_v22  ;;  %8682 = vmatprep.subr.bf16.mxu0 %v12248_v24  ;;  %v2295_v8 = vld [vmem:[#allocation8 + $0x428] sm:$0xff]  ;;  %v12216_v13 = vcombine.high %v2163_v18, %v2167_v3  ;;  %v12215_v31 = vcombine.low %v2163_v18, %v2167_v3 }
 0x281   :  { %8723 = vmatprep.subr.bf16.mxu1 %v12376_v32  ;;  %v12344_v15 = vcombine.high %v2291_v4, %v2295_v8  ;;  %v2283_v16 = vld [vmem:[#allocation8 + $0x3c8] sm:$0xff]  ;;  %v12343_v32 = vcombine.low %v2291_v4, %v2295_v8 }
 0x282   :  { %v2287_v21 = vld [vmem:[#allocation8 + $0x3e8] sm:$0xff] }
 0x283   :  { %8683 = vmatpush1.bf16.msra.mxu0 %v12247_v39  ;;  %v2411_v22 = vld [vmem:[#allocation8 + $0x7c8] sm:$0xff]  ;;  %v12336_v34 = vcombine.high %v2283_v16, %v2287_v21 }
 0x284   :  { %8724 = vmatpush1.bf16.msra.mxu1 %v12375_v40  ;;  %8684 = vmatprep.subr.bf16.mxu0 %v12240_v42  ;;  %v2415_v24 = vld [vmem:[#allocation8 + $0x7e8] sm:$0xff]  ;;  %v12335_v42 = vcombine.low %v2283_v16, %v2287_v21 }
 0x285   :  { %8725 = vmatprep.subr.bf16.mxu1 %v12368_v43  ;;  %v12464_v35 = vcombine.high %v2411_v22, %v2415_v24  ;;  %v2275_v38 = vld [vmem:[#allocation8 + $0x388] sm:$0xff]  ;;  %v12463_v43 = vcombine.low %v2411_v22, %v2415_v24 }
 0x286   :  { %v2279_v36 = vld [vmem:[#allocation8 + $0x3a8] sm:$0xff] }
 0x287   :  { %8685 = vmatpush1.bf16.msra.mxu0 %v12239_v57  ;;  %v2403_v39 = vld [vmem:[#allocation8 + $0x788] sm:$0xff]  ;;  %v12328_v19 = vcombine.high %v2275_v38, %v2279_v36 }
 0x288   :  { %8726 = vmatpush1.bf16.msra.mxu1 %v12367_v52  ;;  %8686 = vmatprep.subr.bf16.mxu0 %v12232_v53  ;;  %v2407_v40 = vld [vmem:[#allocation8 + $0x7a8] sm:$0xff]  ;;  %v12327_v53 = vcombine.low %v2275_v38, %v2279_v36 }
 0x289   :  { %8727 = vmatprep.subr.bf16.mxu1 %v12360_v55  ;;  %v12456_v47 = vcombine.high %v2403_v39, %v2407_v40  ;;  %v2267_v48 = vld [vmem:[#allocation8 + $0x348] sm:$0xff]  ;;  %v12455_v55 = vcombine.low %v2403_v39, %v2407_v40 }
 0x28a   :  { %v2271_v50 = vld [vmem:[#allocation8 + $0x368] sm:$0xff] }
 0x28b   :  { %8687 = vmatpush1.bf16.msra.mxu0 %v12231_v60  ;;  %v2395_v57 = vld [vmem:[#allocation8 + $0x748] sm:$0xff]  ;;  %v12320_v30 = vcombine.high %v2267_v48, %v2271_v50 }
 0x28c   :  { %8728 = vmatpush1.bf16.msra.mxu1 %v12359_v61  ;;  %8688 = vmatprep.subr.bf16.mxu0 %v12224_v62  ;;  %v2399_v52 = vld [vmem:[#allocation8 + $0x768] sm:$0xff]  ;;  %v12319_v62 = vcombine.low %v2267_v48, %v2271_v50 }
 0x28d   :  { %8729 = vmatprep.subr.bf16.mxu1 %v12352_v2  ;;  %v12448_v56 = vcombine.high %v2395_v57, %v2399_v52  ;;  %v2259_v37 = vld [vmem:[#allocation8 + $0x308] sm:$0xff]  ;;  %v12447_v2 = vcombine.low %v2395_v57, %v2399_v52 }
 0x28e   :  { %v2263_v41 = vld [vmem:[#allocation8 + $0x328] sm:$0xff] }
 0x28f   :  { %8689 = vmatpush1.bf16.msra.mxu0 %v12223_v9  ;;  %v2387_v60 = vld [vmem:[#allocation8 + $0x708] sm:$0xff]  ;;  %v12312_v18 = vcombine.high %v2259_v37, %v2263_v41 }
 0x290   :  { %8730 = vmatpush1.bf16.msra.mxu1 %v12351_v11  ;;  %8690 = vmatprep.subr.bf16.mxu0 %v12216_v13  ;;  %v2391_v61 = vld [vmem:[#allocation8 + $0x728] sm:$0xff]  ;;  %v12311_v13 = vcombine.low %v2259_v37, %v2263_v41 }
 0x291   :  { %8731 = vmatprep.subr.bf16.mxu1 %v12344_v15  ;;  %v12440_v3 = vcombine.high %v2387_v60, %v2391_v61  ;;  %v2251_v4 = vld [vmem:[#allocation8 + $0x2c8] sm:$0xff]  ;;  %v12439_v15 = vcombine.low %v2387_v60, %v2391_v61 }
 0x292   :  { %v2255_v8 = vld [vmem:[#allocation8 + $0x2e8] sm:$0xff] }
 0x293   :  { %8691 = vmatpush1.bf16.msra.mxu0 %v12215_v31  ;;  %v2379_v9 = vld [vmem:[#allocation8 + $0x6c8] sm:$0xff]  ;;  %v12304_v16 = vcombine.high %v2251_v4, %v2255_v8 }
 0x294   :  { %8732 = vmatpush1.bf16.msra.mxu1 %v12343_v32  ;;  %8692 = vmatprep.subr.bf16.mxu0 %v12336_v34  ;;  %v2383_v11 = vld [vmem:[#allocation8 + $0x6e8] sm:$0xff]  ;;  %v12303_v34 = vcombine.low %v2251_v4, %v2255_v8 }
 0x295   :  { %8733 = vmatprep.subr.bf16.mxu1 %v12464_v35  ;;  %v12432_v21 = vcombine.high %v2379_v9, %v2383_v11  ;;  %v2243_v22 = vld [vmem:[#allocation8 + $0x288] sm:$0xff]  ;;  %v12431_v35 = vcombine.low %v2379_v9, %v2383_v11 }
 0x296   :  { %v2247_v24 = vld [vmem:[#allocation8 + $0x2a8] sm:$0xff] }
 0x297   :  { %8693 = vmatpush2.bf16.msra.mxu0 %v12335_v42  ;;  %v2371_v31 = vld [vmem:[#allocation8 + $0x688] sm:$0xff]  ;;  %v12296_v38 = vcombine.high %v2243_v22, %v2247_v24 }
 0x298   :  { %8734 = vmatpush2.bf16.msra.mxu1 %v12463_v43  ;;  %8694 = vmatprep.subr.bf16.mxu0 %v12328_v19  ;;  %v2375_v32 = vld [vmem:[#allocation8 + $0x6a8] sm:$0xff]  ;;  %v12295_v19 = vcombine.low %v2243_v22, %v2247_v24 }
 0x299   :  { %8735 = vmatprep.subr.bf16.mxu1 %v12456_v47  ;;  %v12424_v36 = vcombine.high %v2371_v31, %v2375_v32  ;;  %v2235_v39 = vld [vmem:[#allocation8 + $0x248] sm:$0xff]  ;;  %v12423_v47 = vcombine.low %v2371_v31, %v2375_v32 }
 0x29a   :  { %v2239_v40 = vld [vmem:[#allocation8 + $0x268] sm:$0xff] }
 0x29b   :  { %8695 = vmatpush2.bf16.msra.mxu0 %v12327_v53  ;;  %v2363_v42 = vld [vmem:[#allocation8 + $0x648] sm:$0xff]  ;;  %v12288_v48 = vcombine.high %v2235_v39, %v2239_v40 }
 0x29c   :  { %8736 = vmatpush2.bf16.msra.mxu1 %v12455_v55  ;;  %8696 = vmatprep.subr.bf16.mxu0 %v12320_v30  ;;  %v2367_v43 = vld [vmem:[#allocation8 + $0x668] sm:$0xff]  ;;  %v12287_v30 = vcombine.low %v2235_v39, %v2239_v40 }
 0x29d   :  { %8737 = vmatprep.subr.bf16.mxu1 %v12448_v56  ;;  %v12416_v50 = vcombine.high %v2363_v42, %v2367_v43  ;;  %v2227_v57 = vld [vmem:[#allocation8 + $0x208] sm:$0xff]  ;;  %v12415_v56 = vcombine.low %v2363_v42, %v2367_v43 }
 0x29e   :  { %v2231_v52 = vld [vmem:[#allocation8 + $0x228] sm:$0xff] }
 0x29f   :  { %8697 = vmatpush2.bf16.msra.mxu0 %v12319_v62  ;;  %v2355_v53 = vld [vmem:[#allocation8 + $0x608] sm:$0xff]  ;;  %v12280_v37 = vcombine.high %v2227_v57, %v2231_v52 }
 0x2a0   :  { %8738 = vmatpush2.bf16.msra.mxu1 %v12447_v2  ;;  %8698 = vmatprep.subr.bf16.mxu0 %v12312_v18  ;;  %v2359_v55 = vld [vmem:[#allocation8 + $0x628] sm:$0xff]  ;;  %v12279_v18 = vcombine.low %v2227_v57, %v2231_v52 }
 0x2a1   :  { %8739 = vmatprep.subr.bf16.mxu1 %v12440_v3  ;;  %v12408_v41 = vcombine.high %v2355_v53, %v2359_v55  ;;  %v2475_v60 = vld [vmem:[#allocation8 + $0x9c8] sm:$0xff]  ;;  %v12407_v3 = vcombine.low %v2355_v53, %v2359_v55 }
 0x2a2   :  { %v2479_v61 = vld [vmem:[#allocation8 + $0x9e8] sm:$0xff] }
 0x2a3   :  { %8699 = vmatpush2.bf16.msra.mxu0 %v12311_v13  ;;  %v2603_v62 = vld [vmem:[#allocation8 + $0xdc8] sm:$0xff]  ;;  %v12528_v4 = vcombine.high %v2475_v60, %v2479_v61  ;;  %v12527_v13 = vcombine.low %v2475_v60, %v2479_v61 }
 0x2a4   :  { %8740 = vmatpush2.bf16.msra.mxu1 %v12439_v15  ;;  %8700 = vmatprep.subr.bf16.mxu0 %v12304_v16  ;;  %v2607_v2 = vld [vmem:[#allocation8 + $0xde8] sm:$0xff] }
 0x2a5   :  { %8741 = vmatprep.subr.bf16.mxu1 %v12432_v21  ;;  %v12656_v8 = vcombine.high %v2603_v62, %v2607_v2  ;;  %v2467_v9 = vld [vmem:[#allocation8 + $0x988] sm:$0xff]  ;;  %v12655_v21 = vcombine.low %v2603_v62, %v2607_v2 }
 0x2a6   :  { %v2471_v11 = vld [vmem:[#allocation8 + $0x9a8] sm:$0xff] }
 0x2a7   :  { %8701 = vmatpush2.bf16.msra.mxu0 %v12303_v34  ;;  %v2595_v15 = vld [vmem:[#allocation8 + $0xd88] sm:$0xff]  ;;  %v12520_v22 = vcombine.high %v2467_v9, %v2471_v11  ;;  %v12519_v40 = vcombine.low %v2467_v9, %v2471_v11 }
 0x2a8   :  { %8742 = vmatpush2.bf16.msra.mxu1 %v12431_v35  ;;  %8702 = vmatprep.subr.bf16.mxu0 %v12296_v38  ;;  %v2599_v16 = vld [vmem:[#allocation8 + $0xda8] sm:$0xff] }
 0x2a9   :  { %8743 = vmatprep.subr.bf16.mxu1 %v12424_v36  ;;  %v2459_v24 = vld [vmem:[#allocation8 + $0x948] sm:$0xff]  ;;  %v12648_v34 = vcombine.high %v2595_v15, %v2599_v16  ;;  %v12647_v43 = vcombine.low %v2595_v15, %v2599_v16 }
 0x2aa   :  { %v2463_v31 = vld [vmem:[#allocation8 + $0x968] sm:$0xff] }
 0x2ab   :  { %8703 = vmatpush2.bf16.msra.mxu0 %v12295_v19  ;;  %v2587_v35 = vld [vmem:[#allocation8 + $0xd48] sm:$0xff]  ;;  %v12512_v19 = vcombine.high %v2459_v24, %v2463_v31 }
 0x2ac   :  { %8744 = vmatpush2.bf16.msra.mxu1 %v12423_v47  ;;  %8704 = vmatprep.subr.bf16.mxu0 %v12288_v48  ;;  %v2591_v38 = vld [vmem:[#allocation8 + $0xd68] sm:$0xff] }
 0x2ad   :  { %8745 = vmatprep.subr.bf16.mxu1 %v12416_v50  ;;  %v2451_v57 = vld [vmem:[#allocation8 + $0x908] sm:$0xff]  ;;  %v12639_v61 = vcombine.low %v2587_v35, %v2591_v38 }
 0x2ae   :  { %v2455_v52 = vld [vmem:[#allocation8 + $0x928] sm:$0xff] }
 0x2af   :  { %8705 = vmatpush2.bf16.msra.mxu0 %v12287_v30  ;;  %v2579_v55 = vld [vmem:[#allocation8 + $0xd08] sm:$0xff]  ;;  %v12504_v62 = vcombine.high %v2451_v57, %v2455_v52  ;;  %v12503_v9 = vcombine.low %v2451_v57, %v2455_v52 }
 0x2b0   :  { %8746 = vmatpush2.bf16.msra.mxu1 %v12415_v56  ;;  %8706 = vmatprep.subr.bf16.mxu0 %v12280_v37  ;;  %v2583_v30 = vld [vmem:[#allocation8 + $0xd28] sm:$0xff] }
 0x2b1   :  { %8747 = vmatprep.subr.bf16.mxu1 %v12408_v41  ;;  %v12511_v41 = vcombine.low %v2459_v24, %v2463_v31  ;;  %v12632_v2 = vcombine.high %v2579_v55, %v2583_v30  ;;  %v12631_v11 = vcombine.low %v2579_v55, %v2583_v30  ;;  %v2435_v16 = vld [vmem:[#allocation8 + $0x888] sm:$0xff] }
 0x2b2   :  { %v2567_v24 = vld [vmem:[#allocation8 + $0xca8] sm:$0xff] }
 0x2b3   :  { %8707 = vmatpush2.bf16.msra.mxu0 %v12279_v18  ;;  %v2443_v18 = vld [vmem:[#allocation8 + $0x8c8] sm:$0xff] }
 0x2b4   :  { %8748 = vmatpush2.bf16.msra.mxu1 %v12407_v3  ;;  %8758 = vmatprep.subr.bf16.mxu0 %v12528_v4  ;;  %v2447_v3 = vld [vmem:[#allocation8 + $0x8e8] sm:$0xff] }
 0x2b5   :  { %8799 = vmatprep.subr.bf16.mxu1 %v12656_v8  ;;  %v2571_v4 = vld [vmem:[#allocation8 + $0xcc8] sm:$0xff]  ;;  %v12495_v31 = vcombine.low %v2443_v18, %v2447_v3 }
 0x2b6   :  { %v8464_v32 = vpop.f32.mrf.mxu0  ;;  %8709 = vmatmul.mubr.bf16.vlgmr.msra.gmra.mxu0 %v14377_v10  ;;  %v8505_v39 = vpop.f32.mrf.mxu1  ;;  %v2575_v8 = vld [vmem:[#allocation8 + $0xce8] sm:$0xff] }
 0x2b7   :  { %v8465_v36 = vadd.f32 %v8464_v32, %v14472_v28  ;;  %8750 = vmatmul.mubr.bf16.vlgmr.msra.gmra.mxu1 %v14379_v14  ;;  %8759 = vmatpush1.bf16.msra.mxu0 %v12527_v13  ;;  %v12640_v28 = vcombine.high %v2587_v35, %v2591_v38  ;;  %v12496_v13 = vcombine.high %v2443_v18, %v2447_v3  ;;  %v2427_v38 = vld [vmem:[#allocation8 + $0x848] sm:$0xff] }
 0x2b8   :  { %8790 = vmatprep.mubr.bf16.mxu0 %v14391_v54  ;;  %8800 = vmatpush1.bf16.msra.mxu1 %v12655_v21  ;;  %v8466_v42 = vpop.f32.mrf.mxu0  ;;  %v8507_v50 = vpop.f32.mrf.mxu1  ;;  %v12624_v15 = vcombine.high %v2571_v4, %v2575_v8  ;;  %v2439_v21 = vld [vmem:[#allocation8 + $0x8a8] sm:$0xff]  ;;  %v12623_v32 = vcombine.low %v2571_v4, %v2575_v8 }
 0x2b9   :  { %v14481_v47 = vadd.f32 %v8505_v39, %v8465_v36  ;;  %8831 = vmatprep.mubr.bf16.mxu1 %v14393_v59  ;;  %v8467_v48 = vadd.f32 %v8466_v42, %v14475_v58  ;;  %8760 = vmatprep.subr.bf16.mxu0 %v12520_v22  ;;  %v2563_v22 = vld [vmem:[#allocation8 + $0xc88] sm:$0xff]  ;;  %v12487_v42 = vcombine.low %v2435_v16, %v2439_v21 }
 0x2ba   :  { %v8468_v53 = vpop.f32.mrf.mxu0  ;;  %8801 = vmatprep.subr.bf16.mxu1 %v12648_v34  ;;  %v8509_v37 = vpop.f32.mrf.mxu1  ;;  %v12488_v34 = vcombine.high %v2435_v16, %v2439_v21  ;;  %v12616_v35 = vcombine.high %v2563_v22, %v2567_v24  ;;  %v2431_v36 = vld [vmem:[#allocation8 + $0x868] sm:$0xff] }
 0x2bb   :  { %v14485_v56 = vadd.f32 %v8507_v50, %v8467_v48  ;;  %8761 = vmatpush1.bf16.msra.mxu0 %v12519_v40  ;;  %v2555_v39 = vld [vmem:[#allocation8 + $0xc48] sm:$0xff]  ;;  %v12479_v53 = vcombine.low %v2427_v38, %v2431_v36 }
 0x2bc   :  { %8802 = vmatpush1.bf16.msra.mxu1 %v12647_v43  ;;  %v8469_v60 = vpop.f32.mrf.mxu0  ;;  %8762 = vmatprep.subr.bf16.mxu0 %v12512_v19  ;;  %v8510_v58 = vpop.f32.mrf.mxu1  ;;  %v2559_v40 = vld [vmem:[#allocation8 + $0xc68] sm:$0xff]  ;;  %v12615_v43 = vcombine.low %v2563_v22, %v2567_v24  ;;  %v12480_v19 = vcombine.high %v2427_v38, %v2431_v36 }
 0x2bd   :  { %8803 = vmatprep.subr.bf16.mxu1 %v12640_v28  ;;  %v12608_v48 = vcombine.high %v2555_v39, %v2559_v40  ;;  %v2419_v50 = vld [vmem:[#allocation8 + $0x808] sm:$0xff]  ;;  %v12607_v55 = vcombine.low %v2555_v39, %v2559_v40 }
 0x2be   :  { %v2423_v28 = vld [vmem:[#allocation8 + $0x828] sm:$0xff] }
 0x2bf   :  { %8763 = vmatpush1.bf16.msra.mxu0 %v12511_v41  ;;  %v2547_v57 = vld [vmem:[#allocation8 + $0xc08] sm:$0xff]  ;;  %v12472_v30 = vcombine.high %v2419_v50, %v2423_v28  ;;  %v12471_v58 = vcombine.low %v2419_v50, %v2423_v28 }
 0x2c0   :  { %8804 = vmatpush1.bf16.msra.mxu1 %v12639_v61  ;;  %8764 = vmatprep.subr.bf16.mxu0 %v12504_v62  ;;  %v2551_v52 = vld [vmem:[#allocation8 + $0xc28] sm:$0xff] }
 0x2c1   :  { %8805 = vmatprep.subr.bf16.mxu1 %v12632_v2  ;;  %v12600_v37 = vcombine.high %v2547_v57, %v2551_v52  ;;  %v2539_v41 = vld [vmem:[#allocation8 + $0xbc8] sm:$0xff]  ;;  %v12599_v2 = vcombine.low %v2547_v57, %v2551_v52 }
 0x2c2   :  { %v2543_v60 = vld [vmem:[#allocation8 + $0xbe8] sm:$0xff] }
 0x2c3   :  { %8765 = vmatpush1.bf16.msra.mxu0 %v12503_v9  ;;  %v2667_v61 = vld [vmem:[#allocation8 + $0xfc8] sm:$0xff]  ;;  %v12592_v18 = vcombine.high %v2539_v41, %v2543_v60 }
 0x2c4   :  { %8806 = vmatpush1.bf16.msra.mxu1 %v12631_v11  ;;  %8766 = vmatprep.subr.bf16.mxu0 %v12496_v13  ;;  %v2671_v62 = vld [vmem:[#allocation8 + $0xfe8] sm:$0xff]  ;;  %v12591_v13 = vcombine.low %v2539_v41, %v2543_v60 }
 0x2c5   :  { %8807 = vmatprep.subr.bf16.mxu1 %v12624_v15  ;;  %v12720_v3 = vcombine.high %v2667_v61, %v2671_v62  ;;  %v2531_v4 = vld [vmem:[#allocation8 + $0xb88] sm:$0xff]  ;;  %v12719_v15 = vcombine.low %v2667_v61, %v2671_v62 }
 0x2c6   :  { %v2535_v8 = vld [vmem:[#allocation8 + $0xba8] sm:$0xff] }
 0x2c7   :  { %8767 = vmatpush1.bf16.msra.mxu0 %v12495_v31  ;;  %v2659_v9 = vld [vmem:[#allocation8 + $0xf88] sm:$0xff]  ;;  %v12584_v16 = vcombine.high %v2531_v4, %v2535_v8 }
 0x2c8   :  { %8808 = vmatpush1.bf16.msra.mxu1 %v12623_v32  ;;  %8768 = vmatprep.subr.bf16.mxu0 %v12488_v34  ;;  %v2663_v11 = vld [vmem:[#allocation8 + $0xfa8] sm:$0xff]  ;;  %v12583_v34 = vcombine.low %v2531_v4, %v2535_v8 }
 0x2c9   :  { %8809 = vmatprep.subr.bf16.mxu1 %v12616_v35  ;;  %v12712_v21 = vcombine.high %v2659_v9, %v2663_v11  ;;  %v2523_v22 = vld [vmem:[#allocation8 + $0xb48] sm:$0xff]  ;;  %v12711_v35 = vcombine.low %v2659_v9, %v2663_v11 }
 0x2ca   :  { %v2527_v24 = vld [vmem:[#allocation8 + $0xb68] sm:$0xff] }
 0x2cb   :  { %8769 = vmatpush1.bf16.msra.mxu0 %v12487_v42  ;;  %v2651_v31 = vld [vmem:[#allocation8 + $0xf48] sm:$0xff]  ;;  %v12576_v38 = vcombine.high %v2523_v22, %v2527_v24 }
 0x2cc   :  { %8810 = vmatpush1.bf16.msra.mxu1 %v12615_v43  ;;  %8770 = vmatprep.subr.bf16.mxu0 %v12480_v19  ;;  %v2655_v32 = vld [vmem:[#allocation8 + $0xf68] sm:$0xff]  ;;  %v12575_v19 = vcombine.low %v2523_v22, %v2527_v24 }
 0x2cd   :  { %8811 = vmatprep.subr.bf16.mxu1 %v12608_v48  ;;  %v12704_v36 = vcombine.high %v2651_v31, %v2655_v32  ;;  %v2515_v39 = vld [vmem:[#allocation8 + $0xb08] sm:$0xff]  ;;  %v12703_v48 = vcombine.low %v2651_v31, %v2655_v32 }
 0x2ce   :  { %v2519_v40 = vld [vmem:[#allocation8 + $0xb28] sm:$0xff] }
 0x2cf   :  { %8771 = vmatpush1.bf16.msra.mxu0 %v12479_v53  ;;  %v2643_v42 = vld [vmem:[#allocation8 + $0xf08] sm:$0xff]  ;;  %v12568_v50 = vcombine.high %v2515_v39, %v2519_v40 }
 0x2d0   :  { %8812 = vmatpush1.bf16.msra.mxu1 %v12607_v55  ;;  %8772 = vmatprep.subr.bf16.mxu0 %v12472_v30  ;;  %v2647_v43 = vld [vmem:[#allocation8 + $0xf28] sm:$0xff]  ;;  %v12567_v30 = vcombine.low %v2515_v39, %v2519_v40 }
 0x2d1   :  { %8813 = vmatprep.subr.bf16.mxu1 %v12600_v37  ;;  %v12696_v28 = vcombine.high %v2643_v42, %v2647_v43  ;;  %v2507_v57 = vld [vmem:[#allocation8 + $0xac8] sm:$0xff]  ;;  %v12695_v37 = vcombine.low %v2643_v42, %v2647_v43 }
 0x2d2   :  { %v2511_v52 = vld [vmem:[#allocation8 + $0xae8] sm:$0xff] }
 0x2d3   :  { %8773 = vmatpush1.bf16.msra.mxu0 %v12471_v58  ;;  %v2635_v53 = vld [vmem:[#allocation8 + $0xec8] sm:$0xff]  ;;  %v12560_v41 = vcombine.high %v2507_v57, %v2511_v52 }
 0x2d4   :  { %8814 = vmatpush1.bf16.msra.mxu1 %v12599_v2  ;;  %8774 = vmatprep.subr.bf16.mxu0 %v12592_v18  ;;  %v2639_v55 = vld [vmem:[#allocation8 + $0xee8] sm:$0xff]  ;;  %v12559_v18 = vcombine.low %v2507_v57, %v2511_v52 }
 0x2d5   :  { %8815 = vmatprep.subr.bf16.mxu1 %v12720_v3  ;;  %v12688_v60 = vcombine.high %v2635_v53, %v2639_v55  ;;  %v2499_v61 = vld [vmem:[#allocation8 + $0xa88] sm:$0xff]  ;;  %v12687_v3 = vcombine.low %v2635_v53, %v2639_v55 }
 0x2d6   :  { %v2503_v62 = vld [vmem:[#allocation8 + $0xaa8] sm:$0xff] }
 0x2d7   :  { %8775 = vmatpush2.bf16.msra.mxu0 %v12591_v13  ;;  %v2627_v58 = vld [vmem:[#allocation8 + $0xe88] sm:$0xff]  ;;  %v12552_v4 = vcombine.high %v2499_v61, %v2503_v62 }
 0x2d8   :  { %8816 = vmatpush2.bf16.msra.mxu1 %v12719_v15  ;;  %8776 = vmatprep.subr.bf16.mxu0 %v12584_v16  ;;  %v2631_v2 = vld [vmem:[#allocation8 + $0xea8] sm:$0xff]  ;;  %v12551_v16 = vcombine.low %v2499_v61, %v2503_v62 }
 0x2d9   :  { %8817 = vmatprep.subr.bf16.mxu1 %v12712_v21  ;;  %v12680_v8 = vcombine.high %v2627_v58, %v2631_v2  ;;  %v2491_v9 = vld [vmem:[#allocation8 + $0xa48] sm:$0xff]  ;;  %v12679_v21 = vcombine.low %v2627_v58, %v2631_v2 }
 0x2da   :  { %v2495_v11 = vld [vmem:[#allocation8 + $0xa68] sm:$0xff] }
 0x2db   :  { %8777 = vmatpush2.bf16.msra.mxu0 %v12583_v34  ;;  %v2619_v13 = vld [vmem:[#allocation8 + $0xe48] sm:$0xff]  ;;  %v12544_v22 = vcombine.high %v2491_v9, %v2495_v11 }
 0x2dc   :  { %8818 = vmatpush2.bf16.msra.mxu1 %v12711_v35  ;;  %8778 = vmatprep.subr.bf16.mxu0 %v12576_v38  ;;  %v2623_v15 = vld [vmem:[#allocation8 + $0xe68] sm:$0xff]  ;;  %v12543_v38 = vcombine.low %v2491_v9, %v2495_v11 }
 0x2dd   :  { %8819 = vmatprep.subr.bf16.mxu1 %v12704_v36  ;;  %v12672_v24 = vcombine.high %v2619_v13, %v2623_v15  ;;  %v2483_v31 = vld [vmem:[#allocation8 + $0xa08] sm:$0xff]  ;;  %v12671_v36 = vcombine.low %v2619_v13, %v2623_v15 }
 0x2de   :  { %v2487_v32 = vld [vmem:[#allocation8 + $0xa28] sm:$0xff] }
 0x2df   :  { %8779 = vmatpush2.bf16.msra.mxu0 %v12575_v19  ;;  %v2611_v34 = vld [vmem:[#allocation8 + $0xe08] sm:$0xff]  ;;  %v12536_v39 = vcombine.high %v2483_v31, %v2487_v32 }
 0x2e0   :  { %8820 = vmatpush2.bf16.msra.mxu1 %v12703_v48  ;;  %8780 = vmatprep.subr.bf16.mxu0 %v12568_v50  ;;  %v2615_v35 = vld [vmem:[#allocation8 + $0xe28] sm:$0xff]  ;;  %v12535_v50 = vcombine.low %v2483_v31, %v2487_v32 }
 0x2e1   :  { %8821 = vmatprep.subr.bf16.mxu1 %v12696_v28  ;;  %v12664_v40 = vcombine.high %v2611_v34, %v2615_v35  ;;  %v2731_v42 = vld [vmem:[#allocation8 + $0x11c8] sm:$0xff]  ;;  %v12663_v28 = vcombine.low %v2611_v34, %v2615_v35 }
 0x2e2   :  { %v2735_v43 = vld [vmem:[#allocation8 + $0x11e8] sm:$0xff] }
 0x2e3   :  { %8781 = vmatpush2.bf16.msra.mxu0 %v12567_v30  ;;  %v2859_v19 = vld [vmem:[#allocation8 + $0x15c8] sm:$0xff]  ;;  %v12784_v57 = vcombine.high %v2731_v42, %v2735_v43  ;;  %v12783_v30 = vcombine.low %v2731_v42, %v2735_v43 }
 0x2e4   :  { %8822 = vmatpush2.bf16.msra.mxu1 %v12695_v37  ;;  %8782 = vmatprep.subr.bf16.mxu0 %v12560_v41  ;;  %v2863_v48 = vld [vmem:[#allocation8 + $0x15e8] sm:$0xff] }
 0x2e5   :  { %8823 = vmatprep.subr.bf16.mxu1 %v12688_v60  ;;  %v12912_v52 = vcombine.high %v2859_v19, %v2863_v48  ;;  %v2723_v53 = vld [vmem:[#allocation8 + $0x1188] sm:$0xff]  ;;  %v12911_v60 = vcombine.low %v2859_v19, %v2863_v48 }
 0x2e6   :  { %v2727_v55 = vld [vmem:[#allocation8 + $0x11a8] sm:$0xff] }
 0x2e7   :  { %8783 = vmatpush2.bf16.msra.mxu0 %v12559_v18  ;;  %v2851_v37 = vld [vmem:[#allocation8 + $0x1588] sm:$0xff]  ;;  %v12776_v61 = vcombine.high %v2723_v53, %v2727_v55  ;;  %v12775_v11 = vcombine.low %v2723_v53, %v2727_v55 }
 0x2e8   :  { %8824 = vmatpush2.bf16.msra.mxu1 %v12687_v3  ;;  %8784 = vmatprep.subr.bf16.mxu0 %v12552_v4  ;;  %v2855_v41 = vld [vmem:[#allocation8 + $0x15a8] sm:$0xff] }
 0x2e9   :  { %8825 = vmatprep.subr.bf16.mxu1 %v12680_v8  ;;  %v2715_v62 = vld [vmem:[#allocation8 + $0x1148] sm:$0xff]  ;;  %v12904_v18 = vcombine.high %v2851_v37, %v2855_v41  ;;  %v12903_v15 = vcombine.low %v2851_v37, %v2855_v41 }
 0x2ea   :  { %v2719_v58 = vld [vmem:[#allocation8 + $0x1168] sm:$0xff] }
 0x2eb   :  { %8785 = vmatpush2.bf16.msra.mxu0 %v12551_v16  ;;  %v2843_v3 = vld [vmem:[#allocation8 + $0x1548] sm:$0xff]  ;;  %v12768_v16 = vcombine.high %v2715_v62, %v2719_v58 }
 0x2ec   :  { %8826 = vmatpush2.bf16.msra.mxu1 %v12679_v21  ;;  %8786 = vmatprep.subr.bf16.mxu0 %v12544_v22  ;;  %v2847_v4 = vld [vmem:[#allocation8 + $0x1568] sm:$0xff] }
 0x2ed   :  { %8827 = vmatprep.subr.bf16.mxu1 %v12672_v24  ;;  %v2707_v31 = vld [vmem:[#allocation8 + $0x1108] sm:$0xff]  ;;  %v12895_v43 = vcombine.low %v2843_v3, %v2847_v4 }
 0x2ee   :  { %v2711_v32 = vld [vmem:[#allocation8 + $0x1128] sm:$0xff] }
 0x2ef   :  { %8787 = vmatpush2.bf16.msra.mxu0 %v12543_v38  ;;  %v2835_v35 = vld [vmem:[#allocation8 + $0x1508] sm:$0xff]  ;;  %v12760_v19 = vcombine.high %v2707_v31, %v2711_v32  ;;  %v12759_v53 = vcombine.low %v2707_v31, %v2711_v32 }
 0x2f0   :  { %8828 = vmatpush2.bf16.msra.mxu1 %v12671_v36  ;;  %8788 = vmatprep.subr.bf16.mxu0 %v12536_v39  ;;  %v2839_v38 = vld [vmem:[#allocation8 + $0x1528] sm:$0xff] }
 0x2f1   :  { %8829 = vmatprep.subr.bf16.mxu1 %v12664_v40  ;;  %v12767_v40 = vcombine.low %v2715_v62, %v2719_v58  ;;  %v12888_v48 = vcombine.high %v2835_v35, %v2839_v38  ;;  %v12887_v55 = vcombine.low %v2835_v35, %v2839_v38  ;;  %v2691_v41 = vld [vmem:[#allocation8 + $0x1088] sm:$0xff] }
 0x2f2   :  { %v2823_v62 = vld [vmem:[#allocation8 + $0x14a8] sm:$0xff] }
 0x2f3   :  { %8789 = vmatpush2.bf16.msra.mxu0 %v12535_v50  ;;  %v2699_v50 = vld [vmem:[#allocation8 + $0x10c8] sm:$0xff] }
 0x2f4   :  { %8830 = vmatpush2.bf16.msra.mxu1 %v12663_v28  ;;  %8840 = vmatprep.subr.bf16.mxu0 %v12784_v57  ;;  %v2703_v28 = vld [vmem:[#allocation8 + $0x10e8] sm:$0xff] }
 0x2f5   :  { %8881 = vmatprep.subr.bf16.mxu1 %v12912_v52  ;;  %v2827_v57 = vld [vmem:[#allocation8 + $0x14c8] sm:$0xff]  ;;  %v12751_v58 = vcombine.low %v2699_v50, %v2703_v28 }
 0x2f6   :  { %v8546_v2 = vpop.f32.mrf.mxu0  ;;  %8791 = vmatmul.mubr.bf16.vlgmr.msra.gmra.mxu0 %v14409_v17  ;;  %v8587_v9 = vpop.f32.mrf.mxu1  ;;  %v2831_v52 = vld [vmem:[#allocation8 + $0x14e8] sm:$0xff] }
 0x2f7   :  { %v8547_v8 = vadd.f32 %v8546_v2, %v14481_v47  ;;  %8832 = vmatmul.mubr.bf16.vlgmr.msra.gmra.mxu1 %v14413_v29  ;;  %8841 = vmatpush1.bf16.msra.mxu0 %v12783_v30  ;;  %v12896_v47 = vcombine.high %v2843_v3, %v2847_v4  ;;  %v12752_v30 = vcombine.high %v2699_v50, %v2703_v28  ;;  %v2683_v4 = vld [vmem:[#allocation8 + $0x1048] sm:$0xff] }
 0x2f8   :  { %8872 = vmatprep.mubr.bf16.mxu0 %v14425_v63  ;;  %8882 = vmatpush1.bf16.msra.mxu1 %v12911_v60  ;;  %v8548_v13 = vpop.f32.mrf.mxu0  ;;  %v8589_v24 = vpop.f32.mrf.mxu1  ;;  %v12880_v37 = vcombine.high %v2827_v57, %v2831_v52  ;;  %v2695_v60 = vld [vmem:[#allocation8 + $0x10a8] sm:$0xff]  ;;  %v12879_v2 = vcombine.low %v2827_v57, %v2831_v52 }
 0x2f9   :  { %v14491_v21 = vadd.f32 %v8587_v9, %v8547_v8  ;;  %8913 = vmatprep.mubr.bf16.mxu1 %v14427_v7  ;;  %v8549_v22 = vadd.f32 %v8548_v13, %v14485_v56  ;;  %8842 = vmatprep.subr.bf16.mxu0 %v12776_v61  ;;  %v2819_v61 = vld [vmem:[#allocation8 + $0x1488] sm:$0xff]  ;;  %v12743_v13 = vcombine.low %v2691_v41, %v2695_v60 }
 0x2fa   :  { %v8550_v34 = vpop.f32.mrf.mxu0  ;;  %8883 = vmatprep.subr.bf16.mxu1 %v12904_v18  ;;  %v8591_v39 = vpop.f32.mrf.mxu1  ;;  %v12744_v18 = vcombine.high %v2691_v41, %v2695_v60  ;;  %v12872_v3 = vcombine.high %v2819_v61, %v2823_v62  ;;  %v2687_v8 = vld [vmem:[#allocation8 + $0x1068] sm:$0xff] }
 0x2fb   :  { %v14495_v36 = vadd.f32 %v8589_v24, %v8549_v22  ;;  %8843 = vmatpush1.bf16.msra.mxu0 %v12775_v11  ;;  %v2811_v9 = vld [vmem:[#allocation8 + $0x1448] sm:$0xff]  ;;  %v12735_v34 = vcombine.low %v2683_v4, %v2687_v8 }
 0x2fc   :  { %8884 = vmatpush1.bf16.msra.mxu1 %v12903_v15  ;;  %v8551_v42 = vpop.f32.mrf.mxu0  ;;  %8844 = vmatprep.subr.bf16.mxu0 %v12768_v16  ;;  %v8592_v56 = vpop.f32.mrf.mxu1  ;;  %v2815_v11 = vld [vmem:[#allocation8 + $0x1468] sm:$0xff]  ;;  %v12871_v15 = vcombine.low %v2819_v61, %v2823_v62  ;;  %v12736_v16 = vcombine.high %v2683_v4, %v2687_v8 }
 0x2fd   :  { %8885 = vmatprep.subr.bf16.mxu1 %v12896_v47  ;;  %v12864_v22 = vcombine.high %v2811_v9, %v2815_v11  ;;  %v2675_v24 = vld [vmem:[#allocation8 + $0x1008] sm:$0xff]  ;;  %v12863_v35 = vcombine.low %v2811_v9, %v2815_v11 }
 0x2fe   :  { %v2679_v47 = vld [vmem:[#allocation8 + $0x1028] sm:$0xff] }
 0x2ff   :  { %8845 = vmatpush1.bf16.msra.mxu0 %v12767_v40  ;;  %v2803_v31 = vld [vmem:[#allocation8 + $0x1408] sm:$0xff]  ;;  %v12728_v38 = vcombine.high %v2675_v24, %v2679_v47  ;;  %v12727_v56 = vcombine.low %v2675_v24, %v2679_v47 }
 0x300   :  { %8886 = vmatpush1.bf16.msra.mxu1 %v12895_v43  ;;  %8846 = vmatprep.subr.bf16.mxu0 %v12760_v19  ;;  %v2807_v32 = vld [vmem:[#allocation8 + $0x1428] sm:$0xff] }
 0x301   :  { %8887 = vmatprep.subr.bf16.mxu1 %v12888_v48  ;;  %v12856_v39 = vcombine.high %v2803_v31, %v2807_v32  ;;  %v2795_v40 = vld [vmem:[#allocation8 + $0x13c8] sm:$0xff]  ;;  %v12855_v48 = vcombine.low %v2803_v31, %v2807_v32 }
 0x302   :  { %v2799_v42 = vld [vmem:[#allocation8 + $0x13e8] sm:$0xff] }
 0x303   :  { %8847 = vmatpush1.bf16.msra.mxu0 %v12759_v53  ;;  %v2923_v43 = vld [vmem:[#allocation8 + $0x17c8] sm:$0xff]  ;;  %v12848_v50 = vcombine.high %v2795_v40, %v2799_v42 }
 0x304   :  { %8888 = vmatpush1.bf16.msra.mxu1 %v12887_v55  ;;  %8848 = vmatprep.subr.bf16.mxu0 %v12752_v30  ;;  %v2927_v19 = vld [vmem:[#allocation8 + $0x17e8] sm:$0xff]  ;;  %v12847_v30 = vcombine.low %v2795_v40, %v2799_v42 }
 0x305   :  { %8889 = vmatprep.subr.bf16.mxu1 %v12880_v37  ;;  %v12976_v28 = vcombine.high %v2923_v43, %v2927_v19  ;;  %v2787_v57 = vld [vmem:[#allocation8 + $0x1388] sm:$0xff]  ;;  %v12975_v37 = vcombine.low %v2923_v43, %v2927_v19 }
 0x306   :  { %v2791_v52 = vld [vmem:[#allocation8 + $0x13a8] sm:$0xff] }
 0x307   :  { %8849 = vmatpush1.bf16.msra.mxu0 %v12751_v58  ;;  %v2915_v53 = vld [vmem:[#allocation8 + $0x1788] sm:$0xff]  ;;  %v12840_v41 = vcombine.high %v2787_v57, %v2791_v52 }
 0x308   :  { %8890 = vmatpush1.bf16.msra.mxu1 %v12879_v2  ;;  %8850 = vmatprep.subr.bf16.mxu0 %v12744_v18  ;;  %v2919_v55 = vld [vmem:[#allocation8 + $0x17a8] sm:$0xff]  ;;  %v12839_v18 = vcombine.low %v2787_v57, %v2791_v52 }
 0x309   :  { %8891 = vmatprep.subr.bf16.mxu1 %v12872_v3  ;;  %v12968_v60 = vcombine.high %v2915_v53, %v2919_v55  ;;  %v2779_v61 = vld [vmem:[#allocation8 + $0x1348] sm:$0xff]  ;;  %v12967_v3 = vcombine.low %v2915_v53, %v2919_v55 }
 0x30a   :  { %v2783_v62 = vld [vmem:[#allocation8 + $0x1368] sm:$0xff] }
 0x30b   :  { %8851 = vmatpush1.bf16.msra.mxu0 %v12743_v13  ;;  %v2907_v58 = vld [vmem:[#allocation8 + $0x1748] sm:$0xff]  ;;  %v12832_v4 = vcombine.high %v2779_v61, %v2783_v62 }
 0x30c   :  { %8892 = vmatpush1.bf16.msra.mxu1 %v12871_v15  ;;  %8852 = vmatprep.subr.bf16.mxu0 %v12736_v16  ;;  %v2911_v2 = vld [vmem:[#allocation8 + $0x1768] sm:$0xff]  ;;  %v12831_v16 = vcombine.low %v2779_v61, %v2783_v62 }
 0x30d   :  { %8893 = vmatprep.subr.bf16.mxu1 %v12864_v22  ;;  %v12960_v8 = vcombine.high %v2907_v58, %v2911_v2  ;;  %v2771_v9 = vld [vmem:[#allocation8 + $0x1308] sm:$0xff]  ;;  %v12959_v22 = vcombine.low %v2907_v58, %v2911_v2 }
 0x30e   :  { %v2775_v11 = vld [vmem:[#allocation8 + $0x1328] sm:$0xff] }
 0x30f   :  { %8853 = vmatpush1.bf16.msra.mxu0 %v12735_v34  ;;  %v2899_v13 = vld [vmem:[#allocation8 + $0x1708] sm:$0xff]  ;;  %v12824_v24 = vcombine.high %v2771_v9, %v2775_v11 }
 0x310   :  { %8894 = vmatpush1.bf16.msra.mxu1 %v12863_v35  ;;  %8854 = vmatprep.subr.bf16.mxu0 %v12728_v38  ;;  %v2903_v15 = vld [vmem:[#allocation8 + $0x1728] sm:$0xff]  ;;  %v12823_v38 = vcombine.low %v2771_v9, %v2775_v11 }
 0x311   :  { %8895 = vmatprep.subr.bf16.mxu1 %v12856_v39  ;;  %v12952_v47 = vcombine.high %v2899_v13, %v2903_v15  ;;  %v2763_v31 = vld [vmem:[#allocation8 + $0x12c8] sm:$0xff]  ;;  %v12951_v39 = vcombine.low %v2899_v13, %v2903_v15 }
 0x312   :  { %v2767_v32 = vld [vmem:[#allocation8 + $0x12e8] sm:$0xff] }
 0x313   :  { %8855 = vmatpush1.bf16.msra.mxu0 %v12727_v56  ;;  %v2891_v34 = vld [vmem:[#allocation8 + $0x16c8] sm:$0xff]  ;;  %v12816_v40 = vcombine.high %v2763_v31, %v2767_v32 }
 0x314   :  { %8896 = vmatpush1.bf16.msra.mxu1 %v12855_v48  ;;  %8856 = vmatprep.subr.bf16.mxu0 %v12848_v50  ;;  %v2895_v35 = vld [vmem:[#allocation8 + $0x16e8] sm:$0xff]  ;;  %v12815_v50 = vcombine.low %v2763_v31, %v2767_v32 }
 0x315   :  { %8897 = vmatprep.subr.bf16.mxu1 %v12976_v28  ;;  %v12944_v42 = vcombine.high %v2891_v34, %v2895_v35  ;;  %v2755_v43 = vld [vmem:[#allocation8 + $0x1288] sm:$0xff]  ;;  %v12943_v28 = vcombine.low %v2891_v34, %v2895_v35 }
 0x316   :  { %v2759_v19 = vld [vmem:[#allocation8 + $0x12a8] sm:$0xff] }
 0x317   :  { %8857 = vmatpush2.bf16.msra.mxu0 %v12847_v30  ;;  %v2883_v56 = vld [vmem:[#allocation8 + $0x1688] sm:$0xff]  ;;  %v12808_v57 = vcombine.high %v2755_v43, %v2759_v19 }
 0x318   :  { %8898 = vmatpush2.bf16.msra.mxu1 %v12975_v37  ;;  %8858 = vmatprep.subr.bf16.mxu0 %v12840_v41  ;;  %v2887_v48 = vld [vmem:[#allocation8 + $0x16a8] sm:$0xff]  ;;  %v12807_v41 = vcombine.low %v2755_v43, %v2759_v19 }
 0x319   :  { %8899 = vmatprep.subr.bf16.mxu1 %v12968_v60  ;;  %v12936_v52 = vcombine.high %v2883_v56, %v2887_v48  ;;  %v2747_v53 = vld [vmem:[#allocation8 + $0x1248] sm:$0xff]  ;;  %v12935_v60 = vcombine.low %v2883_v56, %v2887_v48 }
 0x31a   :  { %v2751_v55 = vld [vmem:[#allocation8 + $0x1268] sm:$0xff] }
 0x31b   :  { %8859 = vmatpush2.bf16.msra.mxu0 %v12839_v18  ;;  %v2875_v30 = vld [vmem:[#allocation8 + $0x1648] sm:$0xff]  ;;  %v12800_v61 = vcombine.high %v2747_v53, %v2751_v55 }
 0x31c   :  { %8900 = vmatpush2.bf16.msra.mxu1 %v12967_v3  ;;  %8860 = vmatprep.subr.bf16.mxu0 %v12832_v4  ;;  %v2879_v37 = vld [vmem:[#allocation8 + $0x1668] sm:$0xff]  ;;  %v12799_v4 = vcombine.low %v2747_v53, %v2751_v55 }
 0x31d   :  { %8901 = vmatprep.subr.bf16.mxu1 %v12960_v8  ;;  %v12928_v62 = vcombine.high %v2875_v30, %v2879_v37  ;;  %v2739_v58 = vld [vmem:[#allocation8 + $0x1208] sm:$0xff]  ;;  %v12927_v8 = vcombine.low %v2875_v30, %v2879_v37 }
 0x31e   :  { %v2743_v2 = vld [vmem:[#allocation8 + $0x1228] sm:$0xff] }
 0x31f   :  { %8861 = vmatpush2.bf16.msra.mxu0 %v12831_v16  ;;  %v2867_v18 = vld [vmem:[#allocation8 + $0x1608] sm:$0xff]  ;;  %v12792_v9 = vcombine.high %v2739_v58, %v2743_v2 }
 0x320   :  { %8902 = vmatpush2.bf16.msra.mxu1 %v12959_v22  ;;  %8862 = vmatprep.subr.bf16.mxu0 %v12824_v24  ;;  %v2871_v3 = vld [vmem:[#allocation8 + $0x1628] sm:$0xff]  ;;  %v12791_v24 = vcombine.low %v2739_v58, %v2743_v2 }
 0x321   :  { %8903 = vmatprep.subr.bf16.mxu1 %v12952_v47  ;;  %v12920_v11 = vcombine.high %v2867_v18, %v2871_v3  ;;  %v2987_v13 = vld [vmem:[#allocation8 + $0x19c8] sm:$0xff]  ;;  %v12919_v47 = vcombine.low %v2867_v18, %v2871_v3 }
 0x322   :  { %v2991_v15 = vld [vmem:[#allocation8 + $0x19e8] sm:$0xff] }
 0x323   :  { %8863 = vmatpush2.bf16.msra.mxu0 %v12823_v38  ;;  %v3115_v16 = vld [vmem:[#allocation8 + $0x1dc8] sm:$0xff]  ;;  %v13040_v31 = vcombine.high %v2987_v13, %v2991_v15  ;;  %v13039_v38 = vcombine.low %v2987_v13, %v2991_v15 }
 0x324   :  { %8904 = vmatpush2.bf16.msra.mxu1 %v12951_v39  ;;  %8864 = vmatprep.subr.bf16.mxu0 %v12816_v40  ;;  %v3119_v22 = vld [vmem:[#allocation8 + $0x1de8] sm:$0xff] }
 0x325   :  { %8905 = vmatprep.subr.bf16.mxu1 %v12944_v42  ;;  %v13168_v32 = vcombine.high %v3115_v16, %v3119_v22  ;;  %v2979_v34 = vld [vmem:[#allocation8 + $0x1988] sm:$0xff]  ;;  %v13167_v42 = vcombine.low %v3115_v16, %v3119_v22 }
 0x326   :  { %v2983_v35 = vld [vmem:[#allocation8 + $0x19a8] sm:$0xff] }
 0x327   :  { %8865 = vmatpush2.bf16.msra.mxu0 %v12815_v50  ;;  %v3107_v39 = vld [vmem:[#allocation8 + $0x1d88] sm:$0xff]  ;;  %v13032_v43 = vcombine.high %v2979_v34, %v2983_v35  ;;  %v13031_v55 = vcombine.low %v2979_v34, %v2983_v35 }
 0x328   :  { %8906 = vmatpush2.bf16.msra.mxu1 %v12943_v28  ;;  %8866 = vmatprep.subr.bf16.mxu0 %v12808_v57  ;;  %v3111_v40 = vld [vmem:[#allocation8 + $0x1da8] sm:$0xff] }
 0x329   :  { %8907 = vmatprep.subr.bf16.mxu1 %v12936_v52  ;;  %v2971_v19 = vld [vmem:[#allocation8 + $0x1948] sm:$0xff]  ;;  %v13160_v50 = vcombine.high %v3107_v39, %v3111_v40  ;;  %v13159_v37 = vcombine.low %v3107_v39, %v3111_v40 }
 0x32a   :  { %v2975_v56 = vld [vmem:[#allocation8 + $0x1968] sm:$0xff] }
 0x32b   :  { %8867 = vmatpush2.bf16.msra.mxu0 %v12807_v41  ;;  %v3099_v28 = vld [vmem:[#allocation8 + $0x1d48] sm:$0xff]  ;;  %v13024_v41 = vcombine.high %v2971_v19, %v2975_v56 }
 0x32c   :  { %8908 = vmatpush2.bf16.msra.mxu1 %v12935_v60  ;;  %8868 = vmatprep.subr.bf16.mxu0 %v12800_v61  ;;  %v3103_v57 = vld [vmem:[#allocation8 + $0x1d68] sm:$0xff] }
 0x32d   :  { %8909 = vmatprep.subr.bf16.mxu1 %v12928_v62  ;;  %v2963_v58 = vld [vmem:[#allocation8 + $0x1908] sm:$0xff]  ;;  %v13151_v15 = vcombine.low %v3099_v28, %v3103_v57 }
 0x32e   :  { %v2967_v2 = vld [vmem:[#allocation8 + $0x1928] sm:$0xff] }
 0x32f   :  { %8869 = vmatpush2.bf16.msra.mxu0 %v12799_v4  ;;  %v3091_v3 = vld [vmem:[#allocation8 + $0x1d08] sm:$0xff]  ;;  %v13016_v16 = vcombine.high %v2963_v58, %v2967_v2  ;;  %v13015_v34 = vcombine.low %v2963_v58, %v2967_v2 }
 0x330   :  { %8910 = vmatpush2.bf16.msra.mxu1 %v12927_v8  ;;  %8870 = vmatprep.subr.bf16.mxu0 %v12792_v9  ;;  %v3095_v4 = vld [vmem:[#allocation8 + $0x1d28] sm:$0xff] }
 0x331   :  { %8911 = vmatprep.subr.bf16.mxu1 %v12920_v11  ;;  %v13023_v11 = vcombine.low %v2971_v19, %v2975_v56  ;;  %v13144_v22 = vcombine.high %v3091_v3, %v3095_v4  ;;  %v13143_v35 = vcombine.low %v3091_v3, %v3095_v4  ;;  %v2947_v40 = vld [vmem:[#allocation8 + $0x1888] sm:$0xff] }
 0x332   :  { %v3079_v19 = vld [vmem:[#allocation8 + $0x1ca8] sm:$0xff] }
 0x333   :  { %8871 = vmatpush2.bf16.msra.mxu0 %v12791_v24  ;;  %v2955_v24 = vld [vmem:[#allocation8 + $0x18c8] sm:$0xff] }
 0x334   :  { %8912 = vmatpush2.bf16.msra.mxu1 %v12919_v47  ;;  %8922 = vmatprep.subr.bf16.mxu0 %v13040_v31  ;;  %v2959_v47 = vld [vmem:[#allocation8 + $0x18e8] sm:$0xff] }
 0x335   :  { %8963 = vmatprep.subr.bf16.mxu1 %v13168_v32  ;;  %v3083_v31 = vld [vmem:[#allocation8 + $0x1cc8] sm:$0xff]  ;;  %v13007_v56 = vcombine.low %v2955_v24, %v2959_v47 }
 0x336   :  { %v8628_v48 = vpop.f32.mrf.mxu0  ;;  %8873 = vmatmul.mubr.bf16.vlgmr.msra.gmra.mxu0 %v14437_v51  ;;  %v8669_v53 = vpop.f32.mrf.mxu1  ;;  %v3087_v32 = vld [vmem:[#allocation8 + $0x1ce8] sm:$0xff] }
 0x337   :  { %v8629_v52 = vadd.f32 %v8628_v48, %v14491_v21  ;;  %8914 = vmatmul.mubr.bf16.vlgmr.msra.gmra.mxu1 %v14439_v12  ;;  %8923 = vmatpush1.bf16.msra.mxu0 %v13039_v38  ;;  %v13152_v21 = vcombine.high %v3099_v28, %v3103_v57  ;;  %v13008_v38 = vcombine.high %v2955_v24, %v2959_v47  ;;  %v2939_v57 = vld [vmem:[#allocation8 + $0x1848] sm:$0xff] }
 0x338   :  { %8954 = vmatprep.mubr.bf16.mxu0 %v14451_v45  ;;  %8964 = vmatpush1.bf16.msra.mxu1 %v13167_v42  ;;  %v8630_v30 = vpop.f32.mrf.mxu0  ;;  %v8671_v62 = vpop.f32.mrf.mxu1  ;;  %v13136_v39 = vcombine.high %v3083_v31, %v3087_v32  ;;  %v2951_v42 = vld [vmem:[#allocation8 + $0x18a8] sm:$0xff]  ;;  %v13135_v48 = vcombine.low %v3083_v31, %v3087_v32 }
 0x339   :  { %v14501_v60 = vadd.f32 %v8669_v53, %v8629_v52  ;;  %8995 = vmatprep.mubr.bf16.mxu1 %v14453_v49  ;;  %v8631_v61 = vadd.f32 %v8630_v30, %v14495_v36  ;;  %8924 = vmatprep.subr.bf16.mxu0 %v13032_v43  ;;  %v3075_v43 = vld [vmem:[#allocation8 + $0x1c88] sm:$0xff]  ;;  %v12999_v30 = vcombine.low %v2947_v40, %v2951_v42 }
 0x33a   :  { %v8632_v18 = vpop.f32.mrf.mxu0  ;;  %8965 = vmatprep.subr.bf16.mxu1 %v13160_v50  ;;  %v8673_v9 = vpop.f32.mrf.mxu1  ;;  %v13000_v50 = vcombine.high %v2947_v40, %v2951_v42  ;;  %v13128_v28 = vcombine.high %v3075_v43, %v3079_v19  ;;  %v2943_v52 = vld [vmem:[#allocation8 + $0x1868] sm:$0xff] }
 0x33b   :  { %v14505_v8 = vadd.f32 %v8671_v62, %v8631_v61  ;;  %8925 = vmatpush1.bf16.msra.mxu0 %v13031_v55  ;;  %v3067_v53 = vld [vmem:[#allocation8 + $0x1c48] sm:$0xff]  ;;  %v12991_v18 = vcombine.low %v2939_v57, %v2943_v52  ;;  %vm9660_vm2 = vcmp.gt.f32.partialorder %v14501_v60, 0.0 }
 0x33c   :  { %8966 = vmatpush1.bf16.msra.mxu1 %v13159_v37  ;;  %v8633_v13 = vpop.f32.mrf.mxu0  ;;  %8926 = vmatprep.subr.bf16.mxu0 %v13024_v41  ;;  %v8674_v36 = vpop.f32.mrf.mxu1  ;;  %v3071_v55 = vld [vmem:[#allocation8 + $0x1c68] sm:$0xff]  ;;  %v13127_v37 = vcombine.low %v3075_v43, %v3079_v19  ;;  %v12992_v41 = vcombine.high %v2939_v57, %v2943_v52 }
 0x33d   :  { %8967 = vmatprep.subr.bf16.mxu1 %v13152_v21  ;;  %v13120_v61 = vcombine.high %v3067_v53, %v3071_v55  ;;  %v2931_v62 = vld [vmem:[#allocation8 + $0x1808] sm:$0xff]  ;;  %v13119_v3 = vcombine.low %v3067_v53, %v3071_v55  ;;  %vm9661_vm0 = vcmp.gt.f32.partialorder %v14505_v8, 0.0 }
 0x33e   :  { %v2935_v21 = vld [vmem:[#allocation8 + $0x1828] sm:$0xff] }
 0x33f   :  { %8927 = vmatpush1.bf16.msra.mxu0 %v13023_v11  ;;  %v3059_v58 = vld [vmem:[#allocation8 + $0x1c08] sm:$0xff]  ;;  %v12984_v4 = vcombine.high %v2931_v62, %v2935_v21  ;;  %v12983_v36 = vcombine.low %v2931_v62, %v2935_v21 }
 0x340   :  { %8968 = vmatpush1.bf16.msra.mxu1 %v13151_v15  ;;  %8928 = vmatprep.subr.bf16.mxu0 %v13016_v16  ;;  %v3063_v2 = vld [vmem:[#allocation8 + $0x1c28] sm:$0xff] }
 0x341   :  { %8969 = vmatprep.subr.bf16.mxu1 %v13144_v22  ;;  %v13112_v9 = vcombine.high %v3059_v58, %v3063_v2  ;;  %v3051_v11 = vld [vmem:[#allocation8 + $0x1bc8] sm:$0xff]  ;;  %v13111_v22 = vcombine.low %v3059_v58, %v3063_v2 }
 0x342   :  { %v3055_v13 = vld [vmem:[#allocation8 + $0x1be8] sm:$0xff] }
 0x343   :  { %8929 = vmatpush1.bf16.msra.mxu0 %v13015_v34  ;;  %v3179_v15 = vld [vmem:[#allocation8 + $0x1fc8] sm:$0xff]  ;;  %v13104_v24 = vcombine.high %v3051_v11, %v3055_v13 }
 0x344   :  { %8970 = vmatpush1.bf16.msra.mxu1 %v13143_v35  ;;  %8930 = vmatprep.subr.bf16.mxu0 %v13008_v38  ;;  %v3183_v16 = vld [vmem:[#allocation8 + $0x1fe8] sm:$0xff]  ;;  %v13103_v38 = vcombine.low %v3051_v11, %v3055_v13 }
 0x345   :  { %8971 = vmatprep.subr.bf16.mxu1 %v13136_v39  ;;  %v13232_v47 = vcombine.high %v3179_v15, %v3183_v16  ;;  %v3043_v31 = vld [vmem:[#allocation8 + $0x1b88] sm:$0xff]  ;;  %v13231_v39 = vcombine.low %v3179_v15, %v3183_v16 }
 0x346   :  { %v3047_v32 = vld [vmem:[#allocation8 + $0x1ba8] sm:$0xff] }
 0x347   :  { %8931 = vmatpush1.bf16.msra.mxu0 %v13007_v56  ;;  %v3171_v34 = vld [vmem:[#allocation8 + $0x1f88] sm:$0xff]  ;;  %v13096_v40 = vcombine.high %v3043_v31, %v3047_v32 }
 0x348   :  { %8972 = vmatpush1.bf16.msra.mxu1 %v13135_v48  ;;  %8932 = vmatprep.subr.bf16.mxu0 %v13000_v50  ;;  %v3175_v35 = vld [vmem:[#allocation8 + $0x1fa8] sm:$0xff]  ;;  %v13095_v50 = vcombine.low %v3043_v31, %v3047_v32 }
 0x349   :  { %8973 = vmatprep.subr.bf16.mxu1 %v13128_v28  ;;  %v13224_v42 = vcombine.high %v3171_v34, %v3175_v35  ;;  %v3035_v43 = vld [vmem:[#allocation8 + $0x1b48] sm:$0xff]  ;;  %v13223_v28 = vcombine.low %v3171_v34, %v3175_v35 }
 0x34a   :  { %v3039_v19 = vld [vmem:[#allocation8 + $0x1b68] sm:$0xff] }
 0x34b   :  { %8933 = vmatpush1.bf16.msra.mxu0 %v12999_v30  ;;  %v3163_v56 = vld [vmem:[#allocation8 + $0x1f48] sm:$0xff]  ;;  %v13088_v57 = vcombine.high %v3035_v43, %v3039_v19 }
 0x34c   :  { %8974 = vmatpush1.bf16.msra.mxu1 %v13127_v37  ;;  %8934 = vmatprep.subr.bf16.mxu0 %v12992_v41  ;;  %v3167_v48 = vld [vmem:[#allocation8 + $0x1f68] sm:$0xff]  ;;  %v13087_v41 = vcombine.low %v3035_v43, %v3039_v19 }
 0x34d   :  { %8975 = vmatprep.subr.bf16.mxu1 %v13120_v61  ;;  %v13216_v52 = vcombine.high %v3163_v56, %v3167_v48  ;;  %v3027_v53 = vld [vmem:[#allocation8 + $0x1b08] sm:$0xff]  ;;  %v13215_v61 = vcombine.low %v3163_v56, %v3167_v48 }
 0x34e   :  { %v3031_v55 = vld [vmem:[#allocation8 + $0x1b28] sm:$0xff] }
 0x34f   :  { %8935 = vmatpush1.bf16.msra.mxu0 %v12991_v18  ;;  %v3155_v30 = vld [vmem:[#allocation8 + $0x1f08] sm:$0xff]  ;;  %v13080_v62 = vcombine.high %v3027_v53, %v3031_v55 }
 0x350   :  { %8976 = vmatpush1.bf16.msra.mxu1 %v13119_v3  ;;  %8936 = vmatprep.subr.bf16.mxu0 %v12984_v4  ;;  %v3159_v37 = vld [vmem:[#allocation8 + $0x1f28] sm:$0xff]  ;;  %v13079_v4 = vcombine.low %v3027_v53, %v3031_v55 }
 0x351   :  { %8977 = vmatprep.subr.bf16.mxu1 %v13112_v9  ;;  %v13208_v21 = vcombine.high %v3155_v30, %v3159_v37  ;;  %v3019_v58 = vld [vmem:[#allocation8 + $0x1ac8] sm:$0xff]  ;;  %v13207_v9 = vcombine.low %v3155_v30, %v3159_v37  ;;  %v2220_v30 = vld [vmem:[#allocation8 + $0x1d0] sm:$0xff] }
 0x352   :  { %v3023_v2 = vld [vmem:[#allocation8 + $0x1ae8] sm:$0xff]  ;;  %v2224_v37 = vld [vmem:[#allocation8 + $0x1f0] sm:$0xff] }
 0x353   :  { %8937 = vmatpush1.bf16.msra.mxu0 %v12983_v36  ;;  %v3147_v18 = vld [vmem:[#allocation8 + $0x1ec8] sm:$0xff]  ;;  %v13072_v11 = vcombine.high %v3019_v58, %v3023_v2 }
 0x354   :  { %8978 = vmatpush1.bf16.msra.mxu1 %v13111_v22  ;;  %8938 = vmatprep.subr.bf16.mxu0 %v13104_v24  ;;  %v3151_v3 = vld [vmem:[#allocation8 + $0x1ee8] sm:$0xff]  ;;  %v13071_v24 = vcombine.low %v3019_v58, %v3023_v2  ;;  %v12274_v58 = vcombine.high %v2220_v30, %v2224_v37 }
 0x355   :  { %8979 = vmatprep.subr.bf16.mxu1 %v13232_v47  ;;  %v13200_v13 = vcombine.high %v3147_v18, %v3151_v3  ;;  %v3011_v15 = vld [vmem:[#allocation8 + $0x1a88] sm:$0xff]  ;;  %v13199_v47 = vcombine.low %v3147_v18, %v3151_v3  ;;  %v2212_v18 = vld [vmem:[#allocation8 + $0x190] sm:$0xff] }
 0x356   :  { %v3015_v16 = vld [vmem:[#allocation8 + $0x1aa8] sm:$0xff]  ;;  %v2216_v3 = vld [vmem:[#allocation8 + $0x1b0] sm:$0xff] }
 0x357   :  { %8939 = vmatpush2.bf16.msra.mxu0 %v13103_v38  ;;  %v3139_v36 = vld [vmem:[#allocation8 + $0x1e88] sm:$0xff]  ;;  %v13064_v31 = vcombine.high %v3011_v15, %v3015_v16 }
 0x358   :  { %8980 = vmatpush2.bf16.msra.mxu1 %v13231_v39  ;;  %8940 = vmatprep.subr.bf16.mxu0 %v13096_v40  ;;  %v3143_v22 = vld [vmem:[#allocation8 + $0x1ea8] sm:$0xff]  ;;  %v13063_v40 = vcombine.low %v3011_v15, %v3015_v16  ;;  %v2344_v15 = vld [vmem:[#allocation8 + $0x5b0] sm:$0xff] }
 0x359   :  { %8981 = vmatprep.subr.bf16.mxu1 %v13224_v42  ;;  %v13192_v32 = vcombine.high %v3139_v36, %v3143_v22  ;;  %v3003_v34 = vld [vmem:[#allocation8 + $0x1a48] sm:$0xff]  ;;  %v13191_v42 = vcombine.low %v3139_v36, %v3143_v22  ;;  %v12266_v22 = vcombine.high %v2212_v18, %v2216_v3 }
 0x35a   :  { %v3007_v35 = vld [vmem:[#allocation8 + $0x1a68] sm:$0xff] }
 0x35b   :  { %8941 = vmatpush2.bf16.msra.mxu0 %v13095_v50  ;;  %v3131_v38 = vld [vmem:[#allocation8 + $0x1e48] sm:$0xff]  ;;  %v13056_v43 = vcombine.high %v3003_v34, %v3007_v35 }
 0x35c   :  { %8982 = vmatpush2.bf16.msra.mxu1 %v13223_v28  ;;  %8942 = vmatprep.subr.bf16.mxu0 %v13088_v57  ;;  %v3135_v39 = vld [vmem:[#allocation8 + $0x1e68] sm:$0xff]  ;;  %v13055_v57 = vcombine.low %v3003_v34, %v3007_v35  ;;  %v2332_v34 = vld [vmem:[#allocation8 + $0x550] sm:$0xff] }
 0x35d   :  { %8983 = vmatprep.subr.bf16.mxu1 %v13216_v52  ;;  %v13184_v19 = vcombine.high %v3131_v38, %v3135_v39  ;;  %v2995_v56 = vld [vmem:[#allocation8 + $0x1a08] sm:$0xff]  ;;  %v13183_v52 = vcombine.low %v3131_v38, %v3135_v39  ;;  %v2336_v35 = vld [vmem:[#allocation8 + $0x570] sm:$0xff] }
 0x35e   :  { %v2999_v48 = vld [vmem:[#allocation8 + $0x1a28] sm:$0xff] }
 0x35f   :  { %8943 = vmatpush2.bf16.msra.mxu0 %v13087_v41  ;;  %v3123_v50 = vld [vmem:[#allocation8 + $0x1e08] sm:$0xff]  ;;  %v13048_v53 = vcombine.high %v2995_v56, %v2999_v48  ;;  %v2348_v41 = vld [vmem:[#allocation8 + $0x5d0] sm:$0xff] }
 0x360   :  { %8984 = vmatpush2.bf16.msra.mxu1 %v13215_v61  ;;  %8944 = vmatprep.subr.bf16.mxu0 %v13080_v62  ;;  %v3127_v28 = vld [vmem:[#allocation8 + $0x1e28] sm:$0xff]  ;;  %v2352_v61 = vld [vmem:[#allocation8 + $0x5f0] sm:$0xff]  ;;  %v13047_v62 = vcombine.low %v2995_v56, %v2999_v48 }
 0x361   :  { %8985 = vmatprep.subr.bf16.mxu1 %v13208_v21  ;;  %v13176_v55 = vcombine.high %v3123_v50, %v3127_v28  ;;  %v13175_v21 = vcombine.low %v3123_v50, %v3127_v28  ;;  %v12402_v2 = vcombine.high %v2348_v41, %v2352_v61  ;;  %v12401_v16 = vcombine.low %v2348_v41, %v2352_v61 }
 0x362   :  { %v12386_v28 = vcombine.high %v2332_v34, %v2336_v35 }
 0x363   :  { %8945 = vmatpush2.bf16.msra.mxu0 %v13079_v4  ;;  %v14003_v4 = vld [vmem:[#allocation10] sm:$0xff] }
 0x364   :  { %8986 = vmatpush2.bf16.msra.mxu1 %v13207_v9  ;;  %8946 = vmatprep.subr.bf16.mxu0 %v13072_v11  ;;  %v3199_v9 = vrot.slane %v14003_v4, %v14363_v25  ;;  %v12273_v11 = vcombine.low %v2220_v30, %v2224_v37  ;;  %v3203_v36 = vrot.slane %v14003_v4, %v14339_v26  ;;  %v2328_v30 = vld [vmem:[#allocation8 + $0x530] sm:$0xff] }
 0x365   :  { %8987 = vmatprep.subr.bf16.mxu1 %v13200_v13  ;;  %v2340_v13 = vld [vmem:[#allocation8 + $0x590] sm:$0xff] }
 0x366   :  { %v2192_v4 = vld [vmem:[#allocation8 + $0xf0] sm:$0xff] }
 0x367   :  { %8947 = vmatpush2.bf16.msra.mxu0 %v13071_v24  ;;  %v2204_v24 = vld [vmem:[#allocation8 + $0x150] sm:$0xff] }
 0x368   :  { %8988 = vmatpush2.bf16.msra.mxu1 %v13199_v47  ;;  %8948 = vmatprep.subr.bf16.mxu0 %v13064_v31  ;;  %v2208_v47 = vld [vmem:[#allocation8 + $0x170] sm:$0xff] }
 0x369   :  { %8989 = vmatprep.subr.bf16.mxu1 %v13192_v32  ;;  %v12394_v32 = vcombine.high %v2340_v13, %v2344_v15  ;;  %v12257_v61 = vcombine.low %v2204_v24, %v2208_v47 }
 0x36b   :  { %8949 = vmatpush2.bf16.msra.mxu0 %v13063_v40  ;;  %v12265_v40 = vcombine.low %v2212_v18, %v2216_v3  ;;  %v2188_v3 = vld [vmem:[#allocation8 + $0xd0] sm:$0xff] }
 0x36c   :  { %8990 = vmatpush2.bf16.msra.mxu1 %v13191_v42  ;;  %8950 = vmatprep.subr.bf16.mxu0 %v13056_v43  ;;  %v12393_v43 = vcombine.low %v2340_v13, %v2344_v15 }
 0x36d   :  { %8991 = vmatprep.subr.bf16.mxu1 %v13184_v19  ;;  %v12258_v19 = vcombine.high %v2204_v24, %v2208_v47  ;;  %v2184_v24 = vld [vmem:[#allocation8 + $0xb0] sm:$0xff] }
 0x36e   :  { %v2308_v47 = vld [vmem:[#allocation8 + $0x490] sm:$0xff] }
 0x36f   :  { %8951 = vmatpush2.bf16.msra.mxu0 %v13055_v57  ;;  %v2196_v57 = vld [vmem:[#allocation8 + $0x110] sm:$0xff] }
 0x370   :  { %8992 = vmatpush2.bf16.msra.mxu1 %v13183_v52  ;;  %8952 = vmatprep.subr.bf16.mxu0 %v13048_v53  ;;  %v2200_v52 = vld [vmem:[#allocation8 + $0x130] sm:$0xff] }
 0x371   :  { %8993 = vmatprep.subr.bf16.mxu1 %v13176_v55  ;;  %v2324_v55 = vld [vmem:[#allocation8 + $0x510] sm:$0xff]  ;;  %v12249_v13 = vcombine.low %v2196_v57, %v2200_v52 }
 0x372   :  { %v12378_v18 = vcombine.high %v2324_v55, %v2328_v30  ;;  %v12377_v15 = vcombine.low %v2324_v55, %v2328_v30  ;;  %v2296_v55 = vld [vmem:[#allocation8 + $0x430] sm:$0xff] }
 0x373   :  { %8953 = vmatpush2.bf16.msra.mxu0 %v13047_v62 }
 0x374   :  { %8994 = vmatpush2.bf16.msra.mxu1 %v13175_v21  ;;  %9004 = vmatprep.subr.bf16.mxu0 %v12274_v58  ;;  %v12385_v21 = vcombine.low %v2332_v34, %v2336_v35  ;;  %v12250_v58 = vcombine.high %v2196_v57, %v2200_v52  ;;  %v2164_v57 = vld [vmem:[#allocation8 + $0x10] sm:$0xff] }
 0x375   :  { %9045 = vmatprep.subr.bf16.mxu1 %v12402_v2  ;;  %v2168_v52 = vld [vmem:[#allocation8 + $0x30] sm:$0xff] }
 0x376   :  { %v8710_v31 = vpop.f32.mrf.mxu0  ;;  %8955 = vmatmul.mubr.bf16.vlgmr.msra.gmra.mxu0 %v14464_v44 }
 0x377   :  { %v8711_v38 = vadd.f32 %v8710_v31, %v3199_v9  ;;  %v8751_v39 = vpop.f32.mrf.mxu1  ;;  %8996 = vmatmul.mubr.bf16.vlgmr.msra.gmra.mxu1 %v14466_v46  ;;  %9005 = vmatpush1.bf16.msra.mxu0 %v12273_v11  ;;  %v2316_v9 = vld [vmem:[#allocation8 + $0x4d0] sm:$0xff] }
 0x378   :  { %9036 = vmatprep.mubr.bf16.mxu0 %v14353_v1  ;;  %9046 = vmatpush1.bf16.msra.mxu1 %v12401_v16  ;;  %v8712_v42 = vpop.f32.mrf.mxu0  ;;  %v2320_v11 = vld [vmem:[#allocation8 + $0x4f0] sm:$0xff]  ;;  %v12242_v16 = vcombine.high %v2188_v3, %v2192_v4 }
 0x379   :  { %v14512_v56 = vadd.f32 %v8751_v39, %v8711_v38  ;;  %9077 = vmatprep.mubr.bf16.mxu1 %v14355_v6  ;;  %v8713_v48 = vadd.f32 %v8712_v42, %v3203_v36  ;;  %v8753_v50 = vpop.f32.mrf.mxu1  ;;  %9006 = vmatprep.subr.bf16.mxu0 %v12266_v22  ;;  %v12370_v36 = vcombine.high %v2316_v9, %v2320_v11  ;;  %v2180_v22 = vld [vmem:[#allocation8 + $0x90] sm:$0xff] }
 0x37a   :  { %v8714_v53 = vpop.f32.mrf.mxu0  ;;  %9047 = vmatprep.subr.bf16.mxu1 %v12394_v32  ;;  %v2312_v31 = vld [vmem:[#allocation8 + $0x4b0] sm:$0xff]  ;;  %v12241_v32 = vcombine.low %v2188_v3, %v2192_v4  ;;  %v12369_v34 = vcombine.low %v2316_v9, %v2320_v11  ;;  %v12234_v35 = vcombine.high %v2180_v22, %v2184_v24  ;;  %v12217_v3 = vcombine.low %v2164_v57, %v2168_v52 }
 0x37b   :  { %v14515_v37 = vadd.f32 %v8753_v50, %v8713_v48  ;;  %v8755_v41 = vpop.f32.mrf.mxu1  ;;  %9007 = vmatpush1.bf16.msra.mxu0 %v12265_v40  ;;  %v12362_v38 = vcombine.high %v2308_v47, %v2312_v31  ;;  %v2172_v39 = vld [vmem:[#allocation8 + $0x50] sm:$0xff]  ;;  %v12361_v48 = vcombine.low %v2308_v47, %v2312_v31 }
 0x37c   :  { %9048 = vmatpush1.bf16.msra.mxu1 %v12393_v43  ;;  %v8715_v62 = vpop.f32.mrf.mxu0  ;;  %9008 = vmatprep.subr.bf16.mxu0 %v12258_v19  ;;  %v2176_v40 = vld [vmem:[#allocation8 + $0x70] sm:$0xff]  ;;  %v12233_v19 = vcombine.low %v2180_v22, %v2184_v24 }
 0x37d   :  { %v8756_v2 = vpop.f32.mrf.mxu1  ;;  %9049 = vmatprep.subr.bf16.mxu1 %v12386_v28  ;;  %v2300_v42 = vld [vmem:[#allocation8 + $0x450] sm:$0xff]  ;;  %v12226_v50 = vcombine.high %v2172_v39, %v2176_v40  ;;  %v12225_v30 = vcombine.low %v2172_v39, %v2176_v40 }
 0x37e   :  { %v2304_v43 = vld [vmem:[#allocation8 + $0x470] sm:$0xff] }
 0x37f   :  { %9009 = vmatpush1.bf16.msra.mxu0 %v12257_v61  ;;  %v12354_v28 = vcombine.high %v2300_v42, %v2304_v43  ;;  %v2292_v53 = vld [vmem:[#allocation8 + $0x410] sm:$0xff]  ;;  %v12353_v41 = vcombine.low %v2300_v42, %v2304_v43  ;;  %v12218_v61 = vcombine.high %v2164_v57, %v2168_v52 }
 0x380   :  { %9050 = vmatpush1.bf16.msra.mxu1 %v12385_v21  ;;  %9010 = vmatprep.subr.bf16.mxu0 %v12250_v58  ;;  %v12346_v62 = vcombine.high %v2292_v53, %v2296_v55  ;;  %v2284_v21 = vld [vmem:[#allocation8 + $0x3d0] sm:$0xff]  ;;  %v12345_v4 = vcombine.low %v2292_v53, %v2296_v55 }
 0x381   :  { %9051 = vmatprep.subr.bf16.mxu1 %v12378_v18  ;;  %v2288_v58 = vld [vmem:[#allocation8 + $0x3f0] sm:$0xff] }
 0x382   :  { %v2412_v2 = vld [vmem:[#allocation8 + $0x7d0] sm:$0xff]  ;;  %v12338_v9 = vcombine.high %v2284_v21, %v2288_v58  ;;  %v12337_v22 = vcombine.low %v2284_v21, %v2288_v58 }
 0x383   :  { %9011 = vmatpush1.bf16.msra.mxu0 %v12249_v13  ;;  %v2416_v18 = vld [vmem:[#allocation8 + $0x7f0] sm:$0xff] }
 0x384   :  { %9052 = vmatpush1.bf16.msra.mxu1 %v12377_v15  ;;  %9012 = vmatprep.subr.bf16.mxu0 %v12242_v16  ;;  %v12466_v11 = vcombine.high %v2412_v2, %v2416_v18  ;;  %v2276_v13 = vld [vmem:[#allocation8 + $0x390] sm:$0xff]  ;;  %v12465_v24 = vcombine.low %v2412_v2, %v2416_v18 }
 0x385   :  { %9053 = vmatprep.subr.bf16.mxu1 %v12370_v36  ;;  %v2280_v15 = vld [vmem:[#allocation8 + $0x3b0] sm:$0xff] }
 0x386   :  { %v2404_v16 = vld [vmem:[#allocation8 + $0x790] sm:$0xff]  ;;  %v12330_v47 = vcombine.high %v2276_v13, %v2280_v15  ;;  %v12329_v39 = vcombine.low %v2276_v13, %v2280_v15 }
 0x387   :  { %9013 = vmatpush1.bf16.msra.mxu0 %v12241_v32  ;;  %v2408_v36 = vld [vmem:[#allocation8 + $0x7b0] sm:$0xff] }
 0x388   :  { %9054 = vmatpush1.bf16.msra.mxu1 %v12369_v34  ;;  %9014 = vmatprep.subr.bf16.mxu0 %v12234_v35  ;;  %v12458_v31 = vcombine.high %v2404_v16, %v2408_v36  ;;  %v2268_v32 = vld [vmem:[#allocation8 + $0x350] sm:$0xff]  ;;  %v12457_v40 = vcombine.low %v2404_v16, %v2408_v36 }
 0x389   :  { %9055 = vmatprep.subr.bf16.mxu1 %v12362_v38  ;;  %v2272_v34 = vld [vmem:[#allocation8 + $0x370] sm:$0xff] }
 0x38a   :  { %v2396_v35 = vld [vmem:[#allocation8 + $0x750] sm:$0xff]  ;;  %v12322_v42 = vcombine.high %v2268_v32, %v2272_v34  ;;  %v12321_v57 = vcombine.low %v2268_v32, %v2272_v34 }
 0x38b   :  { %9015 = vmatpush1.bf16.msra.mxu0 %v12233_v19  ;;  %v2400_v38 = vld [vmem:[#allocation8 + $0x770] sm:$0xff] }
 0x38c   :  { %9056 = vmatpush1.bf16.msra.mxu1 %v12361_v48  ;;  %9016 = vmatprep.subr.bf16.mxu0 %v12226_v50  ;;  %v12450_v43 = vcombine.high %v2396_v35, %v2400_v38  ;;  %v2260_v19 = vld [vmem:[#allocation8 + $0x310] sm:$0xff]  ;;  %v12449_v52 = vcombine.low %v2396_v35, %v2400_v38 }
 0x38d   :  { %9057 = vmatprep.subr.bf16.mxu1 %v12354_v28  ;;  %v2264_v48 = vld [vmem:[#allocation8 + $0x330] sm:$0xff] }
 0x38e   :  { %v2388_v50 = vld [vmem:[#allocation8 + $0x710] sm:$0xff]  ;;  %v12314_v53 = vcombine.high %v2260_v19, %v2264_v48  ;;  %v12313_v21 = vcombine.low %v2260_v19, %v2264_v48 }
 0x38f   :  { %9017 = vmatpush1.bf16.msra.mxu0 %v12225_v30  ;;  %v2392_v28 = vld [vmem:[#allocation8 + $0x730] sm:$0xff] }
 0x390   :  { %9058 = vmatpush1.bf16.msra.mxu1 %v12353_v41  ;;  %9018 = vmatprep.subr.bf16.mxu0 %v12218_v61  ;;  %v12442_v55 = vcombine.high %v2388_v50, %v2392_v28  ;;  %v2252_v30 = vld [vmem:[#allocation8 + $0x2d0] sm:$0xff]  ;;  %v12441_v58 = vcombine.low %v2388_v50, %v2392_v28 }
 0x391   :  { %9059 = vmatprep.subr.bf16.mxu1 %v12346_v62  ;;  %v2256_v41 = vld [vmem:[#allocation8 + $0x2f0] sm:$0xff] }
 0x392   :  { %v2380_v61 = vld [vmem:[#allocation8 + $0x6d0] sm:$0xff]  ;;  %v12306_v2 = vcombine.high %v2252_v30, %v2256_v41  ;;  %v12305_v13 = vcombine.low %v2252_v30, %v2256_v41 }
 0x393   :  { %9019 = vmatpush1.bf16.msra.mxu0 %v12217_v3  ;;  %v2384_v62 = vld [vmem:[#allocation8 + $0x6f0] sm:$0xff] }
 0x394   :  { %9060 = vmatpush1.bf16.msra.mxu1 %v12345_v4  ;;  %9020 = vmatprep.subr.bf16.mxu0 %v12338_v9  ;;  %v12434_v18 = vcombine.high %v2380_v61, %v2384_v62  ;;  %v2244_v3 = vld [vmem:[#allocation8 + $0x290] sm:$0xff]  ;;  %v12433_v15 = vcombine.low %v2380_v61, %v2384_v62 }
 0x395   :  { %9061 = vmatprep.subr.bf16.mxu1 %v12466_v11  ;;  %v2248_v4 = vld [vmem:[#allocation8 + $0x2b0] sm:$0xff] }
 0x396   :  { %v2372_v9 = vld [vmem:[#allocation8 + $0x690] sm:$0xff]  ;;  %v12298_v16 = vcombine.high %v2244_v3, %v2248_v4  ;;  %v12297_v32 = vcombine.low %v2244_v3, %v2248_v4 }
 0x397   :  { %9021 = vmatpush2.bf16.msra.mxu0 %v12337_v22  ;;  %v2376_v11 = vld [vmem:[#allocation8 + $0x6b0] sm:$0xff] }
 0x398   :  { %9062 = vmatpush2.bf16.msra.mxu1 %v12465_v24  ;;  %9022 = vmatprep.subr.bf16.mxu0 %v12330_v47  ;;  %v12426_v36 = vcombine.high %v2372_v9, %v2376_v11  ;;  %v2236_v22 = vld [vmem:[#allocation8 + $0x250] sm:$0xff]  ;;  %v12425_v34 = vcombine.low %v2372_v9, %v2376_v11 }
 0x399   :  { %9063 = vmatprep.subr.bf16.mxu1 %v12458_v31  ;;  %v2240_v24 = vld [vmem:[#allocation8 + $0x270] sm:$0xff] }
 0x39a   :  { %v2364_v47 = vld [vmem:[#allocation8 + $0x650] sm:$0xff]  ;;  %v12290_v35 = vcombine.high %v2236_v22, %v2240_v24  ;;  %v12289_v19 = vcombine.low %v2236_v22, %v2240_v24 }
 0x39b   :  { %9023 = vmatpush2.bf16.msra.mxu0 %v12329_v39  ;;  %v2368_v31 = vld [vmem:[#allocation8 + $0x670] sm:$0xff] }
 0x39c   :  { %9064 = vmatpush2.bf16.msra.mxu1 %v12457_v40  ;;  %9024 = vmatprep.subr.bf16.mxu0 %v12322_v42  ;;  %v12418_v38 = vcombine.high %v2364_v47, %v2368_v31  ;;  %v2228_v39 = vld [vmem:[#allocation8 + $0x210] sm:$0xff]  ;;  %v12417_v48 = vcombine.low %v2364_v47, %v2368_v31 }
 0x39d   :  { %9065 = vmatprep.subr.bf16.mxu1 %v12450_v43  ;;  %v2232_v40 = vld [vmem:[#allocation8 + $0x230] sm:$0xff] }
 0x39e   :  { %v2356_v42 = vld [vmem:[#allocation8 + $0x610] sm:$0xff]  ;;  %v12282_v50 = vcombine.high %v2228_v39, %v2232_v40  ;;  %v12281_v30 = vcombine.low %v2228_v39, %v2232_v40 }
 0x39f   :  { %9025 = vmatpush2.bf16.msra.mxu0 %v12321_v57  ;;  %v2360_v43 = vld [vmem:[#allocation8 + $0x630] sm:$0xff] }
 0x3a0   :  { %9066 = vmatpush2.bf16.msra.mxu1 %v12449_v52  ;;  %9026 = vmatprep.subr.bf16.mxu0 %v12314_v53  ;;  %v12410_v28 = vcombine.high %v2356_v42, %v2360_v43  ;;  %v2476_v57 = vld [vmem:[#allocation8 + $0x9d0] sm:$0xff]  ;;  %v12409_v41 = vcombine.low %v2356_v42, %v2360_v43 }
 0x3a1   :  { %9067 = vmatprep.subr.bf16.mxu1 %v12442_v55  ;;  %v2480_v52 = vld [vmem:[#allocation8 + $0x9f0] sm:$0xff] }
 0x3a2   :  { %v2604_v53 = vld [vmem:[#allocation8 + $0xdd0] sm:$0xff]  ;;  %v12530_v61 = vcombine.high %v2476_v57, %v2480_v52 }
 0x3a3   :  { %9027 = vmatpush2.bf16.msra.mxu0 %v12313_v21  ;;  %v2608_v55 = vld [vmem:[#allocation8 + $0xdf0] sm:$0xff] }
 0x3a4   :  { %9068 = vmatpush2.bf16.msra.mxu1 %v12441_v58  ;;  %9028 = vmatprep.subr.bf16.mxu0 %v12306_v2  ;;  %v12658_v62 = vcombine.high %v2604_v53, %v2608_v55  ;;  %v2468_v21 = vld [vmem:[#allocation8 + $0x990] sm:$0xff]  ;;  %v12529_v2 = vcombine.low %v2476_v57, %v2480_v52  ;;  %v12657_v4 = vcombine.low %v2604_v53, %v2608_v55 }
 0x3a5   :  { %9069 = vmatprep.subr.bf16.mxu1 %v12434_v18  ;;  %v2472_v58 = vld [vmem:[#allocation8 + $0x9b0] sm:$0xff] }
 0x3a6   :  { %v2596_v18 = vld [vmem:[#allocation8 + $0xd90] sm:$0xff]  ;;  %v12522_v9 = vcombine.high %v2468_v21, %v2472_v58  ;;  %v12521_v31 = vcombine.low %v2468_v21, %v2472_v58 }
 0x3a7   :  { %9029 = vmatpush2.bf16.msra.mxu0 %v12305_v13  ;;  %v2600_v3 = vld [vmem:[#allocation8 + $0xdb0] sm:$0xff] }
 0x3a8   :  { %9070 = vmatpush2.bf16.msra.mxu1 %v12433_v15  ;;  %9030 = vmatprep.subr.bf16.mxu0 %v12298_v16  ;;  %v2460_v11 = vld [vmem:[#allocation8 + $0x950] sm:$0xff]  ;;  %v12650_v16 = vcombine.high %v2596_v18, %v2600_v3 }
 0x3a9   :  { %9071 = vmatprep.subr.bf16.mxu1 %v12426_v36  ;;  %v2464_v13 = vld [vmem:[#allocation8 + $0x970] sm:$0xff] }
 0x3aa   :  { %v2588_v36 = vld [vmem:[#allocation8 + $0xd50] sm:$0xff]  ;;  %v12513_v52 = vcombine.low %v2460_v11, %v2464_v13 }
 0x3ab   :  { %9031 = vmatpush2.bf16.msra.mxu0 %v12297_v32  ;;  %v2592_v22 = vld [vmem:[#allocation8 + $0xd70] sm:$0xff] }
 0x3ac   :  { %9072 = vmatpush2.bf16.msra.mxu1 %v12425_v34  ;;  %9032 = vmatprep.subr.bf16.mxu0 %v12290_v35  ;;  %v12649_v34 = vcombine.low %v2596_v18, %v2600_v3  ;;  %v12514_v35 = vcombine.high %v2460_v11, %v2464_v13  ;;  %v2452_v42 = vld [vmem:[#allocation8 + $0x910] sm:$0xff]  ;;  %v12641_v55 = vcombine.low %v2588_v36, %v2592_v22 }
 0x3ad   :  { %9073 = vmatprep.subr.bf16.mxu1 %v12418_v38  ;;  %v2456_v43 = vld [vmem:[#allocation8 + $0x930] sm:$0xff] }
 0x3ae   :  { %v2572_v21 = vld [vmem:[#allocation8 + $0xcd0] sm:$0xff] }
 0x3af   :  { %9033 = vmatpush2.bf16.msra.mxu0 %v12289_v19  ;;  %v2576_v58 = vld [vmem:[#allocation8 + $0xcf0] sm:$0xff] }
 0x3b0   :  { %9074 = vmatpush2.bf16.msra.mxu1 %v12417_v48  ;;  %9034 = vmatprep.subr.bf16.mxu0 %v12282_v50  ;;  %v2580_v48 = vld [vmem:[#allocation8 + $0xd10] sm:$0xff] }
 0x3b1   :  { %9075 = vmatprep.subr.bf16.mxu1 %v12410_v28  ;;  %v2584_v50 = vld [vmem:[#allocation8 + $0xd30] sm:$0xff] }
 0x3b2   :  { %v12633_v18 = vcombine.low %v2580_v48, %v2584_v50  ;;  %v2440_v11 = vld [vmem:[#allocation8 + $0x8b0] sm:$0xff] }
 0x3b3   :  { %9035 = vmatpush2.bf16.msra.mxu0 %v12281_v30  ;;  %v12506_v30 = vcombine.high %v2452_v42, %v2456_v43  ;;  %v2564_v13 = vld [vmem:[#allocation8 + $0xc90] sm:$0xff] }
 0x3b4   :  { %9076 = vmatpush2.bf16.msra.mxu1 %v12409_v41  ;;  %9086 = vmatprep.subr.bf16.mxu0 %v12530_v61  ;;  %v12634_v41 = vcombine.high %v2580_v48, %v2584_v50  ;;  %v2444_v61 = vld [vmem:[#allocation8 + $0x8d0] sm:$0xff] }
 0x3b5   :  { %9127 = vmatprep.subr.bf16.mxu1 %v12658_v62  ;;  %v2448_v62 = vld [vmem:[#allocation8 + $0x8f0] sm:$0xff] }
 0x3b6   :  { %v8792_v15 = vpop.f32.mrf.mxu0  ;;  %9037 = vmatmul.mubr.bf16.vlgmr.msra.gmra.mxu0 %v14377_v10  ;;  %v12498_v3 = vcombine.high %v2444_v61, %v2448_v62  ;;  %v2552_v48 = vld [vmem:[#allocation8 + $0xc30] sm:$0xff] }
 0x3b7   :  { %v8793_v24 = vadd.f32 %v8792_v15, %v14512_v56  ;;  %v8833_v47 = vpop.f32.mrf.mxu1  ;;  %9078 = vmatmul.mubr.bf16.vlgmr.msra.gmra.mxu1 %v14379_v14  ;;  %9087 = vmatpush1.bf16.msra.mxu0 %v12529_v2  ;;  %v12642_v56 = vcombine.high %v2588_v36, %v2592_v22  ;;  %v12505_v2 = vcombine.low %v2452_v42, %v2456_v43  ;;  %v2568_v15 = vld [vmem:[#allocation8 + $0xcb0] sm:$0xff] }
 0x3b8   :  { %9118 = vmatprep.mubr.bf16.mxu0 %v14391_v54  ;;  %9128 = vmatpush1.bf16.msra.mxu1 %v12657_v4  ;;  %v8794_v32 = vpop.f32.mrf.mxu0  ;;  %v12626_v4 = vcombine.high %v2572_v21, %v2576_v58  ;;  %v12625_v36 = vcombine.low %v2572_v21, %v2576_v58  ;;  %v2420_v42 = vld [vmem:[#allocation8 + $0x810] sm:$0xff] }
 0x3b9   :  { %v14521_v38 = vadd.f32 %v8833_v47, %v8793_v24  ;;  %9159 = vmatprep.mubr.bf16.mxu1 %v14393_v59  ;;  %v8795_v39 = vadd.f32 %v8794_v32, %v14515_v37  ;;  %v8835_v40 = vpop.f32.mrf.mxu1  ;;  %9088 = vmatprep.subr.bf16.mxu0 %v12522_v9  ;;  %v2436_v9 = vld [vmem:[#allocation8 + $0x890] sm:$0xff]  ;;  %v12618_v24 = vcombine.high %v2564_v13, %v2568_v15 }
 0x3ba   :  { %v8796_v19 = vpop.f32.mrf.mxu0  ;;  %9129 = vmatprep.subr.bf16.mxu1 %v12650_v16  ;;  %v12497_v16 = vcombine.low %v2444_v61, %v2448_v62  ;;  %v12490_v22 = vcombine.high %v2436_v9, %v2440_v11  ;;  %v2428_v47 = vld [vmem:[#allocation8 + $0x850] sm:$0xff] }
 0x3bb   :  { %v14525_v28 = vadd.f32 %v8835_v40, %v8795_v39  ;;  %v8837_v57 = vpop.f32.mrf.mxu1  ;;  %9089 = vmatpush1.bf16.msra.mxu0 %v12521_v31  ;;  %v2432_v31 = vld [vmem:[#allocation8 + $0x870] sm:$0xff]  ;;  %v12617_v39 = vcombine.low %v2564_v13, %v2568_v15 }
 0x3bc   :  { %9130 = vmatpush1.bf16.msra.mxu1 %v12649_v34  ;;  %v8797_v53 = vpop.f32.mrf.mxu0  ;;  %9090 = vmatprep.subr.bf16.mxu0 %v12514_v35  ;;  %v2556_v32 = vld [vmem:[#allocation8 + $0xc50] sm:$0xff]  ;;  %v12489_v35 = vcombine.low %v2436_v9, %v2440_v11  ;;  %v12482_v40 = vcombine.high %v2428_v47, %v2432_v31  ;;  %v12481_v50 = vcombine.low %v2428_v47, %v2432_v31 }
 0x3bd   :  { %v8838_v37 = vpop.f32.mrf.mxu1  ;;  %9131 = vmatprep.subr.bf16.mxu1 %v12642_v56  ;;  %v2560_v34 = vld [vmem:[#allocation8 + $0xc70] sm:$0xff] }
 0x3be   :  { %v12610_v56 = vcombine.high %v2556_v32, %v2560_v34  ;;  %v2424_v43 = vld [vmem:[#allocation8 + $0x830] sm:$0xff]  ;;  %v12609_v57 = vcombine.low %v2556_v32, %v2560_v34 }
 0x3bf   :  { %9091 = vmatpush1.bf16.msra.mxu0 %v12513_v52  ;;  %v2548_v19 = vld [vmem:[#allocation8 + $0xc10] sm:$0xff]  ;;  %v12474_v52 = vcombine.high %v2420_v42, %v2424_v43  ;;  %v12473_v61 = vcombine.low %v2420_v42, %v2424_v43 }
 0x3c0   :  { %9132 = vmatpush1.bf16.msra.mxu1 %v12641_v55  ;;  %9092 = vmatprep.subr.bf16.mxu0 %v12506_v30  ;;  %v12602_v53 = vcombine.high %v2548_v19, %v2552_v48  ;;  %v2540_v55 = vld [vmem:[#allocation8 + $0xbd0] sm:$0xff]  ;;  %v12601_v62 = vcombine.low %v2548_v19, %v2552_v48 }
 0x3c1   :  { %9133 = vmatprep.subr.bf16.mxu1 %v12634_v41  ;;  %v2544_v30 = vld [vmem:[#allocation8 + $0xbf0] sm:$0xff] }
 0x3c2   :  { %v2668_v37 = vld [vmem:[#allocation8 + $0xfd0] sm:$0xff]  ;;  %v12594_v21 = vcombine.high %v2540_v55, %v2544_v30  ;;  %v12593_v9 = vcombine.low %v2540_v55, %v2544_v30 }
 0x3c3   :  { %9093 = vmatpush1.bf16.msra.mxu0 %v12505_v2  ;;  %v2672_v41 = vld [vmem:[#allocation8 + $0xff0] sm:$0xff] }
 0x3c4   :  { %9134 = vmatpush1.bf16.msra.mxu1 %v12633_v18  ;;  %9094 = vmatprep.subr.bf16.mxu0 %v12498_v3  ;;  %v12722_v58 = vcombine.high %v2668_v37, %v2672_v41  ;;  %v2532_v2 = vld [vmem:[#allocation8 + $0xb90] sm:$0xff]  ;;  %v12721_v11 = vcombine.low %v2668_v37, %v2672_v41 }
 0x3c5   :  { %9135 = vmatprep.subr.bf16.mxu1 %v12626_v4  ;;  %v2536_v18 = vld [vmem:[#allocation8 + $0xbb0] sm:$0xff] }
 0x3c6   :  { %v2660_v3 = vld [vmem:[#allocation8 + $0xf90] sm:$0xff]  ;;  %v12586_v13 = vcombine.high %v2532_v2, %v2536_v18  ;;  %v12585_v47 = vcombine.low %v2532_v2, %v2536_v18 }
 0x3c7   :  { %9095 = vmatpush1.bf16.msra.mxu0 %v12497_v16  ;;  %v2664_v4 = vld [vmem:[#allocation8 + $0xfb0] sm:$0xff] }
 0x3c8   :  { %9136 = vmatpush1.bf16.msra.mxu1 %v12625_v36  ;;  %9096 = vmatprep.subr.bf16.mxu0 %v12490_v22  ;;  %v12714_v15 = vcombine.high %v2660_v3, %v2664_v4  ;;  %v2524_v16 = vld [vmem:[#allocation8 + $0xb50] sm:$0xff]  ;;  %v12713_v31 = vcombine.low %v2660_v3, %v2664_v4 }
 0x3c9   :  { %9137 = vmatprep.subr.bf16.mxu1 %v12618_v24  ;;  %v2528_v36 = vld [vmem:[#allocation8 + $0xb70] sm:$0xff] }
 0x3ca   :  { %v2652_v22 = vld [vmem:[#allocation8 + $0xf50] sm:$0xff]  ;;  %v12578_v32 = vcombine.high %v2524_v16, %v2528_v36  ;;  %v12577_v42 = vcombine.low %v2524_v16, %v2528_v36 }
 0x3cb   :  { %9097 = vmatpush1.bf16.msra.mxu0 %v12489_v35  ;;  %v2656_v24 = vld [vmem:[#allocation8 + $0xf70] sm:$0xff] }
 0x3cc   :  { %9138 = vmatpush1.bf16.msra.mxu1 %v12617_v39  ;;  %9098 = vmatprep.subr.bf16.mxu0 %v12482_v40  ;;  %v12706_v34 = vcombine.high %v2652_v22, %v2656_v24  ;;  %v2516_v35 = vld [vmem:[#allocation8 + $0xb10] sm:$0xff]  ;;  %v12705_v43 = vcombine.low %v2652_v22, %v2656_v24 }
 0x3cd   :  { %9139 = vmatprep.subr.bf16.mxu1 %v12610_v56  ;;  %v2520_v39 = vld [vmem:[#allocation8 + $0xb30] sm:$0xff] }
 0x3ce   :  { %v2644_v40 = vld [vmem:[#allocation8 + $0xf10] sm:$0xff]  ;;  %v12570_v19 = vcombine.high %v2516_v35, %v2520_v39  ;;  %v12569_v55 = vcombine.low %v2516_v35, %v2520_v39 }
 0x3cf   :  { %9099 = vmatpush1.bf16.msra.mxu0 %v12481_v50  ;;  %v2648_v56 = vld [vmem:[#allocation8 + $0xf30] sm:$0xff] }
 0x3d0   :  { %9140 = vmatpush1.bf16.msra.mxu1 %v12609_v57  ;;  %9100 = vmatprep.subr.bf16.mxu0 %v12474_v52  ;;  %v12698_v48 = vcombine.high %v2644_v40, %v2648_v56  ;;  %v2508_v50 = vld [vmem:[#allocation8 + $0xad0] sm:$0xff]  ;;  %v12697_v30 = vcombine.low %v2644_v40, %v2648_v56 }
 0x3d1   :  { %9141 = vmatprep.subr.bf16.mxu1 %v12602_v53  ;;  %v2512_v57 = vld [vmem:[#allocation8 + $0xaf0] sm:$0xff] }
 0x3d2   :  { %v2636_v52 = vld [vmem:[#allocation8 + $0xed0] sm:$0xff]  ;;  %v12562_v37 = vcombine.high %v2508_v50, %v2512_v57  ;;  %v12561_v2 = vcombine.low %v2508_v50, %v2512_v57 }
 0x3d3   :  { %9101 = vmatpush1.bf16.msra.mxu0 %v12473_v61  ;;  %v2640_v53 = vld [vmem:[#allocation8 + $0xef0] sm:$0xff] }
 0x3d4   :  { %9142 = vmatpush1.bf16.msra.mxu1 %v12601_v62  ;;  %9102 = vmatprep.subr.bf16.mxu0 %v12594_v21  ;;  %v12690_v41 = vcombine.high %v2636_v52, %v2640_v53  ;;  %v2500_v61 = vld [vmem:[#allocation8 + $0xa90] sm:$0xff]  ;;  %v12689_v18 = vcombine.low %v2636_v52, %v2640_v53 }
 0x3d5   :  { %9143 = vmatprep.subr.bf16.mxu1 %v12722_v58  ;;  %v2504_v62 = vld [vmem:[#allocation8 + $0xab0] sm:$0xff] }
 0x3d6   :  { %v2628_v21 = vld [vmem:[#allocation8 + $0xe90] sm:$0xff]  ;;  %v12554_v3 = vcombine.high %v2500_v61, %v2504_v62  ;;  %v12553_v16 = vcombine.low %v2500_v61, %v2504_v62 }
 0x3d7   :  { %9103 = vmatpush2.bf16.msra.mxu0 %v12593_v9  ;;  %v2632_v58 = vld [vmem:[#allocation8 + $0xeb0] sm:$0xff] }
 0x3d8   :  { %9144 = vmatpush2.bf16.msra.mxu1 %v12721_v11  ;;  %9104 = vmatprep.subr.bf16.mxu0 %v12586_v13  ;;  %v12682_v4 = vcombine.high %v2628_v21, %v2632_v58  ;;  %v2492_v9 = vld [vmem:[#allocation8 + $0xa50] sm:$0xff]  ;;  %v12681_v36 = vcombine.low %v2628_v21, %v2632_v58 }
 0x3d9   :  { %9145 = vmatprep.subr.bf16.mxu1 %v12714_v15  ;;  %v2496_v11 = vld [vmem:[#allocation8 + $0xa70] sm:$0xff] }
 0x3da   :  { %v2620_v13 = vld [vmem:[#allocation8 + $0xe50] sm:$0xff]  ;;  %v12546_v22 = vcombine.high %v2492_v9, %v2496_v11  ;;  %v12545_v35 = vcombine.low %v2492_v9, %v2496_v11 }
 0x3db   :  { %9105 = vmatpush2.bf16.msra.mxu0 %v12585_v47  ;;  %v2624_v15 = vld [vmem:[#allocation8 + $0xe70] sm:$0xff] }
 0x3dc   :  { %9146 = vmatpush2.bf16.msra.mxu1 %v12713_v31  ;;  %9106 = vmatprep.subr.bf16.mxu0 %v12578_v32  ;;  %v12674_v24 = vcombine.high %v2620_v13, %v2624_v15  ;;  %v2484_v47 = vld [vmem:[#allocation8 + $0xa10] sm:$0xff]  ;;  %v12673_v39 = vcombine.low %v2620_v13, %v2624_v15 }
 0x3dd   :  { %9147 = vmatprep.subr.bf16.mxu1 %v12706_v34  ;;  %v2488_v31 = vld [vmem:[#allocation8 + $0xa30] sm:$0xff] }
 0x3de   :  { %v2612_v32 = vld [vmem:[#allocation8 + $0xe10] sm:$0xff]  ;;  %v12538_v40 = vcombine.high %v2484_v47, %v2488_v31  ;;  %v12537_v50 = vcombine.low %v2484_v47, %v2488_v31 }
 0x3df   :  { %9107 = vmatpush2.bf16.msra.mxu0 %v12577_v42  ;;  %v2616_v34 = vld [vmem:[#allocation8 + $0xe30] sm:$0xff] }
 0x3e0   :  { %9148 = vmatpush2.bf16.msra.mxu1 %v12705_v43  ;;  %9108 = vmatprep.subr.bf16.mxu0 %v12570_v19  ;;  %v12666_v56 = vcombine.high %v2612_v32, %v2616_v34  ;;  %v2732_v42 = vld [vmem:[#allocation8 + $0x11d0] sm:$0xff]  ;;  %v12665_v57 = vcombine.low %v2612_v32, %v2616_v34 }
 0x3e1   :  { %9149 = vmatprep.subr.bf16.mxu1 %v12698_v48  ;;  %v2736_v43 = vld [vmem:[#allocation8 + $0x11f0] sm:$0xff] }
 0x3e2   :  { %v2860_v19 = vld [vmem:[#allocation8 + $0x15d0] sm:$0xff]  ;;  %v12786_v52 = vcombine.high %v2732_v42, %v2736_v43 }
 0x3e3   :  { %9109 = vmatpush2.bf16.msra.mxu0 %v12569_v55  ;;  %v2864_v48 = vld [vmem:[#allocation8 + $0x15f0] sm:$0xff] }
 0x3e4   :  { %9150 = vmatpush2.bf16.msra.mxu1 %v12697_v30  ;;  %9110 = vmatprep.subr.bf16.mxu0 %v12562_v37  ;;  %v12914_v53 = vcombine.high %v2860_v19, %v2864_v48  ;;  %v2724_v55 = vld [vmem:[#allocation8 + $0x1190] sm:$0xff]  ;;  %v12785_v37 = vcombine.low %v2732_v42, %v2736_v43  ;;  %v12913_v62 = vcombine.low %v2860_v19, %v2864_v48 }
 0x3e5   :  { %9151 = vmatprep.subr.bf16.mxu1 %v12690_v41  ;;  %v2728_v30 = vld [vmem:[#allocation8 + $0x11b0] sm:$0xff] }
 0x3e6   :  { %v2852_v41 = vld [vmem:[#allocation8 + $0x1590] sm:$0xff]  ;;  %v12778_v21 = vcombine.high %v2724_v55, %v2728_v30  ;;  %v12777_v15 = vcombine.low %v2724_v55, %v2728_v30 }
 0x3e7   :  { %9111 = vmatpush2.bf16.msra.mxu0 %v12561_v2  ;;  %v2856_v61 = vld [vmem:[#allocation8 + $0x15b0] sm:$0xff] }
 0x3e8   :  { %9152 = vmatpush2.bf16.msra.mxu1 %v12689_v18  ;;  %9112 = vmatprep.subr.bf16.mxu0 %v12554_v3  ;;  %v2716_v58 = vld [vmem:[#allocation8 + $0x1150] sm:$0xff]  ;;  %v12906_v3 = vcombine.high %v2852_v41, %v2856_v61 }
 0x3e9   :  { %9153 = vmatprep.subr.bf16.mxu1 %v12682_v4  ;;  %v2720_v2 = vld [vmem:[#allocation8 + $0x1170] sm:$0xff] }
 0x3ea   :  { %v2844_v4 = vld [vmem:[#allocation8 + $0x1550] sm:$0xff]  ;;  %v12769_v43 = vcombine.low %v2716_v58, %v2720_v2 }
 0x3eb   :  { %9113 = vmatpush2.bf16.msra.mxu0 %v12553_v16  ;;  %v2848_v9 = vld [vmem:[#allocation8 + $0x1570] sm:$0xff] }
 0x3ec   :  { %9154 = vmatpush2.bf16.msra.mxu1 %v12681_v36  ;;  %9114 = vmatprep.subr.bf16.mxu0 %v12546_v22  ;;  %v12905_v36 = vcombine.low %v2852_v41, %v2856_v61  ;;  %v12770_v22 = vcombine.high %v2716_v58, %v2720_v2  ;;  %v2708_v32 = vld [vmem:[#allocation8 + $0x1110] sm:$0xff]  ;;  %v12897_v48 = vcombine.low %v2844_v4, %v2848_v9 }
 0x3ed   :  { %9155 = vmatprep.subr.bf16.mxu1 %v12674_v24  ;;  %v2712_v34 = vld [vmem:[#allocation8 + $0x1130] sm:$0xff] }
 0x3ee   :  { %v2828_v55 = vld [vmem:[#allocation8 + $0x14d0] sm:$0xff] }
 0x3ef   :  { %9115 = vmatpush2.bf16.msra.mxu0 %v12545_v35  ;;  %v2832_v30 = vld [vmem:[#allocation8 + $0x14f0] sm:$0xff] }
 0x3f0   :  { %9156 = vmatpush2.bf16.msra.mxu1 %v12673_v39  ;;  %9116 = vmatprep.subr.bf16.mxu0 %v12538_v40  ;;  %v2836_v39 = vld [vmem:[#allocation8 + $0x1510] sm:$0xff] }
 0x3f1   :  { %9157 = vmatprep.subr.bf16.mxu1 %v12666_v56  ;;  %v2840_v40 = vld [vmem:[#allocation8 + $0x1530] sm:$0xff] }
 0x3f2   :  { %v12889_v41 = vcombine.low %v2836_v39, %v2840_v40  ;;  %v2696_v58 = vld [vmem:[#allocation8 + $0x10b0] sm:$0xff] }
 0x3f3   :  { %9117 = vmatpush2.bf16.msra.mxu0 %v12537_v50  ;;  %v12762_v50 = vcombine.high %v2708_v32, %v2712_v34  ;;  %v2820_v2 = vld [vmem:[#allocation8 + $0x1490] sm:$0xff] }
 0x3f4   :  { %9158 = vmatpush2.bf16.msra.mxu1 %v12665_v57  ;;  %9168 = vmatprep.subr.bf16.mxu0 %v12786_v52  ;;  %v12890_v57 = vcombine.high %v2836_v39, %v2840_v40  ;;  %v2700_v52 = vld [vmem:[#allocation8 + $0x10d0] sm:$0xff] }
 0x3f5   :  { %9209 = vmatprep.subr.bf16.mxu1 %v12914_v53  ;;  %v2704_v53 = vld [vmem:[#allocation8 + $0x10f0] sm:$0xff] }
 0x3f6   :  { %v8874_v18 = vpop.f32.mrf.mxu0  ;;  %9119 = vmatmul.mubr.bf16.vlgmr.msra.gmra.mxu0 %v14409_v17  ;;  %v12754_v61 = vcombine.high %v2700_v52, %v2704_v53  ;;  %v2808_v39 = vld [vmem:[#allocation8 + $0x1430] sm:$0xff] }
 0x3f7   :  { %v8875_v11 = vadd.f32 %v8874_v18, %v14521_v38  ;;  %v8915_v13 = vpop.f32.mrf.mxu1  ;;  %9160 = vmatmul.mubr.bf16.vlgmr.msra.gmra.mxu1 %v14413_v29  ;;  %9169 = vmatpush1.bf16.msra.mxu0 %v12785_v37  ;;  %v12898_v38 = vcombine.high %v2844_v4, %v2848_v9  ;;  %v12761_v37 = vcombine.low %v2708_v32, %v2712_v34  ;;  %v2824_v18 = vld [vmem:[#allocation8 + $0x14b0] sm:$0xff] }
 0x3f8   :  { %9200 = vmatprep.mubr.bf16.mxu0 %v14425_v63  ;;  %9210 = vmatpush1.bf16.msra.mxu1 %v12913_v62  ;;  %v8876_v16 = vpop.f32.mrf.mxu0  ;;  %v12882_v62 = vcombine.high %v2828_v55, %v2832_v30  ;;  %v12881_v4 = vcombine.low %v2828_v55, %v2832_v30  ;;  %v2676_v32 = vld [vmem:[#allocation8 + $0x1010] sm:$0xff] }
 0x3f9   :  { %v14531_v24 = vadd.f32 %v8915_v13, %v8875_v11  ;;  %9241 = vmatprep.mubr.bf16.mxu1 %v14427_v7  ;;  %v8877_v47 = vadd.f32 %v8876_v16, %v14525_v28  ;;  %v8917_v31 = vpop.f32.mrf.mxu1  ;;  %9170 = vmatprep.subr.bf16.mxu0 %v12778_v21  ;;  %v2692_v21 = vld [vmem:[#allocation8 + $0x1090] sm:$0xff]  ;;  %v12874_v11 = vcombine.high %v2820_v2, %v2824_v18 }
 0x3fa   :  { %v8878_v35 = vpop.f32.mrf.mxu0  ;;  %9211 = vmatprep.subr.bf16.mxu1 %v12906_v3  ;;  %v12753_v3 = vcombine.low %v2700_v52, %v2704_v53  ;;  %v12746_v9 = vcombine.high %v2692_v21, %v2696_v58  ;;  %v2684_v13 = vld [vmem:[#allocation8 + $0x1050] sm:$0xff] }
 0x3fb   :  { %v14535_v56 = vadd.f32 %v8917_v31, %v8877_v47  ;;  %v8919_v42 = vpop.f32.mrf.mxu1  ;;  %9171 = vmatpush1.bf16.msra.mxu0 %v12777_v15  ;;  %v2688_v15 = vld [vmem:[#allocation8 + $0x1070] sm:$0xff]  ;;  %v12873_v47 = vcombine.low %v2820_v2, %v2824_v18 }
 0x3fc   :  { %9212 = vmatpush1.bf16.msra.mxu1 %v12905_v36  ;;  %v8879_v19 = vpop.f32.mrf.mxu0  ;;  %9172 = vmatprep.subr.bf16.mxu0 %v12770_v22  ;;  %v2812_v16 = vld [vmem:[#allocation8 + $0x1450] sm:$0xff]  ;;  %v12745_v22 = vcombine.low %v2692_v21, %v2696_v58  ;;  %v12738_v31 = vcombine.high %v2684_v13, %v2688_v15  ;;  %v12737_v40 = vcombine.low %v2684_v13, %v2688_v15 }
 0x3fd   :  { %v8920_v28 = vpop.f32.mrf.mxu1  ;;  %9213 = vmatprep.subr.bf16.mxu1 %v12898_v38  ;;  %v2816_v36 = vld [vmem:[#allocation8 + $0x1470] sm:$0xff] }
 0x3fe   :  { %v12866_v38 = vcombine.high %v2812_v16, %v2816_v36  ;;  %v2680_v34 = vld [vmem:[#allocation8 + $0x1030] sm:$0xff]  ;;  %v12865_v42 = vcombine.low %v2812_v16, %v2816_v36 }
 0x3ff   :  { %9173 = vmatpush1.bf16.msra.mxu0 %v12769_v43  ;;  %v2804_v35 = vld [vmem:[#allocation8 + $0x1410] sm:$0xff]  ;;  %v12730_v43 = vcombine.high %v2676_v32, %v2680_v34  ;;  %v12729_v52 = vcombine.low %v2676_v32, %v2680_v34 }
 0x400   :  { %9214 = vmatpush1.bf16.msra.mxu1 %v12897_v48  ;;  %9174 = vmatprep.subr.bf16.mxu0 %v12762_v50  ;;  %v12858_v19 = vcombine.high %v2804_v35, %v2808_v39  ;;  %v2796_v48 = vld [vmem:[#allocation8 + $0x13d0] sm:$0xff]  ;;  %v12857_v53 = vcombine.low %v2804_v35, %v2808_v39 }
 0x401   :  { %9215 = vmatprep.subr.bf16.mxu1 %v12890_v57  ;;  %v2800_v50 = vld [vmem:[#allocation8 + $0x13f0] sm:$0xff] }
 0x402   :  { %v2924_v28 = vld [vmem:[#allocation8 + $0x17d0] sm:$0xff]  ;;  %v12850_v55 = vcombine.high %v2796_v48, %v2800_v50  ;;  %v12849_v21 = vcombine.low %v2796_v48, %v2800_v50 }
 0x403   :  { %9175 = vmatpush1.bf16.msra.mxu0 %v12761_v37  ;;  %v2928_v57 = vld [vmem:[#allocation8 + $0x17f0] sm:$0xff] }
 0x404   :  { %9216 = vmatpush1.bf16.msra.mxu1 %v12889_v41  ;;  %9176 = vmatprep.subr.bf16.mxu0 %v12754_v61  ;;  %v12978_v30 = vcombine.high %v2924_v28, %v2928_v57  ;;  %v2788_v37 = vld [vmem:[#allocation8 + $0x1390] sm:$0xff]  ;;  %v12977_v58 = vcombine.low %v2924_v28, %v2928_v57 }
 0x405   :  { %9217 = vmatprep.subr.bf16.mxu1 %v12882_v62  ;;  %v2792_v41 = vld [vmem:[#allocation8 + $0x13b0] sm:$0xff] }
 0x406   :  { %v2916_v61 = vld [vmem:[#allocation8 + $0x1790] sm:$0xff]  ;;  %v12842_v2 = vcombine.high %v2788_v37, %v2792_v41  ;;  %v12841_v13 = vcombine.low %v2788_v37, %v2792_v41 }
 0x407   :  { %9177 = vmatpush1.bf16.msra.mxu0 %v12753_v3  ;;  %v2920_v62 = vld [vmem:[#allocation8 + $0x17b0] sm:$0xff] }
 0x408   :  { %9218 = vmatpush1.bf16.msra.mxu1 %v12881_v4  ;;  %9178 = vmatprep.subr.bf16.mxu0 %v12746_v9  ;;  %v12970_v18 = vcombine.high %v2916_v61, %v2920_v62  ;;  %v2780_v3 = vld [vmem:[#allocation8 + $0x1350] sm:$0xff]  ;;  %v12969_v15 = vcombine.low %v2916_v61, %v2920_v62 }
 0x409   :  { %9219 = vmatprep.subr.bf16.mxu1 %v12874_v11  ;;  %v2784_v4 = vld [vmem:[#allocation8 + $0x1370] sm:$0xff] }
 0x40a   :  { %v2908_v9 = vld [vmem:[#allocation8 + $0x1750] sm:$0xff]  ;;  %v12834_v16 = vcombine.high %v2780_v3, %v2784_v4  ;;  %v12833_v32 = vcombine.low %v2780_v3, %v2784_v4 }
 0x40b   :  { %9179 = vmatpush1.bf16.msra.mxu0 %v12745_v22  ;;  %v2912_v11 = vld [vmem:[#allocation8 + $0x1770] sm:$0xff] }
 0x40c   :  { %9220 = vmatpush1.bf16.msra.mxu1 %v12873_v47  ;;  %9180 = vmatprep.subr.bf16.mxu0 %v12738_v31  ;;  %v12962_v36 = vcombine.high %v2908_v9, %v2912_v11  ;;  %v2772_v22 = vld [vmem:[#allocation8 + $0x1310] sm:$0xff]  ;;  %v12961_v34 = vcombine.low %v2908_v9, %v2912_v11 }
 0x40d   :  { %9221 = vmatprep.subr.bf16.mxu1 %v12866_v38  ;;  %v2776_v47 = vld [vmem:[#allocation8 + $0x1330] sm:$0xff] }
 0x40e   :  { %v2900_v31 = vld [vmem:[#allocation8 + $0x1710] sm:$0xff]  ;;  %v12826_v35 = vcombine.high %v2772_v22, %v2776_v47  ;;  %v12825_v48 = vcombine.low %v2772_v22, %v2776_v47 }
 0x40f   :  { %9181 = vmatpush1.bf16.msra.mxu0 %v12737_v40  ;;  %v2904_v38 = vld [vmem:[#allocation8 + $0x1730] sm:$0xff] }
 0x410   :  { %9222 = vmatpush1.bf16.msra.mxu1 %v12865_v42  ;;  %9182 = vmatprep.subr.bf16.mxu0 %v12730_v43  ;;  %v12954_v39 = vcombine.high %v2900_v31, %v2904_v38  ;;  %v2764_v40 = vld [vmem:[#allocation8 + $0x12d0] sm:$0xff]  ;;  %v12953_v50 = vcombine.low %v2900_v31, %v2904_v38 }
 0x411   :  { %9223 = vmatprep.subr.bf16.mxu1 %v12858_v19  ;;  %v2768_v42 = vld [vmem:[#allocation8 + $0x12f0] sm:$0xff] }
 0x412   :  { %v2892_v43 = vld [vmem:[#allocation8 + $0x16d0] sm:$0xff]  ;;  %v12818_v28 = vcombine.high %v2764_v40, %v2768_v42  ;;  %v12817_v37 = vcombine.low %v2764_v40, %v2768_v42 }
 0x413   :  { %9183 = vmatpush1.bf16.msra.mxu0 %v12729_v52  ;;  %v2896_v19 = vld [vmem:[#allocation8 + $0x16f0] sm:$0xff] }
 0x414   :  { %9224 = vmatpush1.bf16.msra.mxu1 %v12857_v53  ;;  %9184 = vmatprep.subr.bf16.mxu0 %v12850_v55  ;;  %v12946_v57 = vcombine.high %v2892_v43, %v2896_v19  ;;  %v2756_v52 = vld [vmem:[#allocation8 + $0x1290] sm:$0xff]  ;;  %v12945_v41 = vcombine.low %v2892_v43, %v2896_v19 }
 0x415   :  { %9225 = vmatprep.subr.bf16.mxu1 %v12978_v30  ;;  %v2760_v53 = vld [vmem:[#allocation8 + $0x12b0] sm:$0xff] }
 0x416   :  { %v2884_v55 = vld [vmem:[#allocation8 + $0x1690] sm:$0xff]  ;;  %v12810_v61 = vcombine.high %v2756_v52, %v2760_v53  ;;  %v12809_v3 = vcombine.low %v2756_v52, %v2760_v53 }
 0x417   :  { %9185 = vmatpush2.bf16.msra.mxu0 %v12849_v21  ;;  %v2888_v30 = vld [vmem:[#allocation8 + $0x16b0] sm:$0xff] }
 0x418   :  { %9226 = vmatpush2.bf16.msra.mxu1 %v12977_v58  ;;  %9186 = vmatprep.subr.bf16.mxu0 %v12842_v2  ;;  %v12938_v62 = vcombine.high %v2884_v55, %v2888_v30  ;;  %v2748_v21 = vld [vmem:[#allocation8 + $0x1250] sm:$0xff]  ;;  %v12937_v4 = vcombine.low %v2884_v55, %v2888_v30 }
 0x419   :  { %9227 = vmatprep.subr.bf16.mxu1 %v12970_v18  ;;  %v2752_v58 = vld [vmem:[#allocation8 + $0x1270] sm:$0xff] }
 0x41a   :  { %v2876_v2 = vld [vmem:[#allocation8 + $0x1650] sm:$0xff]  ;;  %v12802_v9 = vcombine.high %v2748_v21, %v2752_v58  ;;  %v12801_v22 = vcombine.low %v2748_v21, %v2752_v58 }
 0x41b   :  { %9187 = vmatpush2.bf16.msra.mxu0 %v12841_v13  ;;  %v2880_v18 = vld [vmem:[#allocation8 + $0x1670] sm:$0xff] }
 0x41c   :  { %9228 = vmatpush2.bf16.msra.mxu1 %v12969_v15  ;;  %9188 = vmatprep.subr.bf16.mxu0 %v12834_v16  ;;  %v12930_v11 = vcombine.high %v2876_v2, %v2880_v18  ;;  %v2740_v13 = vld [vmem:[#allocation8 + $0x1210] sm:$0xff]  ;;  %v12929_v47 = vcombine.low %v2876_v2, %v2880_v18 }
 0x41d   :  { %9229 = vmatprep.subr.bf16.mxu1 %v12962_v36  ;;  %v2744_v15 = vld [vmem:[#allocation8 + $0x1230] sm:$0xff] }
 0x41e   :  { %v2868_v16 = vld [vmem:[#allocation8 + $0x1610] sm:$0xff]  ;;  %v12794_v31 = vcombine.high %v2740_v13, %v2744_v15  ;;  %v12793_v40 = vcombine.low %v2740_v13, %v2744_v15 }
 0x41f   :  { %9189 = vmatpush2.bf16.msra.mxu0 %v12833_v32  ;;  %v2872_v36 = vld [vmem:[#allocation8 + $0x1630] sm:$0xff] }
 0x420   :  { %9230 = vmatpush2.bf16.msra.mxu1 %v12961_v34  ;;  %9190 = vmatprep.subr.bf16.mxu0 %v12826_v35  ;;  %v12922_v38 = vcombine.high %v2868_v16, %v2872_v36  ;;  %v2988_v32 = vld [vmem:[#allocation8 + $0x19d0] sm:$0xff]  ;;  %v12921_v42 = vcombine.low %v2868_v16, %v2872_v36 }
 0x421   :  { %9231 = vmatprep.subr.bf16.mxu1 %v12954_v39  ;;  %v2992_v34 = vld [vmem:[#allocation8 + $0x19f0] sm:$0xff] }
 0x422   :  { %v3116_v35 = vld [vmem:[#allocation8 + $0x1dd0] sm:$0xff]  ;;  %v13042_v43 = vcombine.high %v2988_v32, %v2992_v34 }
 0x423   :  { %9191 = vmatpush2.bf16.msra.mxu0 %v12825_v48  ;;  %v3120_v39 = vld [vmem:[#allocation8 + $0x1df0] sm:$0xff] }
 0x424   :  { %9232 = vmatpush2.bf16.msra.mxu1 %v12953_v50  ;;  %9192 = vmatprep.subr.bf16.mxu0 %v12818_v28  ;;  %v13170_v19 = vcombine.high %v3116_v35, %v3120_v39  ;;  %v2980_v48 = vld [vmem:[#allocation8 + $0x1990] sm:$0xff]  ;;  %v13041_v28 = vcombine.low %v2988_v32, %v2992_v34  ;;  %v13169_v53 = vcombine.low %v3116_v35, %v3120_v39 }
 0x425   :  { %9233 = vmatprep.subr.bf16.mxu1 %v12946_v57  ;;  %v2984_v50 = vld [vmem:[#allocation8 + $0x19b0] sm:$0xff] }
 0x426   :  { %v3108_v57 = vld [vmem:[#allocation8 + $0x1d90] sm:$0xff]  ;;  %v13034_v55 = vcombine.high %v2980_v48, %v2984_v50  ;;  %v13033_v18 = vcombine.low %v2980_v48, %v2984_v50 }
 0x427   :  { %9193 = vmatpush2.bf16.msra.mxu0 %v12817_v37  ;;  %v3112_v52 = vld [vmem:[#allocation8 + $0x1db0] sm:$0xff] }
 0x428   :  { %9234 = vmatpush2.bf16.msra.mxu1 %v12945_v41  ;;  %9194 = vmatprep.subr.bf16.mxu0 %v12810_v61  ;;  %v2972_v30 = vld [vmem:[#allocation8 + $0x1950] sm:$0xff]  ;;  %v13162_v61 = vcombine.high %v3108_v57, %v3112_v52 }
 0x429   :  { %9235 = vmatprep.subr.bf16.mxu1 %v12938_v62  ;;  %v2976_v37 = vld [vmem:[#allocation8 + $0x1970] sm:$0xff] }
 0x42a   :  { %v3100_v62 = vld [vmem:[#allocation8 + $0x1d50] sm:$0xff]  ;;  %v13025_v34 = vcombine.low %v2972_v30, %v2976_v37 }
 0x42b   :  { %9195 = vmatpush2.bf16.msra.mxu0 %v12809_v3  ;;  %v3104_v21 = vld [vmem:[#allocation8 + $0x1d70] sm:$0xff] }
 0x42c   :  { %9236 = vmatpush2.bf16.msra.mxu1 %v12937_v4  ;;  %9196 = vmatprep.subr.bf16.mxu0 %v12802_v9  ;;  %v13161_v4 = vcombine.low %v3108_v57, %v3112_v52  ;;  %v13026_v9 = vcombine.high %v2972_v30, %v2976_v37  ;;  %v2964_v16 = vld [vmem:[#allocation8 + $0x1910] sm:$0xff]  ;;  %v13153_v39 = vcombine.low %v3100_v62, %v3104_v21 }
 0x42d   :  { %9237 = vmatprep.subr.bf16.mxu1 %v12930_v11  ;;  %v2968_v36 = vld [vmem:[#allocation8 + $0x1930] sm:$0xff] }
 0x42e   :  { %v3084_v48 = vld [vmem:[#allocation8 + $0x1cd0] sm:$0xff] }
 0x42f   :  { %9197 = vmatpush2.bf16.msra.mxu0 %v12801_v22  ;;  %v3088_v50 = vld [vmem:[#allocation8 + $0x1cf0] sm:$0xff] }
 0x430   :  { %9238 = vmatpush2.bf16.msra.mxu1 %v12929_v47  ;;  %9198 = vmatprep.subr.bf16.mxu0 %v12794_v31  ;;  %v3092_v47 = vld [vmem:[#allocation8 + $0x1d10] sm:$0xff] }
 0x431   :  { %9239 = vmatprep.subr.bf16.mxu1 %v12922_v38  ;;  %v3096_v31 = vld [vmem:[#allocation8 + $0x1d30] sm:$0xff] }
 0x432   :  { %v13145_v57 = vcombine.low %v3092_v47, %v3096_v31  ;;  %v2952_v30 = vld [vmem:[#allocation8 + $0x18b0] sm:$0xff] }
 0x433   :  { %9199 = vmatpush2.bf16.msra.mxu0 %v12793_v40  ;;  %v13018_v40 = vcombine.high %v2964_v16, %v2968_v36  ;;  %v3076_v37 = vld [vmem:[#allocation8 + $0x1c90] sm:$0xff] }
 0x434   :  { %9240 = vmatpush2.bf16.msra.mxu1 %v12921_v42  ;;  %9250 = vmatprep.subr.bf16.mxu0 %v13042_v43  ;;  %v13146_v42 = vcombine.high %v3092_v47, %v3096_v31  ;;  %v2956_v43 = vld [vmem:[#allocation8 + $0x18d0] sm:$0xff] }
 0x435   :  { %9291 = vmatprep.subr.bf16.mxu1 %v13170_v19  ;;  %v2960_v19 = vld [vmem:[#allocation8 + $0x18f0] sm:$0xff] }
 0x436   :  { %v8956_v41 = vpop.f32.mrf.mxu0  ;;  %9201 = vmatmul.mubr.bf16.vlgmr.msra.gmra.mxu0 %v14437_v51  ;;  %v13010_v52 = vcombine.high %v2956_v43, %v2960_v19  ;;  %v3064_v47 = vld [vmem:[#allocation8 + $0x1c30] sm:$0xff] }
 0x437   :  { %v8957_v58 = vadd.f32 %v8956_v41, %v14531_v24  ;;  %v8997_v2 = vpop.f32.mrf.mxu1  ;;  %9242 = vmatmul.mubr.bf16.vlgmr.msra.gmra.mxu1 %v14439_v12  ;;  %9251 = vmatpush1.bf16.msra.mxu0 %v13041_v28  ;;  %v13154_v24 = vcombine.high %v3100_v62, %v3104_v21  ;;  %v13017_v28 = vcombine.low %v2964_v16, %v2968_v36  ;;  %v3080_v41 = vld [vmem:[#allocation8 + $0x1cb0] sm:$0xff] }
 0x438   :  { %9282 = vmatprep.mubr.bf16.mxu0 %v14451_v45  ;;  %9292 = vmatpush1.bf16.msra.mxu1 %v13169_v53  ;;  %v8958_v3 = vpop.f32.mrf.mxu0  ;;  %v13138_v53 = vcombine.high %v3084_v48, %v3088_v50  ;;  %v13137_v62 = vcombine.low %v3084_v48, %v3088_v50  ;;  %v2932_v16 = vld [vmem:[#allocation8 + $0x1810] sm:$0xff] }
 0x439   :  { %v14541_v11 = vadd.f32 %v8997_v2, %v8957_v58  ;;  %9323 = vmatprep.mubr.bf16.mxu1 %v14453_v49  ;;  %v8959_v13 = vadd.f32 %v8958_v3, %v14535_v56  ;;  %v8999_v15 = vpop.f32.mrf.mxu1  ;;  %9252 = vmatprep.subr.bf16.mxu0 %v13034_v55  ;;  %v2948_v55 = vld [vmem:[#allocation8 + $0x1890] sm:$0xff]  ;;  %v13130_v58 = vcombine.high %v3076_v37, %v3080_v41 }
 0x43a   :  { %v8960_v22 = vpop.f32.mrf.mxu0  ;;  %9293 = vmatprep.subr.bf16.mxu1 %v13162_v61  ;;  %v13009_v61 = vcombine.low %v2956_v43, %v2960_v19  ;;  %v13002_v21 = vcombine.high %v2948_v55, %v2952_v30  ;;  %v2940_v2 = vld [vmem:[#allocation8 + $0x1850] sm:$0xff] }
 0x43b   :  { %v14545_v38 = vadd.f32 %v8999_v15, %v8959_v13  ;;  %v9001_v32 = vpop.f32.mrf.mxu1  ;;  %9253 = vmatpush1.bf16.msra.mxu0 %v13033_v18  ;;  %v2944_v18 = vld [vmem:[#allocation8 + $0x1870] sm:$0xff]  ;;  %v13129_v13 = vcombine.low %v3076_v37, %v3080_v41  ;;  %vm9662_vm3 = vcmp.gt.f32.partialorder %v14541_v11, 0.0 }
 0x43c   :  { %9294 = vmatpush1.bf16.msra.mxu1 %v13161_v4  ;;  %v8961_v35 = vpop.f32.mrf.mxu0  ;;  %9254 = vmatprep.subr.bf16.mxu0 %v13026_v9  ;;  %v3068_v3 = vld [vmem:[#allocation8 + $0x1c50] sm:$0xff]  ;;  %v13001_v9 = vcombine.low %v2948_v55, %v2952_v30  ;;  %v12994_v15 = vcombine.high %v2940_v2, %v2944_v18  ;;  %v12993_v31 = vcombine.low %v2940_v2, %v2944_v18 }
 0x43d   :  { %v9002_v56 = vpop.f32.mrf.mxu1  ;;  %9295 = vmatprep.subr.bf16.mxu1 %v13154_v24  ;;  %v3072_v4 = vld [vmem:[#allocation8 + $0x1c70] sm:$0xff]  ;;  %vm9663_vm1 = vcmp.gt.f32.partialorder %v14545_v38, 0.0 }
 0x43e   :  { %v13122_v24 = vcombine.high %v3068_v3, %v3072_v4  ;;  %v2936_v36 = vld [vmem:[#allocation8 + $0x1830] sm:$0xff]  ;;  %v13121_v32 = vcombine.low %v3068_v3, %v3072_v4 }
 0x43f   :  { %9255 = vmatpush1.bf16.msra.mxu0 %v13025_v34  ;;  %v3060_v22 = vld [vmem:[#allocation8 + $0x1c10] sm:$0xff]  ;;  %v12986_v34 = vcombine.high %v2932_v16, %v2936_v36  ;;  %v12985_v43 = vcombine.low %v2932_v16, %v2936_v36 }
 0x440   :  { %9296 = vmatpush1.bf16.msra.mxu1 %v13153_v39  ;;  %9256 = vmatprep.subr.bf16.mxu0 %v13018_v40  ;;  %v13114_v35 = vcombine.high %v3060_v22, %v3064_v47  ;;  %v3052_v39 = vld [vmem:[#allocation8 + $0x1bd0] sm:$0xff]  ;;  %v13113_v19 = vcombine.low %v3060_v22, %v3064_v47 }
 0x441   :  { %9297 = vmatprep.subr.bf16.mxu1 %v13146_v42  ;;  %v3056_v40 = vld [vmem:[#allocation8 + $0x1bf0] sm:$0xff] }
 0x442   :  { %v3180_v56 = vld [vmem:[#allocation8 + $0x1fd0] sm:$0xff]  ;;  %v13106_v48 = vcombine.high %v3052_v39, %v3056_v40  ;;  %v13105_v55 = vcombine.low %v3052_v39, %v3056_v40 }
 0x443   :  { %9257 = vmatpush1.bf16.msra.mxu0 %v13017_v28  ;;  %v3184_v42 = vld [vmem:[#allocation8 + $0x1ff0] sm:$0xff] }
 0x444   :  { %9298 = vmatpush1.bf16.msra.mxu1 %v13145_v57  ;;  %9258 = vmatprep.subr.bf16.mxu0 %v13010_v52  ;;  %v13234_v50 = vcombine.high %v3180_v56, %v3184_v42  ;;  %v3044_v28 = vld [vmem:[#allocation8 + $0x1b90] sm:$0xff]  ;;  %v13233_v30 = vcombine.low %v3180_v56, %v3184_v42 }
 0x445   :  { %9299 = vmatprep.subr.bf16.mxu1 %v13138_v53  ;;  %v3048_v57 = vld [vmem:[#allocation8 + $0x1bb0] sm:$0xff] }
 0x446   :  { %v3172_v52 = vld [vmem:[#allocation8 + $0x1f90] sm:$0xff]  ;;  %v13098_v37 = vcombine.high %v3044_v28, %v3048_v57  ;;  %v13097_v2 = vcombine.low %v3044_v28, %v3048_v57 }
 0x447   :  { %9259 = vmatpush1.bf16.msra.mxu0 %v13009_v61  ;;  %v3176_v53 = vld [vmem:[#allocation8 + $0x1fb0] sm:$0xff] }
 0x448   :  { %9300 = vmatpush1.bf16.msra.mxu1 %v13137_v62  ;;  %9260 = vmatprep.subr.bf16.mxu0 %v13002_v21  ;;  %v13226_v41 = vcombine.high %v3172_v52, %v3176_v53  ;;  %v3036_v61 = vld [vmem:[#allocation8 + $0x1b50] sm:$0xff]  ;;  %v13225_v18 = vcombine.low %v3172_v52, %v3176_v53 }
 0x449   :  { %9301 = vmatprep.subr.bf16.mxu1 %v13130_v58  ;;  %v3040_v62 = vld [vmem:[#allocation8 + $0x1b70] sm:$0xff] }
 0x44a   :  { %v3164_v21 = vld [vmem:[#allocation8 + $0x1f50] sm:$0xff]  ;;  %v13090_v3 = vcombine.high %v3036_v61, %v3040_v62  ;;  %v13089_v16 = vcombine.low %v3036_v61, %v3040_v62 }
 0x44b   :  { %9261 = vmatpush1.bf16.msra.mxu0 %v13001_v9  ;;  %v3168_v58 = vld [vmem:[#allocation8 + $0x1f70] sm:$0xff] }
 0x44c   :  { %9302 = vmatpush1.bf16.msra.mxu1 %v13129_v13  ;;  %9262 = vmatprep.subr.bf16.mxu0 %v12994_v15  ;;  %v13218_v4 = vcombine.high %v3164_v21, %v3168_v58  ;;  %v3028_v9 = vld [vmem:[#allocation8 + $0x1b10] sm:$0xff]  ;;  %v13217_v36 = vcombine.low %v3164_v21, %v3168_v58 }
 0x44d   :  { %9303 = vmatprep.subr.bf16.mxu1 %v13122_v24  ;;  %v3032_v13 = vld [vmem:[#allocation8 + $0x1b30] sm:$0xff] }
 0x44e   :  { %v3156_v15 = vld [vmem:[#allocation8 + $0x1f10] sm:$0xff]  ;;  %v13082_v22 = vcombine.high %v3028_v9, %v3032_v13  ;;  %v13081_v39 = vcombine.low %v3028_v9, %v3032_v13 }
 0x44f   :  { %9263 = vmatpush1.bf16.msra.mxu0 %v12993_v31  ;;  %v3160_v24 = vld [vmem:[#allocation8 + $0x1f30] sm:$0xff] }
 0x450   :  { %9304 = vmatpush1.bf16.msra.mxu1 %v13121_v32  ;;  %9264 = vmatprep.subr.bf16.mxu0 %v12986_v34  ;;  %v13210_v47 = vcombine.high %v3156_v15, %v3160_v24  ;;  %v3020_v31 = vld [vmem:[#allocation8 + $0x1ad0] sm:$0xff]  ;;  %v13209_v40 = vcombine.low %v3156_v15, %v3160_v24 }
 0x451   :  { %9305 = vmatprep.subr.bf16.mxu1 %v13114_v35  ;;  %v3024_v32 = vld [vmem:[#allocation8 + $0x1af0] sm:$0xff] }
 0x452   :  { %v3148_v34 = vld [vmem:[#allocation8 + $0x1ed0] sm:$0xff]  ;;  %v13074_v56 = vcombine.high %v3020_v31, %v3024_v32  ;;  %v13073_v28 = vcombine.low %v3020_v31, %v3024_v32 }
 0x453   :  { %9265 = vmatpush1.bf16.msra.mxu0 %v12985_v43  ;;  %v3152_v35 = vld [vmem:[#allocation8 + $0x1ef0] sm:$0xff] }
 0x454   :  { %9306 = vmatpush1.bf16.msra.mxu1 %v13113_v19  ;;  %9266 = vmatprep.subr.bf16.mxu0 %v13106_v48  ;;  %v13202_v42 = vcombine.high %v3148_v34, %v3152_v35  ;;  %v3012_v43 = vld [vmem:[#allocation8 + $0x1a90] sm:$0xff]  ;;  %v13201_v57 = vcombine.low %v3148_v34, %v3152_v35 }
 0x455   :  { %9307 = vmatprep.subr.bf16.mxu1 %v13234_v50  ;;  %v3016_v19 = vld [vmem:[#allocation8 + $0x1ab0] sm:$0xff] }
 0x456   :  { %v3140_v48 = vld [vmem:[#allocation8 + $0x1e90] sm:$0xff]  ;;  %v13066_v52 = vcombine.high %v3012_v43, %v3016_v19  ;;  %v13065_v61 = vcombine.low %v3012_v43, %v3016_v19  ;;  %v2341_v19 = vld [vmem:[#allocation8 + $0x598] sm:$0xff] }
 0x457   :  { %9267 = vmatpush2.bf16.msra.mxu0 %v13105_v55  ;;  %v3144_v50 = vld [vmem:[#allocation8 + $0x1eb0] sm:$0xff] }
 0x458   :  { %9308 = vmatpush2.bf16.msra.mxu1 %v13233_v30  ;;  %9268 = vmatprep.subr.bf16.mxu0 %v13098_v37  ;;  %v13194_v53 = vcombine.high %v3140_v48, %v3144_v50  ;;  %v3004_v55 = vld [vmem:[#allocation8 + $0x1a50] sm:$0xff]  ;;  %v13193_v62 = vcombine.low %v3140_v48, %v3144_v50  ;;  %v2345_v48 = vld [vmem:[#allocation8 + $0x5b8] sm:$0xff] }
 0x459   :  { %9309 = vmatprep.subr.bf16.mxu1 %v13226_v41  ;;  %v3008_v30 = vld [vmem:[#allocation8 + $0x1a70] sm:$0xff] }
 0x45a   :  { %v3132_v37 = vld [vmem:[#allocation8 + $0x1e50] sm:$0xff]  ;;  %v13058_v21 = vcombine.high %v3004_v55, %v3008_v30  ;;  %v13057_v9 = vcombine.low %v3004_v55, %v3008_v30  ;;  %v12396_v30 = vcombine.high %v2341_v19, %v2345_v48 }
 0x45b   :  { %9269 = vmatpush2.bf16.msra.mxu0 %v13097_v2  ;;  %v3136_v41 = vld [vmem:[#allocation8 + $0x1e70] sm:$0xff] }
 0x45c   :  { %9310 = vmatpush2.bf16.msra.mxu1 %v13225_v18  ;;  %9270 = vmatprep.subr.bf16.mxu0 %v13090_v3  ;;  %v13186_v58 = vcombine.high %v3132_v37, %v3136_v41  ;;  %v2996_v2 = vld [vmem:[#allocation8 + $0x1a10] sm:$0xff]  ;;  %v13185_v13 = vcombine.low %v3132_v37, %v3136_v41  ;;  %v2333_v37 = vld [vmem:[#allocation8 + $0x558] sm:$0xff] }
 0x45d   :  { %9311 = vmatprep.subr.bf16.mxu1 %v13218_v4  ;;  %v3000_v18 = vld [vmem:[#allocation8 + $0x1a30] sm:$0xff]  ;;  %v2337_v41 = vld [vmem:[#allocation8 + $0x578] sm:$0xff] }
 0x45e   :  { %v3124_v3 = vld [vmem:[#allocation8 + $0x1e10] sm:$0xff]  ;;  %v13050_v15 = vcombine.high %v2996_v2, %v3000_v18  ;;  %v13049_v31 = vcombine.low %v2996_v2, %v3000_v18 }
 0x45f   :  { %9271 = vmatpush2.bf16.msra.mxu0 %v13089_v16  ;;  %v3128_v4 = vld [vmem:[#allocation8 + $0x1e30] sm:$0xff]  ;;  %v2221_v16 = vld [vmem:[#allocation8 + $0x1d8] sm:$0xff] }
 0x460   :  { %9312 = vmatpush2.bf16.msra.mxu1 %v13217_v36  ;;  %9272 = vmatprep.subr.bf16.mxu0 %v13082_v22  ;;  %v13178_v24 = vcombine.high %v3124_v3, %v3128_v4  ;;  %v2225_v36 = vld [vmem:[#allocation8 + $0x1f8] sm:$0xff]  ;;  %v13177_v32 = vcombine.low %v3124_v3, %v3128_v4  ;;  %v12388_v4 = vcombine.high %v2333_v37, %v2337_v41 }
 0x461   :  { %9313 = vmatprep.subr.bf16.mxu1 %v13210_v47  ;;  %v2349_v22 = vld [vmem:[#allocation8 + $0x5d8] sm:$0xff]  ;;  %v12276_v34 = vcombine.high %v2221_v16, %v2225_v36  ;;  %v12275_v43 = vcombine.low %v2221_v16, %v2225_v36 }
 0x462   :  { %v2353_v47 = vld [vmem:[#allocation8 + $0x5f8] sm:$0xff] }
 0x463   :  { %9273 = vmatpush2.bf16.msra.mxu0 %v13081_v39  ;;  %v12404_v35 = vcombine.high %v2349_v22, %v2353_v47  ;;  %v2213_v39 = vld [vmem:[#allocation8 + $0x198] sm:$0xff]  ;;  %v12403_v50 = vcombine.low %v2349_v22, %v2353_v47 }
 0x464   :  { %9314 = vmatpush2.bf16.msra.mxu1 %v13209_v40  ;;  %9274 = vmatprep.subr.bf16.mxu0 %v13074_v56  ;;  %v2217_v40 = vld [vmem:[#allocation8 + $0x1b8] sm:$0xff]  ;;  %v14004_v56 = vld [vmem:[#allocation10] sm:$0xff] }
 0x465   :  { %9315 = vmatprep.subr.bf16.mxu1 %v13202_v42  ;;  %v3207_v42 = vrot.slane %v14004_v56, %v14398_v27  ;;  %v2329_v16 = vld [vmem:[#allocation8 + $0x538] sm:$0xff] }
 0x467   :  { %9275 = vmatpush2.bf16.msra.mxu0 %v13073_v28  ;;  %v3211_v28 = vrot.slane %v14004_v56, %v14372_v0  ;;  %v12395_v0 = vcombine.low %v2341_v19, %v2345_v48  ;;  %v2321_v56 = vld [vmem:[#allocation8 + $0x4f8] sm:$0xff] }
 0x468   :  { %9316 = vmatpush2.bf16.msra.mxu1 %v13201_v57  ;;  %9276 = vmatprep.subr.bf16.mxu0 %v13066_v52  ;;  %v12268_v57 = vcombine.high %v2213_v39, %v2217_v40  ;;  %v2205_v52 = vld [vmem:[#allocation8 + $0x158] sm:$0xff] }
 0x469   :  { %9317 = vmatprep.subr.bf16.mxu1 %v13194_v53  ;;  %v2209_v53 = vld [vmem:[#allocation8 + $0x178] sm:$0xff] }
 0x46a   :  { %v12259_v22 = vcombine.low %v2205_v52, %v2209_v53 }
 0x46b   :  { %9277 = vmatpush2.bf16.msra.mxu0 %v13065_v61 }
 0x46c   :  { %9318 = vmatpush2.bf16.msra.mxu1 %v13193_v62  ;;  %9278 = vmatprep.subr.bf16.mxu0 %v13058_v21  ;;  %v12267_v62 = vcombine.low %v2213_v39, %v2217_v40  ;;  %v2193_v39 = vld [vmem:[#allocation8 + $0xf8] sm:$0xff] }
 0x46d   :  { %9319 = vmatprep.subr.bf16.mxu1 %v13186_v58  ;;  %v12260_v58 = vcombine.high %v2205_v52, %v2209_v53  ;;  %v2317_v40 = vld [vmem:[#allocation8 + $0x4d8] sm:$0xff] }
 0x46e   :  { %v12372_v48 = vcombine.high %v2317_v40, %v2321_v56  ;;  %v2313_v52 = vld [vmem:[#allocation8 + $0x4b8] sm:$0xff] }
 0x46f   :  { %9279 = vmatpush2.bf16.msra.mxu0 %v13057_v9  ;;  %v2197_v9 = vld [vmem:[#allocation8 + $0x118] sm:$0xff] }
 0x470   :  { %9320 = vmatpush2.bf16.msra.mxu1 %v13185_v13  ;;  %9280 = vmatprep.subr.bf16.mxu0 %v13050_v15  ;;  %v2201_v13 = vld [vmem:[#allocation8 + $0x138] sm:$0xff] }
 0x471   :  { %9321 = vmatprep.subr.bf16.mxu1 %v13178_v24  ;;  %v2325_v24 = vld [vmem:[#allocation8 + $0x518] sm:$0xff] }
 0x473   :  { %9281 = vmatpush2.bf16.msra.mxu0 %v13049_v31  ;;  %v12387_v31 = vcombine.low %v2333_v37, %v2337_v41  ;;  %v2173_v41 = vld [vmem:[#allocation8 + $0x58] sm:$0xff] }
 0x474   :  { %9322 = vmatpush2.bf16.msra.mxu1 %v13177_v32  ;;  %9332 = vmatprep.subr.bf16.mxu0 %v12276_v34  ;;  %v12380_v34 = vcombine.high %v2325_v24, %v2329_v16 }
 0x475   :  { %9373 = vmatprep.subr.bf16.mxu1 %v12404_v35  ;;  %v2189_v35 = vld [vmem:[#allocation8 + $0xd8] sm:$0xff] }
 0x476   :  { %v9038_v55 = vpop.f32.mrf.mxu0  ;;  %9283 = vmatmul.mubr.bf16.vlgmr.msra.gmra.mxu0 %v14464_v44  ;;  %v12244_v19 = vcombine.high %v2189_v35, %v2193_v39  ;;  %v12243_v53 = vcombine.low %v2189_v35, %v2193_v39 }
 0x477   :  { %v9039_v61 = vadd.f32 %v9038_v55, %v3207_v42  ;;  %v9079_v27 = vpop.f32.mrf.mxu1  ;;  %9324 = vmatmul.mubr.bf16.vlgmr.msra.gmra.mxu1 %v14466_v46  ;;  %9333 = vmatpush1.bf16.msra.mxu0 %v12275_v43  ;;  %v12251_v42 = vcombine.low %v2197_v9, %v2201_v13  ;;  %v12379_v43 = vcombine.low %v2325_v24, %v2329_v16 }
 0x478   :  { %9364 = vmatprep.mubr.bf16.mxu0 %v14353_v1  ;;  %9374 = vmatpush1.bf16.msra.mxu1 %v12403_v50  ;;  %v9040_v21 = vpop.f32.mrf.mxu0  ;;  %v2181_v50 = vld [vmem:[#allocation8 + $0x98] sm:$0xff]  ;;  %v12371_v55 = vcombine.low %v2317_v40, %v2321_v56 }
 0x479   :  { %v14552_v2 = vadd.f32 %v9079_v27, %v9039_v61  ;;  %9405 = vmatprep.mubr.bf16.mxu1 %v14355_v6  ;;  %v9041_v18 = vadd.f32 %v9040_v21, %v3211_v28  ;;  %v9081_v3 = vpop.f32.mrf.mxu1  ;;  %9334 = vmatprep.subr.bf16.mxu0 %v12268_v57  ;;  %v12252_v6 = vcombine.high %v2197_v9, %v2201_v13  ;;  %v2185_v28 = vld [vmem:[#allocation8 + $0xb8] sm:$0xff] }
 0x47a   :  { %v9042_v15 = vpop.f32.mrf.mxu0  ;;  %9375 = vmatprep.subr.bf16.mxu1 %v12396_v30  ;;  %v2309_v57 = vld [vmem:[#allocation8 + $0x498] sm:$0xff]  ;;  %v12236_v30 = vcombine.high %v2181_v50, %v2185_v28  ;;  %v12235_v21 = vcombine.low %v2181_v50, %v2185_v28 }
 0x47b   :  { %v14555_v36 = vadd.f32 %v9081_v3, %v9041_v18  ;;  %v9083_v1 = vpop.f32.mrf.mxu1  ;;  %9335 = vmatpush1.bf16.msra.mxu0 %v12267_v62  ;;  %v12364_v37 = vcombine.high %v2309_v57, %v2313_v52  ;;  %v2177_v61 = vld [vmem:[#allocation8 + $0x78] sm:$0xff] }
 0x47c   :  { %9376 = vmatpush1.bf16.msra.mxu1 %v12395_v0  ;;  %v9043_v47 = vpop.f32.mrf.mxu0  ;;  %9336 = vmatprep.subr.bf16.mxu0 %v12260_v58  ;;  %v2301_v27 = vld [vmem:[#allocation8 + $0x458] sm:$0xff]  ;;  %v12363_v0 = vcombine.low %v2309_v57, %v2313_v52  ;;  %v12228_v58 = vcombine.high %v2173_v41, %v2177_v61  ;;  %v12227_v15 = vcombine.low %v2173_v41, %v2177_v61 }
 0x47d   :  { %v9084_v32 = vpop.f32.mrf.mxu1  ;;  %9377 = vmatprep.subr.bf16.mxu1 %v12388_v4  ;;  %v2305_v62 = vld [vmem:[#allocation8 + $0x478] sm:$0xff] }
 0x47e   :  { %v12356_v18 = vcombine.high %v2301_v27, %v2305_v62  ;;  %v2165_v3 = vld [vmem:[#allocation8 + $0x18] sm:$0xff]  ;;  %v12355_v24 = vcombine.low %v2301_v27, %v2305_v62 }
 0x47f   :  { %9337 = vmatpush1.bf16.msra.mxu0 %v12259_v22  ;;  %v2169_v4 = vld [vmem:[#allocation8 + $0x38] sm:$0xff] }
 0x480   :  { %9378 = vmatpush1.bf16.msra.mxu1 %v12387_v31  ;;  %9338 = vmatprep.subr.bf16.mxu0 %v12252_v6  ;;  %v2293_v9 = vld [vmem:[#allocation8 + $0x418] sm:$0xff]  ;;  %v12220_v16 = vcombine.high %v2165_v3, %v2169_v4  ;;  %v12219_v32 = vcombine.low %v2165_v3, %v2169_v4 }
 0x481   :  { %9379 = vmatprep.subr.bf16.mxu1 %v12380_v34  ;;  %v2297_v13 = vld [vmem:[#allocation8 + $0x438] sm:$0xff] }
 0x482   :  { %v12348_v1 = vcombine.high %v2293_v9, %v2297_v13  ;;  %v2285_v22 = vld [vmem:[#allocation8 + $0x3d8] sm:$0xff]  ;;  %v12347_v34 = vcombine.low %v2293_v9, %v2297_v13 }
 0x483   :  { %9339 = vmatpush1.bf16.msra.mxu0 %v12251_v42  ;;  %v2289_v47 = vld [vmem:[#allocation8 + $0x3f8] sm:$0xff] }
 0x484   :  { %9380 = vmatpush1.bf16.msra.mxu1 %v12379_v43  ;;  %9340 = vmatprep.subr.bf16.mxu0 %v12244_v19  ;;  %v2413_v31 = vld [vmem:[#allocation8 + $0x7d8] sm:$0xff]  ;;  %v12340_v35 = vcombine.high %v2285_v22, %v2289_v47  ;;  %v12339_v19 = vcombine.low %v2285_v22, %v2289_v47 }
 0x485   :  { %9381 = vmatprep.subr.bf16.mxu1 %v12372_v48  ;;  %v2417_v6 = vld [vmem:[#allocation8 + $0x7f8] sm:$0xff] }
 0x486   :  { %v12468_v39 = vcombine.high %v2413_v31, %v2417_v6  ;;  %v2277_v40 = vld [vmem:[#allocation8 + $0x398] sm:$0xff]  ;;  %v12467_v48 = vcombine.low %v2413_v31, %v2417_v6 }
 0x487   :  { %9341 = vmatpush1.bf16.msra.mxu0 %v12243_v53  ;;  %v2281_v56 = vld [vmem:[#allocation8 + $0x3b8] sm:$0xff] }
 0x488   :  { %9382 = vmatpush1.bf16.msra.mxu1 %v12371_v55  ;;  %9342 = vmatprep.subr.bf16.mxu0 %v12236_v30  ;;  %v2405_v42 = vld [vmem:[#allocation8 + $0x798] sm:$0xff]  ;;  %v12332_v50 = vcombine.high %v2277_v40, %v2281_v56  ;;  %v12331_v30 = vcombine.low %v2277_v40, %v2281_v56 }
 0x489   :  { %9383 = vmatprep.subr.bf16.mxu1 %v12364_v37  ;;  %v2409_v43 = vld [vmem:[#allocation8 + $0x7b8] sm:$0xff] }
 0x48a   :  { %v12460_v28 = vcombine.high %v2405_v42, %v2409_v43  ;;  %v2269_v57 = vld [vmem:[#allocation8 + $0x358] sm:$0xff]  ;;  %v12459_v37 = vcombine.low %v2405_v42, %v2409_v43 }
 0x48b   :  { %9343 = vmatpush1.bf16.msra.mxu0 %v12235_v21  ;;  %v2273_v52 = vld [vmem:[#allocation8 + $0x378] sm:$0xff] }
 0x48c   :  { %9384 = vmatpush1.bf16.msra.mxu1 %v12363_v0  ;;  %9344 = vmatprep.subr.bf16.mxu0 %v12228_v58  ;;  %v2397_v53 = vld [vmem:[#allocation8 + $0x758] sm:$0xff]  ;;  %v12324_v41 = vcombine.high %v2269_v57, %v2273_v52  ;;  %v12323_v58 = vcombine.low %v2269_v57, %v2273_v52 }
 0x48d   :  { %9385 = vmatprep.subr.bf16.mxu1 %v12356_v18  ;;  %v2401_v55 = vld [vmem:[#allocation8 + $0x778] sm:$0xff] }
 0x48e   :  { %v12452_v61 = vcombine.high %v2397_v53, %v2401_v55  ;;  %v2261_v27 = vld [vmem:[#allocation8 + $0x318] sm:$0xff]  ;;  %v12451_v18 = vcombine.low %v2397_v53, %v2401_v55 }
 0x48f   :  { %9345 = vmatpush1.bf16.msra.mxu0 %v12227_v15  ;;  %v2265_v62 = vld [vmem:[#allocation8 + $0x338] sm:$0xff] }
 0x490   :  { %9386 = vmatpush1.bf16.msra.mxu1 %v12355_v24  ;;  %9346 = vmatprep.subr.bf16.mxu0 %v12220_v16  ;;  %v2389_v21 = vld [vmem:[#allocation8 + $0x718] sm:$0xff]  ;;  %v12316_v3 = vcombine.high %v2261_v27, %v2265_v62  ;;  %v12315_v16 = vcombine.low %v2261_v27, %v2265_v62 }
 0x491   :  { %9387 = vmatprep.subr.bf16.mxu1 %v12348_v1  ;;  %v2393_v0 = vld [vmem:[#allocation8 + $0x738] sm:$0xff] }
 0x492   :  { %v12444_v4 = vcombine.high %v2389_v21, %v2393_v0  ;;  %v2253_v9 = vld [vmem:[#allocation8 + $0x2d8] sm:$0xff]  ;;  %v12443_v1 = vcombine.low %v2389_v21, %v2393_v0 }
 0x493   :  { %9347 = vmatpush1.bf16.msra.mxu0 %v12219_v32  ;;  %v2257_v13 = vld [vmem:[#allocation8 + $0x2f8] sm:$0xff] }
 0x494   :  { %9388 = vmatpush1.bf16.msra.mxu1 %v12347_v34  ;;  %9348 = vmatprep.subr.bf16.mxu0 %v12340_v35  ;;  %v2381_v15 = vld [vmem:[#allocation8 + $0x6d8] sm:$0xff]  ;;  %v12308_v22 = vcombine.high %v2253_v9, %v2257_v13  ;;  %v12307_v35 = vcombine.low %v2253_v9, %v2257_v13 }
 0x495   :  { %9389 = vmatprep.subr.bf16.mxu1 %v12468_v39  ;;  %v2385_v24 = vld [vmem:[#allocation8 + $0x6f8] sm:$0xff] }
 0x496   :  { %v12436_v47 = vcombine.high %v2381_v15, %v2385_v24  ;;  %v2245_v31 = vld [vmem:[#allocation8 + $0x298] sm:$0xff]  ;;  %v12435_v39 = vcombine.low %v2381_v15, %v2385_v24 }
 0x497   :  { %9349 = vmatpush2.bf16.msra.mxu0 %v12339_v19  ;;  %v2249_v6 = vld [vmem:[#allocation8 + $0x2b8] sm:$0xff] }
 0x498   :  { %9390 = vmatpush2.bf16.msra.mxu1 %v12467_v48  ;;  %9350 = vmatprep.subr.bf16.mxu0 %v12332_v50  ;;  %v2373_v32 = vld [vmem:[#allocation8 + $0x698] sm:$0xff]  ;;  %v12300_v40 = vcombine.high %v2245_v31, %v2249_v6  ;;  %v12299_v50 = vcombine.low %v2245_v31, %v2249_v6 }
 0x499   :  { %9391 = vmatprep.subr.bf16.mxu1 %v12460_v28  ;;  %v2377_v34 = vld [vmem:[#allocation8 + $0x6b8] sm:$0xff] }
 0x49a   :  { %v12428_v56 = vcombine.high %v2373_v32, %v2377_v34  ;;  %v2237_v42 = vld [vmem:[#allocation8 + $0x258] sm:$0xff]  ;;  %v12427_v28 = vcombine.low %v2373_v32, %v2377_v34 }
 0x49b   :  { %9351 = vmatpush2.bf16.msra.mxu0 %v12331_v30  ;;  %v2241_v43 = vld [vmem:[#allocation8 + $0x278] sm:$0xff] }
 0x49c   :  { %9392 = vmatpush2.bf16.msra.mxu1 %v12459_v37  ;;  %9352 = vmatprep.subr.bf16.mxu0 %v12324_v41  ;;  %v2365_v19 = vld [vmem:[#allocation8 + $0x658] sm:$0xff]  ;;  %v12292_v57 = vcombine.high %v2237_v42, %v2241_v43  ;;  %v12291_v41 = vcombine.low %v2237_v42, %v2241_v43 }
 0x49d   :  { %9393 = vmatprep.subr.bf16.mxu1 %v12452_v61  ;;  %v2369_v48 = vld [vmem:[#allocation8 + $0x678] sm:$0xff] }
 0x49e   :  { %v12420_v52 = vcombine.high %v2365_v19, %v2369_v48  ;;  %v2229_v53 = vld [vmem:[#allocation8 + $0x218] sm:$0xff]  ;;  %v12419_v61 = vcombine.low %v2365_v19, %v2369_v48 }
 0x49f   :  { %9353 = vmatpush2.bf16.msra.mxu0 %v12323_v58  ;;  %v2233_v55 = vld [vmem:[#allocation8 + $0x238] sm:$0xff] }
 0x4a0   :  { %9394 = vmatpush2.bf16.msra.mxu1 %v12451_v18  ;;  %9354 = vmatprep.subr.bf16.mxu0 %v12316_v3  ;;  %v2357_v30 = vld [vmem:[#allocation8 + $0x618] sm:$0xff]  ;;  %v12284_v27 = vcombine.high %v2229_v53, %v2233_v55  ;;  %v12283_v3 = vcombine.low %v2229_v53, %v2233_v55 }
 0x4a1   :  { %9395 = vmatprep.subr.bf16.mxu1 %v12444_v4  ;;  %v2361_v37 = vld [vmem:[#allocation8 + $0x638] sm:$0xff] }
 0x4a2   :  { %v12412_v62 = vcombine.high %v2357_v30, %v2361_v37  ;;  %v2477_v21 = vld [vmem:[#allocation8 + $0x9d8] sm:$0xff]  ;;  %v12411_v4 = vcombine.low %v2357_v30, %v2361_v37 }
 0x4a3   :  { %9355 = vmatpush2.bf16.msra.mxu0 %v12315_v16  ;;  %v2481_v0 = vld [vmem:[#allocation8 + $0x9f8] sm:$0xff] }
 0x4a4   :  { %9396 = vmatpush2.bf16.msra.mxu1 %v12443_v1  ;;  %9356 = vmatprep.subr.bf16.mxu0 %v12308_v22  ;;  %v2605_v58 = vld [vmem:[#allocation8 + $0xdd8] sm:$0xff]  ;;  %v12532_v9 = vcombine.high %v2477_v21, %v2481_v0  ;;  %v12531_v16 = vcombine.low %v2477_v21, %v2481_v0 }
 0x4a5   :  { %9397 = vmatprep.subr.bf16.mxu1 %v12436_v47  ;;  %v2609_v18 = vld [vmem:[#allocation8 + $0xdf8] sm:$0xff] }
 0x4a6   :  { %v12660_v13 = vcombine.high %v2605_v58, %v2609_v18  ;;  %v2469_v15 = vld [vmem:[#allocation8 + $0x998] sm:$0xff]  ;;  %v12659_v47 = vcombine.low %v2605_v58, %v2609_v18 }
 0x4a7   :  { %9357 = vmatpush2.bf16.msra.mxu0 %v12307_v35  ;;  %v2473_v24 = vld [vmem:[#allocation8 + $0x9b8] sm:$0xff] }
 0x4a8   :  { %9398 = vmatpush2.bf16.msra.mxu1 %v12435_v39  ;;  %9358 = vmatprep.subr.bf16.mxu0 %v12300_v40  ;;  %v2597_v1 = vld [vmem:[#allocation8 + $0xd98] sm:$0xff]  ;;  %v12524_v31 = vcombine.high %v2469_v15, %v2473_v24  ;;  %v12523_v43 = vcombine.low %v2469_v15, %v2473_v24 }
 0x4a9   :  { %9399 = vmatprep.subr.bf16.mxu1 %v12428_v56  ;;  %v2601_v22 = vld [vmem:[#allocation8 + $0xdb8] sm:$0xff] }
 0x4aa   :  { %v2461_v6 = vld [vmem:[#allocation8 + $0x958] sm:$0xff]  ;;  %v12652_v35 = vcombine.high %v2597_v1, %v2601_v22  ;;  %v12651_v48 = vcombine.low %v2597_v1, %v2601_v22 }
 0x4ab   :  { %9359 = vmatpush2.bf16.msra.mxu0 %v12299_v50  ;;  %v2465_v32 = vld [vmem:[#allocation8 + $0x978] sm:$0xff] }
 0x4ac   :  { %9400 = vmatpush2.bf16.msra.mxu1 %v12427_v28  ;;  %9360 = vmatprep.subr.bf16.mxu0 %v12292_v57  ;;  %v2589_v39 = vld [vmem:[#allocation8 + $0xd58] sm:$0xff]  ;;  %v12516_v50 = vcombine.high %v2461_v6, %v2465_v32 }
 0x4ad   :  { %9401 = vmatprep.subr.bf16.mxu1 %v12420_v52  ;;  %v2593_v40 = vld [vmem:[#allocation8 + $0xd78] sm:$0xff] }
 0x4ae   :  { %v2453_v52 = vld [vmem:[#allocation8 + $0x918] sm:$0xff] }
 0x4af   :  { %9361 = vmatpush2.bf16.msra.mxu0 %v12291_v41  ;;  %v2457_v53 = vld [vmem:[#allocation8 + $0x938] sm:$0xff]  ;;  %v12515_v41 = vcombine.low %v2461_v6, %v2465_v32 }
 0x4b0   :  { %9402 = vmatpush2.bf16.msra.mxu1 %v12419_v61  ;;  %9362 = vmatprep.subr.bf16.mxu0 %v12284_v27  ;;  %v2581_v55 = vld [vmem:[#allocation8 + $0xd18] sm:$0xff]  ;;  %v12508_v27 = vcombine.high %v2453_v52, %v2457_v53 }
 0x4b1   :  { %9403 = vmatprep.subr.bf16.mxu1 %v12412_v62  ;;  %v2585_v30 = vld [vmem:[#allocation8 + $0xd38] sm:$0xff] }
 0x4b2   :  { %v12636_v62 = vcombine.high %v2581_v55, %v2585_v30  ;;  %v2445_v21 = vld [vmem:[#allocation8 + $0x8d8] sm:$0xff] }
 0x4b3   :  { %9363 = vmatpush2.bf16.msra.mxu0 %v12283_v3  ;;  %v2449_v0 = vld [vmem:[#allocation8 + $0x8f8] sm:$0xff]  ;;  %v12507_v3 = vcombine.low %v2453_v52, %v2457_v53 }
 0x4b4   :  { %9404 = vmatpush2.bf16.msra.mxu1 %v12411_v4  ;;  %9414 = vmatprep.subr.bf16.mxu0 %v12532_v9  ;;  %v2573_v58 = vld [vmem:[#allocation8 + $0xcd8] sm:$0xff]  ;;  %v12635_v4 = vcombine.low %v2581_v55, %v2585_v30  ;;  %v12500_v9 = vcombine.high %v2445_v21, %v2449_v0  ;;  %v12499_v22 = vcombine.low %v2445_v21, %v2449_v0 }
 0x4b5   :  { %9455 = vmatprep.subr.bf16.mxu1 %v12660_v13  ;;  %v2577_v18 = vld [vmem:[#allocation8 + $0xcf8] sm:$0xff] }
 0x4b6   :  { %v9120_v34 = vpop.f32.mrf.mxu0  ;;  %9365 = vmatmul.mubr.bf16.vlgmr.msra.gmra.mxu0 %v14377_v10  ;;  %v12628_v13 = vcombine.high %v2573_v58, %v2577_v18  ;;  %v2437_v15 = vld [vmem:[#allocation8 + $0x898] sm:$0xff] }
 0x4b7   :  { %v9121_v56 = vadd.f32 %v9120_v34, %v14552_v2  ;;  %v9161_v42 = vpop.f32.mrf.mxu1  ;;  %9406 = vmatmul.mubr.bf16.vlgmr.msra.gmra.mxu1 %v14379_v14  ;;  %9415 = vmatpush1.bf16.msra.mxu0 %v12531_v16  ;;  %v12644_v2 = vcombine.high %v2589_v39, %v2593_v40  ;;  %v2441_v24 = vld [vmem:[#allocation8 + $0x8b8] sm:$0xff] }
 0x4b8   :  { %9446 = vmatprep.mubr.bf16.mxu0 %v14391_v54  ;;  %9456 = vmatpush1.bf16.msra.mxu1 %v12659_v47  ;;  %v9122_v19 = vpop.f32.mrf.mxu0  ;;  %v2565_v16 = vld [vmem:[#allocation8 + $0xc98] sm:$0xff]  ;;  %v12627_v47 = vcombine.low %v2573_v58, %v2577_v18 }
 0x4b9   :  { %v14561_v28 = vadd.f32 %v9161_v42, %v9121_v56  ;;  %9487 = vmatprep.mubr.bf16.mxu1 %v14393_v59  ;;  %v9123_v10 = vadd.f32 %v9122_v19, %v14555_v36  ;;  %v9163_v57 = vpop.f32.mrf.mxu1  ;;  %9416 = vmatprep.subr.bf16.mxu0 %v12524_v31  ;;  %v12643_v59 = vcombine.low %v2589_v39, %v2593_v40  ;;  %v2569_v1 = vld [vmem:[#allocation8 + $0xcb8] sm:$0xff] }
 0x4ba   :  { %v9124_v14 = vpop.f32.mrf.mxu0  ;;  %9457 = vmatprep.subr.bf16.mxu1 %v12652_v35  ;;  %v12492_v31 = vcombine.high %v2437_v15, %v2441_v24  ;;  %v12620_v6 = vcombine.high %v2565_v16, %v2569_v1  ;;  %v2429_v32 = vld [vmem:[#allocation8 + $0x858] sm:$0xff]  ;;  %v12491_v40 = vcombine.low %v2437_v15, %v2441_v24  ;;  %v12619_v56 = vcombine.low %v2565_v16, %v2569_v1 }
 0x4bb   :  { %v14565_v54 = vadd.f32 %v9163_v57, %v9123_v10  ;;  %v9165_v37 = vpop.f32.mrf.mxu1  ;;  %9417 = vmatpush1.bf16.msra.mxu0 %v12523_v43  ;;  %v2433_v34 = vld [vmem:[#allocation8 + $0x878] sm:$0xff] }
 0x4bc   :  { %9458 = vmatpush1.bf16.msra.mxu1 %v12651_v48  ;;  %v9125_v61 = vpop.f32.mrf.mxu0  ;;  %9418 = vmatprep.subr.bf16.mxu0 %v12516_v50  ;;  %v2557_v35 = vld [vmem:[#allocation8 + $0xc58] sm:$0xff]  ;;  %v12484_v42 = vcombine.high %v2429_v32, %v2433_v34  ;;  %v12483_v57 = vcombine.low %v2429_v32, %v2433_v34 }
 0x4bd   :  { %v9166_v36 = vpop.f32.mrf.mxu1  ;;  %9459 = vmatprep.subr.bf16.mxu1 %v12644_v2  ;;  %v2561_v39 = vld [vmem:[#allocation8 + $0xc78] sm:$0xff] }
 0x4be   :  { %v12612_v43 = vcombine.high %v2557_v35, %v2561_v39  ;;  %v2421_v19 = vld [vmem:[#allocation8 + $0x818] sm:$0xff]  ;;  %v12611_v2 = vcombine.low %v2557_v35, %v2561_v39 }
 0x4bf   :  { %9419 = vmatpush1.bf16.msra.mxu0 %v12515_v41  ;;  %v2425_v48 = vld [vmem:[#allocation8 + $0x838] sm:$0xff] }
 0x4c0   :  { %9460 = vmatpush1.bf16.msra.mxu1 %v12643_v59  ;;  %9420 = vmatprep.subr.bf16.mxu0 %v12508_v27  ;;  %v2549_v50 = vld [vmem:[#allocation8 + $0xc18] sm:$0xff]  ;;  %v12476_v52 = vcombine.high %v2421_v19, %v2425_v48  ;;  %v12475_v41 = vcombine.low %v2421_v19, %v2425_v48 }
 0x4c1   :  { %9461 = vmatprep.subr.bf16.mxu1 %v12636_v62  ;;  %v2553_v10 = vld [vmem:[#allocation8 + $0xc38] sm:$0xff] }
 0x4c2   :  { %v12604_v53 = vcombine.high %v2549_v50, %v2553_v10  ;;  %v2541_v14 = vld [vmem:[#allocation8 + $0xbd8] sm:$0xff]  ;;  %v12603_v61 = vcombine.low %v2549_v50, %v2553_v10 }
 0x4c3   :  { %9421 = vmatpush1.bf16.msra.mxu0 %v12507_v3  ;;  %v2545_v55 = vld [vmem:[#allocation8 + $0xbf8] sm:$0xff] }
 0x4c4   :  { %9462 = vmatpush1.bf16.msra.mxu1 %v12635_v4  ;;  %9422 = vmatprep.subr.bf16.mxu0 %v12500_v9  ;;  %v2669_v30 = vld [vmem:[#allocation8 + $0xfd8] sm:$0xff]  ;;  %v12596_v59 = vcombine.high %v2541_v14, %v2545_v55  ;;  %v12595_v58 = vcombine.low %v2541_v14, %v2545_v55 }
 0x4c5   :  { %9463 = vmatprep.subr.bf16.mxu1 %v12628_v13  ;;  %v2673_v37 = vld [vmem:[#allocation8 + $0xff8] sm:$0xff] }
 0x4c6   :  { %v12724_v27 = vcombine.high %v2669_v30, %v2673_v37  ;;  %v2533_v36 = vld [vmem:[#allocation8 + $0xb98] sm:$0xff]  ;;  %v12723_v18 = vcombine.low %v2669_v30, %v2673_v37 }
 0x4c7   :  { %9423 = vmatpush1.bf16.msra.mxu0 %v12499_v22  ;;  %v2537_v62 = vld [vmem:[#allocation8 + $0xbb8] sm:$0xff] }
 0x4c8   :  { %9464 = vmatpush1.bf16.msra.mxu1 %v12627_v47  ;;  %9424 = vmatprep.subr.bf16.mxu0 %v12492_v31  ;;  %v2661_v21 = vld [vmem:[#allocation8 + $0xf98] sm:$0xff]  ;;  %v12588_v3 = vcombine.high %v2533_v36, %v2537_v62  ;;  %v12587_v16 = vcombine.low %v2533_v36, %v2537_v62 }
 0x4c9   :  { %9465 = vmatprep.subr.bf16.mxu1 %v12620_v6  ;;  %v2665_v0 = vld [vmem:[#allocation8 + $0xfb8] sm:$0xff] }
 0x4ca   :  { %v12716_v4 = vcombine.high %v2661_v21, %v2665_v0  ;;  %v2525_v9 = vld [vmem:[#allocation8 + $0xb58] sm:$0xff]  ;;  %v12715_v1 = vcombine.low %v2661_v21, %v2665_v0 }
 0x4cb   :  { %9425 = vmatpush1.bf16.msra.mxu0 %v12491_v40  ;;  %v2529_v13 = vld [vmem:[#allocation8 + $0xb78] sm:$0xff] }
 0x4cc   :  { %9466 = vmatpush1.bf16.msra.mxu1 %v12619_v56  ;;  %9426 = vmatprep.subr.bf16.mxu0 %v12484_v42  ;;  %v2653_v15 = vld [vmem:[#allocation8 + $0xf58] sm:$0xff]  ;;  %v12580_v22 = vcombine.high %v2525_v9, %v2529_v13  ;;  %v12579_v35 = vcombine.low %v2525_v9, %v2529_v13 }
 0x4cd   :  { %9467 = vmatprep.subr.bf16.mxu1 %v12612_v43  ;;  %v2657_v24 = vld [vmem:[#allocation8 + $0xf78] sm:$0xff] }
 0x4ce   :  { %v12708_v47 = vcombine.high %v2653_v15, %v2657_v24  ;;  %v2517_v31 = vld [vmem:[#allocation8 + $0xb18] sm:$0xff]  ;;  %v12707_v39 = vcombine.low %v2653_v15, %v2657_v24 }
 0x4cf   :  { %9427 = vmatpush1.bf16.msra.mxu0 %v12483_v57  ;;  %v2521_v6 = vld [vmem:[#allocation8 + $0xb38] sm:$0xff] }
 0x4d0   :  { %9468 = vmatpush1.bf16.msra.mxu1 %v12611_v2  ;;  %9428 = vmatprep.subr.bf16.mxu0 %v12476_v52  ;;  %v2645_v32 = vld [vmem:[#allocation8 + $0xf18] sm:$0xff]  ;;  %v12572_v40 = vcombine.high %v2517_v31, %v2521_v6  ;;  %v12571_v50 = vcombine.low %v2517_v31, %v2521_v6 }
 0x4d1   :  { %9469 = vmatprep.subr.bf16.mxu1 %v12604_v53  ;;  %v2649_v34 = vld [vmem:[#allocation8 + $0xf38] sm:$0xff] }
 0x4d2   :  { %v12700_v56 = vcombine.high %v2645_v32, %v2649_v34  ;;  %v2509_v42 = vld [vmem:[#allocation8 + $0xad8] sm:$0xff]  ;;  %v12699_v10 = vcombine.low %v2645_v32, %v2649_v34 }
 0x4d3   :  { %9429 = vmatpush1.bf16.msra.mxu0 %v12475_v41  ;;  %v2513_v43 = vld [vmem:[#allocation8 + $0xaf8] sm:$0xff] }
 0x4d4   :  { %9470 = vmatpush1.bf16.msra.mxu1 %v12603_v61  ;;  %9430 = vmatprep.subr.bf16.mxu0 %v12596_v59  ;;  %v2637_v19 = vld [vmem:[#allocation8 + $0xed8] sm:$0xff]  ;;  %v12564_v57 = vcombine.high %v2509_v42, %v2513_v43  ;;  %v12563_v30 = vcombine.low %v2509_v42, %v2513_v43 }
 0x4d5   :  { %9471 = vmatprep.subr.bf16.mxu1 %v12724_v27  ;;  %v2641_v48 = vld [vmem:[#allocation8 + $0xef8] sm:$0xff] }
 0x4d6   :  { %v12692_v2 = vcombine.high %v2637_v19, %v2641_v48  ;;  %v2501_v52 = vld [vmem:[#allocation8 + $0xa98] sm:$0xff]  ;;  %v12691_v37 = vcombine.low %v2637_v19, %v2641_v48 }
 0x4d7   :  { %9431 = vmatpush2.bf16.msra.mxu0 %v12595_v58  ;;  %v2505_v53 = vld [vmem:[#allocation8 + $0xab8] sm:$0xff] }
 0x4d8   :  { %9472 = vmatpush2.bf16.msra.mxu1 %v12723_v18  ;;  %9432 = vmatprep.subr.bf16.mxu0 %v12588_v3  ;;  %v2629_v14 = vld [vmem:[#allocation8 + $0xe98] sm:$0xff]  ;;  %v12556_v41 = vcombine.high %v2501_v52, %v2505_v53  ;;  %v12555_v21 = vcombine.low %v2501_v52, %v2505_v53 }
 0x4d9   :  { %9473 = vmatprep.subr.bf16.mxu1 %v12716_v4  ;;  %v2633_v55 = vld [vmem:[#allocation8 + $0xeb8] sm:$0xff] }
 0x4da   :  { %v12684_v61 = vcombine.high %v2629_v14, %v2633_v55  ;;  %v2493_v59 = vld [vmem:[#allocation8 + $0xa58] sm:$0xff]  ;;  %v12683_v0 = vcombine.low %v2629_v14, %v2633_v55 }
 0x4db   :  { %9433 = vmatpush2.bf16.msra.mxu0 %v12587_v16  ;;  %v2497_v27 = vld [vmem:[#allocation8 + $0xa78] sm:$0xff] }
 0x4dc   :  { %9474 = vmatpush2.bf16.msra.mxu1 %v12715_v1  ;;  %9434 = vmatprep.subr.bf16.mxu0 %v12580_v22  ;;  %v2621_v36 = vld [vmem:[#allocation8 + $0xe58] sm:$0xff]  ;;  %v12548_v58 = vcombine.high %v2493_v59, %v2497_v27  ;;  %v12547_v15 = vcombine.low %v2493_v59, %v2497_v27 }
 0x4dd   :  { %9475 = vmatprep.subr.bf16.mxu1 %v12708_v47  ;;  %v2625_v62 = vld [vmem:[#allocation8 + $0xe78] sm:$0xff] }
 0x4de   :  { %v12676_v18 = vcombine.high %v2621_v36, %v2625_v62  ;;  %v2485_v3 = vld [vmem:[#allocation8 + $0xa18] sm:$0xff]  ;;  %v12675_v24 = vcombine.low %v2621_v36, %v2625_v62 }
 0x4df   :  { %9435 = vmatpush2.bf16.msra.mxu0 %v12579_v35  ;;  %v2489_v4 = vld [vmem:[#allocation8 + $0xa38] sm:$0xff] }
 0x4e0   :  { %9476 = vmatpush2.bf16.msra.mxu1 %v12707_v39  ;;  %9436 = vmatprep.subr.bf16.mxu0 %v12572_v40  ;;  %v2613_v9 = vld [vmem:[#allocation8 + $0xe18] sm:$0xff]  ;;  %v12540_v16 = vcombine.high %v2485_v3, %v2489_v4  ;;  %v12539_v32 = vcombine.low %v2485_v3, %v2489_v4 }
 0x4e1   :  { %9477 = vmatprep.subr.bf16.mxu1 %v12700_v56  ;;  %v2617_v13 = vld [vmem:[#allocation8 + $0xe38] sm:$0xff] }
 0x4e2   :  { %v12668_v1 = vcombine.high %v2613_v9, %v2617_v13  ;;  %v2733_v22 = vld [vmem:[#allocation8 + $0x11d8] sm:$0xff]  ;;  %v12667_v34 = vcombine.low %v2613_v9, %v2617_v13 }
 0x4e3   :  { %9437 = vmatpush2.bf16.msra.mxu0 %v12571_v50  ;;  %v2737_v47 = vld [vmem:[#allocation8 + $0x11f8] sm:$0xff] }
 0x4e4   :  { %9478 = vmatpush2.bf16.msra.mxu1 %v12699_v10  ;;  %9438 = vmatprep.subr.bf16.mxu0 %v12564_v57  ;;  %v2861_v31 = vld [vmem:[#allocation8 + $0x15d8] sm:$0xff]  ;;  %v12788_v35 = vcombine.high %v2733_v22, %v2737_v47  ;;  %v12787_v42 = vcombine.low %v2733_v22, %v2737_v47 }
 0x4e5   :  { %9479 = vmatprep.subr.bf16.mxu1 %v12692_v2  ;;  %v2865_v6 = vld [vmem:[#allocation8 + $0x15f8] sm:$0xff] }
 0x4e6   :  { %v12916_v39 = vcombine.high %v2861_v31, %v2865_v6  ;;  %v2725_v40 = vld [vmem:[#allocation8 + $0x1198] sm:$0xff]  ;;  %v12915_v48 = vcombine.low %v2861_v31, %v2865_v6 }
 0x4e7   :  { %9439 = vmatpush2.bf16.msra.mxu0 %v12563_v30  ;;  %v2729_v56 = vld [vmem:[#allocation8 + $0x11b8] sm:$0xff] }
 0x4e8   :  { %9480 = vmatpush2.bf16.msra.mxu1 %v12691_v37  ;;  %9440 = vmatprep.subr.bf16.mxu0 %v12556_v41  ;;  %v2853_v43 = vld [vmem:[#allocation8 + $0x1598] sm:$0xff]  ;;  %v12780_v50 = vcombine.high %v2725_v40, %v2729_v56  ;;  %v12779_v37 = vcombine.low %v2725_v40, %v2729_v56 }
 0x4e9   :  { %9481 = vmatprep.subr.bf16.mxu1 %v12684_v61  ;;  %v2857_v19 = vld [vmem:[#allocation8 + $0x15b8] sm:$0xff] }
 0x4ea   :  { %v2717_v10 = vld [vmem:[#allocation8 + $0x1158] sm:$0xff]  ;;  %v12908_v52 = vcombine.high %v2853_v43, %v2857_v19  ;;  %v12907_v61 = vcombine.low %v2853_v43, %v2857_v19 }
 0x4eb   :  { %9441 = vmatpush2.bf16.msra.mxu0 %v12555_v21  ;;  %v2721_v57 = vld [vmem:[#allocation8 + $0x1178] sm:$0xff] }
 0x4ec   :  { %9482 = vmatpush2.bf16.msra.mxu1 %v12683_v0  ;;  %9442 = vmatprep.subr.bf16.mxu0 %v12548_v58  ;;  %v2845_v53 = vld [vmem:[#allocation8 + $0x1558] sm:$0xff]  ;;  %v12772_v59 = vcombine.high %v2717_v10, %v2721_v57  ;;  %v12771_v3 = vcombine.low %v2717_v10, %v2721_v57 }
 0x4ed   :  { %9483 = vmatprep.subr.bf16.mxu1 %v12676_v18  ;;  %v2849_v14 = vld [vmem:[#allocation8 + $0x1578] sm:$0xff] }
 0x4ee   :  { %v2709_v62 = vld [vmem:[#allocation8 + $0x1118] sm:$0xff] }
 0x4ef   :  { %9443 = vmatpush2.bf16.msra.mxu0 %v12547_v15  ;;  %v2713_v21 = vld [vmem:[#allocation8 + $0x1138] sm:$0xff] }
 0x4f0   :  { %9484 = vmatpush2.bf16.msra.mxu1 %v12675_v24  ;;  %9444 = vmatprep.subr.bf16.mxu0 %v12540_v16  ;;  %v2837_v0 = vld [vmem:[#allocation8 + $0x1518] sm:$0xff]  ;;  %v12764_v9 = vcombine.high %v2709_v62, %v2713_v21  ;;  %v12763_v22 = vcombine.low %v2709_v62, %v2713_v21 }
 0x4f1   :  { %9485 = vmatprep.subr.bf16.mxu1 %v12668_v1  ;;  %v2841_v58 = vld [vmem:[#allocation8 + $0x1538] sm:$0xff] }
 0x4f2   :  { %v12892_v13 = vcombine.high %v2837_v0, %v2841_v58  ;;  %v2701_v15 = vld [vmem:[#allocation8 + $0x10d8] sm:$0xff]  ;;  %v12891_v47 = vcombine.low %v2837_v0, %v2841_v58 }
 0x4f3   :  { %9445 = vmatpush2.bf16.msra.mxu0 %v12539_v32  ;;  %v2705_v24 = vld [vmem:[#allocation8 + $0x10f8] sm:$0xff] }
 0x4f4   :  { %9486 = vmatpush2.bf16.msra.mxu1 %v12667_v34  ;;  %9496 = vmatprep.subr.bf16.mxu0 %v12788_v35  ;;  %v2829_v16 = vld [vmem:[#allocation8 + $0x14d8] sm:$0xff]  ;;  %v12756_v31 = vcombine.high %v2701_v15, %v2705_v24  ;;  %v12755_v40 = vcombine.low %v2701_v15, %v2705_v24 }
 0x4f5   :  { %9537 = vmatprep.subr.bf16.mxu1 %v12916_v39  ;;  %v2833_v1 = vld [vmem:[#allocation8 + $0x14f8] sm:$0xff] }
 0x4f6   :  { %v9202_v2 = vpop.f32.mrf.mxu0  ;;  %9447 = vmatmul.mubr.bf16.vlgmr.msra.gmra.mxu0 %v14409_v17  ;;  %v12884_v6 = vcombine.high %v2829_v16, %v2833_v1  ;;  %v2693_v32 = vld [vmem:[#allocation8 + $0x1098] sm:$0xff]  ;;  %v12883_v56 = vcombine.low %v2829_v16, %v2833_v1 }
 0x4f7   :  { %v9203_v55 = vadd.f32 %v9202_v2, %v14561_v28  ;;  %v9243_v30 = vpop.f32.mrf.mxu1  ;;  %9488 = vmatmul.mubr.bf16.vlgmr.msra.gmra.mxu1 %v14413_v29  ;;  %9497 = vmatpush1.bf16.msra.mxu0 %v12787_v42  ;;  %v12900_v28 = vcombine.high %v2845_v53, %v2849_v14  ;;  %v2697_v34 = vld [vmem:[#allocation8 + $0x10b8] sm:$0xff] }
 0x4f8   :  { %9528 = vmatprep.mubr.bf16.mxu0 %v14425_v63  ;;  %9538 = vmatpush1.bf16.msra.mxu1 %v12915_v48  ;;  %v9204_v41 = vpop.f32.mrf.mxu0  ;;  %v2821_v35 = vld [vmem:[#allocation8 + $0x1498] sm:$0xff]  ;;  %v12748_v42 = vcombine.high %v2693_v32, %v2697_v34  ;;  %v12747_v57 = vcombine.low %v2693_v32, %v2697_v34 }
 0x4f9   :  { %v14571_v27 = vadd.f32 %v9243_v30, %v9203_v55  ;;  %9569 = vmatprep.mubr.bf16.mxu1 %v14427_v7  ;;  %v9205_v17 = vadd.f32 %v9204_v41, %v14565_v54  ;;  %v9245_v36 = vpop.f32.mrf.mxu1  ;;  %9498 = vmatprep.subr.bf16.mxu0 %v12780_v50  ;;  %v12899_v7 = vcombine.low %v2845_v53, %v2849_v14  ;;  %v2825_v39 = vld [vmem:[#allocation8 + $0x14b8] sm:$0xff] }
 0x4fa   :  { %v9206_v29 = vpop.f32.mrf.mxu0  ;;  %9539 = vmatprep.subr.bf16.mxu1 %v12908_v52  ;;  %v12876_v43 = vcombine.high %v2821_v35, %v2825_v39  ;;  %v2685_v19 = vld [vmem:[#allocation8 + $0x1058] sm:$0xff]  ;;  %v12875_v2 = vcombine.low %v2821_v35, %v2825_v39 }
 0x4fb   :  { %v14575_v63 = vadd.f32 %v9245_v36, %v9205_v17  ;;  %v9247_v18 = vpop.f32.mrf.mxu1  ;;  %9499 = vmatpush1.bf16.msra.mxu0 %v12779_v37  ;;  %v2689_v48 = vld [vmem:[#allocation8 + $0x1078] sm:$0xff] }
 0x4fc   :  { %9540 = vmatpush1.bf16.msra.mxu1 %v12907_v61  ;;  %v9207_v4 = vpop.f32.mrf.mxu0  ;;  %9500 = vmatprep.subr.bf16.mxu0 %v12772_v59  ;;  %v2813_v50 = vld [vmem:[#allocation8 + $0x1458] sm:$0xff]  ;;  %v12740_v52 = vcombine.high %v2685_v19, %v2689_v48  ;;  %v12739_v41 = vcombine.low %v2685_v19, %v2689_v48 }
 0x4fd   :  { %v9248_v54 = vpop.f32.mrf.mxu1  ;;  %9541 = vmatprep.subr.bf16.mxu1 %v12900_v28  ;;  %v2817_v10 = vld [vmem:[#allocation8 + $0x1478] sm:$0xff] }
 0x4fe   :  { %v12868_v53 = vcombine.high %v2813_v50, %v2817_v10  ;;  %v2677_v14 = vld [vmem:[#allocation8 + $0x1018] sm:$0xff]  ;;  %v12867_v61 = vcombine.low %v2813_v50, %v2817_v10 }
 0x4ff   :  { %9501 = vmatpush1.bf16.msra.mxu0 %v12771_v3  ;;  %v2681_v55 = vld [vmem:[#allocation8 + $0x1038] sm:$0xff] }
 0x500   :  { %9542 = vmatpush1.bf16.msra.mxu1 %v12899_v7  ;;  %9502 = vmatprep.subr.bf16.mxu0 %v12764_v9  ;;  %v2805_v30 = vld [vmem:[#allocation8 + $0x1418] sm:$0xff]  ;;  %v12732_v59 = vcombine.high %v2677_v14, %v2681_v55  ;;  %v12731_v29 = vcombine.low %v2677_v14, %v2681_v55 }
 0x501   :  { %9543 = vmatprep.subr.bf16.mxu1 %v12892_v13  ;;  %v2809_v37 = vld [vmem:[#allocation8 + $0x1438] sm:$0xff] }
 0x502   :  { %v12860_v17 = vcombine.high %v2805_v30, %v2809_v37  ;;  %v2797_v36 = vld [vmem:[#allocation8 + $0x13d8] sm:$0xff]  ;;  %v12859_v0 = vcombine.low %v2805_v30, %v2809_v37 }
 0x503   :  { %9503 = vmatpush1.bf16.msra.mxu0 %v12763_v22  ;;  %v2801_v28 = vld [vmem:[#allocation8 + $0x13f8] sm:$0xff] }
 0x504   :  { %9544 = vmatpush1.bf16.msra.mxu1 %v12891_v47  ;;  %9504 = vmatprep.subr.bf16.mxu0 %v12756_v31  ;;  %v2925_v62 = vld [vmem:[#allocation8 + $0x17d8] sm:$0xff]  ;;  %v12852_v58 = vcombine.high %v2797_v36, %v2801_v28  ;;  %v12851_v54 = vcombine.low %v2797_v36, %v2801_v28 }
 0x505   :  { %9545 = vmatprep.subr.bf16.mxu1 %v12884_v6  ;;  %v2929_v21 = vld [vmem:[#allocation8 + $0x17f8] sm:$0xff] }
 0x506   :  { %v12980_v18 = vcombine.high %v2925_v62, %v2929_v21  ;;  %v2789_v3 = vld [vmem:[#allocation8 + $0x1398] sm:$0xff]  ;;  %v12979_v13 = vcombine.low %v2925_v62, %v2929_v21 }
 0x507   :  { %9505 = vmatpush1.bf16.msra.mxu0 %v12755_v40  ;;  %v2793_v4 = vld [vmem:[#allocation8 + $0x13b8] sm:$0xff] }
 0x508   :  { %9546 = vmatpush1.bf16.msra.mxu1 %v12883_v56  ;;  %9506 = vmatprep.subr.bf16.mxu0 %v12748_v42  ;;  %v2917_v7 = vld [vmem:[#allocation8 + $0x1798] sm:$0xff]  ;;  %v12844_v15 = vcombine.high %v2789_v3, %v2793_v4  ;;  %v12843_v31 = vcombine.low %v2789_v3, %v2793_v4 }
 0x509   :  { %9547 = vmatprep.subr.bf16.mxu1 %v12876_v43  ;;  %v2921_v9 = vld [vmem:[#allocation8 + $0x17b8] sm:$0xff] }
 0x50a   :  { %v12972_v24 = vcombine.high %v2917_v7, %v2921_v9  ;;  %v2781_v16 = vld [vmem:[#allocation8 + $0x1358] sm:$0xff]  ;;  %v12971_v6 = vcombine.low %v2917_v7, %v2921_v9 }
 0x50b   :  { %9507 = vmatpush1.bf16.msra.mxu0 %v12747_v57  ;;  %v2785_v1 = vld [vmem:[#allocation8 + $0x1378] sm:$0xff] }
 0x50c   :  { %9548 = vmatpush1.bf16.msra.mxu1 %v12875_v2  ;;  %9508 = vmatprep.subr.bf16.mxu0 %v12740_v52  ;;  %v2909_v22 = vld [vmem:[#allocation8 + $0x1758] sm:$0xff]  ;;  %v12836_v32 = vcombine.high %v2781_v16, %v2785_v1  ;;  %v12835_v42 = vcombine.low %v2781_v16, %v2785_v1 }
 0x50d   :  { %9549 = vmatprep.subr.bf16.mxu1 %v12868_v53  ;;  %v2913_v47 = vld [vmem:[#allocation8 + $0x1778] sm:$0xff] }
 0x50e   :  { %v12964_v34 = vcombine.high %v2909_v22, %v2913_v47  ;;  %v2773_v35 = vld [vmem:[#allocation8 + $0x1318] sm:$0xff]  ;;  %v12963_v43 = vcombine.low %v2909_v22, %v2913_v47 }
 0x50f   :  { %9509 = vmatpush1.bf16.msra.mxu0 %v12739_v41  ;;  %v2777_v39 = vld [vmem:[#allocation8 + $0x1338] sm:$0xff] }
 0x510   :  { %9550 = vmatpush1.bf16.msra.mxu1 %v12867_v61  ;;  %9510 = vmatprep.subr.bf16.mxu0 %v12732_v59  ;;  %v2901_v40 = vld [vmem:[#allocation8 + $0x1718] sm:$0xff]  ;;  %v12828_v19 = vcombine.high %v2773_v35, %v2777_v39  ;;  %v12827_v52 = vcombine.low %v2773_v35, %v2777_v39 }
 0x511   :  { %9551 = vmatprep.subr.bf16.mxu1 %v12860_v17  ;;  %v2905_v56 = vld [vmem:[#allocation8 + $0x1738] sm:$0xff] }
 0x512   :  { %v12956_v48 = vcombine.high %v2901_v40, %v2905_v56  ;;  %v2765_v50 = vld [vmem:[#allocation8 + $0x12d8] sm:$0xff]  ;;  %v12955_v53 = vcombine.low %v2901_v40, %v2905_v56 }
 0x513   :  { %9511 = vmatpush1.bf16.msra.mxu0 %v12731_v29  ;;  %v2769_v10 = vld [vmem:[#allocation8 + $0x12f8] sm:$0xff] }
 0x514   :  { %9552 = vmatpush1.bf16.msra.mxu1 %v12859_v0  ;;  %9512 = vmatprep.subr.bf16.mxu0 %v12852_v58  ;;  %v2893_v57 = vld [vmem:[#allocation8 + $0x16d8] sm:$0xff]  ;;  %v12820_v14 = vcombine.high %v2765_v50, %v2769_v10  ;;  %v12819_v59 = vcombine.low %v2765_v50, %v2769_v10 }
 0x515   :  { %9553 = vmatprep.subr.bf16.mxu1 %v12980_v18  ;;  %v2897_v2 = vld [vmem:[#allocation8 + $0x16f8] sm:$0xff] }
 0x516   :  { %v12948_v55 = vcombine.high %v2893_v57, %v2897_v2  ;;  %v2757_v30 = vld [vmem:[#allocation8 + $0x1298] sm:$0xff]  ;;  %v12947_v17 = vcombine.low %v2893_v57, %v2897_v2 }
 0x517   :  { %9513 = vmatpush2.bf16.msra.mxu0 %v12851_v54  ;;  %v2761_v37 = vld [vmem:[#allocation8 + $0x12b8] sm:$0xff] }
 0x518   :  { %9554 = vmatpush2.bf16.msra.mxu1 %v12979_v13  ;;  %9514 = vmatprep.subr.bf16.mxu0 %v12844_v15  ;;  %v2885_v41 = vld [vmem:[#allocation8 + $0x1698] sm:$0xff]  ;;  %v12812_v36 = vcombine.high %v2757_v30, %v2761_v37  ;;  %v12811_v58 = vcombine.low %v2757_v30, %v2761_v37 }
 0x519   :  { %9555 = vmatprep.subr.bf16.mxu1 %v12972_v24  ;;  %v2889_v61 = vld [vmem:[#allocation8 + $0x16b8] sm:$0xff] }
 0x51a   :  { %v12940_v28 = vcombine.high %v2885_v41, %v2889_v61  ;;  %v2749_v62 = vld [vmem:[#allocation8 + $0x1258] sm:$0xff]  ;;  %v12939_v18 = vcombine.low %v2885_v41, %v2889_v61 }
 0x51b   :  { %9515 = vmatpush2.bf16.msra.mxu0 %v12843_v31  ;;  %v2753_v21 = vld [vmem:[#allocation8 + $0x1278] sm:$0xff] }
 0x51c   :  { %9556 = vmatpush2.bf16.msra.mxu1 %v12971_v6  ;;  %9516 = vmatprep.subr.bf16.mxu0 %v12836_v32  ;;  %v2877_v29 = vld [vmem:[#allocation8 + $0x1658] sm:$0xff]  ;;  %v12804_v3 = vcombine.high %v2749_v62, %v2753_v21  ;;  %v12803_v15 = vcombine.low %v2749_v62, %v2753_v21 }
 0x51d   :  { %9557 = vmatprep.subr.bf16.mxu1 %v12964_v34  ;;  %v2881_v0 = vld [vmem:[#allocation8 + $0x1678] sm:$0xff] }
 0x51e   :  { %v12932_v4 = vcombine.high %v2877_v29, %v2881_v0  ;;  %v2741_v7 = vld [vmem:[#allocation8 + $0x1218] sm:$0xff]  ;;  %v12931_v24 = vcombine.low %v2877_v29, %v2881_v0 }
 0x51f   :  { %9517 = vmatpush2.bf16.msra.mxu0 %v12835_v42  ;;  %v2745_v9 = vld [vmem:[#allocation8 + $0x1238] sm:$0xff] }
 0x520   :  { %9558 = vmatpush2.bf16.msra.mxu1 %v12963_v43  ;;  %9518 = vmatprep.subr.bf16.mxu0 %v12828_v19  ;;  %v2869_v54 = vld [vmem:[#allocation8 + $0x1618] sm:$0xff]  ;;  %v12796_v16 = vcombine.high %v2741_v7, %v2745_v9  ;;  %v12795_v32 = vcombine.low %v2741_v7, %v2745_v9 }
 0x521   :  { %9559 = vmatprep.subr.bf16.mxu1 %v12956_v48  ;;  %v2873_v13 = vld [vmem:[#allocation8 + $0x1638] sm:$0xff] }
 0x522   :  { %v12924_v1 = vcombine.high %v2869_v54, %v2873_v13  ;;  %v2989_v22 = vld [vmem:[#allocation8 + $0x19d8] sm:$0xff]  ;;  %v12923_v34 = vcombine.low %v2869_v54, %v2873_v13 }
 0x523   :  { %9519 = vmatpush2.bf16.msra.mxu0 %v12827_v52  ;;  %v2993_v47 = vld [vmem:[#allocation8 + $0x19f8] sm:$0xff] }
 0x524   :  { %9560 = vmatpush2.bf16.msra.mxu1 %v12955_v53  ;;  %9520 = vmatprep.subr.bf16.mxu0 %v12820_v14  ;;  %v3117_v31 = vld [vmem:[#allocation8 + $0x1dd8] sm:$0xff]  ;;  %v13044_v35 = vcombine.high %v2989_v22, %v2993_v47  ;;  %v13043_v42 = vcombine.low %v2989_v22, %v2993_v47 }
 0x525   :  { %9561 = vmatprep.subr.bf16.mxu1 %v12948_v55  ;;  %v3121_v6 = vld [vmem:[#allocation8 + $0x1df8] sm:$0xff] }
 0x526   :  { %v13172_v39 = vcombine.high %v3117_v31, %v3121_v6  ;;  %v2981_v40 = vld [vmem:[#allocation8 + $0x1998] sm:$0xff]  ;;  %v13171_v48 = vcombine.low %v3117_v31, %v3121_v6 }
 0x527   :  { %9521 = vmatpush2.bf16.msra.mxu0 %v12819_v59  ;;  %v2985_v56 = vld [vmem:[#allocation8 + $0x19b8] sm:$0xff] }
 0x528   :  { %9562 = vmatpush2.bf16.msra.mxu1 %v12947_v17  ;;  %9522 = vmatprep.subr.bf16.mxu0 %v12812_v36  ;;  %v3109_v43 = vld [vmem:[#allocation8 + $0x1d98] sm:$0xff]  ;;  %v13036_v50 = vcombine.high %v2981_v40, %v2985_v56  ;;  %v13035_v37 = vcombine.low %v2981_v40, %v2985_v56 }
 0x529   :  { %9563 = vmatprep.subr.bf16.mxu1 %v12940_v28  ;;  %v3113_v19 = vld [vmem:[#allocation8 + $0x1db8] sm:$0xff] }
 0x52a   :  { %v2973_v10 = vld [vmem:[#allocation8 + $0x1958] sm:$0xff]  ;;  %v13164_v52 = vcombine.high %v3109_v43, %v3113_v19  ;;  %v13163_v61 = vcombine.low %v3109_v43, %v3113_v19 }
 0x52b   :  { %9523 = vmatpush2.bf16.msra.mxu0 %v12811_v58  ;;  %v2977_v57 = vld [vmem:[#allocation8 + $0x1978] sm:$0xff] }
 0x52c   :  { %9564 = vmatpush2.bf16.msra.mxu1 %v12939_v18  ;;  %9524 = vmatprep.subr.bf16.mxu0 %v12804_v3  ;;  %v3101_v53 = vld [vmem:[#allocation8 + $0x1d58] sm:$0xff]  ;;  %v13028_v59 = vcombine.high %v2973_v10, %v2977_v57  ;;  %v13027_v58 = vcombine.low %v2973_v10, %v2977_v57 }
 0x52d   :  { %9565 = vmatprep.subr.bf16.mxu1 %v12932_v4  ;;  %v3105_v14 = vld [vmem:[#allocation8 + $0x1d78] sm:$0xff] }
 0x52e   :  { %v2965_v28 = vld [vmem:[#allocation8 + $0x1918] sm:$0xff] }
 0x52f   :  { %9525 = vmatpush2.bf16.msra.mxu0 %v12803_v15  ;;  %v2969_v62 = vld [vmem:[#allocation8 + $0x1938] sm:$0xff] }
 0x530   :  { %9566 = vmatpush2.bf16.msra.mxu1 %v12931_v24  ;;  %9526 = vmatprep.subr.bf16.mxu0 %v12796_v16  ;;  %v3093_v21 = vld [vmem:[#allocation8 + $0x1d18] sm:$0xff]  ;;  %v13020_v3 = vcombine.high %v2965_v28, %v2969_v62  ;;  %v13019_v15 = vcombine.low %v2965_v28, %v2969_v62 }
 0x531   :  { %9567 = vmatprep.subr.bf16.mxu1 %v12924_v1  ;;  %v3097_v29 = vld [vmem:[#allocation8 + $0x1d38] sm:$0xff] }
 0x532   :  { %v13148_v4 = vcombine.high %v3093_v21, %v3097_v29  ;;  %v2957_v7 = vld [vmem:[#allocation8 + $0x18d8] sm:$0xff]  ;;  %v13147_v24 = vcombine.low %v3093_v21, %v3097_v29 }
 0x533   :  { %9527 = vmatpush2.bf16.msra.mxu0 %v12795_v32  ;;  %v2961_v9 = vld [vmem:[#allocation8 + $0x18f8] sm:$0xff] }
 0x534   :  { %9568 = vmatpush2.bf16.msra.mxu1 %v12923_v34  ;;  %9578 = vmatprep.subr.bf16.mxu0 %v13044_v35  ;;  %v3085_v54 = vld [vmem:[#allocation8 + $0x1cd8] sm:$0xff]  ;;  %v13012_v16 = vcombine.high %v2957_v7, %v2961_v9  ;;  %v13011_v32 = vcombine.low %v2957_v7, %v2961_v9 }
 0x535   :  { %9619 = vmatprep.subr.bf16.mxu1 %v13172_v39  ;;  %v3089_v13 = vld [vmem:[#allocation8 + $0x1cf8] sm:$0xff] }
 0x536   :  { %v9284_v2 = vpop.f32.mrf.mxu0  ;;  %9529 = vmatmul.mubr.bf16.vlgmr.msra.gmra.mxu0 %v14437_v51  ;;  %v13140_v1 = vcombine.high %v3085_v54, %v3089_v13  ;;  %v2949_v22 = vld [vmem:[#allocation8 + $0x1898] sm:$0xff]  ;;  %v13139_v34 = vcombine.low %v3085_v54, %v3089_v13 }
 0x537   :  { %v9285_v55 = vadd.f32 %v9284_v2, %v14571_v27  ;;  %v9325_v30 = vpop.f32.mrf.mxu1  ;;  %9570 = vmatmul.mubr.bf16.vlgmr.msra.gmra.mxu1 %v14439_v12  ;;  %9579 = vmatpush1.bf16.msra.mxu0 %v13043_v42  ;;  %v13156_v27 = vcombine.high %v3101_v53, %v3105_v14  ;;  %v2953_v47 = vld [vmem:[#allocation8 + $0x18b8] sm:$0xff] }
 0x538   :  { %9610 = vmatprep.mubr.bf16.mxu0 %v14451_v45  ;;  %9620 = vmatpush1.bf16.msra.mxu1 %v13171_v48  ;;  %v9286_v41 = vpop.f32.mrf.mxu0  ;;  %v3077_v31 = vld [vmem:[#allocation8 + $0x1c98] sm:$0xff]  ;;  %v13004_v35 = vcombine.high %v2949_v22, %v2953_v47  ;;  %v13003_v19 = vcombine.low %v2949_v22, %v2953_v47 }
 0x539   :  { %v14581_v17 = vadd.f32 %v9325_v30, %v9285_v55  ;;  %9651 = vmatprep.mubr.bf16.mxu1 %v14453_v49  ;;  %v9287_v51 = vadd.f32 %v9286_v41, %v14575_v63  ;;  %v9327_v36 = vpop.f32.mrf.mxu1  ;;  %9580 = vmatprep.subr.bf16.mxu0 %v13036_v50  ;;  %v13155_v49 = vcombine.low %v3101_v53, %v3105_v14  ;;  %v3081_v6 = vld [vmem:[#allocation8 + $0x1cb8] sm:$0xff] }
 0x53a   :  { %v9288_v12 = vpop.f32.mrf.mxu0  ;;  %9621 = vmatprep.subr.bf16.mxu1 %v13164_v52  ;;  %v13132_v39 = vcombine.high %v3077_v31, %v3081_v6  ;;  %v2941_v40 = vld [vmem:[#allocation8 + $0x1858] sm:$0xff]  ;;  %v13131_v48 = vcombine.low %v3077_v31, %v3081_v6 }
 0x53b   :  { %v14585_v45 = vadd.f32 %v9327_v36, %v9287_v51  ;;  %v9329_v0 = vpop.f32.mrf.mxu1  ;;  %9581 = vmatpush1.bf16.msra.mxu0 %v13035_v37  ;;  %v2945_v56 = vld [vmem:[#allocation8 + $0x1878] sm:$0xff]  ;;  %vm9664_vm5 = vcmp.gt.f32.partialorder %v14581_v17, 0.0 }
 0x53c   :  { %9622 = vmatpush1.bf16.msra.mxu1 %v13163_v61  ;;  %v9289_v18 = vpop.f32.mrf.mxu0  ;;  %9582 = vmatprep.subr.bf16.mxu0 %v13028_v59  ;;  %v3069_v42 = vld [vmem:[#allocation8 + $0x1c58] sm:$0xff]  ;;  %v12996_v50 = vcombine.high %v2941_v40, %v2945_v56  ;;  %v12995_v14 = vcombine.low %v2941_v40, %v2945_v56 }
 0x53d   :  { %v9330_v63 = vpop.f32.mrf.mxu1  ;;  %9623 = vmatprep.subr.bf16.mxu1 %v13156_v27  ;;  %v3073_v43 = vld [vmem:[#allocation8 + $0x1c78] sm:$0xff]  ;;  %vm9665_vm4 = vcmp.gt.f32.partialorder %v14585_v45, 0.0 }
 0x53e   :  { %v13124_v10 = vcombine.high %v3069_v42, %v3073_v43  ;;  %v2933_v57 = vld [vmem:[#allocation8 + $0x1818] sm:$0xff]  ;;  %v13123_v55 = vcombine.low %v3069_v42, %v3073_v43 }
 0x53f   :  { %9583 = vmatpush1.bf16.msra.mxu0 %v13027_v58  ;;  %v2937_v2 = vld [vmem:[#allocation8 + $0x1838] sm:$0xff] }
 0x540   :  { %9624 = vmatpush1.bf16.msra.mxu1 %v13155_v49  ;;  %9584 = vmatprep.subr.bf16.mxu0 %v13020_v3  ;;  %v3061_v52 = vld [vmem:[#allocation8 + $0x1c18] sm:$0xff]  ;;  %v12988_v30 = vcombine.high %v2933_v57, %v2937_v2  ;;  %v12987_v36 = vcombine.low %v2933_v57, %v2937_v2 }
 0x541   :  { %9625 = vmatprep.subr.bf16.mxu1 %v13148_v4  ;;  %v3065_v53 = vld [vmem:[#allocation8 + $0x1c38] sm:$0xff] }
 0x542   :  { %v13116_v37 = vcombine.high %v3061_v52, %v3065_v53  ;;  %v3053_v41 = vld [vmem:[#allocation8 + $0x1bd8] sm:$0xff]  ;;  %v13115_v27 = vcombine.low %v3061_v52, %v3065_v53 }
 0x543   :  { %9585 = vmatpush1.bf16.msra.mxu0 %v13019_v15  ;;  %v3057_v61 = vld [vmem:[#allocation8 + $0x1bf8] sm:$0xff] }
 0x544   :  { %9626 = vmatpush1.bf16.msra.mxu1 %v13147_v24  ;;  %9586 = vmatprep.subr.bf16.mxu0 %v13012_v16  ;;  %v3181_v59 = vld [vmem:[#allocation8 + $0x1fd8] sm:$0xff]  ;;  %v13108_v28 = vcombine.high %v3053_v41, %v3057_v61  ;;  %v13107_v58 = vcombine.low %v3053_v41, %v3057_v61 }
 0x545   :  { %9627 = vmatprep.subr.bf16.mxu1 %v13140_v1  ;;  %v3185_v51 = vld [vmem:[#allocation8 + $0x1ff8] sm:$0xff] }
 0x546   :  { %v13236_v62 = vcombine.high %v3181_v59, %v3185_v51  ;;  %v3045_v12 = vld [vmem:[#allocation8 + $0x1b98] sm:$0xff]  ;;  %v13235_v18 = vcombine.low %v3181_v59, %v3185_v51 }
 0x547   :  { %9587 = vmatpush1.bf16.msra.mxu0 %v13011_v32  ;;  %v3049_v21 = vld [vmem:[#allocation8 + $0x1bb8] sm:$0xff] }
 0x548   :  { %9628 = vmatpush1.bf16.msra.mxu1 %v13139_v34  ;;  %9588 = vmatprep.subr.bf16.mxu0 %v13004_v35  ;;  %v3173_v29 = vld [vmem:[#allocation8 + $0x1f98] sm:$0xff]  ;;  %v13100_v49 = vcombine.high %v3045_v12, %v3049_v21  ;;  %v13099_v54 = vcombine.low %v3045_v12, %v3049_v21 }
 0x549   :  { %9629 = vmatprep.subr.bf16.mxu1 %v13132_v39  ;;  %v3177_v0 = vld [vmem:[#allocation8 + $0x1fb8] sm:$0xff] }
 0x54a   :  { %v13228_v3 = vcombine.high %v3173_v29, %v3177_v0  ;;  %v3037_v63 = vld [vmem:[#allocation8 + $0x1b58] sm:$0xff]  ;;  %v13227_v13 = vcombine.low %v3173_v29, %v3177_v0 }
 0x54b   :  { %9589 = vmatpush1.bf16.msra.mxu0 %v13003_v19  ;;  %v3041_v4 = vld [vmem:[#allocation8 + $0x1b78] sm:$0xff] }
 0x54c   :  { %9630 = vmatpush1.bf16.msra.mxu1 %v13131_v48  ;;  %9590 = vmatprep.subr.bf16.mxu0 %v12996_v50  ;;  %v3165_v7 = vld [vmem:[#allocation8 + $0x1f58] sm:$0xff]  ;;  %v13092_v15 = vcombine.high %v3037_v63, %v3041_v4  ;;  %v13091_v31 = vcombine.low %v3037_v63, %v3041_v4  ;;  %v9671_v63 = vmul.f32 0.2, %v14545_v38 }
 0x54d   :  { %9631 = vmatprep.subr.bf16.mxu1 %v13124_v10  ;;  %v3169_v9 = vld [vmem:[#allocation8 + $0x1f78] sm:$0xff] }
 0x54e   :  { %v13220_v24 = vcombine.high %v3165_v7, %v3169_v9  ;;  %v3029_v16 = vld [vmem:[#allocation8 + $0x1b18] sm:$0xff]  ;;  %v13219_v6 = vcombine.low %v3165_v7, %v3169_v9 }
 0x54f   :  { %9591 = vmatpush1.bf16.msra.mxu0 %v12995_v14  ;;  %v3033_v1 = vld [vmem:[#allocation8 + $0x1b38] sm:$0xff] }
 0x550   :  { %9632 = vmatpush1.bf16.msra.mxu1 %v13123_v55  ;;  %9592 = vmatprep.subr.bf16.mxu0 %v12988_v30  ;;  %v3157_v22 = vld [vmem:[#allocation8 + $0x1f18] sm:$0xff]  ;;  %v13084_v32 = vcombine.high %v3029_v16, %v3033_v1  ;;  %v13083_v42 = vcombine.low %v3029_v16, %v3033_v1  ;;  %v9679_v1 = vsel %vm9663_vm1, %v14545_v38, %v9671_v63 }
 0x551   :  { %9633 = vmatprep.subr.bf16.mxu1 %v13116_v37  ;;  %v3161_v47 = vld [vmem:[#allocation8 + $0x1f38] sm:$0xff] }
 0x552   :  { %v13212_v34 = vcombine.high %v3157_v22, %v3161_v47  ;;  %v3021_v35 = vld [vmem:[#allocation8 + $0x1ad8] sm:$0xff]  ;;  %v13211_v43 = vcombine.low %v3157_v22, %v3161_v47 }
 0x553   :  { %9593 = vmatpush1.bf16.msra.mxu0 %v12987_v36  ;;  %v3025_v39 = vld [vmem:[#allocation8 + $0x1af8] sm:$0xff] }
 0x554   :  { %9634 = vmatpush1.bf16.msra.mxu1 %v13115_v27  ;;  %9594 = vmatprep.subr.bf16.mxu0 %v13108_v28  ;;  %v3149_v40 = vld [vmem:[#allocation8 + $0x1ed8] sm:$0xff]  ;;  %v13076_v19 = vcombine.high %v3021_v35, %v3025_v39  ;;  %v13075_v52 = vcombine.low %v3021_v35, %v3025_v39 }
 0x555   :  { %9635 = vmatprep.subr.bf16.mxu1 %v13236_v62  ;;  %v3153_v56 = vld [vmem:[#allocation8 + $0x1ef8] sm:$0xff] }
 0x556   :  { %v13204_v48 = vcombine.high %v3149_v40, %v3153_v56  ;;  %v3013_v50 = vld [vmem:[#allocation8 + $0x1a98] sm:$0xff]  ;;  %v13203_v53 = vcombine.low %v3149_v40, %v3153_v56 }
 0x557   :  { %9595 = vmatpush2.bf16.msra.mxu0 %v13107_v58  ;;  %v3017_v10 = vld [vmem:[#allocation8 + $0x1ab8] sm:$0xff] }
 0x558   :  { %9636 = vmatpush2.bf16.msra.mxu1 %v13235_v18  ;;  %9596 = vmatprep.subr.bf16.mxu0 %v13100_v49  ;;  %v3141_v57 = vld [vmem:[#allocation8 + $0x1e98] sm:$0xff]  ;;  %v13068_v14 = vcombine.high %v3013_v50, %v3017_v10  ;;  %v13067_v59 = vcombine.low %v3013_v50, %v3017_v10  ;;  %v9669_v49 = vmul.f32 0.2, %v14505_v8 }
 0x559   :  { %9637 = vmatprep.subr.bf16.mxu1 %v13228_v3  ;;  %v3145_v2 = vld [vmem:[#allocation8 + $0x1eb8] sm:$0xff] }
 0x55a   :  { %v13196_v55 = vcombine.high %v3141_v57, %v3145_v2  ;;  %v3005_v30 = vld [vmem:[#allocation8 + $0x1a58] sm:$0xff]  ;;  %v13195_v51 = vcombine.low %v3141_v57, %v3145_v2 }
 0x55b   :  { %9597 = vmatpush2.bf16.msra.mxu0 %v13099_v54  ;;  %v3009_v37 = vld [vmem:[#allocation8 + $0x1a78] sm:$0xff]  ;;  %v14005_v54 = vld [vmem:[#allocation10] sm:$0xff] }
 0x55c   :  { %9638 = vmatpush2.bf16.msra.mxu1 %v13227_v13  ;;  %9598 = vmatprep.subr.bf16.mxu0 %v13092_v15  ;;  %v3133_v41 = vld [vmem:[#allocation8 + $0x1e58] sm:$0xff]  ;;  %v13060_v36 = vcombine.high %v3005_v30, %v3009_v37  ;;  %v13059_v29 = vcombine.low %v3005_v30, %v3009_v37  ;;  %v3215_v13 = vrot.slane %v14005_v54, %v14401_v33 }
 0x55d   :  { %9639 = vmatprep.subr.bf16.mxu1 %v13220_v24  ;;  %v3137_v61 = vld [vmem:[#allocation8 + $0x1e78] sm:$0xff]  ;;  %v9677_v24 = vsel %vm9661_vm0, %v14505_v8, %v9669_v49  ;;  %v3219_v22 = vrot.slane %v14005_v54, %v14375_v5  ;;  %v14599_v8 = vpack.c.bf16 %v9679_v1, %v9679_v1 }
 0x55e   :  { %v13188_v27 = vcombine.high %v3133_v41, %v3137_v61  ;;  %v2997_v28 = vld [vmem:[#allocation8 + $0x1a18] sm:$0xff]  ;;  %v13187_v0 = vcombine.low %v3133_v41, %v3137_v61 }
 0x55f   :  { %9599 = vmatpush2.bf16.msra.mxu0 %v13091_v31  ;;  %v3001_v62 = vld [vmem:[#allocation8 + $0x1a38] sm:$0xff] }
 0x560   :  { %9640 = vmatpush2.bf16.msra.mxu1 %v13219_v6  ;;  %9600 = vmatprep.subr.bf16.mxu0 %v13084_v32  ;;  %v3125_v12 = vld [vmem:[#allocation8 + $0x1e18] sm:$0xff]  ;;  %v13052_v58 = vcombine.high %v2997_v28, %v3001_v62  ;;  %v13051_v3 = vcombine.low %v2997_v28, %v3001_v62  ;;  %v14596_v6 = vpack.c.bf16 %v9677_v24, %v9677_v24 }
 0x561   :  { %9641 = vmatprep.subr.bf16.mxu1 %v13212_v34  ;;  %v3129_v21 = vld [vmem:[#allocation8 + $0x1e38] sm:$0xff] }
 0x562   :  { %v13180_v18 = vcombine.high %v3125_v12, %v3129_v21  ;;  %v13179_v4 = vcombine.low %v3125_v12, %v3129_v21  ;;  %v13589_v7 = vld [vmem:[#allocation11 + $0xe4] ss:$16 sps:$4 sm:$0xff]   ;;  %v13587_v15 = vld [vmem:[#allocation11 + $0xe0] ss:$16 sps:$4 sm:$0xff]  }
 0x563   :  { %9601 = vmatpush2.bf16.msra.mxu0 %v13083_v42  ;;  %v13592_v9 = vld [vmem:[#allocation11 + $0x2e4] ss:$16 sps:$4 sm:$0xff]   ;;  %v13590_v16 = vld [vmem:[#allocation11 + $0x2e0] ss:$16 sps:$4 sm:$0xff]  }
 0x564   :  { %9642 = vmatpush2.bf16.msra.mxu1 %v13211_v43  ;;  %9602 = vmatprep.subr.bf16.mxu0 %v13076_v19  ;;  %v13595_v47 = vld [vmem:[#allocation11 + $0xc4] ss:$16 sps:$4 sm:$0xff]   ;;  %v13593_v35 = vld [vmem:[#allocation11 + $0xc0] ss:$16 sps:$4 sm:$0xff]  }
 0x565   :  { %9643 = vmatprep.subr.bf16.mxu1 %v13204_v48  ;;  %v13598_v32 = vld [vmem:[#allocation11 + $0x2c4] ss:$16 sps:$4 sm:$0xff]   ;;  %v13596_v5 = vld [vmem:[#allocation11 + $0x2c0] ss:$16 sps:$4 sm:$0xff]  }
 0x566   :  { %v13601_v39 = vld [vmem:[#allocation11 + $0xa4] ss:$16 sps:$4 sm:$0xff]   ;;  %v13599_v48 = vld [vmem:[#allocation11 + $0xa0] ss:$16 sps:$4 sm:$0xff]  }
 0x567   :  { %9603 = vmatpush2.bf16.msra.mxu0 %v13075_v52  ;;  %v13604_v42 = vld [vmem:[#allocation11 + $0x2a4] ss:$16 sps:$4 sm:$0xff]   ;;  %v13602_v10 = vld [vmem:[#allocation11 + $0x2a0] ss:$16 sps:$4 sm:$0xff]  }
 0x568   :  { %9644 = vmatpush2.bf16.msra.mxu1 %v13203_v53  ;;  %9604 = vmatprep.subr.bf16.mxu0 %v13068_v14  ;;  %v13607_v57 = vld [vmem:[#allocation11 + $0x84] ss:$16 sps:$4 sm:$0xff]   ;;  %v13605_v53 = vld [vmem:[#allocation11 + $0x80] ss:$16 sps:$4 sm:$0xff]  }
 0x569   :  { %9645 = vmatprep.subr.bf16.mxu1 %v13196_v55  ;;  %v13610_v52 = vld [vmem:[#allocation11 + $0x284] ss:$16 sps:$4 sm:$0xff]   ;;  %v13608_v14 = vld [vmem:[#allocation11 + $0x280] ss:$16 sps:$4 sm:$0xff]  }
 0x56a   :  { %v13613_v55 = vld [vmem:[#allocation11 + $0x64] ss:$16 sps:$4 sm:$0xff]   ;;  %v13611_v37 = vld [vmem:[#allocation11 + $0x60] ss:$16 sps:$4 sm:$0xff]  }
 0x56b   :  { %9605 = vmatpush2.bf16.msra.mxu0 %v13067_v59  ;;  %v13616_v30 = vld [vmem:[#allocation11 + $0x264] ss:$16 sps:$4 sm:$0xff]   ;;  %v13614_v41 = vld [vmem:[#allocation11 + $0x260] ss:$16 sps:$4 sm:$0xff]  }
 0x56c   :  { %9646 = vmatpush2.bf16.msra.mxu1 %v13195_v51  ;;  %9606 = vmatprep.subr.bf16.mxu0 %v13060_v36  ;;  %v13619_v61 = vld [vmem:[#allocation11 + $0x44] ss:$16 sps:$4 sm:$0xff]   ;;  %v13617_v51 = vld [vmem:[#allocation11 + $0x40] ss:$16 sps:$4 sm:$0xff]  }
 0x56d   :  { %9647 = vmatprep.subr.bf16.mxu1 %v13188_v27  ;;  %v13622_v59 = vld [vmem:[#allocation11 + $0x244] ss:$16 sps:$4 sm:$0xff]   ;;  %v13620_v36 = vld [vmem:[#allocation11 + $0x240] ss:$16 sps:$4 sm:$0xff]  }
 0x56e   :  { %v13625_v27 = vld [vmem:[#allocation11 + $0x24] ss:$16 sps:$4 sm:$0xff]   ;;  %v13623_v62 = vld [vmem:[#allocation11 + $0x20] ss:$16 sps:$4 sm:$0xff]  }
 0x56f   :  { %9607 = vmatpush2.bf16.msra.mxu0 %v13059_v29  ;;  %v13628_v28 = vld [vmem:[#allocation11 + $0x224] ss:$16 sps:$4 sm:$0xff]   ;;  %v13626_v12 = vld [vmem:[#allocation11 + $0x220] ss:$16 sps:$4 sm:$0xff]  }
 0x570   :  { %9648 = vmatpush2.bf16.msra.mxu1 %v13187_v0  ;;  %9608 = vmatprep.subr.bf16.mxu0 %v13052_v58  ;;  %v13631_v21 = vld [vmem:[#allocation11 + $0x4] ss:$16 sps:$4 sm:$0xff]   ;;  %v13629_v0 = vld [vmem:[#allocation11] ss:$16 sps:$4 sm:$0xff]  }
 0x571   :  { %9649 = vmatprep.subr.bf16.mxu1 %v13180_v18  ;;  %v13634_v29 = vld [vmem:[#allocation11 + $0x204] ss:$16 sps:$4 sm:$0xff]   ;;  %v13632_v58 = vld [vmem:[#allocation11 + $0x200] ss:$16 sps:$4 sm:$0xff]  }
 0x572   :  { %v13637_v18 = vld [vmem:[#allocation11 + $0x1e4] ss:$16 sps:$4 sm:$0xff]   ;;  %v13638_v63 = vld [vmem:[#allocation11 + $0x3e0] ss:$16 sps:$4 sm:$0xff]  }
 0x573   :  { %9609 = vmatpush2.bf16.msra.mxu0 %v13051_v3  ;;  %v13640_v49 = vld [vmem:[#allocation11 + $0x3e4] ss:$16 sps:$4 sm:$0xff]   ;;  %v13635_v3 = vld [vmem:[#allocation11 + $0x1e0] ss:$16 sps:$4 sm:$0xff]  }
 0x574   :  { %9650 = vmatpush2.bf16.msra.mxu1 %v13179_v4  ;;  %11250 = vmatprep.subr.bf16.mxu0 %v13589_v7  ;;  %v13643_v4 = vld [vmem:[#allocation11 + $0x1c4] ss:$16 sps:$4 sm:$0xff]   ;;  %v13644_v54 = vld [vmem:[#allocation11 + $0x3c0] ss:$16 sps:$4 sm:$0xff]  }
 0x575   :  { %11291 = vmatprep.subr.bf16.mxu1 %v13592_v9  ;;  %v13646_v7 = vld [vmem:[#allocation11 + $0x3c4] ss:$16 sps:$4 sm:$0xff]   ;;  %v13641_v9 = vld [vmem:[#allocation11 + $0x1c0] ss:$16 sps:$4 sm:$0xff]  }
 0x576   :  { %v9366_v31 = vpop.f32.mrf.mxu0  ;;  %9611 = vmatmul.mubr.bf16.vlgmr.msra.gmra.mxu0 %v14464_v44  ;;  %v13647_v24 = vld [vmem:[#allocation11 + $0x1a0] ss:$16 sps:$4 sm:$0xff]   ;;  %v13655_v1 = vld [vmem:[#allocation11 + $0x184] ss:$16 sps:$4 sm:$0xff]  }
 0x577   :  { %v9367_v34 = vadd.f32 %v9366_v31, %v3215_v13  ;;  %v9407_v33 = vpop.f32.mrf.mxu1  ;;  %9652 = vmatmul.mubr.bf16.vlgmr.msra.gmra.mxu1 %v14466_v46  ;;  %11251 = vmatpush1.bf16.msra.mxu0 %v13587_v15  ;;  %v13649_v13 = vld [vmem:[#allocation11 + $0x1a4] ss:$16 sps:$4 sm:$0xff]   ;;  %v13656_v31 = vld [vmem:[#allocation11 + $0x380] ss:$16 sps:$4 sm:$0xff]  }
 0x578   :  { %11282 = vmatprep.mubr.bf16.mxu0 %v14596_v6  ;;  %11292 = vmatpush1.bf16.msra.mxu1 %v13590_v16  ;;  %v9368_v38 = vpop.f32.mrf.mxu0  ;;  %v13652_v15 = vld [vmem:[#allocation11 + $0x3a4] ss:$16 sps:$4 sm:$0xff]   ;;  %v13650_v16 = vld [vmem:[#allocation11 + $0x3a0] ss:$16 sps:$4 sm:$0xff]  }
 0x579   :  { %v14602_v40 = vadd.f32 %v9407_v33, %v9367_v34  ;;  %11323 = vmatprep.mubr.bf16.mxu1 %v14599_v8  ;;  %v9369_v44 = vadd.f32 %v9368_v38, %v3219_v22  ;;  %v9409_v56 = vpop.f32.mrf.mxu1  ;;  %11252 = vmatprep.subr.bf16.mxu0 %v13595_v47  ;;  %v13658_v22 = vld [vmem:[#allocation11 + $0x384] ss:$16 sps:$4 sm:$0xff]   ;;  %v13653_v47 = vld [vmem:[#allocation11 + $0x180] ss:$16 sps:$4 sm:$0xff]  }
 0x57a   :  { %v9370_v43 = vpop.f32.mrf.mxu0  ;;  %11293 = vmatprep.subr.bf16.mxu1 %v13598_v32  ;;  %v13661_v32 = vld [vmem:[#allocation11 + $0x164] ss:$16 sps:$4 sm:$0xff]   ;;  %v13659_v33 = vld [vmem:[#allocation11 + $0x160] ss:$16 sps:$4 sm:$0xff]  }
 0x57b   :  { %v14605_v46 = vadd.f32 %v9409_v56, %v9369_v44  ;;  %v9411_v19 = vpop.f32.mrf.mxu1  ;;  %11253 = vmatpush1.bf16.msra.mxu0 %v13593_v35  ;;  %v13664_v34 = vld [vmem:[#allocation11 + $0x364] ss:$16 sps:$4 sm:$0xff]   ;;  %v13662_v35 = vld [vmem:[#allocation11 + $0x360] ss:$16 sps:$4 sm:$0xff]  }
 0x57c   :  { %11294 = vmatpush1.bf16.msra.mxu1 %v13596_v5  ;;  %v9371_v50 = vpop.f32.mrf.mxu0  ;;  %11254 = vmatprep.subr.bf16.mxu0 %v13601_v39  ;;  %v13667_v38 = vld [vmem:[#allocation11 + $0x144] ss:$16 sps:$4 sm:$0xff]   ;;  %v13665_v39 = vld [vmem:[#allocation11 + $0x140] ss:$16 sps:$4 sm:$0xff]  }
 0x57d   :  { %v9412_v2 = vpop.f32.mrf.mxu1  ;;  %11295 = vmatprep.subr.bf16.mxu1 %v13604_v42  ;;  %v13670_v5 = vld [vmem:[#allocation11 + $0x344] ss:$16 sps:$4 sm:$0xff]   ;;  %v13668_v44 = vld [vmem:[#allocation11 + $0x340] ss:$16 sps:$4 sm:$0xff]   ;;  %v9668_v50 = vmul.f32 0.2, %v14501_v60 }
 0x57e   :  { %v13673_v56 = vld [vmem:[#allocation11 + $0x124] ss:$16 sps:$4 sm:$0xff]   ;;  %v13671_v43 = vld [vmem:[#allocation11 + $0x120] ss:$16 sps:$4 sm:$0xff]   ;;  %v9673_v2 = vmul.f32 0.2, %v14585_v45 }
 0x57f   :  { %11255 = vmatpush1.bf16.msra.mxu0 %v13599_v48  ;;  %v13676_v42 = vld [vmem:[#allocation11 + $0x324] ss:$16 sps:$4 sm:$0xff]   ;;  %v13674_v19 = vld [vmem:[#allocation11 + $0x320] ss:$16 sps:$4 sm:$0xff]  }
 0x580   :  { %11296 = vmatpush1.bf16.msra.mxu1 %v13602_v10  ;;  %11256 = vmatprep.subr.bf16.mxu0 %v13607_v57  ;;  %v13679_v48 = vld [vmem:[#allocation11 + $0x104] ss:$16 sps:$4 sm:$0xff]   ;;  %v9670_v57 = vmul.f32 0.2, %v14541_v11 }
 0x581   :  { %11297 = vmatprep.subr.bf16.mxu1 %v13610_v52  ;;  %v13682_v10 = vld [vmem:[#allocation11 + $0x304] ss:$16 sps:$4 sm:$0xff]   ;;  %v13677_v52 = vld [vmem:[#allocation11 + $0x100] ss:$16 sps:$4 sm:$0xff]  }
 0x583   :  { %11257 = vmatpush1.bf16.msra.mxu0 %v13605_v53  ;;  %v13680_v53 = vld [vmem:[#allocation11 + $0x300] ss:$16 sps:$4 sm:$0xff]  }
 0x584   :  { %11298 = vmatpush1.bf16.msra.mxu1 %v13608_v14  ;;  %11258 = vmatprep.subr.bf16.mxu0 %v13613_v55  ;;  %v13685_v14 = vld [vmem:[#allocation11 + $0x4e4] ss:$16 sps:$4 sm:$0xff]   ;;  %v9676_v55 = vsel %vm9660_vm2, %v14501_v60, %v9668_v50 }
 0x585   :  { %11299 = vmatprep.subr.bf16.mxu1 %v13616_v30  ;;  %v13742_v30 = vld [vmem:[#allocation11 + $0x6e4] ss:$16 sps:$4 sm:$0xff]  }
 0x586   :  { %v13790_v50 = vld [vmem:[#allocation11 + $0x7e4] ss:$16 sps:$4 sm:$0xff]  }
 0x587   :  { %11259 = vmatpush1.bf16.msra.mxu0 %v13611_v37  ;;  %v9678_v37 = vsel %vm9662_vm3, %v14541_v11, %v9670_v57  ;;  %v13712_v57 = vld [vmem:[#allocation11 + $0x5c4] ss:$16 sps:$4 sm:$0xff]  }
 0x588   :  { %11300 = vmatpush1.bf16.msra.mxu1 %v13614_v41  ;;  %11260 = vmatprep.subr.bf16.mxu0 %v13619_v61  ;;  %v13683_v41 = vld [vmem:[#allocation11 + $0x4e0] ss:$16 sps:$4 sm:$0xff]   ;;  %v9681_v61 = vsel %vm9665_vm4, %v14585_v45, %v9673_v2 }
 0x589   :  { %11301 = vmatprep.subr.bf16.mxu1 %v13622_v59  ;;  %v14616_v59 = vpack.c.bf16 %v9676_v55, %v9676_v55  ;;  %v14621_v60 = vpack.c.bf16 %v9681_v61, %v9681_v61  ;;  %v13686_v45 = vld [vmem:[#allocation11 + $0x4c0] ss:$16 sps:$4 sm:$0xff]  }
 0x58a   :  { %v13788_v2 = vld [vmem:[#allocation11 + $0x7e0] ss:$16 sps:$4 sm:$0xff]  }
 0x58b   :  { %11261 = vmatpush1.bf16.msra.mxu0 %v13617_v51  ;;  %v13688_v51 = vld [vmem:[#allocation11 + $0x4c4] ss:$16 sps:$4 sm:$0xff]   ;;  %v13794_v55 = vld [vmem:[#allocation11 + $0x7c0] ss:$16 sps:$4 sm:$0xff]  }
 0x58c   :  { %11302 = vmatpush1.bf16.msra.mxu1 %v13620_v36  ;;  %11262 = vmatprep.subr.bf16.mxu0 %v13625_v27  ;;  %v14618_v36 = vpack.c.bf16 %v9678_v37, %v9678_v37  ;;  %v13740_v27 = vld [vmem:[#allocation11 + $0x6e0] ss:$16 sps:$4 sm:$0xff]  }
 0x58d   :  { %11303 = vmatprep.subr.bf16.mxu1 %v13628_v28  ;;  %v13713_v37 = vld [vmem:[#allocation11 + $0x5a0] ss:$16 sps:$4 sm:$0xff]  }
 0x58e   :  { %v13800_v61 = vld [vmem:[#allocation11 + $0x7a0] ss:$16 sps:$4 sm:$0xff]  }
 0x58f   :  { %11263 = vmatpush1.bf16.msra.mxu0 %v13623_v62  ;;  %v13748_v62 = vld [vmem:[#allocation11 + $0x6c4] ss:$16 sps:$4 sm:$0xff]  }
 0x590   :  { %11304 = vmatpush1.bf16.msra.mxu1 %v13626_v12  ;;  %11264 = vmatprep.subr.bf16.mxu0 %v13631_v21 }
 0x591   :  { %11305 = vmatprep.subr.bf16.mxu1 %v13634_v29  ;;  %v13691_v29 = vld [vmem:[#allocation11 + $0x4a4] ss:$16 sps:$4 sm:$0xff]  }
 0x593   :  { %11265 = vmatpush1.bf16.msra.mxu0 %v13629_v0 }
 0x594   :  { %11306 = vmatpush1.bf16.msra.mxu1 %v13632_v58  ;;  %11266 = vmatprep.subr.bf16.mxu0 %v13637_v18 }
 0x595   :  { %11307 = vmatprep.subr.bf16.mxu1 %v13640_v49  ;;  %v13746_v49 = vld [vmem:[#allocation11 + $0x6c0] ss:$16 sps:$4 sm:$0xff]  }
 0x597   :  { %11267 = vmatpush2.bf16.msra.mxu0 %v13635_v3 }
 0x598   :  { %11308 = vmatpush2.bf16.msra.mxu1 %v13638_v63  ;;  %11268 = vmatprep.subr.bf16.mxu0 %v13643_v4 }
 0x599   :  { %11309 = vmatprep.subr.bf16.mxu1 %v13646_v7  ;;  %v13689_v7 = vld [vmem:[#allocation11 + $0x4a0] ss:$16 sps:$4 sm:$0xff]  }
 0x59b   :  { %11269 = vmatpush2.bf16.msra.mxu0 %v13641_v9 }
 0x59c   :  { %11310 = vmatpush2.bf16.msra.mxu1 %v13644_v54  ;;  %11270 = vmatprep.subr.bf16.mxu0 %v13649_v13  ;;  %v13694_v54 = vld [vmem:[#allocation11 + $0x484] ss:$16 sps:$4 sm:$0xff]  }
 0x59d   :  { %11311 = vmatprep.subr.bf16.mxu1 %v13652_v15  ;;  %v13752_v15 = vld [vmem:[#allocation11 + $0x6a0] ss:$16 sps:$4 sm:$0xff]  }
 0x59f   :  { %11271 = vmatpush2.bf16.msra.mxu0 %v13647_v24  ;;  %v13760_v24 = vld [vmem:[#allocation11 + $0x684] ss:$16 sps:$4 sm:$0xff]  }
 0x5a0   :  { %11312 = vmatpush2.bf16.msra.mxu1 %v13650_v16  ;;  %11272 = vmatprep.subr.bf16.mxu0 %v13655_v1  ;;  %v13697_v16 = vld [vmem:[#allocation11 + $0x464] ss:$16 sps:$4 sm:$0xff]   ;;  %v13758_v1 = vld [vmem:[#allocation11 + $0x680] ss:$16 sps:$4 sm:$0xff]  }
 0x5a1   :  { %11313 = vmatprep.subr.bf16.mxu1 %v13658_v22  ;;  %v13766_v22 = vld [vmem:[#allocation11 + $0x664] ss:$16 sps:$4 sm:$0xff]  }
 0x5a3   :  { %11273 = vmatpush2.bf16.msra.mxu0 %v13653_v47  ;;  %v13695_v47 = vld [vmem:[#allocation11 + $0x460] ss:$16 sps:$4 sm:$0xff]  }
 0x5a4   :  { %11314 = vmatpush2.bf16.msra.mxu1 %v13656_v31  ;;  %11274 = vmatprep.subr.bf16.mxu0 %v13661_v32  ;;  %v13700_v31 = vld [vmem:[#allocation11 + $0x444] ss:$16 sps:$4 sm:$0xff]   ;;  %v13764_v32 = vld [vmem:[#allocation11 + $0x660] ss:$16 sps:$4 sm:$0xff]  }
 0x5a5   :  { %11315 = vmatprep.subr.bf16.mxu1 %v13664_v34  ;;  %v13772_v34 = vld [vmem:[#allocation11 + $0x644] ss:$16 sps:$4 sm:$0xff]  }
 0x5a7   :  { %11275 = vmatpush2.bf16.msra.mxu0 %v13659_v33  ;;  %v13698_v33 = vld [vmem:[#allocation11 + $0x440] ss:$16 sps:$4 sm:$0xff]  }
 0x5a8   :  { %11316 = vmatpush2.bf16.msra.mxu1 %v13662_v35  ;;  %11276 = vmatprep.subr.bf16.mxu0 %v13667_v38  ;;  %v13703_v35 = vld [vmem:[#allocation11 + $0x424] ss:$16 sps:$4 sm:$0xff]   ;;  %v13770_v38 = vld [vmem:[#allocation11 + $0x640] ss:$16 sps:$4 sm:$0xff]  }
 0x5a9   :  { %11317 = vmatprep.subr.bf16.mxu1 %v13670_v5  ;;  %v13778_v5 = vld [vmem:[#allocation11 + $0x624] ss:$16 sps:$4 sm:$0xff]  }
 0x5ab   :  { %11277 = vmatpush2.bf16.msra.mxu0 %v13665_v39  ;;  %v13701_v39 = vld [vmem:[#allocation11 + $0x420] ss:$16 sps:$4 sm:$0xff]  }
 0x5ac   :  { %11318 = vmatpush2.bf16.msra.mxu1 %v13668_v44  ;;  %11278 = vmatprep.subr.bf16.mxu0 %v13673_v56  ;;  %v13706_v44 = vld [vmem:[#allocation11 + $0x404] ss:$16 sps:$4 sm:$0xff]   ;;  %v13776_v56 = vld [vmem:[#allocation11 + $0x620] ss:$16 sps:$4 sm:$0xff]  }
 0x5ad   :  { %11319 = vmatprep.subr.bf16.mxu1 %v13676_v42  ;;  %v13784_v42 = vld [vmem:[#allocation11 + $0x604] ss:$16 sps:$4 sm:$0xff]  }
 0x5af   :  { %11279 = vmatpush2.bf16.msra.mxu0 %v13671_v43  ;;  %v13704_v43 = vld [vmem:[#allocation11 + $0x400] ss:$16 sps:$4 sm:$0xff]  }
 0x5b0   :  { %11320 = vmatpush2.bf16.msra.mxu1 %v13674_v19  ;;  %11280 = vmatprep.subr.bf16.mxu0 %v13679_v48  ;;  %v13709_v19 = vld [vmem:[#allocation11 + $0x5e4] ss:$16 sps:$4 sm:$0xff]   ;;  %v13782_v48 = vld [vmem:[#allocation11 + $0x600] ss:$16 sps:$4 sm:$0xff]  }
 0x5b1   :  { %11321 = vmatprep.subr.bf16.mxu1 %v13682_v10  ;;  %v13707_v10 = vld [vmem:[#allocation11 + $0x5e0] ss:$16 sps:$4 sm:$0xff]  }
 0x5b3   :  { %11281 = vmatpush2.bf16.msra.mxu0 %v13677_v52  ;;  %v13796_v52 = vld [vmem:[#allocation11 + $0x7c4] ss:$16 sps:$4 sm:$0xff]  }
 0x5b4   :  { %11322 = vmatpush2.bf16.msra.mxu1 %v13680_v53  ;;  %11332 = vmatprep.subr.bf16.mxu0 %v13685_v14  ;;  %v13710_v53 = vld [vmem:[#allocation11 + $0x5c0] ss:$16 sps:$4 sm:$0xff]   ;;  %v13715_v14 = vld [vmem:[#allocation11 + $0x5a4] ss:$16 sps:$4 sm:$0xff]  }
 0x5b5   :  { %11373 = vmatprep.subr.bf16.mxu1 %v13742_v30  ;;  %v13802_v30 = vld [vmem:[#allocation11 + $0x7a4] ss:$16 sps:$4 sm:$0xff]  }
 0x5b6   :  { %v9448_v28 = vpop.f32.mrf.mxu0  ;;  %11283 = vmatmul.mubr.bf16.vlgmr.msra.gmra.mxu0 %v14616_v59 }
 0x5b7   :  { %v9449_v11 = vadd.f32 %v9448_v28, %v14602_v40  ;;  %v9489_v12 = vpop.f32.mrf.mxu1  ;;  %11324 = vmatmul.mubr.bf16.vlgmr.msra.gmra.mxu1 %v14618_v36  ;;  %11333 = vmatpush1.bf16.msra.mxu0 %v13683_v41  ;;  %v13754_v40 = vld [vmem:[#allocation11 + $0x6a4] ss:$16 sps:$4 sm:$0xff]  }
 0x5b8   :  { %11364 = vmatprep.mubr.bf16.mxu0 %v14621_v60  ;;  %v9450_v21 = vpop.f32.mrf.mxu0  ;;  %11334 = vmatprep.subr.bf16.mxu0 %v13688_v51  ;;  %v13718_v41 = vld [vmem:[#allocation11 + $0x584] ss:$16 sps:$4 sm:$0xff]  }
 0x5b9   :  { %v14626_v0 = vadd.f32 %v9489_v12, %v9449_v11  ;;  %v9451_v58 = vadd.f32 %v9450_v21, %v14605_v46  ;;  %v9491_v18 = vpop.f32.mrf.mxu1  ;;  %11374 = vmatpush1.bf16.msra.mxu1 %v13740_v27  ;;  %v13692_v46 = vld [vmem:[#allocation11 + $0x480] ss:$16 sps:$4 sm:$0xff]   ;;  %v13808_v51 = vld [vmem:[#allocation11 + $0x784] ss:$16 sps:$4 sm:$0xff]  }
 0x5ba   :  { %v9452_v3 = vpop.f32.mrf.mxu0  ;;  %11375 = vmatprep.subr.bf16.mxu1 %v13748_v62  ;;  %v13716_v27 = vld [vmem:[#allocation11 + $0x580] ss:$16 sps:$4 sm:$0xff]   ;;  %v13721_v28 = vld [vmem:[#allocation11 + $0x564] ss:$16 sps:$4 sm:$0xff]  }
 0x5bb   :  { %v14629_v63 = vadd.f32 %v9491_v18, %v9451_v58  ;;  %v9493_v4 = vpop.f32.mrf.mxu1  ;;  %11335 = vmatpush1.bf16.msra.mxu0 %v13686_v45  ;;  %v13806_v62 = vld [vmem:[#allocation11 + $0x780] ss:$16 sps:$4 sm:$0xff]   ;;  %v13814_v11 = vld [vmem:[#allocation11 + $0x764] ss:$16 sps:$4 sm:$0xff]  }
 0x5bc   :  { %v9453_v9 = vpop.f32.mrf.mxu0  ;;  %11336 = vmatprep.subr.bf16.mxu0 %v13691_v29  ;;  %v13719_v12 = vld [vmem:[#allocation11 + $0x560] ss:$16 sps:$4 sm:$0xff]   ;;  %v13724_v45 = vld [vmem:[#allocation11 + $0x544] ss:$16 sps:$4 sm:$0xff]  }
 0x5bd   :  { %v9494_v13 = vpop.f32.mrf.mxu1  ;;  %11376 = vmatpush1.bf16.msra.mxu1 %v13746_v49  ;;  %v13812_v21 = vld [vmem:[#allocation11 + $0x760] ss:$16 sps:$4 sm:$0xff]   ;;  %v13820_v29 = vld [vmem:[#allocation11 + $0x744] ss:$16 sps:$4 sm:$0xff]  }
 0x5be   :  { %11377 = vmatprep.subr.bf16.mxu1 %v13754_v40  ;;  %v13722_v58 = vld [vmem:[#allocation11 + $0x540] ss:$16 sps:$4 sm:$0xff]   ;;  %v13727_v18 = vld [vmem:[#allocation11 + $0x524] ss:$16 sps:$4 sm:$0xff]  }
 0x5bf   :  { %11337 = vmatpush1.bf16.msra.mxu0 %v13689_v7  ;;  %v13818_v49 = vld [vmem:[#allocation11 + $0x740] ss:$16 sps:$4 sm:$0xff]   ;;  %v13826_v3 = vld [vmem:[#allocation11 + $0x724] ss:$16 sps:$4 sm:$0xff]   ;;  %v9672_v7 = vmul.f32 0.2, %v14581_v17 }
 0x5c0   :  { %11338 = vmatprep.subr.bf16.mxu0 %v13694_v54  ;;  %v13725_v40 = vld [vmem:[#allocation11 + $0x520] ss:$16 sps:$4 sm:$0xff]   ;;  %v13730_v4 = vld [vmem:[#allocation11 + $0x504] ss:$16 sps:$4 sm:$0xff]  }
 0x5c1   :  { %11378 = vmatpush1.bf16.msra.mxu1 %v13752_v15  ;;  %v13824_v9 = vld [vmem:[#allocation11 + $0x720] ss:$16 sps:$4 sm:$0xff]   ;;  %v13832_v54 = vld [vmem:[#allocation11 + $0x704] ss:$16 sps:$4 sm:$0xff]   ;;  %v13733_v15 = vld [vmem:[#allocation11 + $0xec] ss:$16 sps:$4 sm:$0xff]  }
 0x5c2   :  { %11379 = vmatprep.subr.bf16.mxu1 %v13760_v24  ;;  %v13728_v13 = vld [vmem:[#allocation11 + $0x500] ss:$16 sps:$4 sm:$0xff]   ;;  %v9680_v24 = vsel %vm9664_vm5, %v14581_v17, %v9672_v7  ;;  %v13734_v17 = vld [vmem:[#allocation11 + $0xc8] ss:$16 sps:$4 sm:$0xff]  }
 0x5c3   :  { %11339 = vmatpush1.bf16.msra.mxu0 %v13692_v46  ;;  %v13830_v46 = vld [vmem:[#allocation11 + $0x700] ss:$16 sps:$4 sm:$0xff]  }
 0x5c4   :  { %11340 = vmatprep.subr.bf16.mxu0 %v13697_v16  ;;  %v13838_v16 = vld [vmem:[#allocation11 + $0x2ec] ss:$16 sps:$4 sm:$0xff]  }
 0x5c5   :  { %11380 = vmatpush1.bf16.msra.mxu1 %v13758_v1  ;;  %v13731_v1 = vld [vmem:[#allocation11 + $0xe8] ss:$16 sps:$4 sm:$0xff]  }
 0x5c6   :  { %11381 = vmatprep.subr.bf16.mxu1 %v13766_v22  ;;  %v14634_v22 = vpack.c.bf16 %v9680_v24, %v9680_v24  ;;  %v13835_v24 = vld [vmem:[#allocation11 + $0x4ac] ss:$16 sps:$4 sm:$0xff]  }
 0x5c7   :  { %11341 = vmatpush1.bf16.msra.mxu0 %v13695_v47  ;;  %v13736_v47 = vld [vmem:[#allocation11 + $0xcc] ss:$16 sps:$4 sm:$0xff]  }
 0x5c8   :  { %11342 = vmatprep.subr.bf16.mxu0 %v13700_v31 }
 0x5c9   :  { %11382 = vmatpush1.bf16.msra.mxu1 %v13764_v32 }
 0x5ca   :  { %11383 = vmatprep.subr.bf16.mxu1 %v13772_v34 }
 0x5cb   :  { %11343 = vmatpush1.bf16.msra.mxu0 %v13698_v33 }
 0x5cc   :  { %11344 = vmatprep.subr.bf16.mxu0 %v13703_v35  ;;  %v13739_v35 = vld [vmem:[#allocation11 + $0xac] ss:$16 sps:$4 sm:$0xff]  }
 0x5cd   :  { %11384 = vmatpush1.bf16.msra.mxu1 %v13770_v38 }
 0x5ce   :  { %11385 = vmatprep.subr.bf16.mxu1 %v13778_v5 }
 0x5cf   :  { %11345 = vmatpush1.bf16.msra.mxu0 %v13701_v39 }
 0x5d0   :  { %11346 = vmatprep.subr.bf16.mxu0 %v13706_v44 }
 0x5d1   :  { %11386 = vmatpush1.bf16.msra.mxu1 %v13776_v56  ;;  %v13737_v56 = vld [vmem:[#allocation11 + $0xa8] ss:$16 sps:$4 sm:$0xff]  }
 0x5d2   :  { %11387 = vmatprep.subr.bf16.mxu1 %v13784_v42 }
 0x5d3   :  { %11347 = vmatpush1.bf16.msra.mxu0 %v13704_v43 }
 0x5d4   :  { %11348 = vmatprep.subr.bf16.mxu0 %v13709_v19  ;;  %v13743_v19 = vld [vmem:[#allocation11 + $0x88] ss:$16 sps:$4 sm:$0xff]  }
 0x5d5   :  { %11388 = vmatpush1.bf16.msra.mxu1 %v13782_v48  ;;  %v13749_v48 = vld [vmem:[#allocation11 + $0x68] ss:$16 sps:$4 sm:$0xff]  }
 0x5d6   :  { %11389 = vmatprep.subr.bf16.mxu1 %v13790_v50  ;;  %v13757_v50 = vld [vmem:[#allocation11 + $0x4c] ss:$16 sps:$4 sm:$0xff]  }
 0x5d7   :  { %11349 = vmatpush2.bf16.msra.mxu0 %v13707_v10  ;;  %v13755_v10 = vld [vmem:[#allocation11 + $0x48] ss:$16 sps:$4 sm:$0xff]  }
 0x5d8   :  { %11350 = vmatprep.subr.bf16.mxu0 %v13712_v57  ;;  %v13763_v57 = vld [vmem:[#allocation11 + $0x2c] ss:$16 sps:$4 sm:$0xff]  }
 0x5d9   :  { %11390 = vmatpush2.bf16.msra.mxu1 %v13788_v2  ;;  %v13761_v2 = vld [vmem:[#allocation11 + $0x28] ss:$16 sps:$4 sm:$0xff]  }
 0x5da   :  { %11391 = vmatprep.subr.bf16.mxu1 %v13796_v52  ;;  %v13769_v52 = vld [vmem:[#allocation11 + $0xc] ss:$16 sps:$4 sm:$0xff]  }
 0x5db   :  { %11351 = vmatpush2.bf16.msra.mxu0 %v13710_v53  ;;  %v13767_v53 = vld [vmem:[#allocation11 + $0x8] ss:$16 sps:$4 sm:$0xff]  }
 0x5dc   :  { %11352 = vmatprep.subr.bf16.mxu0 %v13715_v14  ;;  %v13775_v14 = vld [vmem:[#allocation11 + $0x1ec] ss:$16 sps:$4 sm:$0xff]  }
 0x5dd   :  { %11392 = vmatpush2.bf16.msra.mxu1 %v13794_v55  ;;  %v13773_v55 = vld [vmem:[#allocation11 + $0x1e8] ss:$16 sps:$4 sm:$0xff]  }
 0x5de   :  { %11393 = vmatprep.subr.bf16.mxu1 %v13802_v30  ;;  %v13781_v30 = vld [vmem:[#allocation11 + $0x1cc] ss:$16 sps:$4 sm:$0xff]  }
 0x5df   :  { %11353 = vmatpush2.bf16.msra.mxu0 %v13713_v37  ;;  %v13779_v37 = vld [vmem:[#allocation11 + $0x1c8] ss:$16 sps:$4 sm:$0xff]  }
 0x5e0   :  { %11354 = vmatprep.subr.bf16.mxu0 %v13718_v41  ;;  %v13787_v41 = vld [vmem:[#allocation11 + $0x1ac] ss:$16 sps:$4 sm:$0xff]  }
 0x5e1   :  { %11394 = vmatpush2.bf16.msra.mxu1 %v13800_v61  ;;  %v13785_v61 = vld [vmem:[#allocation11 + $0x1a8] ss:$16 sps:$4 sm:$0xff]  }
 0x5e2   :  { %11395 = vmatprep.subr.bf16.mxu1 %v13808_v51  ;;  %v13793_v51 = vld [vmem:[#allocation11 + $0x18c] ss:$16 sps:$4 sm:$0xff]  }
 0x5e3   :  { %11355 = vmatpush2.bf16.msra.mxu0 %v13716_v27  ;;  %v13791_v27 = vld [vmem:[#allocation11 + $0x188] ss:$16 sps:$4 sm:$0xff]  }
 0x5e4   :  { %11356 = vmatprep.subr.bf16.mxu0 %v13721_v28  ;;  %v13799_v28 = vld [vmem:[#allocation11 + $0x16c] ss:$16 sps:$4 sm:$0xff]  }
 0x5e5   :  { %11396 = vmatpush2.bf16.msra.mxu1 %v13806_v62  ;;  %v13797_v62 = vld [vmem:[#allocation11 + $0x168] ss:$16 sps:$4 sm:$0xff]  }
 0x5e6   :  { %11397 = vmatprep.subr.bf16.mxu1 %v13814_v11  ;;  %v13805_v11 = vld [vmem:[#allocation11 + $0x14c] ss:$16 sps:$4 sm:$0xff]  }
 0x5e7   :  { %11357 = vmatpush2.bf16.msra.mxu0 %v13719_v12  ;;  %v13803_v12 = vld [vmem:[#allocation11 + $0x148] ss:$16 sps:$4 sm:$0xff]  }
 0x5e8   :  { %11358 = vmatprep.subr.bf16.mxu0 %v13724_v45  ;;  %v13811_v45 = vld [vmem:[#allocation11 + $0x12c] ss:$16 sps:$4 sm:$0xff]  }
 0x5e9   :  { %11398 = vmatpush2.bf16.msra.mxu1 %v13812_v21  ;;  %v13809_v21 = vld [vmem:[#allocation11 + $0x128] ss:$16 sps:$4 sm:$0xff]  }
 0x5ea   :  { %11399 = vmatprep.subr.bf16.mxu1 %v13820_v29  ;;  %v13817_v29 = vld [vmem:[#allocation11 + $0x10c] ss:$16 sps:$4 sm:$0xff]  }
 0x5eb   :  { %11359 = vmatpush2.bf16.msra.mxu0 %v13722_v58  ;;  %v13815_v58 = vld [vmem:[#allocation11 + $0x108] ss:$16 sps:$4 sm:$0xff]  }
 0x5ec   :  { %11360 = vmatprep.subr.bf16.mxu0 %v13727_v18  ;;  %v13823_v18 = vld [vmem:[#allocation11 + $0x4ec] ss:$16 sps:$4 sm:$0xff]  }
 0x5ed   :  { %11400 = vmatpush2.bf16.msra.mxu1 %v13818_v49 }
 0x5ee   :  { %11401 = vmatprep.subr.bf16.mxu1 %v13826_v3  ;;  %v13821_v3 = vld [vmem:[#allocation11 + $0x4e8] ss:$16 sps:$4 sm:$0xff]  }
 0x5ef   :  { %11361 = vmatpush2.bf16.msra.mxu0 %v13725_v40  ;;  %v13829_v40 = vld [vmem:[#allocation11 + $0x4cc] ss:$16 sps:$4 sm:$0xff]  }
 0x5f0   :  { %11362 = vmatprep.subr.bf16.mxu0 %v13730_v4 }
 0x5f1   :  { %11402 = vmatpush2.bf16.msra.mxu1 %v13824_v9 }
 0x5f2   :  { %11403 = vmatprep.subr.bf16.mxu1 %v13832_v54 }
 0x5f3   :  { %11363 = vmatpush2.bf16.msra.mxu0 %v13728_v13  ;;  %v13827_v13 = vld [vmem:[#allocation11 + $0x4c8] ss:$16 sps:$4 sm:$0xff]  }
 0x5f4   :  { %11414 = vmatprep.subr.bf16.mxu0 %v13733_v15 }
 0x5f5   :  { %11404 = vmatpush2.bf16.msra.mxu1 %v13830_v46 }
 0x5f6   :  { %v9530_v31 = vpop.f32.mrf.mxu0  ;;  %11365 = vmatmul.mubr.bf16.vlgmr.msra.gmra.mxu0 %v14634_v22  ;;  %11455 = vmatprep.subr.bf16.mxu1 %v13838_v16 }
 0x5f7   :  { %v9531_v32 = vadd.f32 %v9530_v31, %v14626_v0  ;;  %v9571_v34 = vpop.f32.mrf.mxu1  ;;  %11415 = vmatpush1.bf16.msra.mxu0 %v13731_v1  ;;  %11446 = vmatprep.mubr.bf16.mxu0 %v14596_v6  ;;  %v13745_v0 = vld [vmem:[#allocation11 + $0x8c] ss:$16 sps:$4 sm:$0xff]  }
 0x5f8   :  { %v14639_v33 = vpop.f32.mrf.mxu0  ;;  %11416 = vmatprep.subr.bf16.mxu0 %v13736_v47  ;;  %v13751_v6 = vld [vmem:[#allocation11 + $0x6c] ss:$16 sps:$4 sm:$0xff]  }
 0x5f9   :  { %v14641_v38 = vadd.f32 %v9571_v34, %v9531_v32  ;;  %v14643_v5 = vpop.f32.mrf.mxu1  ;;  %v9533_v49 = vadd.f32 %v14639_v33, %v14629_v63  ;;  %v13833_v32 = vld [vmem:[#allocation11 + $0x4a8] ss:$16 sps:$4 sm:$0xff]  }
 0x5fa   :  { %v9534_v39 = vpop.f32.mrf.mxu0 }
 0x5fb   :  { %v9575_v44 = vpop.f32.mrf.mxu1  ;;  %11417 = vmatpush1.bf16.msra.mxu0 %v13734_v17  ;;  %v9574_v7 = vadd.f32 %v14643_v5, %v9533_v49  ;;  %v13841_v17 = vld [vmem:[#allocation11 + $0x48c] ss:$16 sps:$4 sm:$0xff]   ;;  %v13839_v5 = vld [vmem:[#allocation11 + $0x488] ss:$16 sps:$4 sm:$0xff]  }
 0x5fc   :  { %v9535_v42 = vpop.f32.mrf.mxu0  ;;  %11418 = vmatprep.subr.bf16.mxu0 %v13739_v35  ;;  %v13836_v44 = vld [vmem:[#allocation11 + $0x2e8] ss:$16 sps:$4 sm:$0xff]  }
 0x5fd   :  { %v9576_v43 = vpop.f32.mrf.mxu1  ;;  %v13844_v42 = vld [vmem:[#allocation11 + $0x2cc] ss:$16 sps:$4 sm:$0xff]   ;;  %v13887_v49 = vld [vmem:[#allocation11 + $0x588] ss:$16 sps:$4 sm:$0xff]  }
 0x5fe   :  { %v13845_v43 = vld [vmem:[#allocation11 + $0x468] ss:$16 sps:$4 sm:$0xff]  }
 0x5ff   :  { %11419 = vmatpush1.bf16.msra.mxu0 %v13737_v56 }
 0x600   :  { %11420 = vmatprep.subr.bf16.mxu0 %v13745_v0  ;;  %v13847_v0 = vld [vmem:[#allocation11 + $0x46c] ss:$16 sps:$4 sm:$0xff]  }
 0x603   :  { %11421 = vmatpush1.bf16.msra.mxu0 %v13743_v19  ;;  %v13842_v19 = vld [vmem:[#allocation11 + $0x2c8] ss:$16 sps:$4 sm:$0xff]  }
 0x604   :  { %11422 = vmatprep.subr.bf16.mxu0 %v13751_v6  ;;  %v13853_v6 = vld [vmem:[#allocation11 + $0x44c] ss:$16 sps:$4 sm:$0xff]  }
 0x607   :  { %11423 = vmatpush1.bf16.msra.mxu0 %v13749_v48  ;;  %v13850_v48 = vld [vmem:[#allocation11 + $0x2ac] ss:$16 sps:$4 sm:$0xff]  }
 0x608   :  { %11424 = vmatprep.subr.bf16.mxu0 %v13757_v50  ;;  %v13851_v50 = vld [vmem:[#allocation11 + $0x448] ss:$16 sps:$4 sm:$0xff]  }
 0x60b   :  { %11425 = vmatpush1.bf16.msra.mxu0 %v13755_v10  ;;  %v13848_v10 = vld [vmem:[#allocation11 + $0x2a8] ss:$16 sps:$4 sm:$0xff]  }
 0x60c   :  { %11426 = vmatprep.subr.bf16.mxu0 %v13763_v57  ;;  %v13859_v57 = vld [vmem:[#allocation11 + $0x42c] ss:$16 sps:$4 sm:$0xff]  }
 0x60f   :  { %11427 = vmatpush1.bf16.msra.mxu0 %v13761_v2  ;;  %v13856_v2 = vld [vmem:[#allocation11 + $0x28c] ss:$16 sps:$4 sm:$0xff]  }
 0x610   :  { %11428 = vmatprep.subr.bf16.mxu0 %v13769_v52  ;;  %v13857_v52 = vld [vmem:[#allocation11 + $0x428] ss:$16 sps:$4 sm:$0xff]  }
 0x613   :  { %11429 = vmatpush1.bf16.msra.mxu0 %v13767_v53  ;;  %v13854_v53 = vld [vmem:[#allocation11 + $0x288] ss:$16 sps:$4 sm:$0xff]  }
 0x614   :  { %11430 = vmatprep.subr.bf16.mxu0 %v13775_v14  ;;  %v13865_v14 = vld [vmem:[#allocation11 + $0x40c] ss:$16 sps:$4 sm:$0xff]  }
 0x617   :  { %11431 = vmatpush2.bf16.msra.mxu0 %v13773_v55  ;;  %v13863_v55 = vld [vmem:[#allocation11 + $0x408] ss:$16 sps:$4 sm:$0xff]  }
 0x618   :  { %11432 = vmatprep.subr.bf16.mxu0 %v13781_v30  ;;  %v13860_v30 = vld [vmem:[#allocation11 + $0x268] ss:$16 sps:$4 sm:$0xff]  }
 0x61b   :  { %11433 = vmatpush2.bf16.msra.mxu0 %v13779_v37  ;;  %v13871_v37 = vld [vmem:[#allocation11 + $0x5ec] ss:$16 sps:$4 sm:$0xff]  }
 0x61c   :  { %11434 = vmatprep.subr.bf16.mxu0 %v13787_v41  ;;  %v13868_v41 = vld [vmem:[#allocation11 + $0x24c] ss:$16 sps:$4 sm:$0xff]  }
 0x61f   :  { %11435 = vmatpush2.bf16.msra.mxu0 %v13785_v61  ;;  %v13869_v61 = vld [vmem:[#allocation11 + $0x5e8] ss:$16 sps:$4 sm:$0xff]  }
 0x620   :  { %11436 = vmatprep.subr.bf16.mxu0 %v13793_v51  ;;  %v13866_v51 = vld [vmem:[#allocation11 + $0x248] ss:$16 sps:$4 sm:$0xff]  }
 0x623   :  { %11437 = vmatpush2.bf16.msra.mxu0 %v13791_v27  ;;  %v13877_v27 = vld [vmem:[#allocation11 + $0x5cc] ss:$16 sps:$4 sm:$0xff]  }
 0x624   :  { %11438 = vmatprep.subr.bf16.mxu0 %v13799_v28  ;;  %v13874_v28 = vld [vmem:[#allocation11 + $0x22c] ss:$16 sps:$4 sm:$0xff]  }
 0x627   :  { %11439 = vmatpush2.bf16.msra.mxu0 %v13797_v62  ;;  %v13875_v62 = vld [vmem:[#allocation11 + $0x5c8] ss:$16 sps:$4 sm:$0xff]  }
 0x628   :  { %11440 = vmatprep.subr.bf16.mxu0 %v13805_v11  ;;  %v13872_v11 = vld [vmem:[#allocation11 + $0x228] ss:$16 sps:$4 sm:$0xff]  }
 0x62b   :  { %11441 = vmatpush2.bf16.msra.mxu0 %v13803_v12  ;;  %v13883_v12 = vld [vmem:[#allocation11 + $0x5ac] ss:$16 sps:$4 sm:$0xff]  }
 0x62c   :  { %11442 = vmatprep.subr.bf16.mxu0 %v13811_v45  ;;  %v13880_v45 = vld [vmem:[#allocation11 + $0x20c] ss:$16 sps:$4 sm:$0xff]  }
 0x62f   :  { %11443 = vmatpush2.bf16.msra.mxu0 %v13809_v21  ;;  %v13881_v21 = vld [vmem:[#allocation11 + $0x5a8] ss:$16 sps:$4 sm:$0xff]  }
 0x630   :  { %11444 = vmatprep.subr.bf16.mxu0 %v13817_v29  ;;  %v13878_v29 = vld [vmem:[#allocation11 + $0x208] ss:$16 sps:$4 sm:$0xff]  }
 0x633   :  { %11445 = vmatpush2.bf16.msra.mxu0 %v13815_v58  ;;  %v13889_v58 = vld [vmem:[#allocation11 + $0x58c] ss:$16 sps:$4 sm:$0xff]  }
 0x634   :  { %11496 = vmatprep.subr.bf16.mxu0 %v13823_v18  ;;  %v13886_v18 = vld [vmem:[#allocation11 + $0x3ec] ss:$16 sps:$4 sm:$0xff]  }
 0x636   :  { %v9612_v4 = vpop.f32.mrf.mxu0  ;;  %11447 = vmatmul.mubr.bf16.vlgmr.msra.gmra.mxu0 %v14616_v59 }
 0x637   :  { %v9613_v9 = vadd.f32 %v9612_v4, %v14641_v38  ;;  %v9653_v54 = vpop.f32.mrf.mxu1  ;;  %11497 = vmatpush1.bf16.msra.mxu0 %v13821_v3  ;;  %11528 = vmatprep.mubr.bf16.mxu0 %v14621_v60  ;;  %v13884_v3 = vld [vmem:[#allocation11 + $0x3e8] ss:$16 sps:$4 sm:$0xff]   ;;  %v13892_v4 = vld [vmem:[#allocation11 + $0x3cc] ss:$16 sps:$4 sm:$0xff]  }
 0x638   :  { %v9614_v15 = vpop.f32.mrf.mxu0  ;;  %11498 = vmatprep.subr.bf16.mxu0 %v13829_v40  ;;  %v13895_v40 = vld [vmem:[#allocation11 + $0x56c] ss:$16 sps:$4 sm:$0xff]  }
 0x639   :  { %v9654_v63 = vadd.f32 %v9653_v54, %v9613_v9  ;;  %v9615_v46 = vadd.f32 %v9614_v15, %v9574_v7  ;;  %v9655_v16 = vpop.f32.mrf.mxu1  ;;  %v13893_v7 = vld [vmem:[#allocation11 + $0x568] ss:$16 sps:$4 sm:$0xff]   ;;  %v13901_v54 = vld [vmem:[#allocation11 + $0x54c] ss:$16 sps:$4 sm:$0xff]  }
 0x63a   :  { %v9616_v1 = vpop.f32.mrf.mxu0  ;;  %v13890_v9 = vld [vmem:[#allocation11 + $0x3c8] ss:$16 sps:$4 sm:$0xff]  }
 0x63b   :  { %vm9666_vm6 = vcmp.gt.f32.partialorder %v9654_v63, 0.0  ;;  %v9674_v47 = vmul.f32 0.2, %v9654_v63  ;;  %v9656_v31 = vadd.f32 %v9655_v16, %v9615_v46  ;;  %v9657_v59 = vpop.f32.mrf.mxu1  ;;  %11499 = vmatpush1.bf16.msra.mxu0 %v13827_v13  ;;  %v13898_v13 = vld [vmem:[#allocation11 + $0x3ac] ss:$16 sps:$4 sm:$0xff]  }
 0x63c   :  { %v9617_v34 = vpop.f32.mrf.mxu0  ;;  %11500 = vmatprep.subr.bf16.mxu0 %v13835_v24  ;;  %v13899_v15 = vld [vmem:[#allocation11 + $0x548] ss:$16 sps:$4 sm:$0xff]   ;;  %v13904_v46 = vld [vmem:[#allocation11 + $0x38c] ss:$16 sps:$4 sm:$0xff]  }
 0x63d   :  { %vm9667_vm7 = vcmp.gt.f32.partialorder %v9656_v31, 0.0  ;;  %v9675_v33 = vmul.f32 0.2, %v9656_v31  ;;  %v9658_v60 = vpop.f32.mrf.mxu1  ;;  %v9682_v35 = vsel %vm9666_vm6, %v9654_v63, %v9674_v47  ;;  %v13896_v24 = vld [vmem:[#allocation11 + $0x3a8] ss:$16 sps:$4 sm:$0xff]  }
 0x63e   :  { %v14653_v56 = vpack.c.bf16 %v9682_v35, %v9682_v35  ;;  %v13907_v63 = vld [vmem:[#allocation11 + $0x52c] ss:$16 sps:$4 sm:$0xff]   ;;  %v13905_v16 = vld [vmem:[#allocation11 + $0x528] ss:$16 sps:$4 sm:$0xff]   ;;  %v14658_v34 = vld [vmem:[#allocation13] sm:$0xf] }
 0x63f   :  { %11501 = vmatpush1.bf16.msra.mxu0 %v13833_v32  ;;  %v9683_v38 = vsel %vm9667_vm7, %v9656_v31, %v9675_v33  ;;  %v13902_v1 = vld [vmem:[#allocation11 + $0x388] ss:$16 sps:$4 sm:$0xff]   ;;  %v13913_v47 = vld [vmem:[#allocation11 + $0x50c] ss:$16 sps:$4 sm:$0xff]   ;;  %v9953_v60 = vrot.slane %v14658_v34, %v14360_v20 }
 0x640   :  { %v14651_v39 = vpack.c.bf16 %v9683_v38, %v9683_v38  ;;  %11502 = vmatprep.subr.bf16.mxu0 %v13841_v17  ;;  %v13910_v31 = vld [vmem:[#allocation11 + $0x36c] ss:$16 sps:$4 sm:$0xff]   ;;  %v13911_v59 = vld [vmem:[#allocation11 + $0x508] ss:$16 sps:$4 sm:$0xff]  }
 0x641   :  { %v13908_v32 = vld [vmem:[#allocation11 + $0x368] ss:$16 sps:$4 sm:$0xff]   ;;  %v13971_v17 = vld [vmem:[#allocation14 + $0x78] sm:$0xff]  }
 0x642   :  { %11405 = vmatprep.mubr.bf16.mxu1 %v14651_v39  ;;  %v13916_v33 = vld [vmem:[#allocation11 + $0x34c] ss:$16 sps:$4 sm:$0xff]   ;;  %v13914_v38 = vld [vmem:[#allocation11 + $0x348] ss:$16 sps:$4 sm:$0xff]  }
 0x643   :  { %11406 = vmatmul.mubr.bf16.vlgmr.msra.gmra.mxu1 %v14653_v56  ;;  %11503 = vmatpush1.bf16.msra.mxu0 %v13839_v5  ;;  %v13972_v35 = vld [vmem:[#allocation14 + $0x38] sm:$0xff]   ;;  %v13973_v5 = vld [vmem:[#allocation14 + $0x70] sm:$0xff]  }
 0x644   :  { %11456 = vmatpush1.bf16.msra.mxu1 %v13836_v44  ;;  %11487 = vmatprep.mubr.bf16.mxu1 %v14599_v8  ;;  %v13862_v8 = vld [vmem:[#allocation11 + $0x26c] ss:$16 sps:$4 sm:$0xff]   ;;  %v9957_v44 = vrot.slane %v14658_v34, %v14336_v23  ;;  %v13917_v20 = vld [vmem:[#allocation11 + $0x328] ss:$16 sps:$4 sm:$0xff]  }
 0x645   :  { %11457 = vmatprep.subr.bf16.mxu1 %v13844_v42  ;;  %11504 = vmatprep.subr.bf16.mxu0 %v13847_v0  ;;  %v13919_v42 = vld [vmem:[#allocation11 + $0x32c] ss:$16 sps:$4 sm:$0xff]  }
 0x647   :  { %11505 = vmatpush1.bf16.msra.mxu0 %v13845_v43 }
 0x648   :  { %11458 = vmatpush1.bf16.msra.mxu1 %v13842_v19  ;;  %11506 = vmatprep.subr.bf16.mxu0 %v13853_v6  ;;  %v13974_v6 = vld [vmem:[#allocation14 + $0x30] sm:$0xff]  }
 0x649   :  { %11459 = vmatprep.subr.bf16.mxu1 %v13850_v48 }
 0x64b   :  { %11507 = vmatpush1.bf16.msra.mxu0 %v13851_v50  ;;  %v13975_v50 = vld [vmem:[#allocation14 + $0x68] sm:$0xff]  }
 0x64c   :  { %11460 = vmatpush1.bf16.msra.mxu1 %v13848_v10  ;;  %11508 = vmatprep.subr.bf16.mxu0 %v13859_v57 }
 0x64d   :  { %11461 = vmatprep.subr.bf16.mxu1 %v13856_v2 }
 0x64f   :  { %11509 = vmatpush1.bf16.msra.mxu0 %v13857_v52  ;;  %v13922_v52 = vld [vmem:[#allocation11 + $0x30c] ss:$16 sps:$4 sm:$0xff]  }
 0x650   :  { %11462 = vmatpush1.bf16.msra.mxu1 %v13854_v53  ;;  %11510 = vmatprep.subr.bf16.mxu0 %v13865_v14 }
 0x651   :  { %11463 = vmatprep.subr.bf16.mxu1 %v13862_v8 }
 0x653   :  { %11511 = vmatpush1.bf16.msra.mxu0 %v13863_v55  ;;  %v13920_v55 = vld [vmem:[#allocation11 + $0x308] ss:$16 sps:$4 sm:$0xff]  }
 0x654   :  { %11464 = vmatpush1.bf16.msra.mxu1 %v13860_v30  ;;  %11512 = vmatprep.subr.bf16.mxu0 %v13871_v37  ;;  %v13977_v30 = vld [vmem:[#allocation14 + $0x60] sm:$0xff]  }
 0x655   :  { %11465 = vmatprep.subr.bf16.mxu1 %v13868_v41  ;;  %v13925_v41 = vld [vmem:[#allocation11 + $0x6ec] ss:$16 sps:$4 sm:$0xff]  }
 0x657   :  { %11513 = vmatpush2.bf16.msra.mxu0 %v13869_v61  ;;  %v13978_v61 = vld [vmem:[#allocation14 + $0x20] sm:$0xff]  }
 0x658   :  { %11466 = vmatpush1.bf16.msra.mxu1 %v13866_v51  ;;  %11514 = vmatprep.subr.bf16.mxu0 %v13877_v27  ;;  %v13923_v51 = vld [vmem:[#allocation11 + $0x6e8] ss:$16 sps:$4 sm:$0xff]   ;;  %v13928_v27 = vld [vmem:[#allocation11 + $0x6cc] ss:$16 sps:$4 sm:$0xff]  }
 0x659   :  { %11467 = vmatprep.subr.bf16.mxu1 %v13874_v28  ;;  %v13979_v28 = vld [vmem:[#allocation14 + $0x58] sm:$0xff]  }
 0x65b   :  { %11515 = vmatpush2.bf16.msra.mxu0 %v13875_v62  ;;  %v13980_v62 = vld [vmem:[#allocation14 + $0x18] sm:$0xff]  }
 0x65c   :  { %11468 = vmatpush1.bf16.msra.mxu1 %v13872_v11  ;;  %11516 = vmatprep.subr.bf16.mxu0 %v13883_v12  ;;  %v13926_v11 = vld [vmem:[#allocation11 + $0x6c8] ss:$16 sps:$4 sm:$0xff]  }
 0x65d   :  { %11469 = vmatprep.subr.bf16.mxu1 %v13880_v45  ;;  %v13981_v12 = vld [vmem:[#allocation14 + $0x50] sm:$0xff]   ;;  %v13931_v45 = vld [vmem:[#allocation11 + $0x6ac] ss:$16 sps:$4 sm:$0xff]  }
 0x65f   :  { %11517 = vmatpush2.bf16.msra.mxu0 %v13881_v21  ;;  %v13982_v21 = vld [vmem:[#allocation14 + $0x10] sm:$0xff]  }
 0x660   :  { %11470 = vmatpush1.bf16.msra.mxu1 %v13878_v29  ;;  %11518 = vmatprep.subr.bf16.mxu0 %v13889_v58  ;;  %v13929_v29 = vld [vmem:[#allocation11 + $0x6a8] ss:$16 sps:$4 sm:$0xff]   ;;  %v13983_v58 = vld [vmem:[#allocation14 + $0x48] sm:$0xff]  }
 0x661   :  { %11471 = vmatprep.subr.bf16.mxu1 %v13886_v18  ;;  %v13934_v18 = vld [vmem:[#allocation11 + $0x68c] ss:$16 sps:$4 sm:$0xff]  }
 0x663   :  { %11519 = vmatpush2.bf16.msra.mxu0 %v13887_v49  ;;  %v13932_v49 = vld [vmem:[#allocation11 + $0x688] ss:$16 sps:$4 sm:$0xff]  }
 0x664   :  { %11472 = vmatpush2.bf16.msra.mxu1 %v13884_v3  ;;  %11520 = vmatprep.subr.bf16.mxu0 %v13895_v40  ;;  %v13985_v3 = vld [vmem:[#allocation14 + $0x40] sm:$0xff]  }
 0x665   :  { %11473 = vmatprep.subr.bf16.mxu1 %v13892_v4  ;;  %v13986_v40 = vld [vmem:[#allocation14] sm:$0xff]  }
 0x666   :  { %v13935_v4 = vld [vmem:[#allocation11 + $0x668] ss:$16 sps:$4 sm:$0xff]  }
 0x667   :  { %11521 = vmatpush2.bf16.msra.mxu0 %v13893_v7  ;;  %v13940_v7 = vld [vmem:[#allocation11 + $0x64c] ss:$16 sps:$4 sm:$0xff]  }
 0x668   :  { %11474 = vmatpush2.bf16.msra.mxu1 %v13890_v9  ;;  %11522 = vmatprep.subr.bf16.mxu0 %v13901_v54  ;;  %v13938_v9 = vld [vmem:[#allocation11 + $0x648] ss:$16 sps:$4 sm:$0xff]   ;;  %v13943_v54 = vld [vmem:[#allocation11 + $0x62c] ss:$16 sps:$4 sm:$0xff]  }
 0x669   :  { %11475 = vmatprep.subr.bf16.mxu1 %v13898_v13  ;;  %v13941_v13 = vld [vmem:[#allocation11 + $0x628] ss:$16 sps:$4 sm:$0xff]  }
 0x66b   :  { %11523 = vmatpush2.bf16.msra.mxu0 %v13899_v15  ;;  %v13946_v15 = vld [vmem:[#allocation11 + $0x60c] ss:$16 sps:$4 sm:$0xff]  }
 0x66c   :  { %11476 = vmatpush2.bf16.msra.mxu1 %v13896_v24  ;;  %11524 = vmatprep.subr.bf16.mxu0 %v13907_v63  ;;  %v13944_v24 = vld [vmem:[#allocation11 + $0x608] ss:$16 sps:$4 sm:$0xff]   ;;  %v13949_v63 = vld [vmem:[#allocation11 + $0x7ec] ss:$16 sps:$4 sm:$0xff]  }
 0x66d   :  { %11477 = vmatprep.subr.bf16.mxu1 %v13904_v46  ;;  %v13947_v46 = vld [vmem:[#allocation11 + $0x7e8] ss:$16 sps:$4 sm:$0xff]  }
 0x66f   :  { %11525 = vmatpush2.bf16.msra.mxu0 %v13905_v16  ;;  %v13952_v16 = vld [vmem:[#allocation11 + $0x7cc] ss:$16 sps:$4 sm:$0xff]  }
 0x670   :  { %11478 = vmatpush2.bf16.msra.mxu1 %v13902_v1  ;;  %11526 = vmatprep.subr.bf16.mxu0 %v13913_v47  ;;  %v13950_v1 = vld [vmem:[#allocation11 + $0x7c8] ss:$16 sps:$4 sm:$0xff]   ;;  %v13955_v47 = vld [vmem:[#allocation11 + $0x7ac] ss:$16 sps:$4 sm:$0xff]  }
 0x671   :  { %11479 = vmatprep.subr.bf16.mxu1 %v13910_v31  ;;  %v13953_v31 = vld [vmem:[#allocation11 + $0x7a8] ss:$16 sps:$4 sm:$0xff]  }
 0x673   :  { %11527 = vmatpush2.bf16.msra.mxu0 %v13911_v59  ;;  %v13958_v59 = vld [vmem:[#allocation11 + $0x78c] ss:$16 sps:$4 sm:$0xff]  }
 0x674   :  { %11480 = vmatpush2.bf16.msra.mxu1 %v13908_v32  ;;  %13526 = vmatprep.subr.bf16.mxu0 %v13971_v17  ;;  %v13956_v32 = vld [vmem:[#allocation11 + $0x788] ss:$16 sps:$4 sm:$0xff]   ;;  %v13961_v17 = vld [vmem:[#allocation11 + $0x76c] ss:$16 sps:$4 sm:$0xff]  }
 0x675   :  { %11481 = vmatprep.subr.bf16.mxu1 %v13916_v33  ;;  %v13959_v33 = vld [vmem:[#allocation11 + $0x768] ss:$16 sps:$4 sm:$0xff]  }
 0x676   :  { %v11284_v0 = vpop.f32.mrf.mxu0  ;;  %11529 = vmatmul.mubr.bf16.vlgmr.msra.gmra.mxu0 %v14634_v22  ;;  %v13976_v22 = vld [vmem:[#allocation14 + $0x28] sm:$0xff]  }
 0x677   :  { %v11285_v43 = vadd.f32 %v11284_v0, %v9953_v60  ;;  %v11325_v19 = vpop.f32.mrf.mxu1  ;;  %13527 = vmatpush3.bf16.msra.mxu0 %v13972_v35  ;;  %v13964_v60 = vld [vmem:[#allocation11 + $0x74c] ss:$16 sps:$4 sm:$0xff]   ;;  %v13962_v35 = vld [vmem:[#allocation11 + $0x748] ss:$16 sps:$4 sm:$0xff]  }
 0x678   :  { %11482 = vmatpush2.bf16.msra.mxu1 %v13914_v38  ;;  %v11286_v48 = vpop.f32.mrf.mxu0  ;;  %13528 = vmatprep.subr.bf16.mxu0 %v13973_v5  ;;  %v13967_v38 = vld [vmem:[#allocation11 + $0x72c] ss:$16 sps:$4 sm:$0xff]   ;;  %v13965_v0 = vld [vmem:[#allocation11 + $0x728] ss:$16 sps:$4 sm:$0xff]  }
 0x679   :  { %v14665_v10 = vadd.f32 %v11325_v19, %v11285_v43  ;;  %v11287_v57 = vadd.f32 %v11286_v48, %v9957_v44  ;;  %v11327_v2 = vpop.f32.mrf.mxu1  ;;  %11483 = vmatprep.subr.bf16.mxu1 %v13919_v42  ;;  %v13970_v19 = vld [vmem:[#allocation11 + $0x70c] ss:$16 sps:$4 sm:$0xff]  }
 0x67a   :  { %v11288_v23 = vpop.f32.mrf.mxu0 }
 0x67b   :  { %v14667_v53 = vadd.f32 %v11327_v2, %v11287_v57  ;;  %v11329_v14 = vpop.f32.mrf.mxu1  ;;  %13529 = vmatpush3.bf16.msra.mxu0 %v13974_v6  ;;  %v13988_v57 = vld [vmem:[#allocation14 + $0xb8] sm:$0xff]   ;;  %v13989_v2 = vld [vmem:[#allocation14 + $0xf0] sm:$0xff]   ;;  %v13992_v23 = vld [vmem:[#allocation14 + $0xa8] sm:$0xff]  }
 0x67c   :  { %11484 = vmatpush2.bf16.msra.mxu1 %v13917_v20  ;;  %v11289_v8 = vpop.f32.mrf.mxu0  ;;  %13530 = vmatprep.subr.bf16.mxu0 %v13975_v50  ;;  %v13968_v20 = vld [vmem:[#allocation11 + $0x708] ss:$16 sps:$4 sm:$0xff]   ;;  %v13987_v50 = vld [vmem:[#allocation14 + $0xf8] sm:$0xff]  }
 0x67d   :  { %v11330_v37 = vpop.f32.mrf.mxu1  ;;  %11485 = vmatprep.subr.bf16.mxu1 %v13922_v52  ;;  %v13991_v52 = vld [vmem:[#allocation14 + $0xe8] sm:$0xff]   ;;  %v13994_v14 = vld [vmem:[#allocation14 + $0xa0] sm:$0xff]   ;;  %v13996_v8 = vld [vmem:[#allocation14 + $0x98] sm:$0xff]  }
 0x67f   :  { %13531 = vmatpush3.bf16.msra.mxu0 %v13976_v22  ;;  %v13995_v22 = vld [vmem:[#allocation14 + $0xd8] sm:$0xff]  }
 0x680   :  { %11486 = vmatpush2.bf16.msra.mxu1 %v13920_v55  ;;  %13532 = vmatprep.subr.bf16.mxu0 %v13977_v30 }
 0x681   :  { %11537 = vmatprep.subr.bf16.mxu1 %v13925_v41 }
 0x683   :  { %11488 = vmatmul.mubr.bf16.vlgmr.msra.gmra.mxu1 %v14618_v36  ;;  %13533 = vmatpush3.bf16.msra.mxu0 %v13978_v61  ;;  %v13984_v36 = vld [vmem:[#allocation14 + $0x8] sm:$0xff]   ;;  %v13998_v61 = vld [vmem:[#allocation14 + $0x90] sm:$0xff]  }
 0x684   :  { %11538 = vmatpush1.bf16.msra.mxu1 %v13923_v51  ;;  %11569 = vmatprep.mubr.bf16.mxu1 %v14651_v39  ;;  %v13937_v39 = vld [vmem:[#allocation11 + $0x66c] ss:$16 sps:$4 sm:$0xff]  }
 0x685   :  { %11539 = vmatprep.subr.bf16.mxu1 %v13928_v27  ;;  %13534 = vmatprep.subr.bf16.mxu0 %v13979_v28 }
 0x687   :  { %13535 = vmatpush3.bf16.msra.mxu0 %v13980_v62  ;;  %v13999_v62 = vld [vmem:[#allocation14 + $0xc8] sm:$0xff]  }
 0x688   :  { %11540 = vmatpush1.bf16.msra.mxu1 %v13926_v11  ;;  %13536 = vmatprep.subr.bf16.mxu0 %v13981_v12 }
 0x689   :  { %11541 = vmatprep.subr.bf16.mxu1 %v13931_v45  ;;  %v14000_v45 = vld [vmem:[#allocation14 + $0x88] sm:$0xff]  }
 0x68b   :  { %13537 = vmatpush3.bf16.msra.mxu0 %v13982_v21 }
 0x68c   :  { %11542 = vmatpush1.bf16.msra.mxu1 %v13929_v29  ;;  %13538 = vmatprep.subr.bf16.mxu0 %v13983_v58 }
 0x68d   :  { %11543 = vmatprep.subr.bf16.mxu1 %v13934_v18 }
 0x68f   :  { %13539 = vmatpush3.bf16.msra.mxu0 %v13984_v36  ;;  %v14001_v36 = vld [vmem:[#allocation14 + $0xc0] sm:$0xff]  }
 0x690   :  { %11544 = vmatpush1.bf16.msra.mxu1 %v13932_v49  ;;  %13540 = vmatprep.subr.bf16.mxu0 %v13985_v3  ;;  %v14002_v49 = vld [vmem:[#allocation14 + $0x80] sm:$0xff]  }
 0x691   :  { %11545 = vmatprep.subr.bf16.mxu1 %v13937_v39 }
 0x693   :  { %13541 = vmatpush3.bf16.msra.mxu0 %v13986_v40 }
 0x694   :  { %11546 = vmatpush1.bf16.msra.mxu1 %v13935_v4 }
 0x695   :  { %11547 = vmatprep.subr.bf16.mxu1 %v13940_v7 }
 0x698   :  { %11548 = vmatpush1.bf16.msra.mxu1 %v13938_v9 }
 0x699   :  { %11549 = vmatprep.subr.bf16.mxu1 %v13943_v54 }
 0x69c   :  { %11550 = vmatpush1.bf16.msra.mxu1 %v13941_v13  ;;  %v9961_v13 = vrot.slane %v14658_v34, %v14363_v25 }
 0x69d   :  { %11551 = vmatprep.subr.bf16.mxu1 %v13946_v15  ;;  %v9965_v15 = vrot.slane %v14658_v34, %v14339_v26 }
 0x6a0   :  { %11552 = vmatpush1.bf16.msra.mxu1 %v13944_v24 }
 0x6a1   :  { %11553 = vmatprep.subr.bf16.mxu1 %v13949_v63 }
 0x6a4   :  { %11554 = vmatpush2.bf16.msra.mxu1 %v13947_v46 }
 0x6a5   :  { %11555 = vmatprep.subr.bf16.mxu1 %v13952_v16 }
 0x6a8   :  { %11556 = vmatpush2.bf16.msra.mxu1 %v13950_v1 }
 0x6a9   :  { %11557 = vmatprep.subr.bf16.mxu1 %v13955_v47 }
 0x6ac   :  { %11558 = vmatpush2.bf16.msra.mxu1 %v13953_v31 }
 0x6ad   :  { %11559 = vmatprep.subr.bf16.mxu1 %v13958_v59 }
 0x6b0   :  { %11560 = vmatpush2.bf16.msra.mxu1 %v13956_v32 }
 0x6b1   :  { %11561 = vmatprep.subr.bf16.mxu1 %v13961_v17 }
 0x6b4   :  { %11562 = vmatpush2.bf16.msra.mxu1 %v13959_v33 }
 0x6b5   :  { %11563 = vmatprep.subr.bf16.mxu1 %v13964_v60 }
 0x6b6   :  { %v11366_v5 = vpop.f32.mrf.mxu0 }
 0x6b7   :  { %v11367_v44 = vadd.f32 %v11366_v5, %v14665_v10  ;;  %v13990_v10 = vld [vmem:[#allocation14 + $0xb0] sm:$0xff]  }
 0x6b8   :  { %11564 = vmatpush2.bf16.msra.mxu1 %v13962_v35  ;;  %v11368_v42 = vpop.f32.mrf.mxu0 }
 0x6b9   :  { %v11369_v43 = vadd.f32 %v11368_v42, %v14667_v53  ;;  %11565 = vmatprep.subr.bf16.mxu1 %v13967_v38  ;;  %v13993_v53 = vld [vmem:[#allocation14 + $0xe0] sm:$0xff]  }
 0x6ba   :  { %v11370_v6 = vpop.f32.mrf.mxu0 }
 0x6bc   :  { %11566 = vmatpush2.bf16.msra.mxu1 %v13965_v0  ;;  %v11371_v48 = vpop.f32.mrf.mxu0 }
 0x6bd   :  { %11567 = vmatprep.subr.bf16.mxu1 %v13970_v19 }
 0x6c0   :  { %11568 = vmatpush2.bf16.msra.mxu1 %v13968_v20 }
 0x6c1   :  { %13548 = vmatprep.subr.bf16.mxu1 %v13987_v50 }
 0x6c3   :  { %11570 = vmatmul.mubr.bf16.vlgmr.msra.gmra.mxu1 %v14653_v56  ;;  %v13997_v56 = vld [vmem:[#allocation14 + $0xd0] sm:$0xff]  }
 0x6c4   :  { %13549 = vmatpush3.bf16.msra.mxu1 %v13988_v57  ;;  %v13493_v57 = vld [vmem:[#allocation16] ss:$0 sm:$0xff] }
 0x6c5   :  { %13550 = vmatprep.subr.bf16.mxu1 %v13989_v2 }
 0x6c8   :  { %13551 = vmatpush3.bf16.msra.mxu1 %v13990_v10 }
 0x6c9   :  { %13552 = vmatprep.subr.bf16.mxu1 %v13991_v52 }
 0x6cc   :  { %13553 = vmatpush3.bf16.msra.mxu1 %v13992_v23 }
 0x6cd   :  { %13554 = vmatprep.subr.bf16.mxu1 %v13993_v53 }
 0x6d0   :  { %13555 = vmatpush3.bf16.msra.mxu1 %v13994_v14 }
 0x6d1   :  { %13556 = vmatprep.subr.bf16.mxu1 %v13995_v22 }
 0x6d4   :  { %13557 = vmatpush3.bf16.msra.mxu1 %v13996_v8 }
 0x6d5   :  { %13558 = vmatprep.subr.bf16.mxu1 %v13997_v56 }
 0x6d8   :  { %13559 = vmatpush3.bf16.msra.mxu1 %v13998_v61 }
 0x6d9   :  { %13560 = vmatprep.subr.bf16.mxu1 %v13999_v62 }
 0x6dc   :  { %13561 = vmatpush3.bf16.msra.mxu1 %v14000_v45 }
 0x6dd   :  { %13562 = vmatprep.subr.bf16.mxu1 %v14001_v36 }
 0x6e0   :  { %13563 = vmatpush3.bf16.msra.mxu1 %v14002_v49 }
 0x6f6   :  { %v11448_v55 = vpop.f32.mrf.mxu0 }
 0x6f7   :  { %v11449_v24 = vadd.f32 %v11448_v55, %v9961_v13 }
 0x6f8   :  { %v11450_v30 = vpop.f32.mrf.mxu0 }
 0x6f9   :  { %v11451_v46 = vadd.f32 %v11450_v30, %v9965_v15 }
 0x6fa   :  { %v11452_v37 = vpop.f32.mrf.mxu0 }
 0x6fc   :  { %v11453_v41 = vpop.f32.mrf.mxu0 }
 0x703   :  { %v11407_v51 = vpop.f32.mrf.mxu1 }
 0x704   :  { %v11408_v27 = vadd.f32 %v11407_v51, %v11367_v44 }
 0x705   :  { %v11409_v28 = vpop.f32.mrf.mxu1 }
 0x706   :  { %vm11578_vm8 = vcmp.gt.f32.partialorder %v11408_v27, 0.0  ;;  %v11582_v11 = vmul.f32 0.2, %v11408_v27  ;;  %v11410_v12 = vadd.f32 %v11409_v28, %v11369_v43 }
 0x707   :  { %v11411_v21 = vpop.f32.mrf.mxu1 }
 0x708   :  { %vm11579_vm9 = vcmp.gt.f32.partialorder %v11410_v12, 0.0  ;;  %v11583_v29 = vmul.f32 0.2, %v11410_v12  ;;  %v11586_v58 = vsel %vm11578_vm8, %v11408_v27, %v11582_v11 }
 0x709   :  { %v11412_v18 = vpop.f32.mrf.mxu1  ;;  %v11590_v40 = vpack.c.bf16 %v11586_v58, %v11586_v58 }
 0x70a   :  { %v11587_v3 = vsel %vm11579_vm9, %v11410_v12, %v11583_v29 }
 0x70b   :  { %v11591_v39 = vpack.c.bf16 %v11587_v3, %v11587_v3 }
 0x70d   :  { %11889 = vmatprep.mubr.bf16.mxu0 %v11591_v39 }
 0x70e   :  { %11890 = vmatmul.mubr.bf16.vlgmr.msra.gmra.mxu0 %v11590_v40 }
 0x736   :  { %v11530_v4 = vpop.f32.mrf.mxu0 }
 0x738   :  { %v11532_v7 = vpop.f32.mrf.mxu0 }
 0x73a   :  { %v11534_v9 = vpop.f32.mrf.mxu0 }
 0x73c   :  { %v11535_v54 = vpop.f32.mrf.mxu0 }
 0x743   :  { %v11489_v63 = vpop.f32.mrf.mxu1 }
 0x744   :  { %v11490_v16 = vadd.f32 %v11489_v63, %v11449_v24 }
 0x745   :  { %v11491_v1 = vpop.f32.mrf.mxu1 }
 0x746   :  { %v11492_v47 = vadd.f32 %v11491_v1, %v11451_v46  ;;  %v11531_v31 = vadd.f32 %v11530_v4, %v11490_v16 }
 0x747   :  { %v11493_v59 = vpop.f32.mrf.mxu1 }
 0x748   :  { %v11533_v32 = vadd.f32 %v11532_v7, %v11492_v47 }
 0x749   :  { %v11494_v17 = vpop.f32.mrf.mxu1 }
 0x783   :  { %v11571_v33 = vpop.f32.mrf.mxu1 }
 0x784   :  { %v11572_v60 = vadd.f32 %v11571_v33, %v11531_v31 }
 0x785   :  { %v11573_v35 = vpop.f32.mrf.mxu1 }
 0x786   :  { %vm11580_vm10 = vcmp.gt.f32.partialorder %v11572_v60, 0.0  ;;  %v11584_v38 = vmul.f32 0.2, %v11572_v60  ;;  %v11574_v5 = vadd.f32 %v11573_v35, %v11533_v32 }
 0x787   :  { %v11575_v25 = vpop.f32.mrf.mxu1 }
 0x788   :  { %vm11581_vm11 = vcmp.gt.f32.partialorder %v11574_v5, 0.0  ;;  %v11585_v44 = vmul.f32 0.2, %v11574_v5  ;;  %v11588_v26 = vsel %vm11580_vm10, %v11572_v60, %v11584_v38 }
 0x789   :  { %v11576_v34 = vpop.f32.mrf.mxu1  ;;  %v11592_v43 = vpack.c.bf16 %v11588_v26, %v11588_v26 }
 0x78a   :  { %v11589_v42 = vsel %vm11581_vm11, %v11574_v5, %v11585_v44 }
 0x78b   :  { %v11593_v0 = vpack.c.bf16 %v11589_v42, %v11589_v42 }
 0x78d   :  { %11929 = vmatprep.mubr.bf16.mxu1 %v11593_v0 }
 0x78e   :  { %11930 = vmatmul.mubr.bf16.vlgmr.msra.gmra.mxu1 %v11592_v43 }
 0x7ce   :  { %v13542_v19 = vpop.f32.mrf.mxu0 }
 0x7d0   :  { %v13543_v6 = vpop.f32.mrf.mxu0 }
 0x7d1   :  { %v13544_v48 = vadd.f32 %v13543_v6, %v13542_v19 }
 0x7d2   :  { %v13545_v20 = vpop.f32.mrf.mxu0 }
 0x7d3   :  { %v11892_v52 = vadd.f32 %v13544_v48, %v13493_v57 }
 0x7d4   :  { %v13546_v50 = vpop.f32.mrf.mxu0 }
 0x84e   :  { %v13564_v2 = vpop.f32.mrf.mxu1 }
 0x850   :  { %v13565_v10 = vpop.f32.mrf.mxu1 }
 0x851   :  { %v13566_v23 = vadd.f32 %v13565_v10, %v13564_v2 }
 0x852   :  { %v13567_v53 = vpop.f32.mrf.mxu1 }
 0x853   :  { %v11932_v14 = vadd.f32 %v13566_v23, %v11892_v52 }
 0x854   :  { %v13568_v22 = vpop.f32.mrf.mxu1 }
 0x855   :  { %11937 = vst [vmem:[#allocation17] sm:$0xff] %v11932_v14 }
 0x856   :  { %14197 = shalt.err (!%p14194_p7)
}
 0x857   :  { %11947 = dma.vmem_to_hbm [thread:$0]  %s11945_s8, 128, %s14690_s9, [#allocation4]  }
 0x858   :  { %14216 = dma.done.wait [#allocation4], 128  }
 0x859   :  { %14217 = vsyncadd [#allocation4], 4294967168 }
 0x85a   :  { %11951 = vsyncpa [#allocation3], 1 }
 0x85b   :  { %11952 = vsyncpa [#allocation6], 1 }
 0x85c   :  { %11953 = vsyncpa [#allocation9], 1 }
 0x85d   :  { %11954 = vsyncpa [#allocation12], 1 }
 0x85e   :  { %11955 = vsyncpa [#allocation15], 1 }
 0x85f   :  { %11956 = vsyncpa [#allocation4], 1 }

</bundles_post_ra>
